<compile_context>
chip_gen: v7x
topology: tpu7x:2x2x1
jax: 0.10.0
libtpu: 0.0.40
codegen_flags: <defaults>
</compile_context>

<pallas_src>
import functools

import jax
import jax.numpy as jnp
from jax.experimental import pallas as pl
from jax.experimental.pallas import tpu as pltpu

BN_EPS = 1e-5
EXPANSION = 4
# (stage name, mid channels, num blocks, stride of first block)
ARCH = (("res2", 64, 3, 1), ("res3", 128, 4, 2), ("res4", 256, 6, 2))

ACT_DTYPE = jnp.bfloat16  # MXU-native operand/activation dtype; f32 accum.


# ----------------------------------------------------------------------------
# Pallas kernels: single-K-block fused GEMM + bias (+ residual) (+ ReLU)
# ----------------------------------------------------------------------------
def _gemm_bias_kernel(x_ref, w_ref, b_ref, o_ref, *, relu):
    y = jnp.dot(x_ref[...], w_ref[...], preferred_element_type=jnp.float32)
    y = y + b_ref[...]
    if relu:
        y = jnp.maximum(y, 0.0)
    o_ref[...] = y.astype(o_ref.dtype)


def _gemm_bias_res_kernel(x_ref, w_ref, b_ref, r_ref, o_ref, *, relu):
    y = jnp.dot(x_ref[...], w_ref[...], preferred_element_type=jnp.float32)
    y = y + b_ref[...] + r_ref[...].astype(jnp.float32)
    if relu:
        y = jnp.maximum(y, 0.0)
    o_ref[...] = y.astype(o_ref.dtype)


# ----------------------------------------------------------------------------
# Wrappers
# ----------------------------------------------------------------------------
def _round_up(x, m):
    return (x + m - 1) // m * m


def _fused_matmul(x2d, w2d, bias, residual=None, relu=True,
                  out_dtype=ACT_DTYPE):
    """(M,K)@(K,N) + bias [+ residual] [+ relu]; bf16 operands, f32 accum."""
    M, K = x2d.shape
    _, N = w2d.shape

    # Adaptive tiles: avoid padding tiny-M layers to 128 rows; cap at 256 so
    # blocks fit comfortably inside v7x's 64 MiB VMEM even with K in one block.
    tm = min(256, _round_up(M, 16))        # 16-row granularity (bf16 packing)
    tn = min(256, _round_up(N, 128))
    Mp, Np = _round_up(M, tm), _round_up(N, tn)
    Kp = _round_up(K, 128)                 # single K block (K <= 2304 here)
    # Give both v7x TensorCores work when the grid would otherwise be 1x1.
    if Mp // tm == 1 and Np // tn == 1 and Np >= 256:
        tn = 128

    xp = x2d.astype(ACT_DTYPE)
    wp = w2d.astype(ACT_DTYPE)
    if Mp != M or Kp != K:
        xp = jnp.pad(xp, ((0, Mp - M), (0, Kp - K)))
    if Kp != K or Np != N:
        wp = jnp.pad(wp, ((0, Kp - K), (0, Np - N)))
    bp = jnp.pad(bias.astype(jnp.float32), (0, Np - N)).reshape(1, Np)

    in_specs = [
        pl.BlockSpec((tm, Kp), lambda i, j: (i, 0)),
        pl.BlockSpec((Kp, tn), lambda i, j: (0, j)),
        pl.BlockSpec((1, tn), lambda i, j: (0, j)),
    ]
    args = [xp, wp, bp]
    if residual is not None:
        rp = residual.astype(ACT_DTYPE)
        if Mp != M or Np != N:
            rp = jnp.pad(rp, ((0, Mp - M), (0, Np - N)))
        in_specs.append(pl.BlockSpec((tm, tn), lambda i, j: (i, j)))
        args.append(rp)
        kernel = functools.partial(_gemm_bias_res_kernel, relu=relu)
    else:
        kernel = functools.partial(_gemm_bias_kernel, relu=relu)

    out = pl.pallas_call(
        kernel,
        out_shape=jax.ShapeDtypeStruct((Mp, Np), out_dtype),
        grid_spec=pltpu.PrefetchScalarGridSpec(
            num_scalar_prefetch=0,
            grid=(Mp // tm, Np // tn),
            in_specs=in_specs,
            out_specs=pl.BlockSpec((tm, tn), lambda i, j: (i, j)),
        ),
        compiler_params=pltpu.CompilerParams(
            dimension_semantics=("parallel", "parallel"),
            vmem_limit_bytes=48 * 1024 * 1024),  # re-budgeted for v7x 64 MiB
    )(*args)
    if Mp != M or Np != N:
        out = out[:M, :N]
    return out


def _im2col(x, kh, kw, stride, padding):
    """Patches in the activation dtype (bf16) to halve the im2col HBM blow-up."""
    n, h, w, c = x.shape
    if padding:
        x = jnp.pad(x, ((0, 0), (padding, padding), (padding, padding), (0, 0)))
    ho = (h + 2 * padding - kh) // stride + 1
    wo = (w + 2 * padding - kw) // stride + 1
    cols = []
    for i in range(kh):
        for j in range(kw):
            cols.append(x[:, i:i + stride * (ho - 1) + 1:stride,
                          j:j + stride * (wo - 1) + 1:stride, :])
    patches = cols[0] if len(cols) == 1 else jnp.concatenate(cols, axis=-1)
    return patches.reshape(n * ho * wo, kh * kw * c), (n, ho, wo)


def conv_bn(x, w, scale, bias, stride=1, padding=0, residual=None, relu=True):
    """Conv2d (no bias) + folded eval-mode BatchNorm (+ residual / ReLU)."""
    kh, kw, cin, cout = w.shape
    x2d, (n, ho, wo) = _im2col(x, kh, kw, stride, padding)
    # Fold BN scale into the weights (exact for eval-mode BN); bias stays in
    # the kernel epilogue.
    w2d = w.reshape(kh * kw * cin, cout) * scale[None, :]
    r2d = None
    if residual is not None:
        r2d = residual.reshape(n * ho * wo, cout)
    out = _fused_matmul(x2d, w2d, bias, residual=r2d, relu=relu)
    return out.reshape(n, ho, wo, cout)


def maxpool_3x3_s2_p1(x):
    # Pairwise maximum tree in plain JAX: no 9x stacked HBM copy, no
    # un-gridded whole-array Pallas call (which could exceed VMEM on v7x).
    n, h, w, c = x.shape
    xp = jnp.pad(x, ((0, 0), (1, 1), (1, 1), (0, 0)),
                 constant_values=-jnp.inf)
    ho = (h + 2 - 3) // 2 + 1
    wo = (w + 2 - 3) // 2 + 1
    out = None
    for i in range(3):
        for j in range(3):
            win = xp[:, i:i + 2 * (ho - 1) + 1:2,
                     j:j + 2 * (wo - 1) + 1:2, :]
            out = win if out is None else jnp.maximum(out, win)
    return out


# ----------------------------------------------------------------------------
# Parameters (deterministic synthetic init matching the PyTorch __init__)
# ----------------------------------------------------------------------------
def _kaiming_conv(key, kh, kw, cin, cout):
    # kaiming_normal_, mode='fan_out', nonlinearity='relu'
    std = (2.0 / (cout * kh * kw)) ** 0.5
    return (std * jax.random.normal(key, (kh, kw, cin, cout))).astype(jnp.float32)


def _bn_scale(c):
    # gamma=1, running_var=1  ->  scale = 1/sqrt(var+eps)
    return jnp.full((c,), 1.0 / (1.0 + BN_EPS) ** 0.5, dtype=jnp.float32)


def _bn_bias(c):
    # beta=0, running_mean=0  ->  bias = 0
    return jnp.zeros((c,), dtype=jnp.float32)


def init_params(key, input_channels=3):
    keys = iter(jax.random.split(key, 64))
    params = {
        "conv1_w": _kaiming_conv(next(keys), 7, 7, input_channels, 64),
        "bn1_s": _bn_scale(64),
        "bn1_b": _bn_bias(64),
        "stages": [],
    }
    in_ch = 64
    for _, cmid, nblocks, stride in ARCH:
        blocks = []
        for b in range(nblocks):
            s = stride if b == 0 else 1
            cin = in_ch if b == 0 else cmid * EXPANSION
            blk = {
                "w1": _kaiming_conv(next(keys), 1, 1, cin, cmid),
                "s1": _bn_scale(cmid), "b1": _bn_bias(cmid),
                "w2": _kaiming_conv(next(keys), 3, 3, cmid, cmid),
                "s2": _bn_scale(cmid), "b2": _bn_bias(cmid),
                "w3": _kaiming_conv(next(keys), 1, 1, cmid, cmid * EXPANSION),
                "s3": _bn_scale(cmid * EXPANSION),
                "b3": _bn_bias(cmid * EXPANSION),
            }
            if b == 0 and (s != 1 or cin != cmid * EXPANSION):
                blk["wd"] = _kaiming_conv(next(keys), 1, 1, cin,
                                          cmid * EXPANSION)
                blk["sd"] = _bn_scale(cmid * EXPANSION)
                blk["bd"] = _bn_bias(cmid * EXPANSION)
            blocks.append(blk)
        params["stages"].append(blocks)
        in_ch = cmid * EXPANSION
    return params


# ----------------------------------------------------------------------------
# Forward (mirrors BottleNeck.forward for every block)
# ----------------------------------------------------------------------------
def _bottleneck(x, p, stride):
    out = conv_bn(x, p["w1"], p["s1"], p["b1"], stride=1, padding=0, relu=True)
    out = conv_bn(out, p["w2"], p["s2"], p["b2"], stride=stride, padding=1,
                  relu=True)
    if "wd" in p:
        identity = conv_bn(x, p["wd"], p["sd"], p["bd"], stride=stride,
                           padding=0, relu=False)
    else:
        identity = x
    out = conv_bn(out, p["w3"], p["s3"], p["b3"], stride=1, padding=0,
                  residual=identity, relu=True)
    return out


def resnet_feature_extractor(x_nchw, params):
    # NCHW (PyTorch) -> NHWC (kernel layout); bf16 activations internally.
    x = jnp.transpose(x_nchw, (0, 2, 3, 1)).astype(ACT_DTYPE)
    # conv1 + bn1 (the reference forward applies NO ReLU here)
    x = conv_bn(x, params["conv1_w"], params["bn1_s"], params["bn1_b"],
                stride=2, padding=3, relu=False)
    x = maxpool_3x3_s2_p1(x)
    for (_, _, nblocks, stage_stride), blocks in zip(ARCH, params["stages"]):
        for b in range(nblocks):
            s = stage_stride if b == 0 else 1
            x = _bottleneck(x, blocks[b], s)
    # back to NCHW / f32 to match the PyTorch output convention
    return jnp.transpose(x, (0, 3, 1, 2)).astype(jnp.float32)


# ----------------------------------------------------------------------------
if __name__ == "__main__":
    key = jax.random.PRNGKey(0)
    pkey, xkey = jax.random.split(key)

    params = init_params(pkey, input_channels=3)
    x = jax.random.normal(xkey, (2, 3, 32, 32), dtype=jnp.float32)

    fwd = jax.jit(resnet_feature_extractor)
    out = jax.block_until_ready(fwd(x, params))

    # 32 -> conv1/2 -> 16 -> maxpool/2 -> 8 -> res3/2 -> 4 -> res4/2 -> 2
    assert out.shape == (2, 1024, 2, 2), out.shape
    assert out.dtype == jnp.float32
    assert bool(jnp.all(jnp.isfinite(out)))
    print("KERNEL_OK")
</pallas_src>

<mosaic_0001>
module attributes {stable_mosaic.version = 11 : i64} {
  func.func @_gemm_bias_kernel(%arg0: i32, %arg1: i32, %arg2: memref<256x256xbf16, #tpu.memory_space<vmem>>, %arg3: memref<256x128xbf16, #tpu.memory_space<vmem>>, %arg4: memref<1x128xf32, #tpu.memory_space<vmem>>, %arg5: memref<256x128xbf16, #tpu.memory_space<vmem>>) attributes {dimension_semantics = [#tpu.dimension_semantics<parallel>, #tpu.dimension_semantics<parallel>], iteration_bounds = array<i64: 2, 1>, scalar_prefetch = 0 : i64, scratch_operands = 0 : i64, tpu.core_type = #tpu.core_type<tc>, window_params = [{transform_indices = @transform_0, window_bounds = array<i64: 256, 256>}, {transform_indices = @transform_1, window_bounds = array<i64: 256, 128>}, {transform_indices = @transform_2, window_bounds = array<i64: 1, 128>}, {transform_indices = @transform_3, window_bounds = array<i64: 256, 128>}]} {
    %c0 = arith.constant 0 : index
    %c0_0 = arith.constant 0 : index
    %0 = vector.load %arg2[%c0, %c0_0] : memref<256x256xbf16, #tpu.memory_space<vmem>>, vector<256x256xbf16>
    %c0_1 = arith.constant 0 : index
    %c0_2 = arith.constant 0 : index
    %1 = vector.load %arg3[%c0_1, %c0_2] : memref<256x128xbf16, #tpu.memory_space<vmem>>, vector<256x128xbf16>
    %cst = arith.constant dense<0.000000e+00> : vector<256x128xf32>
    %2 = tpu.matmul %0, %1, %cst {dimension_numbers = #tpu.dot_dimension_numbers<[1], [0], [0], [1], [0, 0, 1, 1], [], []>} : vector<256x256xbf16>, vector<256x128xbf16>, vector<256x128xf32> -> vector<256x128xf32>
    %c0_3 = arith.constant 0 : index
    %c0_4 = arith.constant 0 : index
    %3 = vector.load %arg4[%c0_3, %c0_4] : memref<1x128xf32, #tpu.memory_space<vmem>>, vector<1x128xf32>
    %4 = vector.broadcast %3 : vector<1x128xf32> to vector<256x128xf32>
    %5 = arith.addf %2, %4 : vector<256x128xf32>
    %6 = arith.truncf %5 : vector<256x128xf32> to vector<256x128xbf16>
    %c0_5 = arith.constant 0 : index
    %c0_6 = arith.constant 0 : index
    %7 = vector.load %arg5[%c0_5, %c0_6] : memref<256x128xbf16, #tpu.memory_space<vmem>>, vector<256x128xbf16>
    tpu.vector_store %arg5[%c0_5, %c0_6], %6 {strides = array<i32>} : memref<256x128xbf16, #tpu.memory_space<vmem>>, vector<256x128xbf16>,
    return
  }
  func.func @transform_0(%arg0: i32, %arg1: i32) -> (i32, i32) {
    %c0_i32 = arith.constant 0 : i32
    %c0_i32_0 = arith.constant 0 : i32
    return %arg0, %c0_i32 : i32, i32
  }
  func.func @transform_1(%arg0: i32, %arg1: i32) -> (i32, i32) {
    %c0_i32 = arith.constant 0 : i32
    %c0_i32_0 = arith.constant 0 : i32
    return %c0_i32, %arg1 : i32, i32
  }
  func.func @transform_2(%arg0: i32, %arg1: i32) -> (i32, i32) {
    %c0_i32 = arith.constant 0 : i32
    %c0_i32_0 = arith.constant 0 : i32
    return %c0_i32, %arg1 : i32, i32
  }
  func.func @transform_3(%arg0: i32, %arg1: i32) -> (i32, i32) {
    %c0_i32 = arith.constant 0 : i32
    return %arg0, %arg1 : i32, i32
  }
}

module attributes {stable_mosaic.version = 11 : i64} {
  func.func @_gemm_bias_kernel(%arg0: i32, %arg1: i32, %arg2: memref<128x128xbf16, #tpu.memory_space<vmem>>, %arg3: memref<128x128xbf16, #tpu.memory_space<vmem>>, %arg4: memref<1x128xf32, #tpu.memory_space<vmem>>, %arg5: memref<128x128xbf16, #tpu.memory_space<vmem>>) attributes {dimension_semantics = [#tpu.dimension_semantics<parallel>, #tpu.dimension_semantics<parallel>], iteration_bounds = array<i64: 1, 1>, scalar_prefetch = 0 : i64, scratch_operands = 0 : i64, tpu.core_type = #tpu.core_type<tc>, window_params = [{transform_indices = @transform_0, window_bounds = array<i64: 128, 128>}, {transform_indices = @transform_1, window_bounds = array<i64: 128, 128>}, {transform_indices = @transform_2, window_bounds = array<i64: 1, 128>}, {transform_indices = @transform_3, window_bounds = array<i64: 128, 128>}]} {
    %c0 = arith.constant 0 : index
    %c0_0 = arith.constant 0 : index
    %0 = vector.load %arg2[%c0, %c0_0] : memref<128x128xbf16, #tpu.memory_space<vmem>>, vector<128x128xbf16>
    %c0_1 = arith.constant 0 : index
    %c0_2 = arith.constant 0 : index
    %1 = vector.load %arg3[%c0_1, %c0_2] : memref<128x128xbf16, #tpu.memory_space<vmem>>, vector<128x128xbf16>
    %cst = arith.constant dense<0.000000e+00> : vector<128x128xf32>
    %2 = tpu.matmul %0, %1, %cst {dimension_numbers = #tpu.dot_dimension_numbers<[1], [0], [0], [1], [0, 0, 1, 1], [], []>} : vector<128x128xbf16>, vector<128x128xbf16>, vector<128x128xf32> -> vector<128x128xf32>
    %c0_3 = arith.constant 0 : index
    %c0_4 = arith.constant 0 : index
    %3 = vector.load %arg4[%c0_3, %c0_4] : memref<1x128xf32, #tpu.memory_space<vmem>>, vector<1x128xf32>
    %4 = vector.broadcast %3 : vector<1x128xf32> to vector<128x128xf32>
    %5 = arith.addf %2, %4 : vector<128x128xf32>
    %cst_5 = arith.constant 0.000000e+00 : f32
    %6 = vector.broadcast %cst_5 : f32 to vector<128x128xf32>
    %7 = arith.maximumf %5, %6 : vector<128x128xf32>
    %8 = arith.truncf %7 : vector<128x128xf32> to vector<128x128xbf16>
    %c0_6 = arith.constant 0 : index
    %c0_7 = arith.constant 0 : index
    %9 = vector.load %arg5[%c0_6, %c0_7] : memref<128x128xbf16, #tpu.memory_space<vmem>>, vector<128x128xbf16>
    tpu.vector_store %arg5[%c0_6, %c0_7], %8 {strides = array<i32>} : memref<128x128xbf16, #tpu.memory_space<vmem>>, vector<128x128xbf16>,
    return
  }
  func.func @transform_0(%arg0: i32, %arg1: i32) -> (i32, i32) {
    %c0_i32 = arith.constant 0 : i32
    %c0_i32_0 = arith.constant 0 : i32
    return %arg0, %c0_i32 : i32, i32
  }
  func.func @transform_1(%arg0: i32, %arg1: i32) -> (i32, i32) {
    %c0_i32 = arith.constant 0 : i32
    %c0_i32_0 = arith.constant 0 : i32
    return %c0_i32, %arg1 : i32, i32
  }
  func.func @transform_2(%arg0: i32, %arg1: i32) -> (i32, i32) {
    %c0_i32 = arith.constant 0 : i32
    %c0_i32_0 = arith.constant 0 : i32
    return %c0_i32, %arg1 : i32, i32
  }
  func.func @transform_3(%arg0: i32, %arg1: i32) -> (i32, i32) {
    %c0_i32 = arith.constant 0 : i32
    return %arg0, %arg1 : i32, i32
  }
}

module attributes {stable_mosaic.version = 11 : i64} {
  func.func @_gemm_bias_kernel(%arg0: i32, %arg1: i32, %arg2: memref<128x640xbf16, #tpu.memory_space<vmem>>, %arg3: memref<640x128xbf16, #tpu.memory_space<vmem>>, %arg4: memref<1x128xf32, #tpu.memory_space<vmem>>, %arg5: memref<128x128xbf16, #tpu.memory_space<vmem>>) attributes {dimension_semantics = [#tpu.dimension_semantics<parallel>, #tpu.dimension_semantics<parallel>], iteration_bounds = array<i64: 1, 1>, scalar_prefetch = 0 : i64, scratch_operands = 0 : i64, tpu.core_type = #tpu.core_type<tc>, window_params = [{transform_indices = @transform_0, window_bounds = array<i64: 128, 640>}, {transform_indices = @transform_1, window_bounds = array<i64: 640, 128>}, {transform_indices = @transform_2, window_bounds = array<i64: 1, 128>}, {transform_indices = @transform_3, window_bounds = array<i64: 128, 128>}]} {
    %c0 = arith.constant 0 : index
    %c0_0 = arith.constant 0 : index
    %0 = vector.load %arg2[%c0, %c0_0] : memref<128x640xbf16, #tpu.memory_space<vmem>>, vector<128x640xbf16>
    %c0_1 = arith.constant 0 : index
    %c0_2 = arith.constant 0 : index
    %1 = vector.load %arg3[%c0_1, %c0_2] : memref<640x128xbf16, #tpu.memory_space<vmem>>, vector<640x128xbf16>
    %cst = arith.constant dense<0.000000e+00> : vector<128x128xf32>
    %2 = tpu.matmul %0, %1, %cst {dimension_numbers = #tpu.dot_dimension_numbers<[1], [0], [0], [1], [0, 0, 1, 1], [], []>} : vector<128x640xbf16>, vector<640x128xbf16>, vector<128x128xf32> -> vector<128x128xf32>
    %c0_3 = arith.constant 0 : index
    %c0_4 = arith.constant 0 : index
    %3 = vector.load %arg4[%c0_3, %c0_4] : memref<1x128xf32, #tpu.memory_space<vmem>>, vector<1x128xf32>
    %4 = vector.broadcast %3 : vector<1x128xf32> to vector<128x128xf32>
    %5 = arith.addf %2, %4 : vector<128x128xf32>
    %cst_5 = arith.constant 0.000000e+00 : f32
    %6 = vector.broadcast %cst_5 : f32 to vector<128x128xf32>
    %7 = arith.maximumf %5, %6 : vector<128x128xf32>
    %8 = arith.truncf %7 : vector<128x128xf32> to vector<128x128xbf16>
    %c0_6 = arith.constant 0 : index
    %c0_7 = arith.constant 0 : index
    %9 = vector.load %arg5[%c0_6, %c0_7] : memref<128x128xbf16, #tpu.memory_space<vmem>>, vector<128x128xbf16>
    tpu.vector_store %arg5[%c0_6, %c0_7], %8 {strides = array<i32>} : memref<128x128xbf16, #tpu.memory_space<vmem>>, vector<128x128xbf16>,
    return
  }
  func.func @transform_0(%arg0: i32, %arg1: i32) -> (i32, i32) {
    %c0_i32 = arith.constant 0 : i32
    %c0_i32_0 = arith.constant 0 : i32
    return %arg0, %c0_i32 : i32, i32
  }
  func.func @transform_1(%arg0: i32, %arg1: i32) -> (i32, i32) {
    %c0_i32 = arith.constant 0 : i32
    %c0_i32_0 = arith.constant 0 : i32
    return %c0_i32, %arg1 : i32, i32
  }
  func.func @transform_2(%arg0: i32, %arg1: i32) -> (i32, i32) {
    %c0_i32 = arith.constant 0 : i32
    %c0_i32_0 = arith.constant 0 : i32
    return %c0_i32, %arg1 : i32, i32
  }
  func.func @transform_3(%arg0: i32, %arg1: i32) -> (i32, i32) {
    %c0_i32 = arith.constant 0 : i32
    return %arg0, %arg1 : i32, i32
  }
}

module attributes {stable_mosaic.version = 11 : i64} {
  func.func @_gemm_bias_kernel(%arg0: i32, %arg1: i32, %arg2: memref<128x128xbf16, #tpu.memory_space<vmem>>, %arg3: memref<128x128xbf16, #tpu.memory_space<vmem>>, %arg4: memref<1x128xf32, #tpu.memory_space<vmem>>, %arg5: memref<128x128xbf16, #tpu.memory_space<vmem>>) attributes {dimension_semantics = [#tpu.dimension_semantics<parallel>, #tpu.dimension_semantics<parallel>], iteration_bounds = array<i64: 1, 2>, scalar_prefetch = 0 : i64, scratch_operands = 0 : i64, tpu.core_type = #tpu.core_type<tc>, window_params = [{transform_indices = @transform_0, window_bounds = array<i64: 128, 128>}, {transform_indices = @transform_1, window_bounds = array<i64: 128, 128>}, {transform_indices = @transform_2, window_bounds = array<i64: 1, 128>}, {transform_indices = @transform_3, window_bounds = array<i64: 128, 128>}]} {
    %c0 = arith.constant 0 : index
    %c0_0 = arith.constant 0 : index
    %0 = vector.load %arg2[%c0, %c0_0] : memref<128x128xbf16, #tpu.memory_space<vmem>>, vector<128x128xbf16>
    %c0_1 = arith.constant 0 : index
    %c0_2 = arith.constant 0 : index
    %1 = vector.load %arg3[%c0_1, %c0_2] : memref<128x128xbf16, #tpu.memory_space<vmem>>, vector<128x128xbf16>
    %cst = arith.constant dense<0.000000e+00> : vector<128x128xf32>
    %2 = tpu.matmul %0, %1, %cst {dimension_numbers = #tpu.dot_dimension_numbers<[1], [0], [0], [1], [0, 0, 1, 1], [], []>} : vector<128x128xbf16>, vector<128x128xbf16>, vector<128x128xf32> -> vector<128x128xf32>
    %c0_3 = arith.constant 0 : index
    %c0_4 = arith.constant 0 : index
    %3 = vector.load %arg4[%c0_3, %c0_4] : memref<1x128xf32, #tpu.memory_space<vmem>>, vector<1x128xf32>
    %4 = vector.broadcast %3 : vector<1x128xf32> to vector<128x128xf32>
    %5 = arith.addf %2, %4 : vector<128x128xf32>
    %6 = arith.truncf %5 : vector<128x128xf32> to vector<128x128xbf16>
    %c0_5 = arith.constant 0 : index
    %c0_6 = arith.constant 0 : index
    %7 = vector.load %arg5[%c0_5, %c0_6] : memref<128x128xbf16, #tpu.memory_space<vmem>>, vector<128x128xbf16>
    tpu.vector_store %arg5[%c0_5, %c0_6], %6 {strides = array<i32>} : memref<128x128xbf16, #tpu.memory_space<vmem>>, vector<128x128xbf16>,
    return
  }
  func.func @transform_0(%arg0: i32, %arg1: i32) -> (i32, i32) {
    %c0_i32 = arith.constant 0 : i32
    %c0_i32_0 = arith.constant 0 : i32
    return %arg0, %c0_i32 : i32, i32
  }
  func.func @transform_1(%arg0: i32, %arg1: i32) -> (i32, i32) {
    %c0_i32 = arith.constant 0 : i32
    %c0_i32_0 = arith.constant 0 : i32
    return %c0_i32, %arg1 : i32, i32
  }
  func.func @transform_2(%arg0: i32, %arg1: i32) -> (i32, i32) {
    %c0_i32 = arith.constant 0 : i32
    %c0_i32_0 = arith.constant 0 : i32
    return %c0_i32, %arg1 : i32, i32
  }
  func.func @transform_3(%arg0: i32, %arg1: i32) -> (i32, i32) {
    %c0_i32 = arith.constant 0 : i32
    return %arg0, %arg1 : i32, i32
  }
}

module attributes {stable_mosaic.version = 11 : i64} {
  func.func @_gemm_bias_res_kernel(%arg0: i32, %arg1: i32, %arg2: memref<128x128xbf16, #tpu.memory_space<vmem>>, %arg3: memref<128x128xbf16, #tpu.memory_space<vmem>>, %arg4: memref<1x128xf32, #tpu.memory_space<vmem>>, %arg5: memref<128x128xbf16, #tpu.memory_space<vmem>>, %arg6: memref<128x128xbf16, #tpu.memory_space<vmem>>) attributes {dimension_semantics = [#tpu.dimension_semantics<parallel>, #tpu.dimension_semantics<parallel>], iteration_bounds = array<i64: 1, 2>, scalar_prefetch = 0 : i64, scratch_operands = 0 : i64, tpu.core_type = #tpu.core_type<tc>, window_params = [{transform_indices = @transform_0, window_bounds = array<i64: 128, 128>}, {transform_indices = @transform_1, window_bounds = array<i64: 128, 128>}, {transform_indices = @transform_2, window_bounds = array<i64: 1, 128>}, {transform_indices = @transform_3, window_bounds = array<i64: 128, 128>}, {transform_indices = @transform_4, window_bounds = array<i64: 128, 128>}]} {
    %c0 = arith.constant 0 : index
    %c0_0 = arith.constant 0 : index
    %0 = vector.load %arg2[%c0, %c0_0] : memref<128x128xbf16, #tpu.memory_space<vmem>>, vector<128x128xbf16>
    %c0_1 = arith.constant 0 : index
    %c0_2 = arith.constant 0 : index
    %1 = vector.load %arg3[%c0_1, %c0_2] : memref<128x128xbf16, #tpu.memory_space<vmem>>, vector<128x128xbf16>
    %cst = arith.constant dense<0.000000e+00> : vector<128x128xf32>
    %2 = tpu.matmul %0, %1, %cst {dimension_numbers = #tpu.dot_dimension_numbers<[1], [0], [0], [1], [0, 0, 1, 1], [], []>} : vector<128x128xbf16>, vector<128x128xbf16>, vector<128x128xf32> -> vector<128x128xf32>
    %c0_3 = arith.constant 0 : index
    %c0_4 = arith.constant 0 : index
    %3 = vector.load %arg4[%c0_3, %c0_4] : memref<1x128xf32, #tpu.memory_space<vmem>>, vector<1x128xf32>
    %4 = vector.broadcast %3 : vector<1x128xf32> to vector<128x128xf32>
    %5 = arith.addf %2, %4 : vector<128x128xf32>
    %c0_5 = arith.constant 0 : index
    %c0_6 = arith.constant 0 : index
    %6 = vector.load %arg5[%c0_5, %c0_6] : memref<128x128xbf16, #tpu.memory_space<vmem>>, vector<128x128xbf16>
    %7 = arith.extf %6 : vector<128x128xbf16> to vector<128x128xf32>
    %8 = arith.addf %5, %7 : vector<128x128xf32>
    %cst_7 = arith.constant 0.000000e+00 : f32
    %9 = vector.broadcast %cst_7 : f32 to vector<128x128xf32>
    %10 = arith.maximumf %8, %9 : vector<128x128xf32>
    %11 = arith.truncf %10 : vector<128x128xf32> to vector<128x128xbf16>
    %c0_8 = arith.constant 0 : index
    %c0_9 = arith.constant 0 : index
    %12 = vector.load %arg6[%c0_8, %c0_9] : memref<128x128xbf16, #tpu.memory_space<vmem>>, vector<128x128xbf16>
    tpu.vector_store %arg6[%c0_8, %c0_9], %11 {strides = array<i32>} : memref<128x128xbf16, #tpu.memory_space<vmem>>, vector<128x128xbf16>,
    return
  }
  func.func @transform_0(%arg0: i32, %arg1: i32) -> (i32, i32) {
    %c0_i32 = arith.constant 0 : i32
    %c0_i32_0 = arith.constant 0 : i32
    return %arg0, %c0_i32 : i32, i32
  }
  func.func @transform_1(%arg0: i32, %arg1: i32) -> (i32, i32) {
    %c0_i32 = arith.constant 0 : i32
    %c0_i32_0 = arith.constant 0 : i32
    return %c0_i32, %arg1 : i32, i32
  }
  func.func @transform_2(%arg0: i32, %arg1: i32) -> (i32, i32) {
    %c0_i32 = arith.constant 0 : i32
    %c0_i32_0 = arith.constant 0 : i32
    return %c0_i32, %arg1 : i32, i32
  }
  func.func @transform_3(%arg0: i32, %arg1: i32) -> (i32, i32) {
    %c0_i32 = arith.constant 0 : i32
    return %arg0, %arg1 : i32, i32
  }
  func.func @transform_4(%arg0: i32, %arg1: i32) -> (i32, i32) {
    %c0_i32 = arith.constant 0 : i32
    return %arg0, %arg1 : i32, i32
  }
}

module attributes {stable_mosaic.version = 11 : i64} {
  func.func @_gemm_bias_kernel(%arg0: i32, %arg1: i32, %arg2: memref<128x256xbf16, #tpu.memory_space<vmem>>, %arg3: memref<256x128xbf16, #tpu.memory_space<vmem>>, %arg4: memref<1x128xf32, #tpu.memory_space<vmem>>, %arg5: memref<128x128xbf16, #tpu.memory_space<vmem>>) attributes {dimension_semantics = [#tpu.dimension_semantics<parallel>, #tpu.dimension_semantics<parallel>], iteration_bounds = array<i64: 1, 1>, scalar_prefetch = 0 : i64, scratch_operands = 0 : i64, tpu.core_type = #tpu.core_type<tc>, window_params = [{transform_indices = @transform_0, window_bounds = array<i64: 128, 256>}, {transform_indices = @transform_1, window_bounds = array<i64: 256, 128>}, {transform_indices = @transform_2, window_bounds = array<i64: 1, 128>}, {transform_indices = @transform_3, window_bounds = array<i64: 128, 128>}]} {
    %c0 = arith.constant 0 : index
    %c0_0 = arith.constant 0 : index
    %0 = vector.load %arg2[%c0, %c0_0] : memref<128x256xbf16, #tpu.memory_space<vmem>>, vector<128x256xbf16>
    %c0_1 = arith.constant 0 : index
    %c0_2 = arith.constant 0 : index
    %1 = vector.load %arg3[%c0_1, %c0_2] : memref<256x128xbf16, #tpu.memory_space<vmem>>, vector<256x128xbf16>
    %cst = arith.constant dense<0.000000e+00> : vector<128x128xf32>
    %2 = tpu.matmul %0, %1, %cst {dimension_numbers = #tpu.dot_dimension_numbers<[1], [0], [0], [1], [0, 0, 1, 1], [], []>} : vector<128x256xbf16>, vector<256x128xbf16>, vector<128x128xf32> -> vector<128x128xf32>
    %c0_3 = arith.constant 0 : index
    %c0_4 = arith.constant 0 : index
    %3 = vector.load %arg4[%c0_3, %c0_4] : memref<1x128xf32, #tpu.memory_space<vmem>>, vector<1x128xf32>
    %4 = vector.broadcast %3 : vector<1x128xf32> to vector<128x128xf32>
    %5 = arith.addf %2, %4 : vector<128x128xf32>
    %cst_5 = arith.constant 0.000000e+00 : f32
    %6 = vector.broadcast %cst_5 : f32 to vector<128x128xf32>
    %7 = arith.maximumf %5, %6 : vector<128x128xf32>
    %8 = arith.truncf %7 : vector<128x128xf32> to vector<128x128xbf16>
    %c0_6 = arith.constant 0 : index
    %c0_7 = arith.constant 0 : index
    %9 = vector.load %arg5[%c0_6, %c0_7] : memref<128x128xbf16, #tpu.memory_space<vmem>>, vector<128x128xbf16>
    tpu.vector_store %arg5[%c0_6, %c0_7], %8 {strides = array<i32>} : memref<128x128xbf16, #tpu.memory_space<vmem>>, vector<128x128xbf16>,
    return
  }
  func.func @transform_0(%arg0: i32, %arg1: i32) -> (i32, i32) {
    %c0_i32 = arith.constant 0 : i32
    %c0_i32_0 = arith.constant 0 : i32
    return %arg0, %c0_i32 : i32, i32
  }
  func.func @transform_1(%arg0: i32, %arg1: i32) -> (i32, i32) {
    %c0_i32 = arith.constant 0 : i32
    %c0_i32_0 = arith.constant 0 : i32
    return %c0_i32, %arg1 : i32, i32
  }
  func.func @transform_2(%arg0: i32, %arg1: i32) -> (i32, i32) {
    %c0_i32 = arith.constant 0 : i32
    %c0_i32_0 = arith.constant 0 : i32
    return %c0_i32, %arg1 : i32, i32
  }
  func.func @transform_3(%arg0: i32, %arg1: i32) -> (i32, i32) {
    %c0_i32 = arith.constant 0 : i32
    return %arg0, %arg1 : i32, i32
  }
}

module attributes {stable_mosaic.version = 11 : i64} {
  func.func @_gemm_bias_kernel(%arg0: i32, %arg1: i32, %arg2: memref<32x1152xbf16, #tpu.memory_space<vmem>>, %arg3: memref<1152x128xbf16, #tpu.memory_space<vmem>>, %arg4: memref<1x128xf32, #tpu.memory_space<vmem>>, %arg5: memref<32x128xbf16, #tpu.memory_space<vmem>>) attributes {dimension_semantics = [#tpu.dimension_semantics<parallel>, #tpu.dimension_semantics<parallel>], iteration_bounds = array<i64: 1, 1>, scalar_prefetch = 0 : i64, scratch_operands = 0 : i64, tpu.core_type = #tpu.core_type<tc>, window_params = [{transform_indices = @transform_0, window_bounds = array<i64: 32, 1152>}, {transform_indices = @transform_1, window_bounds = array<i64: 1152, 128>}, {transform_indices = @transform_2, window_bounds = array<i64: 1, 128>}, {transform_indices = @transform_3, window_bounds = array<i64: 32, 128>}]} {
    %c0 = arith.constant 0 : index
    %c0_0 = arith.constant 0 : index
    %0 = vector.load %arg2[%c0, %c0_0] : memref<32x1152xbf16, #tpu.memory_space<vmem>>, vector<32x1152xbf16>
    %c0_1 = arith.constant 0 : index
    %c0_2 = arith.constant 0 : index
    %1 = vector.load %arg3[%c0_1, %c0_2] : memref<1152x128xbf16, #tpu.memory_space<vmem>>, vector<1152x128xbf16>
    %cst = arith.constant dense<0.000000e+00> : vector<32x128xf32>
    %2 = tpu.matmul %0, %1, %cst {dimension_numbers = #tpu.dot_dimension_numbers<[1], [0], [0], [1], [0, 0, 1, 1], [], []>} : vector<32x1152xbf16>, vector<1152x128xbf16>, vector<32x128xf32> -> vector<32x128xf32>
    %c0_3 = arith.constant 0 : index
    %c0_4 = arith.constant 0 : index
    %3 = vector.load %arg4[%c0_3, %c0_4] : memref<1x128xf32, #tpu.memory_space<vmem>>, vector<1x128xf32>
    %4 = vector.broadcast %3 : vector<1x128xf32> to vector<32x128xf32>
    %5 = arith.addf %2, %4 : vector<32x128xf32>
    %cst_5 = arith.constant 0.000000e+00 : f32
    %6 = vector.broadcast %cst_5 : f32 to vector<32x128xf32>
    %7 = arith.maximumf %5, %6 : vector<32x128xf32>
    %8 = arith.truncf %7 : vector<32x128xf32> to vector<32x128xbf16>
    %c0_6 = arith.constant 0 : index
    %c0_7 = arith.constant 0 : index
    %9 = vector.load %arg5[%c0_6, %c0_7] : memref<32x128xbf16, #tpu.memory_space<vmem>>, vector<32x128xbf16>
    tpu.vector_store %arg5[%c0_6, %c0_7], %8 {strides = array<i32>} : memref<32x128xbf16, #tpu.memory_space<vmem>>, vector<32x128xbf16>,
    return
  }
  func.func @transform_0(%arg0: i32, %arg1: i32) -> (i32, i32) {
    %c0_i32 = arith.constant 0 : i32
    %c0_i32_0 = arith.constant 0 : i32
    return %arg0, %c0_i32 : i32, i32
  }
  func.func @transform_1(%arg0: i32, %arg1: i32) -> (i32, i32) {
    %c0_i32 = arith.constant 0 : i32
    %c0_i32_0 = arith.constant 0 : i32
    return %c0_i32, %arg1 : i32, i32
  }
  func.func @transform_2(%arg0: i32, %arg1: i32) -> (i32, i32) {
    %c0_i32 = arith.constant 0 : i32
    %c0_i32_0 = arith.constant 0 : i32
    return %c0_i32, %arg1 : i32, i32
  }
  func.func @transform_3(%arg0: i32, %arg1: i32) -> (i32, i32) {
    %c0_i32 = arith.constant 0 : i32
    return %arg0, %arg1 : i32, i32
  }
}

module attributes {stable_mosaic.version = 11 : i64} {
  func.func @_gemm_bias_kernel(%arg0: i32, %arg1: i32, %arg2: memref<32x256xbf16, #tpu.memory_space<vmem>>, %arg3: memref<256x256xbf16, #tpu.memory_space<vmem>>, %arg4: memref<1x256xf32, #tpu.memory_space<vmem>>, %arg5: memref<32x256xbf16, #tpu.memory_space<vmem>>) attributes {dimension_semantics = [#tpu.dimension_semantics<parallel>, #tpu.dimension_semantics<parallel>], iteration_bounds = array<i64: 1, 2>, scalar_prefetch = 0 : i64, scratch_operands = 0 : i64, tpu.core_type = #tpu.core_type<tc>, window_params = [{transform_indices = @transform_0, window_bounds = array<i64: 32, 256>}, {transform_indices = @transform_1, window_bounds = array<i64: 256, 256>}, {transform_indices = @transform_2, window_bounds = array<i64: 1, 256>}, {transform_indices = @transform_3, window_bounds = array<i64: 32, 256>}]} {
    %c0 = arith.constant 0 : index
    %c0_0 = arith.constant 0 : index
    %0 = vector.load %arg2[%c0, %c0_0] : memref<32x256xbf16, #tpu.memory_space<vmem>>, vector<32x256xbf16>
    %c0_1 = arith.constant 0 : index
    %c0_2 = arith.constant 0 : index
    %1 = vector.load %arg3[%c0_1, %c0_2] : memref<256x256xbf16, #tpu.memory_space<vmem>>, vector<256x256xbf16>
    %cst = arith.constant dense<0.000000e+00> : vector<32x256xf32>
    %2 = tpu.matmul %0, %1, %cst {dimension_numbers = #tpu.dot_dimension_numbers<[1], [0], [0], [1], [0, 0, 1, 1], [], []>} : vector<32x256xbf16>, vector<256x256xbf16>, vector<32x256xf32> -> vector<32x256xf32>
    %c0_3 = arith.constant 0 : index
    %c0_4 = arith.constant 0 : index
    %3 = vector.load %arg4[%c0_3, %c0_4] : memref<1x256xf32, #tpu.memory_space<vmem>>, vector<1x256xf32>
    %4 = vector.broadcast %3 : vector<1x256xf32> to vector<32x256xf32>
    %5 = arith.addf %2, %4 : vector<32x256xf32>
    %6 = arith.truncf %5 : vector<32x256xf32> to vector<32x256xbf16>
    %c0_5 = arith.constant 0 : index
    %c0_6 = arith.constant 0 : index
    %7 = vector.load %arg5[%c0_5, %c0_6] : memref<32x256xbf16, #tpu.memory_space<vmem>>, vector<32x256xbf16>
    tpu.vector_store %arg5[%c0_5, %c0_6], %6 {strides = array<i32>} : memref<32x256xbf16, #tpu.memory_space<vmem>>, vector<32x256xbf16>,
    return
  }
  func.func @transform_0(%arg0: i32, %arg1: i32) -> (i32, i32) {
    %c0_i32 = arith.constant 0 : i32
    %c0_i32_0 = arith.constant 0 : i32
    return %arg0, %c0_i32 : i32, i32
  }
  func.func @transform_1(%arg0: i32, %arg1: i32) -> (i32, i32) {
    %c0_i32 = arith.constant 0 : i32
    %c0_i32_0 = arith.constant 0 : i32
    return %c0_i32, %arg1 : i32, i32
  }
  func.func @transform_2(%arg0: i32, %arg1: i32) -> (i32, i32) {
    %c0_i32 = arith.constant 0 : i32
    %c0_i32_0 = arith.constant 0 : i32
    return %c0_i32, %arg1 : i32, i32
  }
  func.func @transform_3(%arg0: i32, %arg1: i32) -> (i32, i32) {
    %c0_i32 = arith.constant 0 : i32
    return %arg0, %arg1 : i32, i32
  }
}

module attributes {stable_mosaic.version = 11 : i64} {
  func.func @_gemm_bias_res_kernel(%arg0: i32, %arg1: i32, %arg2: memref<32x128xbf16, #tpu.memory_space<vmem>>, %arg3: memref<128x256xbf16, #tpu.memory_space<vmem>>, %arg4: memref<1x256xf32, #tpu.memory_space<vmem>>, %arg5: memref<32x256xbf16, #tpu.memory_space<vmem>>, %arg6: memref<32x256xbf16, #tpu.memory_space<vmem>>) attributes {dimension_semantics = [#tpu.dimension_semantics<parallel>, #tpu.dimension_semantics<parallel>], iteration_bounds = array<i64: 1, 2>, scalar_prefetch = 0 : i64, scratch_operands = 0 : i64, tpu.core_type = #tpu.core_type<tc>, window_params = [{transform_indices = @transform_0, window_bounds = array<i64: 32, 128>}, {transform_indices = @transform_1, window_bounds = array<i64: 128, 256>}, {transform_indices = @transform_2, window_bounds = array<i64: 1, 256>}, {transform_indices = @transform_3, window_bounds = array<i64: 32, 256>}, {transform_indices = @transform_4, window_bounds = array<i64: 32, 256>}]} {
    %c0 = arith.constant 0 : index
    %c0_0 = arith.constant 0 : index
    %0 = vector.load %arg2[%c0, %c0_0] : memref<32x128xbf16, #tpu.memory_space<vmem>>, vector<32x128xbf16>
    %c0_1 = arith.constant 0 : index
    %c0_2 = arith.constant 0 : index
    %1 = vector.load %arg3[%c0_1, %c0_2] : memref<128x256xbf16, #tpu.memory_space<vmem>>, vector<128x256xbf16>
    %cst = arith.constant dense<0.000000e+00> : vector<32x256xf32>
    %2 = tpu.matmul %0, %1, %cst {dimension_numbers = #tpu.dot_dimension_numbers<[1], [0], [0], [1], [0, 0, 1, 1], [], []>} : vector<32x128xbf16>, vector<128x256xbf16>, vector<32x256xf32> -> vector<32x256xf32>
    %c0_3 = arith.constant 0 : index
    %c0_4 = arith.constant 0 : index
    %3 = vector.load %arg4[%c0_3, %c0_4] : memref<1x256xf32, #tpu.memory_space<vmem>>, vector<1x256xf32>
    %4 = vector.broadcast %3 : vector<1x256xf32> to vector<32x256xf32>
    %5 = arith.addf %2, %4 : vector<32x256xf32>
    %c0_5 = arith.constant 0 : index
    %c0_6 = arith.constant 0 : index
    %6 = vector.load %arg5[%c0_5, %c0_6] : memref<32x256xbf16, #tpu.memory_space<vmem>>, vector<32x256xbf16>
    %7 = arith.extf %6 : vector<32x256xbf16> to vector<32x256xf32>
    %8 = arith.addf %5, %7 : vector<32x256xf32>
    %cst_7 = arith.constant 0.000000e+00 : f32
    %9 = vector.broadcast %cst_7 : f32 to vector<32x256xf32>
    %10 = arith.maximumf %8, %9 : vector<32x256xf32>
    %11 = arith.truncf %10 : vector<32x256xf32> to vector<32x256xbf16>
    %c0_8 = arith.constant 0 : index
    %c0_9 = arith.constant 0 : index
    %12 = vector.load %arg6[%c0_8, %c0_9] : memref<32x256xbf16, #tpu.memory_space<vmem>>, vector<32x256xbf16>
    tpu.vector_store %arg6[%c0_8, %c0_9], %11 {strides = array<i32>} : memref<32x256xbf16, #tpu.memory_space<vmem>>, vector<32x256xbf16>,
    return
  }
  func.func @transform_0(%arg0: i32, %arg1: i32) -> (i32, i32) {
    %c0_i32 = arith.constant 0 : i32
    %c0_i32_0 = arith.constant 0 : i32
    return %arg0, %c0_i32 : i32, i32
  }
  func.func @transform_1(%arg0: i32, %arg1: i32) -> (i32, i32) {
    %c0_i32 = arith.constant 0 : i32
    %c0_i32_0 = arith.constant 0 : i32
    return %c0_i32, %arg1 : i32, i32
  }
  func.func @transform_2(%arg0: i32, %arg1: i32) -> (i32, i32) {
    %c0_i32 = arith.constant 0 : i32
    %c0_i32_0 = arith.constant 0 : i32
    return %c0_i32, %arg1 : i32, i32
  }
  func.func @transform_3(%arg0: i32, %arg1: i32) -> (i32, i32) {
    %c0_i32 = arith.constant 0 : i32
    return %arg0, %arg1 : i32, i32
  }
  func.func @transform_4(%arg0: i32, %arg1: i32) -> (i32, i32) {
    %c0_i32 = arith.constant 0 : i32
    return %arg0, %arg1 : i32, i32
  }
}

module attributes {stable_mosaic.version = 11 : i64} {
  func.func @_gemm_bias_kernel(%arg0: i32, %arg1: i32, %arg2: memref<32x512xbf16, #tpu.memory_space<vmem>>, %arg3: memref<512x128xbf16, #tpu.memory_space<vmem>>, %arg4: memref<1x128xf32, #tpu.memory_space<vmem>>, %arg5: memref<32x128xbf16, #tpu.memory_space<vmem>>) attributes {dimension_semantics = [#tpu.dimension_semantics<parallel>, #tpu.dimension_semantics<parallel>], iteration_bounds = array<i64: 1, 1>, scalar_prefetch = 0 : i64, scratch_operands = 0 : i64, tpu.core_type = #tpu.core_type<tc>, window_params = [{transform_indices = @transform_0, window_bounds = array<i64: 32, 512>}, {transform_indices = @transform_1, window_bounds = array<i64: 512, 128>}, {transform_indices = @transform_2, window_bounds = array<i64: 1, 128>}, {transform_indices = @transform_3, window_bounds = array<i64: 32, 128>}]} {
    %c0 = arith.constant 0 : index
    %c0_0 = arith.constant 0 : index
    %0 = vector.load %arg2[%c0, %c0_0] : memref<32x512xbf16, #tpu.memory_space<vmem>>, vector<32x512xbf16>
    %c0_1 = arith.constant 0 : index
    %c0_2 = arith.constant 0 : index
    %1 = vector.load %arg3[%c0_1, %c0_2] : memref<512x128xbf16, #tpu.memory_space<vmem>>, vector<512x128xbf16>
    %cst = arith.constant dense<0.000000e+00> : vector<32x128xf32>
    %2 = tpu.matmul %0, %1, %cst {dimension_numbers = #tpu.dot_dimension_numbers<[1], [0], [0], [1], [0, 0, 1, 1], [], []>} : vector<32x512xbf16>, vector<512x128xbf16>, vector<32x128xf32> -> vector<32x128xf32>
    %c0_3 = arith.constant 0 : index
    %c0_4 = arith.constant 0 : index
    %3 = vector.load %arg4[%c0_3, %c0_4] : memref<1x128xf32, #tpu.memory_space<vmem>>, vector<1x128xf32>
    %4 = vector.broadcast %3 : vector<1x128xf32> to vector<32x128xf32>
    %5 = arith.addf %2, %4 : vector<32x128xf32>
    %cst_5 = arith.constant 0.000000e+00 : f32
    %6 = vector.broadcast %cst_5 : f32 to vector<32x128xf32>
    %7 = arith.maximumf %5, %6 : vector<32x128xf32>
    %8 = arith.truncf %7 : vector<32x128xf32> to vector<32x128xbf16>
    %c0_6 = arith.constant 0 : index
    %c0_7 = arith.constant 0 : index
    %9 = vector.load %arg5[%c0_6, %c0_7] : memref<32x128xbf16, #tpu.memory_space<vmem>>, vector<32x128xbf16>
    tpu.vector_store %arg5[%c0_6, %c0_7], %8 {strides = array<i32>} : memref<32x128xbf16, #tpu.memory_space<vmem>>, vector<32x128xbf16>,
    return
  }
  func.func @transform_0(%arg0: i32, %arg1: i32) -> (i32, i32) {
    %c0_i32 = arith.constant 0 : i32
    %c0_i32_0 = arith.constant 0 : i32
    return %arg0, %c0_i32 : i32, i32
  }
  func.func @transform_1(%arg0: i32, %arg1: i32) -> (i32, i32) {
    %c0_i32 = arith.constant 0 : i32
    %c0_i32_0 = arith.constant 0 : i32
    return %c0_i32, %arg1 : i32, i32
  }
  func.func @transform_2(%arg0: i32, %arg1: i32) -> (i32, i32) {
    %c0_i32 = arith.constant 0 : i32
    %c0_i32_0 = arith.constant 0 : i32
    return %c0_i32, %arg1 : i32, i32
  }
  func.func @transform_3(%arg0: i32, %arg1: i32) -> (i32, i32) {
    %c0_i32 = arith.constant 0 : i32
    return %arg0, %arg1 : i32, i32
  }
}

module attributes {stable_mosaic.version = 11 : i64} {
  func.func @_gemm_bias_kernel(%arg0: i32, %arg1: i32, %arg2: memref<32x512xbf16, #tpu.memory_space<vmem>>, %arg3: memref<512x128xbf16, #tpu.memory_space<vmem>>, %arg4: memref<1x128xf32, #tpu.memory_space<vmem>>, %arg5: memref<32x128xbf16, #tpu.memory_space<vmem>>) attributes {dimension_semantics = [#tpu.dimension_semantics<parallel>, #tpu.dimension_semantics<parallel>], iteration_bounds = array<i64: 1, 2>, scalar_prefetch = 0 : i64, scratch_operands = 0 : i64, tpu.core_type = #tpu.core_type<tc>, window_params = [{transform_indices = @transform_0, window_bounds = array<i64: 32, 512>}, {transform_indices = @transform_1, window_bounds = array<i64: 512, 128>}, {transform_indices = @transform_2, window_bounds = array<i64: 1, 128>}, {transform_indices = @transform_3, window_bounds = array<i64: 32, 128>}]} {
    %c0 = arith.constant 0 : index
    %c0_0 = arith.constant 0 : index
    %0 = vector.load %arg2[%c0, %c0_0] : memref<32x512xbf16, #tpu.memory_space<vmem>>, vector<32x512xbf16>
    %c0_1 = arith.constant 0 : index
    %c0_2 = arith.constant 0 : index
    %1 = vector.load %arg3[%c0_1, %c0_2] : memref<512x128xbf16, #tpu.memory_space<vmem>>, vector<512x128xbf16>
    %cst = arith.constant dense<0.000000e+00> : vector<32x128xf32>
    %2 = tpu.matmul %0, %1, %cst {dimension_numbers = #tpu.dot_dimension_numbers<[1], [0], [0], [1], [0, 0, 1, 1], [], []>} : vector<32x512xbf16>, vector<512x128xbf16>, vector<32x128xf32> -> vector<32x128xf32>
    %c0_3 = arith.constant 0 : index
    %c0_4 = arith.constant 0 : index
    %3 = vector.load %arg4[%c0_3, %c0_4] : memref<1x128xf32, #tpu.memory_space<vmem>>, vector<1x128xf32>
    %4 = vector.broadcast %3 : vector<1x128xf32> to vector<32x128xf32>
    %5 = arith.addf %2, %4 : vector<32x128xf32>
    %cst_5 = arith.constant 0.000000e+00 : f32
    %6 = vector.broadcast %cst_5 : f32 to vector<32x128xf32>
    %7 = arith.maximumf %5, %6 : vector<32x128xf32>
    %8 = arith.truncf %7 : vector<32x128xf32> to vector<32x128xbf16>
    %c0_6 = arith.constant 0 : index
    %c0_7 = arith.constant 0 : index
    %9 = vector.load %arg5[%c0_6, %c0_7] : memref<32x128xbf16, #tpu.memory_space<vmem>>, vector<32x128xbf16>
    tpu.vector_store %arg5[%c0_6, %c0_7], %8 {strides = array<i32>} : memref<32x128xbf16, #tpu.memory_space<vmem>>, vector<32x128xbf16>,
    return
  }
  func.func @transform_0(%arg0: i32, %arg1: i32) -> (i32, i32) {
    %c0_i32 = arith.constant 0 : i32
    %c0_i32_0 = arith.constant 0 : i32
    return %arg0, %c0_i32 : i32, i32
  }
  func.func @transform_1(%arg0: i32, %arg1: i32) -> (i32, i32) {
    %c0_i32 = arith.constant 0 : i32
    %c0_i32_0 = arith.constant 0 : i32
    return %c0_i32, %arg1 : i32, i32
  }
  func.func @transform_2(%arg0: i32, %arg1: i32) -> (i32, i32) {
    %c0_i32 = arith.constant 0 : i32
    %c0_i32_0 = arith.constant 0 : i32
    return %c0_i32, %arg1 : i32, i32
  }
  func.func @transform_3(%arg0: i32, %arg1: i32) -> (i32, i32) {
    %c0_i32 = arith.constant 0 : i32
    return %arg0, %arg1 : i32, i32
  }
}

module attributes {stable_mosaic.version = 11 : i64} {
  func.func @_gemm_bias_kernel(%arg0: i32, %arg1: i32, %arg2: memref<16x2304xbf16, #tpu.memory_space<vmem>>, %arg3: memref<2304x128xbf16, #tpu.memory_space<vmem>>, %arg4: memref<1x128xf32, #tpu.memory_space<vmem>>, %arg5: memref<16x128xbf16, #tpu.memory_space<vmem>>) attributes {dimension_semantics = [#tpu.dimension_semantics<parallel>, #tpu.dimension_semantics<parallel>], iteration_bounds = array<i64: 1, 2>, scalar_prefetch = 0 : i64, scratch_operands = 0 : i64, tpu.core_type = #tpu.core_type<tc>, window_params = [{transform_indices = @transform_0, window_bounds = array<i64: 16, 2304>}, {transform_indices = @transform_1, window_bounds = array<i64: 2304, 128>}, {transform_indices = @transform_2, window_bounds = array<i64: 1, 128>}, {transform_indices = @transform_3, window_bounds = array<i64: 16, 128>}]} {
    %c0 = arith.constant 0 : index
    %c0_0 = arith.constant 0 : index
    %0 = vector.load %arg2[%c0, %c0_0] : memref<16x2304xbf16, #tpu.memory_space<vmem>>, vector<16x2304xbf16>
    %c0_1 = arith.constant 0 : index
    %c0_2 = arith.constant 0 : index
    %1 = vector.load %arg3[%c0_1, %c0_2] : memref<2304x128xbf16, #tpu.memory_space<vmem>>, vector<2304x128xbf16>
    %cst = arith.constant dense<0.000000e+00> : vector<16x128xf32>
    %2 = tpu.matmul %0, %1, %cst {dimension_numbers = #tpu.dot_dimension_numbers<[1], [0], [0], [1], [0, 0, 1, 1], [], []>} : vector<16x2304xbf16>, vector<2304x128xbf16>, vector<16x128xf32> -> vector<16x128xf32>
    %c0_3 = arith.constant 0 : index
    %c0_4 = arith.constant 0 : index
    %3 = vector.load %arg4[%c0_3, %c0_4] : memref<1x128xf32, #tpu.memory_space<vmem>>, vector<1x128xf32>
    %4 = vector.broadcast %3 : vector<1x128xf32> to vector<16x128xf32>
    %5 = arith.addf %2, %4 : vector<16x128xf32>
    %cst_5 = arith.constant 0.000000e+00 : f32
    %6 = vector.broadcast %cst_5 : f32 to vector<16x128xf32>
    %7 = arith.maximumf %5, %6 : vector<16x128xf32>
    %8 = arith.truncf %7 : vector<16x128xf32> to vector<16x128xbf16>
    %c0_6 = arith.constant 0 : index
    %c0_7 = arith.constant 0 : index
    %9 = vector.load %arg5[%c0_6, %c0_7] : memref<16x128xbf16, #tpu.memory_space<vmem>>, vector<16x128xbf16>
    tpu.vector_store %arg5[%c0_6, %c0_7], %8 {strides = array<i32>} : memref<16x128xbf16, #tpu.memory_space<vmem>>, vector<16x128xbf16>,
    return
  }
  func.func @transform_0(%arg0: i32, %arg1: i32) -> (i32, i32) {
    %c0_i32 = arith.constant 0 : i32
    %c0_i32_0 = arith.constant 0 : i32
    return %arg0, %c0_i32 : i32, i32
  }
  func.func @transform_1(%arg0: i32, %arg1: i32) -> (i32, i32) {
    %c0_i32 = arith.constant 0 : i32
    %c0_i32_0 = arith.constant 0 : i32
    return %c0_i32, %arg1 : i32, i32
  }
  func.func @transform_2(%arg0: i32, %arg1: i32) -> (i32, i32) {
    %c0_i32 = arith.constant 0 : i32
    %c0_i32_0 = arith.constant 0 : i32
    return %c0_i32, %arg1 : i32, i32
  }
  func.func @transform_3(%arg0: i32, %arg1: i32) -> (i32, i32) {
    %c0_i32 = arith.constant 0 : i32
    return %arg0, %arg1 : i32, i32
  }
}

module attributes {stable_mosaic.version = 11 : i64} {
  func.func @_gemm_bias_kernel(%arg0: i32, %arg1: i32, %arg2: memref<16x512xbf16, #tpu.memory_space<vmem>>, %arg3: memref<512x256xbf16, #tpu.memory_space<vmem>>, %arg4: memref<1x256xf32, #tpu.memory_space<vmem>>, %arg5: memref<16x256xbf16, #tpu.memory_space<vmem>>) attributes {dimension_semantics = [#tpu.dimension_semantics<parallel>, #tpu.dimension_semantics<parallel>], iteration_bounds = array<i64: 1, 4>, scalar_prefetch = 0 : i64, scratch_operands = 0 : i64, tpu.core_type = #tpu.core_type<tc>, window_params = [{transform_indices = @transform_0, window_bounds = array<i64: 16, 512>}, {transform_indices = @transform_1, window_bounds = array<i64: 512, 256>}, {transform_indices = @transform_2, window_bounds = array<i64: 1, 256>}, {transform_indices = @transform_3, window_bounds = array<i64: 16, 256>}]} {
    %c0 = arith.constant 0 : index
    %c0_0 = arith.constant 0 : index
    %0 = vector.load %arg2[%c0, %c0_0] : memref<16x512xbf16, #tpu.memory_space<vmem>>, vector<16x512xbf16>
    %c0_1 = arith.constant 0 : index
    %c0_2 = arith.constant 0 : index
    %1 = vector.load %arg3[%c0_1, %c0_2] : memref<512x256xbf16, #tpu.memory_space<vmem>>, vector<512x256xbf16>
    %cst = arith.constant dense<0.000000e+00> : vector<16x256xf32>
    %2 = tpu.matmul %0, %1, %cst {dimension_numbers = #tpu.dot_dimension_numbers<[1], [0], [0], [1], [0, 0, 1, 1], [], []>} : vector<16x512xbf16>, vector<512x256xbf16>, vector<16x256xf32> -> vector<16x256xf32>
    %c0_3 = arith.constant 0 : index
    %c0_4 = arith.constant 0 : index
    %3 = vector.load %arg4[%c0_3, %c0_4] : memref<1x256xf32, #tpu.memory_space<vmem>>, vector<1x256xf32>
    %4 = vector.broadcast %3 : vector<1x256xf32> to vector<16x256xf32>
    %5 = arith.addf %2, %4 : vector<16x256xf32>
    %6 = arith.truncf %5 : vector<16x256xf32> to vector<16x256xbf16>
    %c0_5 = arith.constant 0 : index
    %c0_6 = arith.constant 0 : index
    %7 = vector.load %arg5[%c0_5, %c0_6] : memref<16x256xbf16, #tpu.memory_space<vmem>>, vector<16x256xbf16>
    tpu.vector_store %arg5[%c0_5, %c0_6], %6 {strides = array<i32>} : memref<16x256xbf16, #tpu.memory_space<vmem>>, vector<16x256xbf16>,
    return
  }
  func.func @transform_0(%arg0: i32, %arg1: i32) -> (i32, i32) {
    %c0_i32 = arith.constant 0 : i32
    %c0_i32_0 = arith.constant 0 : i32
    return %arg0, %c0_i32 : i32, i32
  }
  func.func @transform_1(%arg0: i32, %arg1: i32) -> (i32, i32) {
    %c0_i32 = arith.constant 0 : i32
    %c0_i32_0 = arith.constant 0 : i32
    return %c0_i32, %arg1 : i32, i32
  }
  func.func @transform_2(%arg0: i32, %arg1: i32) -> (i32, i32) {
    %c0_i32 = arith.constant 0 : i32
    %c0_i32_0 = arith.constant 0 : i32
    return %c0_i32, %arg1 : i32, i32
  }
  func.func @transform_3(%arg0: i32, %arg1: i32) -> (i32, i32) {
    %c0_i32 = arith.constant 0 : i32
    return %arg0, %arg1 : i32, i32
  }
}

module attributes {stable_mosaic.version = 11 : i64} {
  func.func @_gemm_bias_res_kernel(%arg0: i32, %arg1: i32, %arg2: memref<16x256xbf16, #tpu.memory_space<vmem>>, %arg3: memref<256x256xbf16, #tpu.memory_space<vmem>>, %arg4: memref<1x256xf32, #tpu.memory_space<vmem>>, %arg5: memref<16x256xbf16, #tpu.memory_space<vmem>>, %arg6: memref<16x256xbf16, #tpu.memory_space<vmem>>) attributes {dimension_semantics = [#tpu.dimension_semantics<parallel>, #tpu.dimension_semantics<parallel>], iteration_bounds = array<i64: 1, 4>, scalar_prefetch = 0 : i64, scratch_operands = 0 : i64, tpu.core_type = #tpu.core_type<tc>, window_params = [{transform_indices = @transform_0, window_bounds = array<i64: 16, 256>}, {transform_indices = @transform_1, window_bounds = array<i64: 256, 256>}, {transform_indices = @transform_2, window_bounds = array<i64: 1, 256>}, {transform_indices = @transform_3, window_bounds = array<i64: 16, 256>}, {transform_indices = @transform_4, window_bounds = array<i64: 16, 256>}]} {
    %c0 = arith.constant 0 : index
    %c0_0 = arith.constant 0 : index
    %0 = vector.load %arg2[%c0, %c0_0] : memref<16x256xbf16, #tpu.memory_space<vmem>>, vector<16x256xbf16>
    %c0_1 = arith.constant 0 : index
    %c0_2 = arith.constant 0 : index
    %1 = vector.load %arg3[%c0_1, %c0_2] : memref<256x256xbf16, #tpu.memory_space<vmem>>, vector<256x256xbf16>
    %cst = arith.constant dense<0.000000e+00> : vector<16x256xf32>
    %2 = tpu.matmul %0, %1, %cst {dimension_numbers = #tpu.dot_dimension_numbers<[1], [0], [0], [1], [0, 0, 1, 1], [], []>} : vector<16x256xbf16>, vector<256x256xbf16>, vector<16x256xf32> -> vector<16x256xf32>
    %c0_3 = arith.constant 0 : index
    %c0_4 = arith.constant 0 : index
    %3 = vector.load %arg4[%c0_3, %c0_4] : memref<1x256xf32, #tpu.memory_space<vmem>>, vector<1x256xf32>
    %4 = vector.broadcast %3 : vector<1x256xf32> to vector<16x256xf32>
    %5 = arith.addf %2, %4 : vector<16x256xf32>
    %c0_5 = arith.constant 0 : index
    %c0_6 = arith.constant 0 : index
    %6 = vector.load %arg5[%c0_5, %c0_6] : memref<16x256xbf16, #tpu.memory_space<vmem>>, vector<16x256xbf16>
    %7 = arith.extf %6 : vector<16x256xbf16> to vector<16x256xf32>
    %8 = arith.addf %5, %7 : vector<16x256xf32>
    %cst_7 = arith.constant 0.000000e+00 : f32
    %9 = vector.broadcast %cst_7 : f32 to vector<16x256xf32>
    %10 = arith.maximumf %8, %9 : vector<16x256xf32>
    %11 = arith.truncf %10 : vector<16x256xf32> to vector<16x256xbf16>
    %c0_8 = arith.constant 0 : index
    %c0_9 = arith.constant 0 : index
    %12 = vector.load %arg6[%c0_8, %c0_9] : memref<16x256xbf16, #tpu.memory_space<vmem>>, vector<16x256xbf16>
    tpu.vector_store %arg6[%c0_8, %c0_9], %11 {strides = array<i32>} : memref<16x256xbf16, #tpu.memory_space<vmem>>, vector<16x256xbf16>,
    return
  }
  func.func @transform_0(%arg0: i32, %arg1: i32) -> (i32, i32) {
    %c0_i32 = arith.constant 0 : i32
    %c0_i32_0 = arith.constant 0 : i32
    return %arg0, %c0_i32 : i32, i32
  }
  func.func @transform_1(%arg0: i32, %arg1: i32) -> (i32, i32) {
    %c0_i32 = arith.constant 0 : i32
    %c0_i32_0 = arith.constant 0 : i32
    return %c0_i32, %arg1 : i32, i32
  }
  func.func @transform_2(%arg0: i32, %arg1: i32) -> (i32, i32) {
    %c0_i32 = arith.constant 0 : i32
    %c0_i32_0 = arith.constant 0 : i32
    return %c0_i32, %arg1 : i32, i32
  }
  func.func @transform_3(%arg0: i32, %arg1: i32) -> (i32, i32) {
    %c0_i32 = arith.constant 0 : i32
    return %arg0, %arg1 : i32, i32
  }
  func.func @transform_4(%arg0: i32, %arg1: i32) -> (i32, i32) {
    %c0_i32 = arith.constant 0 : i32
    return %arg0, %arg1 : i32, i32
  }
}

module attributes {stable_mosaic.version = 11 : i64} {
  func.func @_gemm_bias_kernel(%arg0: i32, %arg1: i32, %arg2: memref<16x1024xbf16, #tpu.memory_space<vmem>>, %arg3: memref<1024x128xbf16, #tpu.memory_space<vmem>>, %arg4: memref<1x128xf32, #tpu.memory_space<vmem>>, %arg5: memref<16x128xbf16, #tpu.memory_space<vmem>>) attributes {dimension_semantics = [#tpu.dimension_semantics<parallel>, #tpu.dimension_semantics<parallel>], iteration_bounds = array<i64: 1, 2>, scalar_prefetch = 0 : i64, scratch_operands = 0 : i64, tpu.core_type = #tpu.core_type<tc>, window_params = [{transform_indices = @transform_0, window_bounds = array<i64: 16, 1024>}, {transform_indices = @transform_1, window_bounds = array<i64: 1024, 128>}, {transform_indices = @transform_2, window_bounds = array<i64: 1, 128>}, {transform_indices = @transform_3, window_bounds = array<i64: 16, 128>}]} {
    %c0 = arith.constant 0 : index
    %c0_0 = arith.constant 0 : index
    %0 = vector.load %arg2[%c0, %c0_0] : memref<16x1024xbf16, #tpu.memory_space<vmem>>, vector<16x1024xbf16>
    %c0_1 = arith.constant 0 : index
    %c0_2 = arith.constant 0 : index
    %1 = vector.load %arg3[%c0_1, %c0_2] : memref<1024x128xbf16, #tpu.memory_space<vmem>>, vector<1024x128xbf16>
    %cst = arith.constant dense<0.000000e+00> : vector<16x128xf32>
    %2 = tpu.matmul %0, %1, %cst {dimension_numbers = #tpu.dot_dimension_numbers<[1], [0], [0], [1], [0, 0, 1, 1], [], []>} : vector<16x1024xbf16>, vector<1024x128xbf16>, vector<16x128xf32> -> vector<16x128xf32>
    %c0_3 = arith.constant 0 : index
    %c0_4 = arith.constant 0 : index
    %3 = vector.load %arg4[%c0_3, %c0_4] : memref<1x128xf32, #tpu.memory_space<vmem>>, vector<1x128xf32>
    %4 = vector.broadcast %3 : vector<1x128xf32> to vector<16x128xf32>
    %5 = arith.addf %2, %4 : vector<16x128xf32>
    %cst_5 = arith.constant 0.000000e+00 : f32
    %6 = vector.broadcast %cst_5 : f32 to vector<16x128xf32>
    %7 = arith.maximumf %5, %6 : vector<16x128xf32>
    %8 = arith.truncf %7 : vector<16x128xf32> to vector<16x128xbf16>
    %c0_6 = arith.constant 0 : index
    %c0_7 = arith.constant 0 : index
    %9 = vector.load %arg5[%c0_6, %c0_7] : memref<16x128xbf16, #tpu.memory_space<vmem>>, vector<16x128xbf16>
    tpu.vector_store %arg5[%c0_6, %c0_7], %8 {strides = array<i32>} : memref<16x128xbf16, #tpu.memory_space<vmem>>, vector<16x128xbf16>,
    return
  }
  func.func @transform_0(%arg0: i32, %arg1: i32) -> (i32, i32) {
    %c0_i32 = arith.constant 0 : i32
    %c0_i32_0 = arith.constant 0 : i32
    return %arg0, %c0_i32 : i32, i32
  }
  func.func @transform_1(%arg0: i32, %arg1: i32) -> (i32, i32) {
    %c0_i32 = arith.constant 0 : i32
    %c0_i32_0 = arith.constant 0 : i32
    return %c0_i32, %arg1 : i32, i32
  }
  func.func @transform_2(%arg0: i32, %arg1: i32) -> (i32, i32) {
    %c0_i32 = arith.constant 0 : i32
    %c0_i32_0 = arith.constant 0 : i32
    return %c0_i32, %arg1 : i32, i32
  }
  func.func @transform_3(%arg0: i32, %arg1: i32) -> (i32, i32) {
    %c0_i32 = arith.constant 0 : i32
    return %arg0, %arg1 : i32, i32
  }
}

</mosaic_0001>

<bundles_post_ra>
// kernel: resnet_feature_extractor.43
= control target key start
LH: loop header
LB: loop body
LE: loop exit
PB: predicated region body
PF: predicated region fallthrough
CT: control target
= control target key end

     0   :  { %s1462_s12 = smov 0   ;;  %s1464_s13 = smov 0   ;;  %s1636_s0 = inlined_call_operand.vmem [shape: bf16[512,256], index: 0, kind: input, shape index: {}]   ;;  %s1637_s1 = inlined_call_operand.vmem [shape: bf16[256,128], index: 1, kind: input, shape index: {}]   ;;  %s1638_s2 = inlined_call_operand.vmem [shape: f32[1,128], index: 2, kind: input, shape index: {}]   ;;  %s1639_s3 = inlined_call_operand.vmem [shape: bf16[512,128], index: 3, kind: output, shape index: {}]  }
   0x1   :  { %s1466_s14 = smov 0  }
   0x2 LB: > { %s25_s15 = sadd.s32 1, %s1436_s13  ;;  %p985_p0 = scmp.ge.s32.totalorder %s1440_s14, 1  ;;  %s1440_s14 = sphi %s1466_s14, %s13_s14   ;;  %s1436_s13 = sphi %s1464_s13, %s1641_s13   ;;  %s1432_s12 = sphi %s1462_s12, %s1640_s12  }
   0x3   : > { %p27_p1 = scmp.ge.s32.totalorder %s25_s15, 2  ;;  %p170_p2 = scmp.lt.s32.totalorder %s1440_s14, 3 }
   0x5   : > { %s1643_s15 = smov (%p27_p1, %s25_s15), 0  ;;  %p171_p3 = pnand %p985_p0, %p170_p2 }
   0x6   : > { %v1354_v0 = vld [vmem:[%s1637_s1 + $0x40] sm:$0xff] (!%p171_p3)   ;;  %s986_s18 = sshll.u32 (!%p171_p3), %s1432_s12, 5  ;;  %v1356_v2 = vld [vmem:[%s1637_s1 + $0x48] sm:$0xff] (!%p171_p3)   ;;  %v1358_v4 = vld [vmem:[%s1637_s1 + $0x50] sm:$0xff] (!%p171_p3)  }
   0x7   : > { %174 = sbr.rel (%p171_p3) target bundleno = 317 (0x13d), region = 32  ;;  %v1355_v1 = vld [vmem:[%s1637_s1] sm:$0xff] (!%p171_p3)   ;;  %1202 = vmatprep.subr.bf16.mxu0 (!%p171_p3), %v1354_v0  ;;  %1314 = vmatprep.subr.bf16.mxu1 (!%p171_p3), %v1354_v0  ;;  %v1357_v3 = vld [vmem:[%s1637_s1 + $0x8] sm:$0xff] (!%p171_p3)   ;;  %p206_p4 = scmp.lt.s32.totalorder (!%p171_p3), %s986_s18, 63  ;;  %v1359_v5 = vld [vmem:[%s1637_s1 + $0x10] sm:$0xff] (!%p171_p3)  }
   0x8   : > { %1203 = vmatpush3.bf16.msra.mxu0 (!%p171_p3), %v1355_v1  ;;  %1322 = vmatpush3.bf16.msra.mxu1 (!%p171_p3), %v1355_v1  ;;  %v1360_v6 = vld [vmem:[%s1637_s1 + $0x58] sm:$0xff] (!%p171_p3)   ;;  %v1362_v8 = vld [vmem:[%s1637_s1 + $0x60] sm:$0xff] (!%p171_p3)   ;;  %v1364_v10 = vld [vmem:[%s1637_s1 + $0x68] sm:$0xff] (!%p171_p3)  }
   0x9   : > { %1204 = vmatprep.subr.bf16.mxu0 (!%p171_p3), %v1356_v2  ;;  %1315 = vmatprep.subr.bf16.mxu1 (!%p171_p3), %v1356_v2  ;;  %v1361_v7 = vld [vmem:[%s1637_s1 + $0x18] sm:$0xff] (!%p171_p3)   ;;  %v1363_v9 = vld [vmem:[%s1637_s1 + $0x20] sm:$0xff] (!%p171_p3)   ;;  %v1365_v13 = vld [vmem:[%s1637_s1 + $0x28] sm:$0xff] (!%p171_p3)  }
   0xa   : > { %v1366_v14 = vld [vmem:[%s1637_s1 + $0x70] sm:$0xff] (!%p171_p3)   ;;  %v1368_v16 = vld [vmem:[%s1637_s1 + $0x78] sm:$0xff] (!%p171_p3)   ;;  %v1571_v56 = vld [vmem:[%s1638_s2] ss:$0 sm:$0xff] (!%p171_p3) }
   0xb   : > { %v1367_v15 = vld [vmem:[%s1637_s1 + $0x30] sm:$0xff] (!%p171_p3)   ;;  %v1369_v17 = vld [vmem:[%s1637_s1 + $0x38] sm:$0xff] (!%p171_p3)  }
   0xc   : > { %1205 = vmatpush3.bf16.msra.mxu0 (!%p171_p3), %v1357_v3  ;;  %1323 = vmatpush3.bf16.msra.mxu1 (!%p171_p3), %v1357_v3 }
   0xd   : > { %1206 = vmatprep.subr.bf16.mxu0 (!%p171_p3), %v1358_v4  ;;  %1316 = vmatprep.subr.bf16.mxu1 (!%p171_p3), %v1358_v4 }
   0xe   : > { %s1645_s18 = smov (!%p206_p4, %s986_s18), 63 }
   0xf   : > { %s1074_s6 = sshll.u32 %s1645_s18, 3  ;;  %s990_s5 = sshll.u32 %s1645_s18, 2 }
  0x10   : > { %1207 = vmatpush3.bf16.msra.mxu0 %v1359_v5  ;;  %1324 = vmatpush3.bf16.msra.mxu1 %v1359_v5  ;;  %s1513_s11 = scalar_lea.vmem %s1636_s0, %s1074_s6  ;;  %s1581_s8 = scalar_lea.vmem %s1639_s3, %s990_s5 }
  0x11   : > { %1208 = vmatprep.subr.bf16.mxu0 %v1360_v6  ;;  %1317 = vmatprep.subr.bf16.mxu1 %v1360_v6  ;;  %v1372_v11 = vld [vmem:[%s1513_s11 + $0x4] ss:$8 sps:$4 sm:$0xff]   ;;  %v1370_v18 = vld [vmem:[%s1513_s11] ss:$8 sps:$4 sm:$0xff]   ;;  %v1376_v20 = vld [vmem:[%s1513_s11 + $0x14] ss:$8 sps:$4 sm:$0xff]  }
  0x12   : > { %v1375_v12 = vld [vmem:[%s1513_s11 + $0x84] ss:$8 sps:$4 sm:$0xff]   ;;  %588 = vmatprep.mubr.bf16.mxu0 %v1372_v11  ;;  %v1373_v19 = vld [vmem:[%s1513_s11 + $0x80] ss:$8 sps:$4 sm:$0xff]   ;;  %v1378_v21 = vld [vmem:[%s1513_s11 + $0x94] ss:$8 sps:$4 sm:$0xff]  }
  0x13   : > { %652 = vmatprep.mubr.bf16.mxu1 %v1375_v12  ;;  %v1380_v22 = vld [vmem:[%s1513_s11 + $0x10] ss:$8 sps:$4 sm:$0xff]   ;;  %v1382_v24 = vld [vmem:[%s1513_s11 + $0x24] ss:$8 sps:$4 sm:$0xff]   ;;  %v1386_v26 = vld [vmem:[%s1513_s11 + $0x20] ss:$8 sps:$4 sm:$0xff]  }
  0x14   : > { %1209 = vmatpush3.bf16.msra.mxu0 %v1361_v7  ;;  %1325 = vmatpush3.bf16.msra.mxu1 %v1361_v7  ;;  %v1381_v23 = vld [vmem:[%s1513_s11 + $0x90] ss:$8 sps:$4 sm:$0xff]   ;;  %v1384_v25 = vld [vmem:[%s1513_s11 + $0xa4] ss:$8 sps:$4 sm:$0xff]   ;;  %v1387_v27 = vld [vmem:[%s1513_s11 + $0xa0] ss:$8 sps:$4 sm:$0xff]  }
  0x15   : > { %1210 = vmatprep.subr.bf16.mxu0 %v1362_v8  ;;  %1318 = vmatprep.subr.bf16.mxu1 %v1362_v8  ;;  %v1388_v28 = vld [vmem:[%s1513_s11 + $0x34] ss:$8 sps:$4 sm:$0xff]   ;;  %v1392_v30 = vld [vmem:[%s1513_s11 + $0x30] ss:$8 sps:$4 sm:$0xff]   ;;  %v1394_v32 = vld [vmem:[%s1513_s11 + $0x44] ss:$8 sps:$4 sm:$0xff]  }
  0x16   : > { %v1390_v29 = vld [vmem:[%s1513_s11 + $0xb4] ss:$8 sps:$4 sm:$0xff]   ;;  %v1393_v31 = vld [vmem:[%s1513_s11 + $0xb0] ss:$8 sps:$4 sm:$0xff]   ;;  %v1396_v33 = vld [vmem:[%s1513_s11 + $0xc4] ss:$8 sps:$4 sm:$0xff]  }
  0x17   : > { %v1398_v34 = vld [vmem:[%s1513_s11 + $0x40] ss:$8 sps:$4 sm:$0xff]   ;;  %v1400_v36 = vld [vmem:[%s1513_s11 + $0x54] ss:$8 sps:$4 sm:$0xff]   ;;  %v1404_v38 = vld [vmem:[%s1513_s11 + $0x50] ss:$8 sps:$4 sm:$0xff]  }
  0x18   : > { %1211 = vmatpush3.bf16.msra.mxu0 %v1363_v9  ;;  %1326 = vmatpush3.bf16.msra.mxu1 %v1363_v9  ;;  %v1399_v35 = vld [vmem:[%s1513_s11 + $0xc0] ss:$8 sps:$4 sm:$0xff]   ;;  %v1402_v37 = vld [vmem:[%s1513_s11 + $0xd4] ss:$8 sps:$4 sm:$0xff]   ;;  %v1405_v39 = vld [vmem:[%s1513_s11 + $0xd0] ss:$8 sps:$4 sm:$0xff]  }
  0x19   : > { %1212 = vmatprep.subr.bf16.mxu0 %v1364_v10  ;;  %1319 = vmatprep.subr.bf16.mxu1 %v1364_v10  ;;  %v1406_v40 = vld [vmem:[%s1513_s11 + $0x64] ss:$8 sps:$4 sm:$0xff]   ;;  %v1410_v42 = vld [vmem:[%s1513_s11 + $0x60] ss:$8 sps:$4 sm:$0xff]   ;;  %v1412_v44 = vld [vmem:[%s1513_s11 + $0x74] ss:$8 sps:$4 sm:$0xff]  }
  0x1a   : > { %v1408_v41 = vld [vmem:[%s1513_s11 + $0xe4] ss:$8 sps:$4 sm:$0xff]   ;;  %v1411_v43 = vld [vmem:[%s1513_s11 + $0xe0] ss:$8 sps:$4 sm:$0xff]   ;;  %v1414_v45 = vld [vmem:[%s1513_s11 + $0xf4] ss:$8 sps:$4 sm:$0xff]  }
  0x1b   : > { %v1416_v46 = vld [vmem:[%s1513_s11 + $0x70] ss:$8 sps:$4 sm:$0xff]  }
  0x1c   : > { %1213 = vmatpush3.bf16.msra.mxu0 %v1365_v13  ;;  %1327 = vmatpush3.bf16.msra.mxu1 %v1365_v13  ;;  %v1417_v47 = vld [vmem:[%s1513_s11 + $0xf0] ss:$8 sps:$4 sm:$0xff]  }
  0x1d   : > { %1214 = vmatprep.subr.bf16.mxu0 %v1366_v14  ;;  %1320 = vmatprep.subr.bf16.mxu1 %v1366_v14 }
  0x20   : > { %1215 = vmatpush3.bf16.msra.mxu0 %v1367_v15  ;;  %1328 = vmatpush3.bf16.msra.mxu1 %v1367_v15 }
  0x21   : > { %1216 = vmatprep.subr.bf16.mxu0 %v1368_v16  ;;  %1321 = vmatprep.subr.bf16.mxu1 %v1368_v16 }
  0x24   : > { %1217 = vmatpush3.bf16.msra.mxu0 %v1369_v17  ;;  %1329 = vmatpush3.bf16.msra.mxu1 %v1369_v17 }
  0x27   : > { %589 = vmatmul.mubr.bf16.vlgmr.msra.gmra.mrb[0].mxu0 %v1370_v18  ;;  %653 = vmatmul.mubr.bf16.vlgmr.msra.gmra.mrb[0].mxu1 %v1373_v19 }
  0x28   : > { %596 = vmatprep.mubr.bf16.mxu0 %v1376_v20  ;;  %660 = vmatprep.mubr.bf16.mxu1 %v1378_v21 }
  0x2f   : > { %597 = vmatmul.mubr.bf16.gmra.mrb[4].mxu0 %v1380_v22  ;;  %661 = vmatmul.mubr.bf16.gmra.mrb[4].mxu1 %v1381_v23 }
  0x30   : > { %604 = vmatprep.mubr.bf16.mxu0 %v1382_v24  ;;  %668 = vmatprep.mubr.bf16.mxu1 %v1384_v25 }
  0x37   : > { %605 = vmatmul.mubr.bf16.gmra.mrb[8].mxu0 %v1386_v26  ;;  %669 = vmatmul.mubr.bf16.gmra.mrb[8].mxu1 %v1387_v27 }
  0x38   : > { %612 = vmatprep.mubr.bf16.mxu0 %v1388_v28  ;;  %676 = vmatprep.mubr.bf16.mxu1 %v1390_v29 }
  0x3f   : > { %613 = vmatmul.mubr.bf16.gmra.mrb[12].mxu0 %v1392_v30  ;;  %677 = vmatmul.mubr.bf16.gmra.mrb[12].mxu1 %v1393_v31 }
  0x40   : > { %620 = vmatprep.mubr.bf16.mxu0 %v1394_v32  ;;  %684 = vmatprep.mubr.bf16.mxu1 %v1396_v33 }
  0x47   : > { %621 = vmatmul.mubr.bf16.gmra.mrb[16].mxu0 %v1398_v34  ;;  %685 = vmatmul.mubr.bf16.gmra.mrb[16].mxu1 %v1399_v35 }
  0x48   : > { %628 = vmatprep.mubr.bf16.mxu0 %v1400_v36  ;;  %692 = vmatprep.mubr.bf16.mxu1 %v1402_v37 }
  0x4f   : > { %629 = vmatmul.mubr.bf16.gmra.mrb[20].mxu0 %v1404_v38  ;;  %693 = vmatmul.mubr.bf16.gmra.mrb[20].mxu1 %v1405_v39 }
  0x50   : > { %636 = vmatprep.mubr.bf16.mxu0 %v1406_v40  ;;  %700 = vmatprep.mubr.bf16.mxu1 %v1408_v41 }
  0x57   : > { %637 = vmatmul.mubr.bf16.gmra.mrb[24].mxu0 %v1410_v42  ;;  %701 = vmatmul.mubr.bf16.gmra.mrb[24].mxu1 %v1411_v43 }
  0x58   : > { %644 = vmatprep.mubr.bf16.mxu0 %v1412_v44  ;;  %708 = vmatprep.mubr.bf16.mxu1 %v1414_v45 }
  0x5f   : > { %645 = vmatmul.mubr.bf16.gmra.mrb[28].mxu0 %v1416_v46  ;;  %709 = vmatmul.mubr.bf16.gmra.mrb[28].mxu1 %v1417_v47 }
  0xfa   : > { %v1218_v48 = vpop.f32.mrb[0].mxu0  ;;  %v1266_v49 = vpop.f32.mrb[0].mxu1 }
  0xfb   : > { %v1219_v50 = vpop.f32.mrb[1].mxu0  ;;  %v1267_v51 = vpop.f32.mrb[1].mxu1 }
  0xfc   : > { %v1220_v52 = vadd.f32 %v1219_v50, %v1218_v48  ;;  %v1268_v53 = vadd.f32 %v1267_v51, %v1266_v49  ;;  %v1221_v54 = vpop.f32.mrb[2].mxu0  ;;  %v1269_v55 = vpop.f32.mrb[2].mxu1 }
  0xfd   : > { %v1222_v57 = vpop.f32.mrb[3].mxu0  ;;  %v1270_v58 = vpop.f32.mrb[3].mxu1 }
  0xfe   : > { %v1223_v59 = vadd.f32 %v1222_v57, %v1221_v54  ;;  %v1271_v60 = vadd.f32 %v1270_v58, %v1269_v55  ;;  %v591_v61 = vadd.f32 %v1220_v52, %v1571_v56  ;;  %v655_v62 = vadd.f32 %v1268_v53, %v1571_v56 }
 0x100   : > { %v594_v63 = vadd.f32 %v1223_v59, %v1571_v56  ;;  %v658_v0 = vadd.f32 %v1271_v60, %v1571_v56 }
 0x102   : > { %v1110_v1 = vpack.c.bf16 %v594_v63, %v591_v61  ;;  %v1150_v2 = vpack.c.bf16 %v658_v0, %v655_v62  ;;  %v1224_v3 = vpop.f32.mrb[4].mxu0  ;;  %v1272_v4 = vpop.f32.mrb[4].mxu1 }
 0x103   : > { %v1225_v5 = vpop.f32.mrb[5].mxu0  ;;  %v1273_v6 = vpop.f32.mrb[5].mxu1 }
 0x104   : > { %1111 = vst [vmem:[%s1581_s8] sm:$0xff] %v1110_v1   ;;  %1194 = vst [vmem:[%s1581_s8 + $0x40] sm:$0xff] %v1150_v2   ;;  %v1226_v7 = vadd.f32 %v1225_v5, %v1224_v3  ;;  %v1274_v8 = vadd.f32 %v1273_v6, %v1272_v4  ;;  %v1227_v9 = vpop.f32.mrb[6].mxu0  ;;  %v1275_v10 = vpop.f32.mrb[6].mxu1 }
 0x105   : > { %v1228_v11 = vpop.f32.mrb[7].mxu0  ;;  %v1276_v12 = vpop.f32.mrb[7].mxu1 }
 0x106   : > { %v1229_v13 = vadd.f32 %v1228_v11, %v1227_v9  ;;  %v1277_v14 = vadd.f32 %v1276_v12, %v1275_v10  ;;  %v599_v15 = vadd.f32 %v1226_v7, %v1571_v56  ;;  %v663_v16 = vadd.f32 %v1274_v8, %v1571_v56 }
 0x108   : > { %v602_v17 = vadd.f32 %v1229_v13, %v1571_v56  ;;  %v666_v18 = vadd.f32 %v1277_v14, %v1571_v56 }
 0x10a   : > { %v1115_v19 = vpack.c.bf16 %v602_v17, %v599_v15  ;;  %v1155_v20 = vpack.c.bf16 %v666_v18, %v663_v16  ;;  %v1230_v21 = vpop.f32.mrb[8].mxu0  ;;  %v1278_v22 = vpop.f32.mrb[8].mxu1 }
 0x10b   : > { %v1231_v23 = vpop.f32.mrb[9].mxu0  ;;  %v1279_v24 = vpop.f32.mrb[9].mxu1 }
 0x10c   : > { %1187 = vst [vmem:[%s1581_s8 + $0x8] sm:$0xff] %v1115_v19   ;;  %1195 = vst [vmem:[%s1581_s8 + $0x48] sm:$0xff] %v1155_v20   ;;  %v1232_v25 = vadd.f32 %v1231_v23, %v1230_v21  ;;  %v1280_v26 = vadd.f32 %v1279_v24, %v1278_v22  ;;  %v1233_v27 = vpop.f32.mrb[10].mxu0  ;;  %v1281_v28 = vpop.f32.mrb[10].mxu1 }
 0x10d   : > { %v1234_v29 = vpop.f32.mrb[11].mxu0  ;;  %v1282_v30 = vpop.f32.mrb[11].mxu1 }
 0x10e   : > { %v1235_v31 = vadd.f32 %v1234_v29, %v1233_v27  ;;  %v1283_v32 = vadd.f32 %v1282_v30, %v1281_v28  ;;  %v607_v33 = vadd.f32 %v1232_v25, %v1571_v56  ;;  %v671_v34 = vadd.f32 %v1280_v26, %v1571_v56 }
 0x110   : > { %v610_v35 = vadd.f32 %v1235_v31, %v1571_v56  ;;  %v674_v36 = vadd.f32 %v1283_v32, %v1571_v56 }
 0x112   : > { %v1120_v37 = vpack.c.bf16 %v610_v35, %v607_v33  ;;  %v1160_v38 = vpack.c.bf16 %v674_v36, %v671_v34  ;;  %v1236_v39 = vpop.f32.mrb[12].mxu0  ;;  %v1284_v40 = vpop.f32.mrb[12].mxu1 }
 0x113   : > { %v1237_v41 = vpop.f32.mrb[13].mxu0  ;;  %v1285_v42 = vpop.f32.mrb[13].mxu1 }
 0x114   : > { %1188 = vst [vmem:[%s1581_s8 + $0x10] sm:$0xff] %v1120_v37   ;;  %1196 = vst [vmem:[%s1581_s8 + $0x50] sm:$0xff] %v1160_v38   ;;  %v1238_v43 = vadd.f32 %v1237_v41, %v1236_v39  ;;  %v1286_v44 = vadd.f32 %v1285_v42, %v1284_v40  ;;  %v1239_v45 = vpop.f32.mrb[14].mxu0  ;;  %v1287_v46 = vpop.f32.mrb[14].mxu1 }
 0x115   : > { %v1240_v47 = vpop.f32.mrb[15].mxu0  ;;  %v1288_v48 = vpop.f32.mrb[15].mxu1 }
 0x116   : > { %v1241_v49 = vadd.f32 %v1240_v47, %v1239_v45  ;;  %v1289_v50 = vadd.f32 %v1288_v48, %v1287_v46  ;;  %v615_v51 = vadd.f32 %v1238_v43, %v1571_v56  ;;  %v679_v52 = vadd.f32 %v1286_v44, %v1571_v56 }
 0x118   : > { %v618_v53 = vadd.f32 %v1241_v49, %v1571_v56  ;;  %v682_v54 = vadd.f32 %v1289_v50, %v1571_v56 }
 0x11a   : > { %v1125_v55 = vpack.c.bf16 %v618_v53, %v615_v51  ;;  %v1165_v57 = vpack.c.bf16 %v682_v54, %v679_v52  ;;  %v1242_v58 = vpop.f32.mrb[16].mxu0  ;;  %v1290_v59 = vpop.f32.mrb[16].mxu1 }
 0x11b   : > { %v1243_v60 = vpop.f32.mrb[17].mxu0  ;;  %v1291_v61 = vpop.f32.mrb[17].mxu1 }
 0x11c   : > { %1189 = vst [vmem:[%s1581_s8 + $0x18] sm:$0xff] %v1125_v55   ;;  %1197 = vst [vmem:[%s1581_s8 + $0x58] sm:$0xff] %v1165_v57   ;;  %v1244_v62 = vadd.f32 %v1243_v60, %v1242_v58  ;;  %v1292_v63 = vadd.f32 %v1291_v61, %v1290_v59  ;;  %v1245_v0 = vpop.f32.mrb[18].mxu0  ;;  %v1293_v1 = vpop.f32.mrb[18].mxu1 }
 0x11d   : > { %v1246_v2 = vpop.f32.mrb[19].mxu0  ;;  %v1294_v3 = vpop.f32.mrb[19].mxu1 }
 0x11e   : > { %v1247_v4 = vadd.f32 %v1246_v2, %v1245_v0  ;;  %v1295_v5 = vadd.f32 %v1294_v3, %v1293_v1  ;;  %v623_v6 = vadd.f32 %v1244_v62, %v1571_v56  ;;  %v687_v7 = vadd.f32 %v1292_v63, %v1571_v56 }
 0x120   : > { %v626_v8 = vadd.f32 %v1247_v4, %v1571_v56  ;;  %v690_v9 = vadd.f32 %v1295_v5, %v1571_v56 }
 0x122   : > { %v1130_v10 = vpack.c.bf16 %v626_v8, %v623_v6  ;;  %v1170_v11 = vpack.c.bf16 %v690_v9, %v687_v7  ;;  %v1248_v12 = vpop.f32.mrb[20].mxu0  ;;  %v1296_v13 = vpop.f32.mrb[20].mxu1 }
 0x123   : > { %v1249_v14 = vpop.f32.mrb[21].mxu0  ;;  %v1297_v15 = vpop.f32.mrb[21].mxu1 }
 0x124   : > { %1190 = vst [vmem:[%s1581_s8 + $0x20] sm:$0xff] %v1130_v10   ;;  %1198 = vst [vmem:[%s1581_s8 + $0x60] sm:$0xff] %v1170_v11   ;;  %v1250_v16 = vadd.f32 %v1249_v14, %v1248_v12  ;;  %v1298_v17 = vadd.f32 %v1297_v15, %v1296_v13  ;;  %v1251_v18 = vpop.f32.mrb[22].mxu0  ;;  %v1299_v19 = vpop.f32.mrb[22].mxu1 }
 0x125   : > { %v1252_v20 = vpop.f32.mrb[23].mxu0  ;;  %v1300_v21 = vpop.f32.mrb[23].mxu1 }
 0x126   : > { %v1253_v22 = vadd.f32 %v1252_v20, %v1251_v18  ;;  %v1301_v23 = vadd.f32 %v1300_v21, %v1299_v19  ;;  %v631_v24 = vadd.f32 %v1250_v16, %v1571_v56  ;;  %v695_v25 = vadd.f32 %v1298_v17, %v1571_v56 }
 0x128   : > { %v634_v26 = vadd.f32 %v1253_v22, %v1571_v56  ;;  %v698_v27 = vadd.f32 %v1301_v23, %v1571_v56 }
 0x12a   : > { %v1135_v28 = vpack.c.bf16 %v634_v26, %v631_v24  ;;  %v1175_v29 = vpack.c.bf16 %v698_v27, %v695_v25  ;;  %v1254_v30 = vpop.f32.mrb[24].mxu0  ;;  %v1302_v31 = vpop.f32.mrb[24].mxu1 }
 0x12b   : > { %v1255_v32 = vpop.f32.mrb[25].mxu0  ;;  %v1303_v33 = vpop.f32.mrb[25].mxu1 }
 0x12c   : > { %1191 = vst [vmem:[%s1581_s8 + $0x28] sm:$0xff] %v1135_v28   ;;  %1199 = vst [vmem:[%s1581_s8 + $0x68] sm:$0xff] %v1175_v29   ;;  %v1256_v34 = vadd.f32 %v1255_v32, %v1254_v30  ;;  %v1304_v35 = vadd.f32 %v1303_v33, %v1302_v31  ;;  %v1257_v36 = vpop.f32.mrb[26].mxu0  ;;  %v1305_v37 = vpop.f32.mrb[26].mxu1 }
 0x12d   : > { %v1258_v38 = vpop.f32.mrb[27].mxu0  ;;  %v1306_v39 = vpop.f32.mrb[27].mxu1 }
 0x12e   : > { %v1259_v40 = vadd.f32 %v1258_v38, %v1257_v36  ;;  %v1307_v41 = vadd.f32 %v1306_v39, %v1305_v37  ;;  %v639_v42 = vadd.f32 %v1256_v34, %v1571_v56  ;;  %v703_v43 = vadd.f32 %v1304_v35, %v1571_v56 }
 0x130   : > { %v642_v44 = vadd.f32 %v1259_v40, %v1571_v56  ;;  %v706_v45 = vadd.f32 %v1307_v41, %v1571_v56 }
 0x132   : > { %v1140_v46 = vpack.c.bf16 %v642_v44, %v639_v42  ;;  %v1180_v47 = vpack.c.bf16 %v706_v45, %v703_v43  ;;  %v1260_v48 = vpop.f32.mrb[28].mxu0  ;;  %v1308_v49 = vpop.f32.mrb[28].mxu1 }
 0x133   : > { %v1261_v50 = vpop.f32.mrb[29].mxu0  ;;  %v1309_v51 = vpop.f32.mrb[29].mxu1 }
 0x134   : > { %1192 = vst [vmem:[%s1581_s8 + $0x30] sm:$0xff] %v1140_v46   ;;  %1200 = vst [vmem:[%s1581_s8 + $0x70] sm:$0xff] %v1180_v47   ;;  %v1262_v52 = vadd.f32 %v1261_v50, %v1260_v48  ;;  %v1310_v53 = vadd.f32 %v1309_v51, %v1308_v49  ;;  %v1263_v54 = vpop.f32.mrb[30].mxu0  ;;  %v1311_v55 = vpop.f32.mrb[30].mxu1 }
 0x135   : > { %v1264_v57 = vpop.f32.mrb[31].mxu0  ;;  %v1312_v58 = vpop.f32.mrb[31].mxu1 }
 0x136   : > { %v1265_v59 = vadd.f32 %v1264_v57, %v1263_v54  ;;  %v1313_v60 = vadd.f32 %v1312_v58, %v1311_v55  ;;  %v647_v61 = vadd.f32 %v1262_v52, %v1571_v56  ;;  %v711_v62 = vadd.f32 %v1310_v53, %v1571_v56 }
 0x138   : > { %v650_v63 = vadd.f32 %v1265_v59, %v1571_v56  ;;  %v714_v0 = vadd.f32 %v1313_v60, %v1571_v56 }
 0x13a   : > { %v1145_v1 = vpack.c.bf16 %v650_v63, %v647_v61  ;;  %v1185_v2 = vpack.c.bf16 %v714_v0, %v711_v62 }
 0x13c   : > { %1193 = vst [vmem:[%s1581_s8 + $0x38] sm:$0xff] %v1145_v1   ;;  %1201 = vst [vmem:[%s1581_s8 + $0x78] sm:$0xff] %v1185_v2  }
 0x13d PF: > { %s13_s14 = sadd.s32 1, %s1440_s14   ;;  %s1640_s12 = smov %s1436_s13 }
 0x13e   : > { %p10_p5 = scmp.ge.s32.totalorder %s13_s14, 4   ;;  %s1641_s13 = smov %s1643_s15 }
 0x140   :  { %12 = sbr.rel (!%p10_p5) target bundleno = 2 (0x2), region = 68 }

// kernel: resnet_feature_extractor.44
= control target key start
LH: loop header
LB: loop body
LE: loop exit
PB: predicated region body
PF: predicated region fallthrough
CT: control target
= control target key end

     0   :  { %s618_s1 = inlined_call_operand.vmem [shape: bf16[128,128], index: 1, kind: input, shape index: {}]   ;;  %s619_s0 = inlined_call_operand.vmem [shape: bf16[128,128], index: 0, kind: input, shape index: {}]   ;;  %s620_s2 = inlined_call_operand.vmem [shape: f32[1,128], index: 2, kind: input, shape index: {}]   ;;  %s621_s3 = inlined_call_operand.vmem [shape: bf16[128,128], index: 3, kind: output, shape index: {}]  }
   0x1   :  { %v507_v0 = vld [vmem:[%s618_s1] sm:$0xff]   ;;  %v508_v1 = vld [vmem:[%s618_s1 + $0x8] sm:$0xff]   ;;  %v509_v2 = vld [vmem:[%s618_s1 + $0x10] sm:$0xff]  }
   0x2   :  { %459 = vmatprep.subr.bf16.mxu0 %v507_v0  ;;  %491 = vmatprep.subr.bf16.mxu1 %v507_v0  ;;  %v510_v3 = vld [vmem:[%s618_s1 + $0x18] sm:$0xff]   ;;  %v515_v4 = vld [vmem:[%s619_s0] sm:$0xff]   ;;  %v512_v7 = vld [vmem:[%s618_s1 + $0x28] sm:$0xff]  }
   0x3   :  { %460 = vmatpush3.bf16.msra.mxu0 %v507_v0  ;;  %499 = vmatpush3.bf16.msra.mxu1 %v507_v0  ;;  %v516_v5 = vld [vmem:[%s619_s0 + $0x20] sm:$0xff]   ;;  %v513_v8 = vld [vmem:[%s618_s1 + $0x30] sm:$0xff]   ;;  %v514_v9 = vld [vmem:[%s618_s1 + $0x38] sm:$0xff]  }
   0x4   :  { %461 = vmatprep.subr.bf16.mxu0 %v508_v1  ;;  %492 = vmatprep.subr.bf16.mxu1 %v508_v1  ;;  %v511_v6 = vld [vmem:[%s618_s1 + $0x20] sm:$0xff]   ;;  %v517_v10 = vld [vmem:[%s619_s0 + $0x8] sm:$0xff]   ;;  %v519_v12 = vld [vmem:[%s619_s0 + $0x10] sm:$0xff]  }
   0x5   :  { %475 = vmatprep.mubr.bf16.mxu0 %v515_v4  ;;  %483 = vmatprep.mubr.bf16.mxu1 %v516_v5  ;;  %v518_v11 = vld [vmem:[%s619_s0 + $0x28] sm:$0xff]   ;;  %v520_v13 = vld [vmem:[%s619_s0 + $0x30] sm:$0xff]   ;;  %v521_v14 = vld [vmem:[%s619_s0 + $0x18] sm:$0xff]  }
   0x6   :  { %v522_v15 = vld [vmem:[%s619_s0 + $0x38] sm:$0xff]   ;;  %v347_v16 = vld [vmem:[%s620_s2] ss:$0 sm:$0xff] }
   0x7   :  { %462 = vmatpush3.bf16.msra.mxu0 %v508_v1  ;;  %500 = vmatpush3.bf16.msra.mxu1 %v508_v1 }
   0x8   :  { %463 = vmatprep.subr.bf16.mxu0 %v509_v2  ;;  %493 = vmatprep.subr.bf16.mxu1 %v509_v2 }
   0xb   :  { %464 = vmatpush3.bf16.msra.mxu0 %v509_v2  ;;  %501 = vmatpush3.bf16.msra.mxu1 %v509_v2 }
   0xc   :  { %465 = vmatprep.subr.bf16.mxu0 %v510_v3  ;;  %494 = vmatprep.subr.bf16.mxu1 %v510_v3 }
   0xf   :  { %466 = vmatpush3.bf16.msra.mxu0 %v510_v3  ;;  %502 = vmatpush3.bf16.msra.mxu1 %v510_v3 }
  0x10   :  { %467 = vmatprep.subr.bf16.mxu0 %v511_v6  ;;  %495 = vmatprep.subr.bf16.mxu1 %v511_v6 }
  0x13   :  { %468 = vmatpush3.bf16.msra.mxu0 %v511_v6  ;;  %503 = vmatpush3.bf16.msra.mxu1 %v511_v6 }
  0x14   :  { %469 = vmatprep.subr.bf16.mxu0 %v512_v7  ;;  %496 = vmatprep.subr.bf16.mxu1 %v512_v7 }
  0x17   :  { %470 = vmatpush3.bf16.msra.mxu0 %v512_v7  ;;  %504 = vmatpush3.bf16.msra.mxu1 %v512_v7 }
  0x18   :  { %471 = vmatprep.subr.bf16.mxu0 %v513_v8  ;;  %497 = vmatprep.subr.bf16.mxu1 %v513_v8 }
  0x1b   :  { %472 = vmatpush3.bf16.msra.mxu0 %v513_v8  ;;  %505 = vmatpush3.bf16.msra.mxu1 %v513_v8 }
  0x1c   :  { %473 = vmatprep.subr.bf16.mxu0 %v514_v9  ;;  %498 = vmatprep.subr.bf16.mxu1 %v514_v9 }
  0x1f   :  { %474 = vmatpush3.bf16.msra.mxu0 %v514_v9  ;;  %506 = vmatpush3.bf16.msra.mxu1 %v514_v9 }
  0x22   :  { %476 = vmatmul.mubr.bf16.vlgmr.msra.gmra.mrb[0].mxu0 %v517_v10  ;;  %484 = vmatmul.mubr.bf16.vlgmr.msra.gmra.mrb[0].mxu1 %v518_v11 }
  0x23   :  { %479 = vmatprep.mubr.bf16.mxu0 %v519_v12  ;;  %487 = vmatprep.mubr.bf16.mxu1 %v520_v13 }
  0x2a   :  { %480 = vmatmul.mubr.bf16.gmra.mrb[4].mxu0 %v521_v14  ;;  %488 = vmatmul.mubr.bf16.gmra.mrb[4].mxu1 %v522_v15 }
  0xf5   :  { %v477_v17 = vpop.f32.mrb[0].mxu0  ;;  %v485_v18 = vpop.f32.mrb[0].mxu1 }
  0xf6   :  { %v193_v19 = vadd.f32 %v477_v17, %v347_v16  ;;  %v225_v20 = vadd.f32 %v485_v18, %v347_v16  ;;  %v184_v21 = vpop.f32.mrb[1].mxu0  ;;  %v216_v22 = vpop.f32.mrb[1].mxu1 }
  0xf7   :  { %v185_v23 = vadd.f32 %v347_v16, %v184_v21  ;;  %v217_v24 = vadd.f32 %v347_v16, %v216_v22  ;;  %v478_v25 = vpop.f32.mrb[2].mxu0  ;;  %v486_v26 = vpop.f32.mrb[2].mxu1 }
  0xf8   :  { %v196_v27 = vadd.f32 %v478_v25, %v347_v16  ;;  %v228_v28 = vadd.f32 %v486_v26, %v347_v16  ;;  %v187_v29 = vpop.f32.mrb[3].mxu0  ;;  %v219_v30 = vpop.f32.mrb[3].mxu1  ;;  %v249_v33 = vmax.f32 %v193_v19, 0.0  ;;  %v257_v34 = vmax.f32 %v225_v20, 0.0 }
  0xf9   :  { %v188_v31 = vadd.f32 %v347_v16, %v187_v29  ;;  %v220_v32 = vadd.f32 %v347_v16, %v219_v30  ;;  %v247_v37 = vmax.f32 %v185_v23, 0.0  ;;  %v255_v38 = vmax.f32 %v217_v24, 0.0 }
  0xfa   :  { %v250_v35 = vmax.f32 %v196_v27, 0.0  ;;  %v258_v36 = vmax.f32 %v228_v28, 0.0 }
  0xfb   :  { %v248_v39 = vmax.f32 %v188_v31, 0.0  ;;  %v256_v40 = vmax.f32 %v220_v32, 0.0 }
  0xfc   :  { %v404_v41 = vpack.c.bf16 %v250_v35, %v249_v33  ;;  %v424_v42 = vpack.c.bf16 %v258_v36, %v257_v34 }
  0xfd   :  { %v399_v43 = vpack.c.bf16 %v248_v39, %v247_v37  ;;  %v419_v44 = vpack.c.bf16 %v256_v40, %v255_v38  ;;  %v481_v45 = vpop.f32.mrb[4].mxu0  ;;  %v489_v46 = vpop.f32.mrb[4].mxu1 }
  0xfe   :  { %436 = vst [vmem:[%s621_s3 + $0x8] sm:$0xff] %v404_v41   ;;  %440 = vst [vmem:[%s621_s3 + $0x28] sm:$0xff] %v424_v42   ;;  %v209_v47 = vadd.f32 %v481_v45, %v347_v16  ;;  %v241_v48 = vadd.f32 %v489_v46, %v347_v16  ;;  %v200_v49 = vpop.f32.mrb[5].mxu0  ;;  %v232_v50 = vpop.f32.mrb[5].mxu1 }
  0xff   :  { %400 = vst [vmem:[%s621_s3] sm:$0xff] %v399_v43   ;;  %439 = vst [vmem:[%s621_s3 + $0x20] sm:$0xff] %v419_v44   ;;  %v201_v51 = vadd.f32 %v347_v16, %v200_v49  ;;  %v233_v52 = vadd.f32 %v347_v16, %v232_v50  ;;  %v482_v53 = vpop.f32.mrb[6].mxu0  ;;  %v490_v54 = vpop.f32.mrb[6].mxu1 }
 0x100   :  { %v212_v55 = vadd.f32 %v482_v53, %v347_v16  ;;  %v244_v56 = vadd.f32 %v490_v54, %v347_v16  ;;  %v203_v57 = vpop.f32.mrb[7].mxu0  ;;  %v235_v58 = vpop.f32.mrb[7].mxu1  ;;  %v253_v61 = vmax.f32 %v209_v47, 0.0  ;;  %v261_v62 = vmax.f32 %v241_v48, 0.0 }
 0x101   :  { %v204_v59 = vadd.f32 %v347_v16, %v203_v57  ;;  %v236_v60 = vadd.f32 %v347_v16, %v235_v58  ;;  %v251_v1 = vmax.f32 %v201_v51, 0.0  ;;  %v259_v2 = vmax.f32 %v233_v52, 0.0 }
 0x102   :  { %v254_v63 = vmax.f32 %v212_v55, 0.0  ;;  %v262_v0 = vmax.f32 %v244_v56, 0.0 }
 0x103   :  { %v252_v3 = vmax.f32 %v204_v59, 0.0  ;;  %v260_v4 = vmax.f32 %v236_v60, 0.0 }
 0x104   :  { %v414_v5 = vpack.c.bf16 %v254_v63, %v253_v61  ;;  %v434_v6 = vpack.c.bf16 %v262_v0, %v261_v62 }
 0x105   :  { %v409_v7 = vpack.c.bf16 %v252_v3, %v251_v1  ;;  %v429_v8 = vpack.c.bf16 %v260_v4, %v259_v2 }
 0x106   :  { %438 = vst [vmem:[%s621_s3 + $0x18] sm:$0xff] %v414_v5   ;;  %442 = vst [vmem:[%s621_s3 + $0x38] sm:$0xff] %v434_v6  }
 0x107   :  { %437 = vst [vmem:[%s621_s3 + $0x10] sm:$0xff] %v409_v7   ;;  %441 = vst [vmem:[%s621_s3 + $0x30] sm:$0xff] %v429_v8  }

// kernel: resnet_feature_extractor.46
= control target key start
LH: loop header
LB: loop body
LE: loop exit
PB: predicated region body
PF: predicated region fallthrough
CT: control target
= control target key end

     0   :  { %s1122_s12 = smov 0   ;;  %s1124_s13 = smov 0   ;;  %s1281_s0 = inlined_call_operand.vmem [shape: bf16[128,128], index: 0, kind: input, shape index: {}]   ;;  %s1282_s1 = inlined_call_operand.vmem [shape: bf16[128,256], index: 1, kind: input, shape index: {}]   ;;  %s1283_s2 = inlined_call_operand.vmem [shape: f32[1,256], index: 2, kind: input, shape index: {}]   ;;  %s1284_s3 = inlined_call_operand.vmem [shape: bf16[128,256], index: 3, kind: output, shape index: {}]  }
   0x1   :  { %s1126_s14 = smov 0   ;;  %s1128_s15 = smov 0  }
   0x2   :  { %s1130_s16 = smov 0  }
   0x3 LB: > { %s22_s17 = sadd.s32 1, %s1096_s15  ;;  %s832_s18 = sadd.s32 4294967295, %s1100_s16   ;;  %s1100_s16 = sphi %s1130_s16, %s13_s16   ;;  %s1096_s15 = sphi %s1128_s15, %s1289_s15   ;;  %s1092_s14 = sphi %s1126_s14, %s1288_s14   ;;  %s1088_s13 = sphi %s1124_s13, %s1287_s13   ;;  %s1084_s12 = sphi %s1122_s12, %s1286_s12  }
   0x4   : > { %p23_p0 = scmp.ge.s32.totalorder %s22_s17, 2  ;;  %p65_p1 = scmp.ne.s32.totalorder %s1088_s13, %s1084_s12 }
   0x5   : > { %p66_p2 = scmp.eq.s32.totalorder %s1100_s16, 0  ;;  %p123_p4 = scmp.eq.s32.totalorder %s832_s18, 1 }
   0x6   : > { %s1291_s17 = smov (%p23_p0, %s22_s17), 0  ;;  %s58_s20 = sadd.s32 1, %s1088_s13 }
   0x7   : > { %p67_p3 = por %p66_p2, %p65_p1  ;;  %s55_s19 = ssub.s32 %s1096_s15, %s1291_s17 }
   0x8   : > { %p56_p5 = scmp.eq.s32.totalorder %s55_s19, 0  ;;  %p1157_p6 = por %p123_p4, %p65_p1 }
   0x9   : > { %p836_p7 = scmp.ge.s32.totalorder %s1100_s16, 2 }
   0xa   : > { %s1162_s22 = scalar_select %p56_p5, %s1088_s13, %s58_s20  }
   0xb   : > { %154 = sbr.rel (%p836_p7) target bundleno = 32 (0x20), region = 20 }
  0x12   : > { %157 = sbr.rel (!%p67_p3) target bundleno = 32 (0x20), region = 24  ;;  %s159_s23 = sand.u32 (%p67_p3), 1, %s1088_s13  }
  0x13   : > { %s838_s24 = sshll.u32 (%p67_p3), %s1096_s15, 2  ;;  %s837_s25 = sshll.u32 (%p67_p3), %s159_s23, 6 }
  0x14   : > { %s1170_s28 = scalar_lea.vmem (%p67_p3), %s1282_s1, %s838_s24  ;;  %s161_s29 = scalar_lea.vmem (%p67_p3), [#allocation2], %s837_s25 }
  0x15   : > { %v179_v0 = vld [vmem:[%s1170_s28] sm:$0xf] (%p67_p3)  ;;  %v181_v1 = vld [vmem:[%s1170_s28 + $0x8] sm:$0xf] (%p67_p3)  ;;  %v183_v2 = vld [vmem:[%s1170_s28 + $0x10] sm:$0xf] (%p67_p3) }
  0x16   : > { %180 = vst [vmem:[%s161_s29] sm:$0xf] (%p67_p3), %v179_v0  ;;  %182 = vst [vmem:[%s161_s29 + $0x4] sm:$0xf] (%p67_p3), %v181_v1  ;;  %v185_v3 = vld [vmem:[%s1170_s28 + $0x18] sm:$0xf] (%p67_p3) }
  0x17   : > { %v187_v4 = vld [vmem:[%s1170_s28 + $0x20] sm:$0xf] (%p67_p3)  ;;  %184 = vst [vmem:[%s161_s29 + $0x8] sm:$0xf] (%p67_p3), %v183_v2  ;;  %186 = vst [vmem:[%s161_s29 + $0xc] sm:$0xf] (%p67_p3), %v185_v3 }
  0x18   : > { %188 = vst [vmem:[%s161_s29 + $0x10] sm:$0xf] (%p67_p3), %v187_v4  ;;  %v189_v5 = vld [vmem:[%s1170_s28 + $0x28] sm:$0xf] (%p67_p3)  ;;  %v191_v6 = vld [vmem:[%s1170_s28 + $0x30] sm:$0xf] (%p67_p3) }
  0x19   : > { %v193_v7 = vld [vmem:[%s1170_s28 + $0x38] sm:$0xf]  ;;  %190 = vst [vmem:[%s161_s29 + $0x14] sm:$0xf] %v189_v5  ;;  %192 = vst [vmem:[%s161_s29 + $0x18] sm:$0xf] %v191_v6 }
  0x1a   : > { %194 = vst [vmem:[%s161_s29 + $0x1c] sm:$0xf] %v193_v7  ;;  %v195_v8 = vld [vmem:[%s1170_s28 + $0x40] sm:$0xf]  ;;  %v197_v9 = vld [vmem:[%s1170_s28 + $0x48] sm:$0xf] }
  0x1b   : > { %v199_v10 = vld [vmem:[%s1170_s28 + $0x50] sm:$0xf]  ;;  %196 = vst [vmem:[%s161_s29 + $0x20] sm:$0xf] %v195_v8  ;;  %198 = vst [vmem:[%s161_s29 + $0x24] sm:$0xf] %v197_v9 }
  0x1c   : > { %200 = vst [vmem:[%s161_s29 + $0x28] sm:$0xf] %v199_v10  ;;  %v201_v11 = vld [vmem:[%s1170_s28 + $0x58] sm:$0xf]  ;;  %v203_v12 = vld [vmem:[%s1170_s28 + $0x60] sm:$0xf] }
  0x1d   : > { %v205_v13 = vld [vmem:[%s1170_s28 + $0x68] sm:$0xf]  ;;  %202 = vst [vmem:[%s161_s29 + $0x2c] sm:$0xf] %v201_v11  ;;  %204 = vst [vmem:[%s161_s29 + $0x30] sm:$0xf] %v203_v12 }
  0x1e   : > { %206 = vst [vmem:[%s161_s29 + $0x34] sm:$0xf] %v205_v13  ;;  %v207_v14 = vld [vmem:[%s1170_s28 + $0x70] sm:$0xf]  ;;  %v209_v15 = vld [vmem:[%s1170_s28 + $0x78] sm:$0xf] }
  0x1f   : > { %208 = vst [vmem:[%s161_s29 + $0x38] sm:$0xf] %v207_v14  ;;  %210 = vst [vmem:[%s161_s29 + $0x3c] sm:$0xf] %v209_v15 }
  0x20 PF: > { %p839_p8 = scmp.ge.s32.totalorder %s1100_s16, 1  ;;  %p270_p9 = scmp.lt.s32.totalorder %s1100_s16, 3 }
  0x22   : > { %p271_p10 = pnand %p839_p8, %p270_p9 }
  0x23   : > { %s277_s30 = sand.u32 (!%p271_p10), 1, %s1084_s12   ;;  %v1054_v16 = vld [vmem:[%s1281_s0] sm:$0xff] (!%p271_p10)   ;;  %v1056_v26 = vld [vmem:[%s1281_s0 + $0x8] sm:$0xff] (!%p271_p10)   ;;  %v1058_v28 = vld [vmem:[%s1281_s0 + $0x10] sm:$0xff] (!%p271_p10)   ;;  %p313_p11 = scmp.lt.s32.totalorder (!%p271_p10), %s1092_s14, 1 }
  0x24   : > { %274 = sbr.rel (%p271_p10) target bundleno = 310 (0x136), region = 69  ;;  %s1194_s6 = sshll.u32 (!%p271_p10), %s277_s30, 6  ;;  %v1055_v17 = vld [vmem:[%s1281_s0 + $0x20] sm:$0xff] (!%p271_p10)   ;;  %974 = vmatprep.mubr.bf16.mxu0 (!%p271_p10), %v1054_v16  ;;  %v1057_v27 = vld [vmem:[%s1281_s0 + $0x28] sm:$0xff] (!%p271_p10)   ;;  %v1059_v29 = vld [vmem:[%s1281_s0 + $0x30] sm:$0xff] (!%p271_p10)  }
  0x25   : > { %s1200_s9 = scalar_lea.vmem (!%p271_p10), [#allocation2], %s1194_s6  ;;  %982 = vmatprep.mubr.bf16.mxu1 (!%p271_p10), %v1055_v17  ;;  %v1060_v30 = vld [vmem:[%s1281_s0 + $0x18] sm:$0xff] (!%p271_p10)   ;;  %s1234_s7 = scalar_lea.vmem (!%p271_p10), [#allocation3], %s1194_s6 }
  0x26   : > { %v1046_v18 = vld [vmem:[%s1200_s9] sm:$0xff] (!%p271_p10)   ;;  %v1047_v19 = vld [vmem:[%s1200_s9 + $0x8] sm:$0xff] (!%p271_p10)   ;;  %v1048_v20 = vld [vmem:[%s1200_s9 + $0x10] sm:$0xff] (!%p271_p10)  }
  0x27   : > { %958 = vmatprep.subr.bf16.mxu0 (!%p271_p10), %v1046_v18  ;;  %990 = vmatprep.subr.bf16.mxu1 (!%p271_p10), %v1046_v18  ;;  %v1049_v21 = vld [vmem:[%s1200_s9 + $0x18] sm:$0xff] (!%p271_p10)   ;;  %v1050_v22 = vld [vmem:[%s1200_s9 + $0x20] sm:$0xff] (!%p271_p10)   ;;  %v1051_v23 = vld [vmem:[%s1200_s9 + $0x28] sm:$0xff] (!%p271_p10)  }
  0x28   : > { %959 = vmatpush3.bf16.msra.mxu0 (!%p271_p10), %v1046_v18  ;;  %998 = vmatpush3.bf16.msra.mxu1 (!%p271_p10), %v1046_v18  ;;  %v1052_v24 = vld [vmem:[%s1200_s9 + $0x30] sm:$0xff] (!%p271_p10)   ;;  %v1053_v25 = vld [vmem:[%s1200_s9 + $0x38] sm:$0xff] (!%p271_p10)  }
  0x29   : > { %960 = vmatprep.subr.bf16.mxu0 (!%p271_p10), %v1047_v19  ;;  %991 = vmatprep.subr.bf16.mxu1 (!%p271_p10), %v1047_v19  ;;  %v1061_v31 = vld [vmem:[%s1281_s0 + $0x38] sm:$0xff] (!%p271_p10)  }
  0x2b   : > { %s314_s29 = scalar_select %p313_p11, %s1092_s14, 1 }
  0x2c   : > { %961 = vmatpush3.bf16.msra.mxu0 %v1047_v19  ;;  %999 = vmatpush3.bf16.msra.mxu1 %v1047_v19  ;;  %s876_s6 = sshll.u32 (%p1157_p6), %s1092_s14, 2 }
  0x2d   : > { %962 = vmatprep.subr.bf16.mxu0 %v1048_v20  ;;  %992 = vmatprep.subr.bf16.mxu1 %v1048_v20  ;;  %s315_s5 = scalar_lea.vmem %s1283_s2, %s314_s29  ;;  %s641_s10 = scalar_lea.vmem (%p1157_p6), %s1284_s3, %s876_s6 }
  0x2e   : > { %v842_v33 = vld [vmem:[%s315_s5] ss:$0 sm:$0xff] }
  0x30   : > { %963 = vmatpush3.bf16.msra.mxu0 %v1048_v20  ;;  %1000 = vmatpush3.bf16.msra.mxu1 %v1048_v20 }
  0x31   : > { %964 = vmatprep.subr.bf16.mxu0 %v1049_v21  ;;  %993 = vmatprep.subr.bf16.mxu1 %v1049_v21 }
  0x34   : > { %965 = vmatpush3.bf16.msra.mxu0 %v1049_v21  ;;  %1001 = vmatpush3.bf16.msra.mxu1 %v1049_v21 }
  0x35   : > { %966 = vmatprep.subr.bf16.mxu0 %v1050_v22  ;;  %994 = vmatprep.subr.bf16.mxu1 %v1050_v22 }
  0x38   : > { %967 = vmatpush3.bf16.msra.mxu0 %v1050_v22  ;;  %1002 = vmatpush3.bf16.msra.mxu1 %v1050_v22 }
  0x39   : > { %968 = vmatprep.subr.bf16.mxu0 %v1051_v23  ;;  %995 = vmatprep.subr.bf16.mxu1 %v1051_v23 }
  0x3c   : > { %969 = vmatpush3.bf16.msra.mxu0 %v1051_v23  ;;  %1003 = vmatpush3.bf16.msra.mxu1 %v1051_v23 }
  0x3d   : > { %970 = vmatprep.subr.bf16.mxu0 %v1052_v24  ;;  %996 = vmatprep.subr.bf16.mxu1 %v1052_v24 }
  0x40   : > { %971 = vmatpush3.bf16.msra.mxu0 %v1052_v24  ;;  %1004 = vmatpush3.bf16.msra.mxu1 %v1052_v24 }
  0x41   : > { %972 = vmatprep.subr.bf16.mxu0 %v1053_v25  ;;  %997 = vmatprep.subr.bf16.mxu1 %v1053_v25 }
  0x44   : > { %973 = vmatpush3.bf16.msra.mxu0 %v1053_v25  ;;  %1005 = vmatpush3.bf16.msra.mxu1 %v1053_v25 }
  0x47   : > { %975 = vmatmul.mubr.bf16.vlgmr.msra.gmra.mrb[0].mxu0 %v1056_v26  ;;  %983 = vmatmul.mubr.bf16.vlgmr.msra.gmra.mrb[0].mxu1 %v1057_v27 }
  0x48   : > { %978 = vmatprep.mubr.bf16.mxu0 %v1058_v28  ;;  %986 = vmatprep.mubr.bf16.mxu1 %v1059_v29 }
  0x4f   : > { %979 = vmatmul.mubr.bf16.gmra.mrb[4].mxu0 %v1060_v30  ;;  %987 = vmatmul.mubr.bf16.gmra.mrb[4].mxu1 %v1061_v31 }
 0x11a   : > { %v976_v32 = vpop.f32.mrb[0].mxu0  ;;  %v984_v34 = vpop.f32.mrb[0].mxu1 }
 0x11b   : > { %v487_v35 = vpop.f32.mrb[1].mxu0  ;;  %v519_v36 = vpop.f32.mrb[1].mxu1  ;;  %v496_v39 = vadd.f32 %v976_v32, %v842_v33  ;;  %v528_v40 = vadd.f32 %v984_v34, %v842_v33 }
 0x11c   : > { %v977_v37 = vpop.f32.mrb[2].mxu0  ;;  %v985_v38 = vpop.f32.mrb[2].mxu1  ;;  %v488_v45 = vadd.f32 %v842_v33, %v487_v35  ;;  %v520_v46 = vadd.f32 %v842_v33, %v519_v36 }
 0x11d   : > { %v499_v41 = vadd.f32 %v977_v37, %v842_v33  ;;  %v531_v42 = vadd.f32 %v985_v38, %v842_v33  ;;  %v490_v43 = vpop.f32.mrb[3].mxu0  ;;  %v522_v44 = vpop.f32.mrb[3].mxu1 }
 0x11e   : > { %v491_v47 = vadd.f32 %v842_v33, %v490_v43  ;;  %v523_v48 = vadd.f32 %v842_v33, %v522_v44 }
 0x11f   : > { %v903_v49 = vpack.c.bf16 %v499_v41, %v496_v39  ;;  %v923_v50 = vpack.c.bf16 %v531_v42, %v528_v40 }
 0x120   : > { %v898_v51 = vpack.c.bf16 %v491_v47, %v488_v45  ;;  %v918_v52 = vpack.c.bf16 %v523_v48, %v520_v46 }
 0x121   : > { %935 = vst [vmem:[%s1234_s7 + $0x8] sm:$0xff] %v903_v49   ;;  %939 = vst [vmem:[%s1234_s7 + $0x28] sm:$0xff] %v923_v50  }
 0x122   : > { %899 = vst [vmem:[%s1234_s7] sm:$0xff] %v898_v51   ;;  %938 = vst [vmem:[%s1234_s7 + $0x20] sm:$0xff] %v918_v52   ;;  %v980_v53 = vpop.f32.mrb[4].mxu0  ;;  %v988_v54 = vpop.f32.mrb[4].mxu1 }
 0x123   : > { %v503_v55 = vpop.f32.mrb[5].mxu0  ;;  %v535_v56 = vpop.f32.mrb[5].mxu1  ;;  %v512_v59 = vadd.f32 %v980_v53, %v842_v33  ;;  %v544_v60 = vadd.f32 %v988_v54, %v842_v33 }
 0x124   : > { %v981_v57 = vpop.f32.mrb[6].mxu0  ;;  %v989_v58 = vpop.f32.mrb[6].mxu1  ;;  %v504_v1 = vadd.f32 %v842_v33, %v503_v55  ;;  %v536_v2 = vadd.f32 %v842_v33, %v535_v56  ;;  %636 = sbr.rel (!%p1157_p6) target bundleno = 310 (0x136), region = 77 }
 0x125   : > { %v515_v61 = vadd.f32 %v981_v57, %v842_v33  ;;  %v547_v62 = vadd.f32 %v989_v58, %v842_v33  ;;  %v506_v63 = vpop.f32.mrb[7].mxu0  ;;  %v538_v0 = vpop.f32.mrb[7].mxu1 }
 0x126   : > { %v507_v3 = vadd.f32 %v842_v33, %v506_v63  ;;  %v539_v4 = vadd.f32 %v842_v33, %v538_v0 }
 0x127   : > { %v913_v5 = vpack.c.bf16 %v515_v61, %v512_v59  ;;  %v933_v6 = vpack.c.bf16 %v547_v62, %v544_v60 }
 0x128   : > { %v908_v7 = vpack.c.bf16 %v507_v3, %v504_v1  ;;  %v928_v8 = vpack.c.bf16 %v539_v4, %v536_v2  ;;  %v661_v11 = vld [vmem:[%s1234_s7 + $0x8] sm:$0xf] (%p1157_p6)  ;;  %v663_v12 = vld [vmem:[%s1234_s7 + $0xc] sm:$0xf] (%p1157_p6) }
 0x129   : > { %937 = vst [vmem:[%s1234_s7 + $0x18] sm:$0xff] %v913_v5   ;;  %941 = vst [vmem:[%s1234_s7 + $0x38] sm:$0xff] %v933_v6   ;;  %v657_v9 = vld [vmem:[%s1234_s7] sm:$0xf] (%p1157_p6)  ;;  %v659_v10 = vld [vmem:[%s1234_s7 + $0x4] sm:$0xf] (%p1157_p6) }
 0x12a   : > { %936 = vst [vmem:[%s1234_s7 + $0x10] sm:$0xff] %v908_v7   ;;  %940 = vst [vmem:[%s1234_s7 + $0x30] sm:$0xff] %v928_v8   ;;  %v673_v17 = vld [vmem:[%s1234_s7 + $0x20] sm:$0xf] (%p1157_p6)  ;;  %v675_v18 = vld [vmem:[%s1234_s7 + $0x24] sm:$0xf] (%p1157_p6) }
 0x12b   : > { %658 = vst [vmem:[%s641_s10] sm:$0xf] %v657_v9  ;;  %660 = vst [vmem:[%s641_s10 + $0x8] sm:$0xf] %v659_v10  ;;  %v677_v19 = vld [vmem:[%s1234_s7 + $0x28] sm:$0xf] }
 0x12c   : > { %662 = vst [vmem:[%s641_s10 + $0x10] sm:$0xf] %v661_v11  ;;  %664 = vst [vmem:[%s641_s10 + $0x18] sm:$0xf] %v663_v12  ;;  %v679_v20 = vld [vmem:[%s1234_s7 + $0x2c] sm:$0xf] }
 0x12d   : > { %674 = vst [vmem:[%s641_s10 + $0x40] sm:$0xf] %v673_v17  ;;  %676 = vst [vmem:[%s641_s10 + $0x48] sm:$0xf] %v675_v18 }
 0x12e   : > { %678 = vst [vmem:[%s641_s10 + $0x50] sm:$0xf] %v677_v19  ;;  %680 = vst [vmem:[%s641_s10 + $0x58] sm:$0xf] %v679_v20 }
 0x130   : > { %v669_v15 = vld [vmem:[%s1234_s7 + $0x18] sm:$0xf]  ;;  %v671_v16 = vld [vmem:[%s1234_s7 + $0x1c] sm:$0xf] }
 0x131   : > { %v665_v13 = vld [vmem:[%s1234_s7 + $0x10] sm:$0xf]  ;;  %v667_v14 = vld [vmem:[%s1234_s7 + $0x14] sm:$0xf]  ;;  %670 = vst [vmem:[%s641_s10 + $0x30] sm:$0xf] %v669_v15 }
 0x132   : > { %666 = vst [vmem:[%s641_s10 + $0x20] sm:$0xf] %v665_v13  ;;  %668 = vst [vmem:[%s641_s10 + $0x28] sm:$0xf] %v667_v14  ;;  %v681_v21 = vld [vmem:[%s1234_s7 + $0x30] sm:$0xf] }
 0x133   : > { %672 = vst [vmem:[%s641_s10 + $0x38] sm:$0xf] %v671_v16  ;;  %v683_v22 = vld [vmem:[%s1234_s7 + $0x34] sm:$0xf]  ;;  %682 = vst [vmem:[%s641_s10 + $0x60] sm:$0xf] %v681_v21 }
 0x134   : > { %684 = vst [vmem:[%s641_s10 + $0x68] sm:$0xf] %v683_v22  ;;  %v685_v23 = vld [vmem:[%s1234_s7 + $0x38] sm:$0xf]  ;;  %v687_v24 = vld [vmem:[%s1234_s7 + $0x3c] sm:$0xf] }
 0x135   : > { %686 = vst [vmem:[%s641_s10 + $0x70] sm:$0xf] %v685_v23  ;;  %688 = vst [vmem:[%s641_s10 + $0x78] sm:$0xf] %v687_v24 }
 0x136 PF: > { %s13_s16 = sadd.s32 1, %s1100_s16   ;;  %s1286_s12 = smov %s1088_s13 }
 0x137   : > { %p10_p12 = scmp.ge.s32.totalorder %s13_s16, 4   ;;  %s1287_s13 = smov %s1162_s22 }
 0x138   : > { %s1288_s14 = smov %s1096_s15  ;;  %s1289_s15 = smov %s1291_s17 }
 0x139   :  { %12 = sbr.rel (!%p10_p12) target bundleno = 3 (0x3), region = 155 }

// kernel: resnet_feature_extractor.47
= control target key start
LH: loop header
LB: loop body
LE: loop exit
PB: predicated region body
PF: predicated region fallthrough
CT: control target
= control target key end

     0   :  { %s1407_s15 = smov 0   ;;  %s1409_s16 = smov 0   ;;  %s1632_s0 = inlined_call_operand.vmem [shape: bf16[128,128], index: 0, kind: input, shape index: {}]   ;;  %s1633_s1 = inlined_call_operand.vmem [shape: bf16[128,256], index: 1, kind: input, shape index: {}]   ;;  %s1634_s2 = inlined_call_operand.vmem [shape: f32[1,256], index: 2, kind: input, shape index: {}]   ;;  %s1635_s3 = inlined_call_operand.vmem [shape: bf16[128,256], index: 3, kind: input, shape index: {}]   ;;  %s1636_s4 = inlined_call_operand.vmem [shape: bf16[128,256], index: 4, kind: output, shape index: {}]  }
   0x1   :  { %s1411_s17 = smov 0   ;;  %s1413_s18 = smov 0  }
   0x2   :  { %s1415_s19 = smov 0  }
   0x3 LB: > { %s23_s20 = sadd.s32 1, %s1376_s18  ;;  %s1070_s21 = sadd.s32 4294967295, %s1380_s19   ;;  %s1380_s19 = sphi %s1415_s19, %s14_s19   ;;  %s1376_s18 = sphi %s1413_s18, %s1642_s18   ;;  %s1372_s17 = sphi %s1411_s17, %s1641_s17   ;;  %s1368_s16 = sphi %s1409_s16, %s1640_s16   ;;  %s1364_s15 = sphi %s1407_s15, %s1639_s15  }
   0x4   : > { %p24_p0 = scmp.ge.s32.totalorder %s23_s20, 2  ;;  %p66_p1 = scmp.ne.s32.totalorder %s1368_s16, %s1364_s15 }
   0x5   : > { %p67_p2 = scmp.eq.s32.totalorder %s1380_s19, 0  ;;  %p152_p4 = scmp.eq.s32.totalorder %s1070_s21, 1 }
   0x6   : > { %s1644_s20 = smov (%p24_p0, %s23_s20), 0  ;;  %s59_s24 = sadd.s32 1, %s1368_s16 }
   0x7   : > { %p1439_p3 = por %p67_p2, %p66_p1  ;;  %s56_s23 = ssub.s32 %s1376_s18, %s1644_s20 }
   0x8   : > { %p57_p5 = scmp.eq.s32.totalorder %s56_s23, 0  ;;  %p1446_p6 = por %p152_p4, %p66_p1 }
   0x9   : > { %p1074_p7 = scmp.ge.s32.totalorder %s1380_s19, 2 }
   0xa   : > { %s1451_s26 = scalar_select %p57_p5, %s1368_s16, %s59_s24  }
   0xb   : > { %183 = sbr.rel (%p1074_p7) target bundleno = 46 (0x2e), region = 20 }
  0x12   : > { %186 = sbr.rel (!%p1439_p3) target bundleno = 32 (0x20), region = 24  ;;  %s188_s27 = sand.u32 (%p1439_p3), 1, %s1368_s16  }
  0x13   : > { %s1076_s28 = sshll.u32 (%p1439_p3), %s1376_s18, 2  ;;  %s1075_s29 = sshll.u32 (%p1439_p3), %s188_s27, 6 }
  0x14   : > { %s1461_s6 = scalar_lea.vmem (%p1439_p3), %s1633_s1, %s1076_s28  ;;  %s190_s7 = scalar_lea.vmem (%p1439_p3), [#allocation2], %s1075_s29 }
  0x15   : > { %v208_v0 = vld [vmem:[%s1461_s6] sm:$0xf] (%p1439_p3)  ;;  %v210_v1 = vld [vmem:[%s1461_s6 + $0x8] sm:$0xf] (%p1439_p3)  ;;  %v212_v2 = vld [vmem:[%s1461_s6 + $0x10] sm:$0xf] (%p1439_p3) }
  0x16   : > { %209 = vst [vmem:[%s190_s7] sm:$0xf] (%p1439_p3), %v208_v0  ;;  %211 = vst [vmem:[%s190_s7 + $0x4] sm:$0xf] (%p1439_p3), %v210_v1  ;;  %v214_v3 = vld [vmem:[%s1461_s6 + $0x18] sm:$0xf] (%p1439_p3) }
  0x17   : > { %v216_v4 = vld [vmem:[%s1461_s6 + $0x20] sm:$0xf] (%p1439_p3)  ;;  %213 = vst [vmem:[%s190_s7 + $0x8] sm:$0xf] (%p1439_p3), %v212_v2  ;;  %215 = vst [vmem:[%s190_s7 + $0xc] sm:$0xf] (%p1439_p3), %v214_v3 }
  0x18   : > { %217 = vst [vmem:[%s190_s7 + $0x10] sm:$0xf] (%p1439_p3), %v216_v4  ;;  %v218_v5 = vld [vmem:[%s1461_s6 + $0x28] sm:$0xf] (%p1439_p3)  ;;  %v220_v6 = vld [vmem:[%s1461_s6 + $0x30] sm:$0xf] (%p1439_p3) }
  0x19   : > { %v222_v7 = vld [vmem:[%s1461_s6 + $0x38] sm:$0xf]  ;;  %219 = vst [vmem:[%s190_s7 + $0x14] sm:$0xf] %v218_v5  ;;  %221 = vst [vmem:[%s190_s7 + $0x18] sm:$0xf] %v220_v6 }
  0x1a   : > { %223 = vst [vmem:[%s190_s7 + $0x1c] sm:$0xf] %v222_v7  ;;  %v224_v8 = vld [vmem:[%s1461_s6 + $0x40] sm:$0xf]  ;;  %v226_v9 = vld [vmem:[%s1461_s6 + $0x48] sm:$0xf] }
  0x1b   : > { %v228_v10 = vld [vmem:[%s1461_s6 + $0x50] sm:$0xf]  ;;  %225 = vst [vmem:[%s190_s7 + $0x20] sm:$0xf] %v224_v8  ;;  %227 = vst [vmem:[%s190_s7 + $0x24] sm:$0xf] %v226_v9 }
  0x1c   : > { %229 = vst [vmem:[%s190_s7 + $0x28] sm:$0xf] %v228_v10  ;;  %v230_v11 = vld [vmem:[%s1461_s6 + $0x58] sm:$0xf]  ;;  %v232_v12 = vld [vmem:[%s1461_s6 + $0x60] sm:$0xf] }
  0x1d   : > { %v234_v13 = vld [vmem:[%s1461_s6 + $0x68] sm:$0xf]  ;;  %231 = vst [vmem:[%s190_s7 + $0x2c] sm:$0xf] %v230_v11  ;;  %233 = vst [vmem:[%s190_s7 + $0x30] sm:$0xf] %v232_v12 }
  0x1e   : > { %235 = vst [vmem:[%s190_s7 + $0x34] sm:$0xf] %v234_v13  ;;  %v236_v14 = vld [vmem:[%s1461_s6 + $0x70] sm:$0xf]  ;;  %v238_v15 = vld [vmem:[%s1461_s6 + $0x78] sm:$0xf] }
  0x1f   : > { %237 = vst [vmem:[%s190_s7 + $0x38] sm:$0xf] %v236_v14  ;;  %239 = vst [vmem:[%s190_s7 + $0x3c] sm:$0xf] %v238_v15 }
  0x20 PF: > { %300 = sbr.rel (!%p1439_p3) target bundleno = 46 (0x2e), region = 69  ;;  %s302_s8 = sand.u32 (%p1439_p3), 1, %s1368_s16  }
  0x21   : > { %s1078_s9 = sshll.u32 (%p1439_p3), %s1376_s18, 2  ;;  %s1077_s10 = sshll.u32 (%p1439_p3), %s302_s8, 6 }
  0x22   : > { %s1486_s13 = scalar_lea.vmem (%p1439_p3), %s1635_s3, %s1078_s9  ;;  %s304_s14 = scalar_lea.vmem (%p1439_p3), [#allocation3], %s1077_s10 }
  0x23   : > { %v325_v16 = vld [vmem:[%s1486_s13] sm:$0xf] (%p1439_p3)  ;;  %v327_v17 = vld [vmem:[%s1486_s13 + $0x8] sm:$0xf] (%p1439_p3)  ;;  %v329_v18 = vld [vmem:[%s1486_s13 + $0x10] sm:$0xf] (%p1439_p3) }
  0x24   : > { %326 = vst [vmem:[%s304_s14] sm:$0xf] (%p1439_p3), %v325_v16  ;;  %328 = vst [vmem:[%s304_s14 + $0x4] sm:$0xf] (%p1439_p3), %v327_v17  ;;  %v331_v19 = vld [vmem:[%s1486_s13 + $0x18] sm:$0xf] (%p1439_p3) }
  0x25   : > { %v333_v20 = vld [vmem:[%s1486_s13 + $0x20] sm:$0xf] (%p1439_p3)  ;;  %330 = vst [vmem:[%s304_s14 + $0x8] sm:$0xf] (%p1439_p3), %v329_v18  ;;  %332 = vst [vmem:[%s304_s14 + $0xc] sm:$0xf] (%p1439_p3), %v331_v19 }
  0x26   : > { %334 = vst [vmem:[%s304_s14 + $0x10] sm:$0xf] (%p1439_p3), %v333_v20  ;;  %v335_v21 = vld [vmem:[%s1486_s13 + $0x28] sm:$0xf] (%p1439_p3)  ;;  %v337_v22 = vld [vmem:[%s1486_s13 + $0x30] sm:$0xf] (%p1439_p3) }
  0x27   : > { %v339_v23 = vld [vmem:[%s1486_s13 + $0x38] sm:$0xf]  ;;  %336 = vst [vmem:[%s304_s14 + $0x14] sm:$0xf] %v335_v21  ;;  %338 = vst [vmem:[%s304_s14 + $0x18] sm:$0xf] %v337_v22 }
  0x28   : > { %340 = vst [vmem:[%s304_s14 + $0x1c] sm:$0xf] %v339_v23  ;;  %v341_v24 = vld [vmem:[%s1486_s13 + $0x40] sm:$0xf]  ;;  %v343_v25 = vld [vmem:[%s1486_s13 + $0x48] sm:$0xf] }
  0x29   : > { %v345_v26 = vld [vmem:[%s1486_s13 + $0x50] sm:$0xf]  ;;  %342 = vst [vmem:[%s304_s14 + $0x20] sm:$0xf] %v341_v24  ;;  %344 = vst [vmem:[%s304_s14 + $0x24] sm:$0xf] %v343_v25 }
  0x2a   : > { %346 = vst [vmem:[%s304_s14 + $0x28] sm:$0xf] %v345_v26  ;;  %v347_v27 = vld [vmem:[%s1486_s13 + $0x58] sm:$0xf]  ;;  %v349_v28 = vld [vmem:[%s1486_s13 + $0x60] sm:$0xf] }
  0x2b   : > { %v351_v29 = vld [vmem:[%s1486_s13 + $0x68] sm:$0xf]  ;;  %348 = vst [vmem:[%s304_s14 + $0x2c] sm:$0xf] %v347_v27  ;;  %350 = vst [vmem:[%s304_s14 + $0x30] sm:$0xf] %v349_v28 }
  0x2c   : > { %352 = vst [vmem:[%s304_s14 + $0x34] sm:$0xf] %v351_v29  ;;  %v353_v30 = vld [vmem:[%s1486_s13 + $0x70] sm:$0xf]  ;;  %v355_v31 = vld [vmem:[%s1486_s13 + $0x78] sm:$0xf] }
  0x2d   : > { %354 = vst [vmem:[%s304_s14 + $0x38] sm:$0xf] %v353_v30  ;;  %356 = vst [vmem:[%s304_s14 + $0x3c] sm:$0xf] %v355_v31 }
  0x2e PF: > { %p1079_p8 = scmp.ge.s32.totalorder %s1380_s19, 1  ;;  %p410_p9 = scmp.lt.s32.totalorder %s1380_s19, 3 }
  0x30   : > { %p411_p10 = pnand %p1079_p8, %p410_p9 }
  0x31   : > { %s417_s21 = sand.u32 (!%p411_p10), 1, %s1364_s15   ;;  %v1334_v32 = vld [vmem:[%s1632_s0] sm:$0xff] (!%p411_p10)   ;;  %v1336_v42 = vld [vmem:[%s1632_s0 + $0x8] sm:$0xff] (!%p411_p10)   ;;  %v1338_v44 = vld [vmem:[%s1632_s0 + $0x10] sm:$0xff] (!%p411_p10)   ;;  %p466_p11 = scmp.lt.s32.totalorder (!%p411_p10), %s1372_s17, 1 }
  0x32   : > { %414 = sbr.rel (%p411_p10) target bundleno = 328 (0x148), region = 110  ;;  %s1510_s24 = sshll.u32 (!%p411_p10), %s417_s21, 6  ;;  %v1335_v33 = vld [vmem:[%s1632_s0 + $0x20] sm:$0xff] (!%p411_p10)   ;;  %1254 = vmatprep.mubr.bf16.mxu0 (!%p411_p10), %v1334_v32  ;;  %v1337_v43 = vld [vmem:[%s1632_s0 + $0x28] sm:$0xff] (!%p411_p10)   ;;  %v1339_v45 = vld [vmem:[%s1632_s0 + $0x30] sm:$0xff] (!%p411_p10)  }
  0x33   : > { %s1516_s29 = scalar_lea.vmem (!%p411_p10), [#allocation2], %s1510_s24  ;;  %1262 = vmatprep.mubr.bf16.mxu1 (!%p411_p10), %v1335_v33  ;;  %v1340_v46 = vld [vmem:[%s1632_s0 + $0x18] sm:$0xff] (!%p411_p10)   ;;  %s426_s28 = scalar_lea.vmem (!%p411_p10), [#allocation3], %s1510_s24 }
  0x34   : > { %v1326_v34 = vld [vmem:[%s1516_s29] sm:$0xff] (!%p411_p10)   ;;  %v1327_v35 = vld [vmem:[%s1516_s29 + $0x8] sm:$0xff] (!%p411_p10)   ;;  %v1328_v36 = vld [vmem:[%s1516_s29 + $0x10] sm:$0xff] (!%p411_p10)  }
  0x35   : > { %1238 = vmatprep.subr.bf16.mxu0 (!%p411_p10), %v1326_v34  ;;  %1270 = vmatprep.subr.bf16.mxu1 (!%p411_p10), %v1326_v34  ;;  %v1329_v37 = vld [vmem:[%s1516_s29 + $0x18] sm:$0xff] (!%p411_p10)   ;;  %v1330_v38 = vld [vmem:[%s1516_s29 + $0x20] sm:$0xff] (!%p411_p10)   ;;  %v1331_v39 = vld [vmem:[%s1516_s29 + $0x28] sm:$0xff] (!%p411_p10)  }
  0x36   : > { %1239 = vmatpush3.bf16.msra.mxu0 (!%p411_p10), %v1326_v34  ;;  %1278 = vmatpush3.bf16.msra.mxu1 (!%p411_p10), %v1326_v34  ;;  %v1332_v40 = vld [vmem:[%s1516_s29 + $0x30] sm:$0xff] (!%p411_p10)   ;;  %v1333_v41 = vld [vmem:[%s1516_s29 + $0x38] sm:$0xff] (!%p411_p10)   ;;  %v1208_v48 = vld [vmem:[%s426_s28 + $0x8] sm:$0xff] (!%p411_p10)   ;;  %s1581_s29 = scalar_lea.vmem (!%p411_p10), [#allocation4], %s1510_s24 }
  0x37   : > { %1240 = vmatprep.subr.bf16.mxu0 (!%p411_p10), %v1327_v35  ;;  %1271 = vmatprep.subr.bf16.mxu1 (!%p411_p10), %v1327_v35  ;;  %v1341_v47 = vld [vmem:[%s1632_s0 + $0x38] sm:$0xff] (!%p411_p10)   ;;  %v1212_v49 = vld [vmem:[%s426_s28 + $0x28] sm:$0xff] (!%p411_p10)   ;;  %v1137_v50 = vld [vmem:[%s426_s28] sm:$0xff] (!%p411_p10)   ;;  %v1142_v55 = vunpack.c.l.bf16 (!%p411_p10), %v1208_v48  ;;  %v1143_v63 = vunpack.c.h.bf16 (!%p411_p10), %v1208_v48 }
  0x38   : > { %v1211_v51 = vld [vmem:[%s426_s28 + $0x20] sm:$0xff] (!%p411_p10)   ;;  %v1552_v53 = vld [vmem:[%s426_s28 + $0x18] sm:$0xff] (!%p411_p10)   ;;  %v1158_v56 = vunpack.c.l.bf16 (!%p411_p10), %v1212_v49  ;;  %v1138_v57 = vunpack.c.l.bf16 (!%p411_p10), %v1137_v50  ;;  %v1556_v59 = vld [vmem:[%s426_s28 + $0x10] sm:$0xff] (!%p411_p10)   ;;  %v1159_v0 = vunpack.c.h.bf16 (!%p411_p10), %v1212_v49  ;;  %v1139_v1 = vunpack.c.h.bf16 (!%p411_p10), %v1137_v50 }
  0x39   : > { %s467_s21 = scalar_select %p466_p11, %s1372_s17, 1  ;;  %v1554_v54 = vld [vmem:[%s426_s28 + $0x38] sm:$0xff]   ;;  %v1154_v58 = vunpack.c.l.bf16 %v1211_v51  ;;  %v1558_v60 = vld [vmem:[%s426_s28 + $0x30] sm:$0xff]   ;;  %v1155_v2 = vunpack.c.h.bf16 %v1211_v51  ;;  %v1150_v7 = vunpack.c.l.bf16 %v1552_v53  ;;  %v1146_v13 = vunpack.c.l.bf16 %v1556_v59 }
  0x3a   : > { %1241 = vmatpush3.bf16.msra.mxu0 %v1327_v35  ;;  %1279 = vmatpush3.bf16.msra.mxu1 %v1327_v35  ;;  %v1166_v8 = vunpack.c.l.bf16 %v1554_v54  ;;  %v1162_v14 = vunpack.c.l.bf16 %v1558_v60  ;;  %v1151_v27 = vunpack.c.h.bf16 %v1552_v53  ;;  %v1167_v28 = vunpack.c.h.bf16 %v1554_v54  ;;  %s1117_s24 = sshll.u32 (%p1446_p6), %s1372_s17, 2 }
  0x3b   : > { %1242 = vmatprep.subr.bf16.mxu0 %v1328_v36  ;;  %1272 = vmatprep.subr.bf16.mxu1 %v1328_v36  ;;  %s468_s27 = scalar_lea.vmem %s1634_s2, %s467_s21  ;;  %v1147_v31 = vunpack.c.h.bf16 %v1556_v59  ;;  %v1163_v32 = vunpack.c.h.bf16 %v1558_v60  ;;  %s859_s5 = scalar_lea.vmem (%p1446_p6), %s1636_s4, %s1117_s24 }
  0x3c   : > { %v1550_v52 = vld [vmem:[%s468_s27] ss:$0 sm:$0xff] }
  0x3e   : > { %1243 = vmatpush3.bf16.msra.mxu0 %v1328_v36  ;;  %1280 = vmatpush3.bf16.msra.mxu1 %v1328_v36 }
  0x3f   : > { %1244 = vmatprep.subr.bf16.mxu0 %v1329_v37  ;;  %1273 = vmatprep.subr.bf16.mxu1 %v1329_v37 }
  0x42   : > { %1245 = vmatpush3.bf16.msra.mxu0 %v1329_v37  ;;  %1281 = vmatpush3.bf16.msra.mxu1 %v1329_v37 }
  0x43   : > { %1246 = vmatprep.subr.bf16.mxu0 %v1330_v38  ;;  %1274 = vmatprep.subr.bf16.mxu1 %v1330_v38 }
  0x46   : > { %1247 = vmatpush3.bf16.msra.mxu0 %v1330_v38  ;;  %1282 = vmatpush3.bf16.msra.mxu1 %v1330_v38 }
  0x47   : > { %1248 = vmatprep.subr.bf16.mxu0 %v1331_v39  ;;  %1275 = vmatprep.subr.bf16.mxu1 %v1331_v39 }
  0x4a   : > { %1249 = vmatpush3.bf16.msra.mxu0 %v1331_v39  ;;  %1283 = vmatpush3.bf16.msra.mxu1 %v1331_v39 }
  0x4b   : > { %1250 = vmatprep.subr.bf16.mxu0 %v1332_v40  ;;  %1276 = vmatprep.subr.bf16.mxu1 %v1332_v40 }
  0x4e   : > { %1251 = vmatpush3.bf16.msra.mxu0 %v1332_v40  ;;  %1284 = vmatpush3.bf16.msra.mxu1 %v1332_v40 }
  0x4f   : > { %1252 = vmatprep.subr.bf16.mxu0 %v1333_v41  ;;  %1277 = vmatprep.subr.bf16.mxu1 %v1333_v41 }
  0x52   : > { %1253 = vmatpush3.bf16.msra.mxu0 %v1333_v41  ;;  %1285 = vmatpush3.bf16.msra.mxu1 %v1333_v41 }
  0x55   : > { %1255 = vmatmul.mubr.bf16.vlgmr.msra.gmra.mrb[0].mxu0 %v1336_v42  ;;  %1263 = vmatmul.mubr.bf16.vlgmr.msra.gmra.mrb[0].mxu1 %v1337_v43 }
  0x56   : > { %1258 = vmatprep.mubr.bf16.mxu0 %v1338_v44  ;;  %1266 = vmatprep.mubr.bf16.mxu1 %v1339_v45 }
  0x5d   : > { %1259 = vmatmul.mubr.bf16.gmra.mrb[4].mxu0 %v1340_v46  ;;  %1267 = vmatmul.mubr.bf16.gmra.mrb[4].mxu1 %v1341_v47 }
 0x128   : > { %v1256_v61 = vpop.f32.mrb[0].mxu0  ;;  %v1264_v62 = vpop.f32.mrb[0].mxu1 }
 0x129   : > { %v650_v3 = vadd.f32 %v1256_v61, %v1550_v52  ;;  %v682_v4 = vadd.f32 %v1264_v62, %v1550_v52  ;;  %v641_v5 = vpop.f32.mrb[1].mxu0  ;;  %v673_v6 = vpop.f32.mrb[1].mxu1 }
 0x12a   : > { %v642_v9 = vadd.f32 %v1550_v52, %v641_v5  ;;  %v674_v10 = vadd.f32 %v1550_v52, %v673_v6  ;;  %v1257_v11 = vpop.f32.mrb[2].mxu0  ;;  %v1265_v12 = vpop.f32.mrb[2].mxu1 }
 0x12b   : > { %v738_v15 = vadd.f32 %v1142_v55, %v650_v3  ;;  %v746_v16 = vadd.f32 %v1158_v56, %v682_v4  ;;  %v653_v17 = vadd.f32 %v1257_v11, %v1550_v52  ;;  %v685_v18 = vadd.f32 %v1265_v12, %v1550_v52  ;;  %v644_v19 = vpop.f32.mrb[3].mxu0  ;;  %v676_v20 = vpop.f32.mrb[3].mxu1 }
 0x12c   : > { %v736_v21 = vadd.f32 %v1138_v57, %v642_v9  ;;  %v744_v22 = vadd.f32 %v1154_v58, %v674_v10  ;;  %v645_v23 = vadd.f32 %v1550_v52, %v644_v19  ;;  %v677_v24 = vadd.f32 %v1550_v52, %v676_v20 }
 0x12d   : > { %v739_v25 = vadd.f32 %v1143_v63, %v653_v17  ;;  %v747_v26 = vadd.f32 %v1159_v0, %v685_v18  ;;  %v754_v33 = vmax.f32 %v738_v15, 0.0  ;;  %v762_v34 = vmax.f32 %v746_v16, 0.0 }
 0x12e   : > { %v737_v29 = vadd.f32 %v1139_v1, %v645_v23  ;;  %v745_v30 = vadd.f32 %v1155_v2, %v677_v24  ;;  %v752_v37 = vmax.f32 %v736_v21, 0.0  ;;  %v760_v38 = vmax.f32 %v744_v22, 0.0 }
 0x12f   : > { %v755_v35 = vmax.f32 %v739_v25, 0.0  ;;  %v763_v36 = vmax.f32 %v747_v26, 0.0 }
 0x130   : > { %v753_v39 = vmax.f32 %v737_v29, 0.0  ;;  %v761_v40 = vmax.f32 %v745_v30, 0.0  ;;  %v1260_v41 = vpop.f32.mrb[4].mxu0  ;;  %v1268_v42 = vpop.f32.mrb[4].mxu1 }
 0x131   : > { %v1176_v43 = vpack.c.bf16 %v755_v35, %v754_v33  ;;  %v1196_v44 = vpack.c.bf16 %v763_v36, %v762_v34  ;;  %v666_v45 = vadd.f32 %v1260_v41, %v1550_v52  ;;  %v698_v46 = vadd.f32 %v1268_v42, %v1550_v52  ;;  %v657_v47 = vpop.f32.mrb[5].mxu0  ;;  %v689_v48 = vpop.f32.mrb[5].mxu1 }
 0x132   : > { %v1171_v49 = vpack.c.bf16 %v753_v39, %v752_v37  ;;  %v1191_v50 = vpack.c.bf16 %v761_v40, %v760_v38  ;;  %v658_v51 = vadd.f32 %v1550_v52, %v657_v47  ;;  %v690_v53 = vadd.f32 %v1550_v52, %v689_v48  ;;  %v1261_v54 = vpop.f32.mrb[6].mxu0  ;;  %v1269_v55 = vpop.f32.mrb[6].mxu1 }
 0x133   : > { %1215 = vst [vmem:[%s1581_s29 + $0x8] sm:$0xff] %v1176_v43   ;;  %1219 = vst [vmem:[%s1581_s29 + $0x28] sm:$0xff] %v1196_v44   ;;  %v742_v56 = vadd.f32 %v1150_v7, %v666_v45  ;;  %v750_v57 = vadd.f32 %v1166_v8, %v698_v46  ;;  %v669_v58 = vadd.f32 %v1261_v54, %v1550_v52  ;;  %v660_v60 = vpop.f32.mrb[7].mxu0  ;;  %v692_v61 = vpop.f32.mrb[7].mxu1 }
 0x134   : > { %v701_v59 = vadd.f32 %v1269_v55, %v1550_v52  ;;  %1172 = vst [vmem:[%s1581_s29] sm:$0xff] %v1171_v49   ;;  %1218 = vst [vmem:[%s1581_s29 + $0x20] sm:$0xff] %v1191_v50   ;;  %v740_v62 = vadd.f32 %v1146_v13, %v658_v51  ;;  %v748_v63 = vadd.f32 %v1162_v14, %v690_v53 }
 0x135   : > { %v661_v0 = vadd.f32 %v1550_v52, %v660_v60  ;;  %v693_v1 = vadd.f32 %v1550_v52, %v692_v61  ;;  %v743_v2 = vadd.f32 %v1151_v27, %v669_v58  ;;  %v758_v6 = vmax.f32 %v742_v56, 0.0 }
 0x136   : > { %v751_v3 = vadd.f32 %v1167_v28, %v701_v59  ;;  %v766_v7 = vmax.f32 %v750_v57, 0.0  ;;  %v756_v10 = vmax.f32 %v740_v62, 0.0  ;;  %v764_v11 = vmax.f32 %v748_v63, 0.0 }
 0x137   : > { %v741_v4 = vadd.f32 %v1147_v31, %v661_v0  ;;  %v749_v5 = vadd.f32 %v1163_v32, %v693_v1  ;;  %v759_v8 = vmax.f32 %v743_v2, 0.0  ;;  %854 = sbr.rel (!%p1446_p6) target bundleno = 328 (0x148), region = 122 }
 0x138   : > { %v767_v9 = vmax.f32 %v751_v3, 0.0 }
 0x139   : > { %v757_v12 = vmax.f32 %v741_v4, 0.0  ;;  %v765_v13 = vmax.f32 %v749_v5, 0.0  ;;  %v1186_v14 = vpack.c.bf16 %v759_v8, %v758_v6 }
 0x13a   : > { %v1206_v15 = vpack.c.bf16 %v767_v9, %v766_v7  ;;  %v879_v19 = vld [vmem:[%s1581_s29 + $0x8] sm:$0xf] (%p1446_p6)  ;;  %v881_v20 = vld [vmem:[%s1581_s29 + $0xc] sm:$0xf] (%p1446_p6) }
 0x13b   : > { %v1181_v16 = vpack.c.bf16 %v757_v12, %v756_v10  ;;  %v1201_v52 = vpack.c.bf16 %v765_v13, %v764_v11  ;;  %1217 = vst [vmem:[%s1581_s29 + $0x18] sm:$0xff] %v1186_v14   ;;  %v875_v17 = vld [vmem:[%s1581_s29] sm:$0xf] (%p1446_p6)  ;;  %v877_v18 = vld [vmem:[%s1581_s29 + $0x4] sm:$0xf] (%p1446_p6) }
 0x13c   : > { %1221 = vst [vmem:[%s1581_s29 + $0x38] sm:$0xff] %v1206_v15   ;;  %876 = vst [vmem:[%s859_s5] sm:$0xf] (%p1446_p6), %v875_v17  ;;  %v891_v25 = vld [vmem:[%s1581_s29 + $0x20] sm:$0xf] (%p1446_p6)  ;;  %v893_v26 = vld [vmem:[%s1581_s29 + $0x24] sm:$0xf] (%p1446_p6) }
 0x13d   : > { %1216 = vst [vmem:[%s1581_s29 + $0x10] sm:$0xff] %v1181_v16   ;;  %1220 = vst [vmem:[%s1581_s29 + $0x30] sm:$0xff] %v1201_v52   ;;  %v895_v27 = vld [vmem:[%s1581_s29 + $0x28] sm:$0xf] (%p1446_p6)  ;;  %v897_v28 = vld [vmem:[%s1581_s29 + $0x2c] sm:$0xf] (%p1446_p6) }
 0x13e   : > { %878 = vst [vmem:[%s859_s5 + $0x8] sm:$0xf] %v877_v18  ;;  %880 = vst [vmem:[%s859_s5 + $0x10] sm:$0xf] %v879_v19 }
 0x13f   : > { %882 = vst [vmem:[%s859_s5 + $0x18] sm:$0xf] %v881_v20  ;;  %892 = vst [vmem:[%s859_s5 + $0x40] sm:$0xf] %v891_v25 }
 0x140   : > { %894 = vst [vmem:[%s859_s5 + $0x48] sm:$0xf] %v893_v26  ;;  %896 = vst [vmem:[%s859_s5 + $0x50] sm:$0xf] %v895_v27 }
 0x141   : > { %898 = vst [vmem:[%s859_s5 + $0x58] sm:$0xf] %v897_v28 }
 0x142   : > { %v887_v23 = vld [vmem:[%s1581_s29 + $0x18] sm:$0xf]  ;;  %v889_v24 = vld [vmem:[%s1581_s29 + $0x1c] sm:$0xf] }
 0x143   : > { %888 = vst [vmem:[%s859_s5 + $0x30] sm:$0xf] %v887_v23  ;;  %890 = vst [vmem:[%s859_s5 + $0x38] sm:$0xf] %v889_v24  ;;  %v903_v31 = vld [vmem:[%s1581_s29 + $0x38] sm:$0xf] }
 0x144   : > { %v883_v21 = vld [vmem:[%s1581_s29 + $0x10] sm:$0xf]  ;;  %v885_v22 = vld [vmem:[%s1581_s29 + $0x14] sm:$0xf]  ;;  %v905_v32 = vld [vmem:[%s1581_s29 + $0x3c] sm:$0xf] }
 0x145   : > { %884 = vst [vmem:[%s859_s5 + $0x20] sm:$0xf] %v883_v21  ;;  %886 = vst [vmem:[%s859_s5 + $0x28] sm:$0xf] %v885_v22  ;;  %v899_v29 = vld [vmem:[%s1581_s29 + $0x30] sm:$0xf] }
 0x146   : > { %v901_v30 = vld [vmem:[%s1581_s29 + $0x34] sm:$0xf]  ;;  %900 = vst [vmem:[%s859_s5 + $0x60] sm:$0xf] %v899_v29  ;;  %904 = vst [vmem:[%s859_s5 + $0x70] sm:$0xf] %v903_v31 }
 0x147   : > { %902 = vst [vmem:[%s859_s5 + $0x68] sm:$0xf] %v901_v30  ;;  %906 = vst [vmem:[%s859_s5 + $0x78] sm:$0xf] %v905_v32 }
 0x148 PF: > { %s14_s19 = sadd.s32 1, %s1380_s19   ;;  %s1639_s15 = smov %s1368_s16 }
 0x149   : > { %p11_p12 = scmp.ge.s32.totalorder %s14_s19, 4   ;;  %s1640_s16 = smov %s1451_s26 }
 0x14a   : > { %s1641_s17 = smov %s1376_s18  ;;  %s1642_s18 = smov %s1644_s20 }
 0x14b   :  { %13 = sbr.rel (!%p11_p12) target bundleno = 3 (0x3), region = 208 }

// kernel: resnet_feature_extractor.45
= control target key start
LH: loop header
LB: loop body
LE: loop exit
PB: predicated region body
PF: predicated region fallthrough
CT: control target
= control target key end

     0   :  { %s1772_s1 = inlined_call_operand.vmem [shape: bf16[640,128], index: 1, kind: input, shape index: {}]   ;;  %s1773_s0 = inlined_call_operand.vmem [shape: bf16[128,640], index: 0, kind: input, shape index: {}]   ;;  %s1774_s2 = inlined_call_operand.vmem [shape: f32[1,128], index: 2, kind: input, shape index: {}]   ;;  %s1775_s3 = inlined_call_operand.vmem [shape: bf16[128,128], index: 3, kind: output, shape index: {}]  }
   0x1   :  { %v1341_v0 = vld [vmem:[%s1772_s1 + $0x40] sm:$0xff]   ;;  %v1345_v4 = vld [vmem:[%s1772_s1 + $0x48] sm:$0xff]   ;;  %v1349_v8 = vld [vmem:[%s1772_s1 + $0x50] sm:$0xff]  }
   0x2   :  { %v1342_v1 = vld [vmem:[%s1772_s1 + $0xc0] sm:$0xff]   ;;  %1149 = vmatprep.subr.bf16.mxu0 %v1341_v0  ;;  %v1346_v5 = vld [vmem:[%s1772_s1 + $0xc8] sm:$0xff]   ;;  %v1350_v9 = vld [vmem:[%s1772_s1 + $0xd0] sm:$0xff]  }
   0x3   :  { %v1343_v2 = vld [vmem:[%s1772_s1] sm:$0xff]   ;;  %1213 = vmatprep.subr.bf16.mxu1 %v1342_v1  ;;  %v1347_v6 = vld [vmem:[%s1772_s1 + $0x8] sm:$0xff]   ;;  %v1351_v10 = vld [vmem:[%s1772_s1 + $0x10] sm:$0xff]  }
   0x4   :  { %v1344_v3 = vld [vmem:[%s1772_s1 + $0x80] sm:$0xff]   ;;  %1150 = vmatpush3.bf16.msra.mxu0 %v1343_v2  ;;  %v1348_v7 = vld [vmem:[%s1772_s1 + $0x88] sm:$0xff]   ;;  %v1352_v11 = vld [vmem:[%s1772_s1 + $0x90] sm:$0xff]  }
   0x5   :  { %1214 = vmatpush3.bf16.msra.mxu1 %v1344_v3  ;;  %1151 = vmatprep.subr.bf16.mxu0 %v1345_v4  ;;  %v1353_v12 = vld [vmem:[%s1772_s1 + $0x58] sm:$0xff]   ;;  %v1357_v16 = vld [vmem:[%s1772_s1 + $0x60] sm:$0xff]   ;;  %v1361_v20 = vld [vmem:[%s1772_s1 + $0x68] sm:$0xff]  }
   0x6   :  { %1215 = vmatprep.subr.bf16.mxu1 %v1346_v5  ;;  %v1354_v13 = vld [vmem:[%s1772_s1 + $0xd8] sm:$0xff]   ;;  %v1358_v17 = vld [vmem:[%s1772_s1 + $0xe0] sm:$0xff]   ;;  %v1362_v21 = vld [vmem:[%s1772_s1 + $0xe8] sm:$0xff]  }
   0x7   :  { %v1355_v14 = vld [vmem:[%s1772_s1 + $0x18] sm:$0xff]   ;;  %v1359_v18 = vld [vmem:[%s1772_s1 + $0x20] sm:$0xff]   ;;  %v1363_v22 = vld [vmem:[%s1772_s1 + $0x28] sm:$0xff]  }
   0x8   :  { %1152 = vmatpush3.bf16.msra.mxu0 %v1347_v6  ;;  %v1356_v15 = vld [vmem:[%s1772_s1 + $0x98] sm:$0xff]   ;;  %v1360_v19 = vld [vmem:[%s1772_s1 + $0xa0] sm:$0xff]   ;;  %v1364_v23 = vld [vmem:[%s1772_s1 + $0xa8] sm:$0xff]  }
   0x9   :  { %1216 = vmatpush3.bf16.msra.mxu1 %v1348_v7  ;;  %1153 = vmatprep.subr.bf16.mxu0 %v1349_v8  ;;  %v1365_v24 = vld [vmem:[%s1772_s1 + $0x70] sm:$0xff]   ;;  %v1369_v28 = vld [vmem:[%s1772_s1 + $0x78] sm:$0xff]   ;;  %v1378_v35 = vld [vmem:[%s1773_s0 + $0xc] ss:$20 sps:$4 sm:$0xff]  }
   0xa   :  { %1217 = vmatprep.subr.bf16.mxu1 %v1350_v9  ;;  %v1366_v25 = vld [vmem:[%s1772_s1 + $0xf0] sm:$0xff]   ;;  %v1370_v29 = vld [vmem:[%s1772_s1 + $0xf8] sm:$0xff]   ;;  %v1379_v36 = vld [vmem:[%s1772_s1 + $0x100] sm:$0xff]   ;;  %727 = vmatprep.mubr.bf16.mxu1 %v1378_v35 }
   0xb   :  { %v1367_v26 = vld [vmem:[%s1772_s1 + $0x30] sm:$0xff]   ;;  %v1371_v30 = vld [vmem:[%s1772_s1 + $0x38] sm:$0xff]   ;;  %v1380_v37 = vld [vmem:[%s1773_s0 + $0x2c] ss:$20 sps:$4 sm:$0xff]  }
   0xc   :  { %1154 = vmatpush3.bf16.msra.mxu0 %v1351_v10  ;;  %v1368_v27 = vld [vmem:[%s1772_s1 + $0xb0] sm:$0xff]   ;;  %v1372_v31 = vld [vmem:[%s1772_s1 + $0xb8] sm:$0xff]   ;;  %v1386_v39 = vld [vmem:[%s1772_s1 + $0x108] sm:$0xff]  }
   0xd   :  { %1218 = vmatpush3.bf16.msra.mxu1 %v1352_v11  ;;  %1155 = vmatprep.subr.bf16.mxu0 %v1353_v12  ;;  %v1373_v32 = vld [vmem:[%s1773_s0] ss:$20 sps:$4 sm:$0xff]   ;;  %v1375_v33 = vld [vmem:[%s1773_s0 + $0x4] ss:$20 sps:$4 sm:$0xff]   ;;  %v1376_v34 = vld [vmem:[%s1773_s0 + $0x8] ss:$20 sps:$4 sm:$0xff]  }
   0xe   :  { %1219 = vmatprep.subr.bf16.mxu1 %v1354_v13  ;;  %630 = vmatprep.mubr.bf16.mxu0 %v1375_v33  ;;  %v1382_v38 = vld [vmem:[%s1773_s0 + $0x34] ss:$20 sps:$4 sm:$0xff]   ;;  %v1385_v41 = vld [vmem:[%s1773_s0 + $0x30] ss:$20 sps:$4 sm:$0xff]   ;;  %v1400_v45 = vld [vmem:[%s1772_s1 + $0x118] sm:$0xff]  }
   0xf   :  { %v1384_v40 = vld [vmem:[%s1773_s0 + $0x28] ss:$20 sps:$4 sm:$0xff]   ;;  %v1393_v44 = vld [vmem:[%s1772_s1 + $0x110] sm:$0xff]   ;;  %v1392_v47 = vld [vmem:[%s1773_s0 + $0x58] ss:$20 sps:$4 sm:$0xff]  }
  0x10   :  { %1156 = vmatpush3.bf16.msra.mxu0 %v1355_v14  ;;  %v1387_v42 = vld [vmem:[%s1773_s0 + $0x54] ss:$20 sps:$4 sm:$0xff]   ;;  %v1389_v43 = vld [vmem:[%s1773_s0 + $0x5c] ss:$20 sps:$4 sm:$0xff]   ;;  %v1396_v49 = vld [vmem:[%s1773_s0 + $0x84] ss:$20 sps:$4 sm:$0xff]  }
  0x11   :  { %1220 = vmatpush3.bf16.msra.mxu1 %v1356_v15  ;;  %1157 = vmatprep.subr.bf16.mxu0 %v1357_v16  ;;  %v1391_v46 = vld [vmem:[%s1773_s0 + $0x50] ss:$20 sps:$4 sm:$0xff]   ;;  %v1414_v51 = vld [vmem:[%s1772_s1 + $0x128] sm:$0xff]   ;;  %v1399_v53 = vld [vmem:[%s1773_s0 + $0x80] ss:$20 sps:$4 sm:$0xff]  }
  0x12   :  { %1221 = vmatprep.subr.bf16.mxu1 %v1358_v17  ;;  %v1394_v48 = vld [vmem:[%s1773_s0 + $0x7c] ss:$20 sps:$4 sm:$0xff]   ;;  %v1407_v50 = vld [vmem:[%s1772_s1 + $0x120] sm:$0xff]   ;;  %v1398_v52 = vld [vmem:[%s1773_s0 + $0x78] ss:$20 sps:$4 sm:$0xff]  }
  0x13   :  { %v1401_v54 = vld [vmem:[%s1773_s0 + $0xa4] ss:$20 sps:$4 sm:$0xff]   ;;  %v1421_v55 = vld [vmem:[%s1772_s1 + $0x130] sm:$0xff]   ;;  %v1403_v56 = vld [vmem:[%s1773_s0 + $0xac] ss:$20 sps:$4 sm:$0xff]  }
  0x14   :  { %1158 = vmatpush3.bf16.msra.mxu0 %v1359_v18  ;;  %v1428_v57 = vld [vmem:[%s1772_s1 + $0x138] sm:$0xff]   ;;  %v1405_v58 = vld [vmem:[%s1773_s0 + $0xa0] ss:$20 sps:$4 sm:$0xff]   ;;  %v1413_v63 = vld [vmem:[%s1773_s0 + $0xd0] ss:$20 sps:$4 sm:$0xff]  }
  0x15   :  { %1222 = vmatpush3.bf16.msra.mxu1 %v1360_v19  ;;  %1159 = vmatprep.subr.bf16.mxu0 %v1361_v20  ;;  %v1406_v59 = vld [vmem:[%s1773_s0 + $0xa8] ss:$20 sps:$4 sm:$0xff]   ;;  %v1408_v60 = vld [vmem:[%s1773_s0 + $0xcc] ss:$20 sps:$4 sm:$0xff]   ;;  %v1419_v2 = vld [vmem:[%s1773_s0 + $0xf0] ss:$20 sps:$4 sm:$0xff]  }
  0x16   :  { %1223 = vmatprep.subr.bf16.mxu1 %v1362_v21  ;;  %v1410_v61 = vld [vmem:[%s1773_s0 + $0xd4] ss:$20 sps:$4 sm:$0xff]   ;;  %v1417_v1 = vld [vmem:[%s1773_s0 + $0xfc] ss:$20 sps:$4 sm:$0xff]   ;;  %v1420_v3 = vld [vmem:[%s1773_s0 + $0xf8] ss:$20 sps:$4 sm:$0xff]  }
  0x17   :  { %v1412_v62 = vld [vmem:[%s1773_s0 + $0xc8] ss:$20 sps:$4 sm:$0xff]   ;;  %v1424_v5 = vld [vmem:[%s1773_s0 + $0x124] ss:$20 sps:$4 sm:$0xff]   ;;  %v1427_v7 = vld [vmem:[%s1773_s0 + $0x120] ss:$20 sps:$4 sm:$0xff]  }
  0x18   :  { %1160 = vmatpush3.bf16.msra.mxu0 %v1363_v22  ;;  %v1415_v0 = vld [vmem:[%s1773_s0 + $0xf4] ss:$20 sps:$4 sm:$0xff]   ;;  %v1422_v4 = vld [vmem:[%s1773_s0 + $0x11c] ss:$20 sps:$4 sm:$0xff]   ;;  %v1426_v6 = vld [vmem:[%s1773_s0 + $0x118] ss:$20 sps:$4 sm:$0xff]  }
  0x19   :  { %1224 = vmatpush3.bf16.msra.mxu1 %v1364_v23  ;;  %1161 = vmatprep.subr.bf16.mxu0 %v1365_v24  ;;  %v1429_v8 = vld [vmem:[%s1773_s0 + $0x10] ss:$20 sps:$4 sm:$0xff]   ;;  %v1431_v10 = vld [vmem:[%s1773_s0 + $0x38] ss:$20 sps:$4 sm:$0xff]   ;;  %v1433_v12 = vld [vmem:[%s1773_s0 + $0x60] ss:$20 sps:$4 sm:$0xff]  }
  0x1a   :  { %1225 = vmatprep.subr.bf16.mxu1 %v1366_v25  ;;  %v1430_v9 = vld [vmem:[%s1773_s0 + $0xb0] ss:$20 sps:$4 sm:$0xff]   ;;  %v1432_v11 = vld [vmem:[%s1773_s0 + $0xd8] ss:$20 sps:$4 sm:$0xff]   ;;  %v1434_v13 = vld [vmem:[%s1773_s0 + $0x100] ss:$20 sps:$4 sm:$0xff]  }
  0x1b   :  { %v1435_v14 = vld [vmem:[%s1773_s0 + $0x88] ss:$20 sps:$4 sm:$0xff]   ;;  %v1700_v18 = vld [vmem:[%s1774_s2] ss:$0 sm:$0xff] }
  0x1c   :  { %1162 = vmatpush3.bf16.msra.mxu0 %v1367_v26  ;;  %v1436_v15 = vld [vmem:[%s1773_s0 + $0x128] ss:$20 sps:$4 sm:$0xff]  }
  0x1d   :  { %1226 = vmatpush3.bf16.msra.mxu1 %v1368_v27  ;;  %1163 = vmatprep.subr.bf16.mxu0 %v1369_v28 }
  0x1e   :  { %1227 = vmatprep.subr.bf16.mxu1 %v1370_v29 }
  0x20   :  { %1164 = vmatpush3.bf16.msra.mxu0 %v1371_v30 }
  0x21   :  { %1228 = vmatpush3.bf16.msra.mxu1 %v1372_v31  ;;  %1293 = vmatprep.subr.bf16.mxu0 %v1379_v36 }
  0x22   :  { %1325 = vmatprep.subr.bf16.mxu1 %v1379_v36 }
  0x23   :  { %631 = vmatmul.mubr.bf16.vlgmr.msra.gmra.mrb[0].mxu0 %v1373_v32 }
  0x24   :  { %728 = vmatmul.mubr.bf16.vlgmr.msra.gmra.mrb[0].mxu1 %v1376_v34  ;;  %1294 = vmatpush3.bf16.msra.mxu0 %v1379_v36 }
  0x25   :  { %1333 = vmatpush3.bf16.msra.mxu1 %v1379_v36  ;;  %638 = vmatprep.mubr.bf16.mxu0 %v1380_v37 }
  0x26   :  { %735 = vmatprep.mubr.bf16.mxu1 %v1382_v38  ;;  %1295 = vmatprep.subr.bf16.mxu0 %v1386_v39 }
  0x27   :  { %1326 = vmatprep.subr.bf16.mxu1 %v1386_v39 }
  0x28   :  { %1296 = vmatpush3.bf16.msra.mxu0 %v1386_v39 }
  0x29   :  { %1334 = vmatpush3.bf16.msra.mxu1 %v1386_v39  ;;  %1297 = vmatprep.subr.bf16.mxu0 %v1393_v44 }
  0x2a   :  { %1327 = vmatprep.subr.bf16.mxu1 %v1393_v44 }
  0x2b   :  { %639 = vmatmul.mubr.bf16.gmra.mrb[4].mxu0 %v1384_v40 }
  0x2c   :  { %736 = vmatmul.mubr.bf16.gmra.mrb[4].mxu1 %v1385_v41  ;;  %646 = vmatprep.mubr.bf16.mxu0 %v1387_v42 }
  0x2d   :  { %743 = vmatprep.mubr.bf16.mxu1 %v1389_v43  ;;  %1298 = vmatpush3.bf16.msra.mxu0 %v1393_v44 }
  0x2e   :  { %1335 = vmatpush3.bf16.msra.mxu1 %v1393_v44  ;;  %1299 = vmatprep.subr.bf16.mxu0 %v1400_v45 }
  0x2f   :  { %1328 = vmatprep.subr.bf16.mxu1 %v1400_v45 }
  0x31   :  { %1300 = vmatpush3.bf16.msra.mxu0 %v1400_v45 }
  0x32   :  { %1336 = vmatpush3.bf16.msra.mxu1 %v1400_v45  ;;  %1301 = vmatprep.subr.bf16.mxu0 %v1407_v50 }
  0x33   :  { %647 = vmatmul.mubr.bf16.gmra.mrb[8].mxu0 %v1391_v46  ;;  %1329 = vmatprep.subr.bf16.mxu1 %v1407_v50 }
  0x34   :  { %744 = vmatmul.mubr.bf16.gmra.mrb[8].mxu1 %v1392_v47  ;;  %654 = vmatprep.mubr.bf16.mxu0 %v1394_v48 }
  0x35   :  { %751 = vmatprep.mubr.bf16.mxu1 %v1396_v49  ;;  %1302 = vmatpush3.bf16.msra.mxu0 %v1407_v50 }
  0x36   :  { %1337 = vmatpush3.bf16.msra.mxu1 %v1407_v50  ;;  %1303 = vmatprep.subr.bf16.mxu0 %v1414_v51 }
  0x37   :  { %1330 = vmatprep.subr.bf16.mxu1 %v1414_v51 }
  0x39   :  { %1304 = vmatpush3.bf16.msra.mxu0 %v1414_v51 }
  0x3a   :  { %1338 = vmatpush3.bf16.msra.mxu1 %v1414_v51  ;;  %1305 = vmatprep.subr.bf16.mxu0 %v1421_v55 }
  0x3b   :  { %655 = vmatmul.mubr.bf16.gmra.mrb[12].mxu0 %v1398_v52  ;;  %1331 = vmatprep.subr.bf16.mxu1 %v1421_v55 }
  0x3c   :  { %752 = vmatmul.mubr.bf16.gmra.mrb[12].mxu1 %v1399_v53  ;;  %662 = vmatprep.mubr.bf16.mxu0 %v1401_v54 }
  0x3d   :  { %759 = vmatprep.mubr.bf16.mxu1 %v1403_v56  ;;  %1306 = vmatpush3.bf16.msra.mxu0 %v1421_v55 }
  0x3e   :  { %1339 = vmatpush3.bf16.msra.mxu1 %v1421_v55  ;;  %1307 = vmatprep.subr.bf16.mxu0 %v1428_v57 }
  0x3f   :  { %1332 = vmatprep.subr.bf16.mxu1 %v1428_v57 }
  0x41   :  { %1308 = vmatpush3.bf16.msra.mxu0 %v1428_v57 }
  0x42   :  { %1340 = vmatpush3.bf16.msra.mxu1 %v1428_v57 }
  0x43   :  { %663 = vmatmul.mubr.bf16.gmra.mrb[16].mxu0 %v1405_v58 }
  0x44   :  { %760 = vmatmul.mubr.bf16.gmra.mrb[16].mxu1 %v1406_v59  ;;  %670 = vmatprep.mubr.bf16.mxu0 %v1408_v60 }
  0x45   :  { %767 = vmatprep.mubr.bf16.mxu1 %v1410_v61 }
  0x4b   :  { %671 = vmatmul.mubr.bf16.gmra.mrb[20].mxu0 %v1412_v62 }
  0x4c   :  { %768 = vmatmul.mubr.bf16.gmra.mrb[20].mxu1 %v1413_v63  ;;  %678 = vmatprep.mubr.bf16.mxu0 %v1415_v0 }
  0x4d   :  { %775 = vmatprep.mubr.bf16.mxu1 %v1417_v1 }
  0x53   :  { %679 = vmatmul.mubr.bf16.gmra.mrb[24].mxu0 %v1419_v2 }
  0x54   :  { %776 = vmatmul.mubr.bf16.gmra.mrb[24].mxu1 %v1420_v3  ;;  %686 = vmatprep.mubr.bf16.mxu0 %v1422_v4 }
  0x55   :  { %783 = vmatprep.mubr.bf16.mxu1 %v1424_v5 }
  0x5b   :  { %687 = vmatmul.mubr.bf16.gmra.mrb[28].mxu0 %v1426_v6 }
  0x5c   :  { %784 = vmatmul.mubr.bf16.gmra.mrb[28].mxu1 %v1427_v7  ;;  %1309 = vmatprep.mubr.bf16.mxu0 %v1429_v8 }
  0x5d   :  { %1317 = vmatprep.mubr.bf16.mxu1 %v1430_v9 }
  0x63   :  { %1310 = vmatmul.mubr.bf16.vlgmr.msra.gmra.mrb[32].mxu0 %v1431_v10 }
  0x64   :  { %1318 = vmatmul.mubr.bf16.vlgmr.msra.gmra.mrb[32].mxu1 %v1432_v11  ;;  %1313 = vmatprep.mubr.bf16.mxu0 %v1433_v12 }
  0x65   :  { %1321 = vmatprep.mubr.bf16.mxu1 %v1434_v13 }
  0x6b   :  { %1314 = vmatmul.mubr.bf16.gmra.mrb[36].mxu0 %v1435_v14 }
  0x6c   :  { %1322 = vmatmul.mubr.bf16.gmra.mrb[36].mxu1 %v1436_v15 }
  0xf6   :  { %v1165_v16 = vpop.f32.mrb[0].mxu0 }
  0xf7   :  { %v1229_v17 = vpop.f32.mrb[0].mxu1  ;;  %v1166_v19 = vpop.f32.mrb[1].mxu0 }
  0xf8   :  { %v1167_v20 = vadd.f32 %v1166_v19, %v1165_v16  ;;  %v1230_v21 = vpop.f32.mrb[1].mxu1  ;;  %v1168_v22 = vpop.f32.mrb[2].mxu0 }
  0xf9   :  { %v1231_v23 = vadd.f32 %v1230_v21, %v1229_v17  ;;  %v1232_v24 = vpop.f32.mrb[2].mxu1  ;;  %v1169_v25 = vpop.f32.mrb[3].mxu0 }
  0xfa   :  { %v633_v26 = vadd.f32 %v1167_v20, %v1700_v18  ;;  %v1170_v27 = vadd.f32 %v1169_v25, %v1168_v22  ;;  %v1233_v28 = vpop.f32.mrb[3].mxu1 }
  0xfb   :  { %v1234_v29 = vadd.f32 %v1233_v28, %v1232_v24 }
  0xfc   :  { %v636_v30 = vadd.f32 %v1170_v27, %v1700_v18  ;;  %v1704_v31 = vadd.f32 %v1231_v23, %v633_v26 }
  0xfe   :  { %v1171_v32 = vpop.f32.mrb[4].mxu0  ;;  %v1706_v33 = vadd.f32 %v1234_v29, %v636_v30 }
  0xff   :  { %v1235_v34 = vpop.f32.mrb[4].mxu1  ;;  %v1172_v35 = vpop.f32.mrb[5].mxu0 }
 0x100   :  { %v1173_v36 = vadd.f32 %v1172_v35, %v1171_v32  ;;  %v1236_v37 = vpop.f32.mrb[5].mxu1  ;;  %v1174_v38 = vpop.f32.mrb[6].mxu0 }
 0x101   :  { %v1237_v39 = vadd.f32 %v1236_v37, %v1235_v34  ;;  %v1238_v40 = vpop.f32.mrb[6].mxu1  ;;  %v1175_v41 = vpop.f32.mrb[7].mxu0 }
 0x102   :  { %v641_v42 = vadd.f32 %v1173_v36, %v1700_v18  ;;  %v1176_v43 = vadd.f32 %v1175_v41, %v1174_v38  ;;  %v1239_v44 = vpop.f32.mrb[7].mxu1 }
 0x103   :  { %v1240_v45 = vadd.f32 %v1239_v44, %v1238_v40 }
 0x104   :  { %v644_v46 = vadd.f32 %v1176_v43, %v1700_v18  ;;  %v1710_v47 = vadd.f32 %v1237_v39, %v641_v42 }
 0x106   :  { %v1177_v48 = vpop.f32.mrb[8].mxu0  ;;  %v1712_v49 = vadd.f32 %v1240_v45, %v644_v46 }
 0x107   :  { %v1241_v50 = vpop.f32.mrb[8].mxu1  ;;  %v1178_v51 = vpop.f32.mrb[9].mxu0 }
 0x108   :  { %v1179_v52 = vadd.f32 %v1178_v51, %v1177_v48  ;;  %v1242_v53 = vpop.f32.mrb[9].mxu1  ;;  %v1180_v54 = vpop.f32.mrb[10].mxu0 }
 0x109   :  { %v1243_v55 = vadd.f32 %v1242_v53, %v1241_v50  ;;  %v1244_v56 = vpop.f32.mrb[10].mxu1  ;;  %v1181_v57 = vpop.f32.mrb[11].mxu0 }
 0x10a   :  { %v649_v58 = vadd.f32 %v1179_v52, %v1700_v18  ;;  %v1182_v59 = vadd.f32 %v1181_v57, %v1180_v54  ;;  %v1245_v60 = vpop.f32.mrb[11].mxu1 }
 0x10b   :  { %v1246_v61 = vadd.f32 %v1245_v60, %v1244_v56 }
 0x10c   :  { %v652_v62 = vadd.f32 %v1182_v59, %v1700_v18  ;;  %v1716_v63 = vadd.f32 %v1243_v55, %v649_v58 }
 0x10e   :  { %v1183_v0 = vpop.f32.mrb[12].mxu0  ;;  %v1718_v1 = vadd.f32 %v1246_v61, %v652_v62 }
 0x10f   :  { %v1247_v2 = vpop.f32.mrb[12].mxu1  ;;  %v1184_v3 = vpop.f32.mrb[13].mxu0 }
 0x110   :  { %v1185_v4 = vadd.f32 %v1184_v3, %v1183_v0  ;;  %v1248_v5 = vpop.f32.mrb[13].mxu1  ;;  %v1186_v6 = vpop.f32.mrb[14].mxu0 }
 0x111   :  { %v1249_v7 = vadd.f32 %v1248_v5, %v1247_v2  ;;  %v1250_v8 = vpop.f32.mrb[14].mxu1  ;;  %v1187_v9 = vpop.f32.mrb[15].mxu0 }
 0x112   :  { %v657_v10 = vadd.f32 %v1185_v4, %v1700_v18  ;;  %v1188_v11 = vadd.f32 %v1187_v9, %v1186_v6  ;;  %v1251_v12 = vpop.f32.mrb[15].mxu1 }
 0x113   :  { %v1252_v13 = vadd.f32 %v1251_v12, %v1250_v8 }
 0x114   :  { %v660_v14 = vadd.f32 %v1188_v11, %v1700_v18  ;;  %v1722_v15 = vadd.f32 %v1249_v7, %v657_v10 }
 0x116   :  { %v1189_v16 = vpop.f32.mrb[16].mxu0  ;;  %v1724_v17 = vadd.f32 %v1252_v13, %v660_v14 }
 0x117   :  { %v1253_v19 = vpop.f32.mrb[16].mxu1  ;;  %v1190_v20 = vpop.f32.mrb[17].mxu0 }
 0x118   :  { %v1191_v21 = vadd.f32 %v1190_v20, %v1189_v16  ;;  %v1254_v22 = vpop.f32.mrb[17].mxu1  ;;  %v1192_v23 = vpop.f32.mrb[18].mxu0 }
 0x119   :  { %v1255_v24 = vadd.f32 %v1254_v22, %v1253_v19  ;;  %v1256_v25 = vpop.f32.mrb[18].mxu1  ;;  %v1193_v26 = vpop.f32.mrb[19].mxu0 }
 0x11a   :  { %v665_v27 = vadd.f32 %v1191_v21, %v1700_v18  ;;  %v1194_v28 = vadd.f32 %v1193_v26, %v1192_v23  ;;  %v1257_v29 = vpop.f32.mrb[19].mxu1 }
 0x11b   :  { %v1258_v30 = vadd.f32 %v1257_v29, %v1256_v25 }
 0x11c   :  { %v668_v32 = vadd.f32 %v1194_v28, %v1700_v18  ;;  %v762_v34 = vadd.f32 %v1255_v24, %v665_v27 }
 0x11e   :  { %v1195_v35 = vpop.f32.mrb[20].mxu0  ;;  %v1728_v36 = vadd.f32 %v1258_v30, %v668_v32 }
 0x11f   :  { %v1259_v37 = vpop.f32.mrb[20].mxu1  ;;  %v1196_v38 = vpop.f32.mrb[21].mxu0 }
 0x120   :  { %v1197_v39 = vadd.f32 %v1196_v38, %v1195_v35  ;;  %v1260_v40 = vpop.f32.mrb[21].mxu1  ;;  %v1198_v41 = vpop.f32.mrb[22].mxu0 }
 0x121   :  { %v1261_v42 = vadd.f32 %v1260_v40, %v1259_v37  ;;  %v1262_v43 = vpop.f32.mrb[22].mxu1  ;;  %v1199_v44 = vpop.f32.mrb[23].mxu0 }
 0x122   :  { %v673_v45 = vadd.f32 %v1197_v39, %v1700_v18  ;;  %v1200_v46 = vadd.f32 %v1199_v44, %v1198_v41  ;;  %v1263_v48 = vpop.f32.mrb[23].mxu1 }
 0x123   :  { %v1264_v50 = vadd.f32 %v1263_v48, %v1262_v43 }
 0x124   :  { %v676_v51 = vadd.f32 %v1200_v46, %v1700_v18  ;;  %v770_v52 = vadd.f32 %v1261_v42, %v673_v45 }
 0x126   :  { %v1201_v53 = vpop.f32.mrb[24].mxu0  ;;  %v773_v54 = vadd.f32 %v1264_v50, %v676_v51 }
 0x127   :  { %v1265_v55 = vpop.f32.mrb[24].mxu1  ;;  %v1202_v56 = vpop.f32.mrb[25].mxu0 }
 0x128   :  { %v1203_v57 = vadd.f32 %v1202_v56, %v1201_v53  ;;  %v1266_v58 = vpop.f32.mrb[25].mxu1  ;;  %v1204_v59 = vpop.f32.mrb[26].mxu0 }
 0x129   :  { %v1267_v60 = vadd.f32 %v1266_v58, %v1265_v55  ;;  %v1268_v61 = vpop.f32.mrb[26].mxu1  ;;  %v1205_v62 = vpop.f32.mrb[27].mxu0 }
 0x12a   :  { %v681_v0 = vadd.f32 %v1203_v57, %v1700_v18  ;;  %v1206_v2 = vadd.f32 %v1205_v62, %v1204_v59  ;;  %v1269_v3 = vpop.f32.mrb[27].mxu1 }
 0x12b   :  { %v1270_v4 = vadd.f32 %v1269_v3, %v1268_v61 }
 0x12c   :  { %v684_v5 = vadd.f32 %v1206_v2, %v1700_v18  ;;  %v778_v6 = vadd.f32 %v1267_v60, %v681_v0 }
 0x12e   :  { %v1207_v7 = vpop.f32.mrb[28].mxu0  ;;  %v1734_v8 = vadd.f32 %v1270_v4, %v684_v5 }
 0x12f   :  { %v1271_v9 = vpop.f32.mrb[28].mxu1  ;;  %v1208_v10 = vpop.f32.mrb[29].mxu0 }
 0x130   :  { %v1209_v11 = vadd.f32 %v1208_v10, %v1207_v7  ;;  %v1272_v12 = vpop.f32.mrb[29].mxu1  ;;  %v1210_v13 = vpop.f32.mrb[30].mxu0 }
 0x131   :  { %v1273_v14 = vadd.f32 %v1272_v12, %v1271_v9  ;;  %v1274_v16 = vpop.f32.mrb[30].mxu1  ;;  %v1211_v19 = vpop.f32.mrb[31].mxu0 }
 0x132   :  { %v689_v20 = vadd.f32 %v1209_v11, %v1700_v18  ;;  %v1212_v21 = vadd.f32 %v1211_v19, %v1210_v13  ;;  %v1275_v22 = vpop.f32.mrb[31].mxu1 }
 0x133   :  { %v1276_v23 = vadd.f32 %v1275_v22, %v1274_v16 }
 0x134   :  { %v692_v24 = vadd.f32 %v1212_v21, %v1700_v18  ;;  %v786_v25 = vadd.f32 %v1273_v14, %v689_v20 }
 0x136   :  { %v1311_v26 = vpop.f32.mrb[32].mxu0  ;;  %v789_v27 = vadd.f32 %v1276_v23, %v692_v24 }
 0x137   :  { %v835_v28 = vadd.f32 %v1311_v26, %v1710_v47  ;;  %v1319_v29 = vpop.f32.mrb[32].mxu1  ;;  %v826_v30 = vpop.f32.mrb[33].mxu0 }
 0x138   :  { %v867_v32 = vadd.f32 %v1319_v29, %v770_v52  ;;  %v827_v35 = vadd.f32 %v826_v30, %v1704_v31  ;;  %v858_v37 = vpop.f32.mrb[33].mxu1  ;;  %v1312_v38 = vpop.f32.mrb[34].mxu0 }
 0x139   :  { %v859_v39 = vadd.f32 %v858_v37, %v762_v34  ;;  %v838_v40 = vadd.f32 %v1312_v38, %v1712_v49  ;;  %v1320_v41 = vpop.f32.mrb[34].mxu1  ;;  %v829_v42 = vpop.f32.mrb[35].mxu0  ;;  %v891_v45 = vmax.f32 %v835_v28, 0.0 }
 0x13a   :  { %v870_v43 = vadd.f32 %v1320_v41, %v773_v54  ;;  %v830_v18 = vadd.f32 %v829_v42, %v1706_v33  ;;  %v861_v44 = vpop.f32.mrb[35].mxu1  ;;  %v899_v48 = vmax.f32 %v867_v32, 0.0  ;;  %v889_v50 = vmax.f32 %v827_v35, 0.0 }
 0x13b   :  { %v892_v46 = vmax.f32 %v838_v40, 0.0  ;;  %v862_v47 = vadd.f32 %v861_v44, %v1728_v36  ;;  %v897_v31 = vmax.f32 %v859_v39, 0.0 }
 0x13c   :  { %v900_v51 = vmax.f32 %v870_v43, 0.0  ;;  %v890_v52 = vmax.f32 %v830_v18, 0.0 }
 0x13d   :  { %v1110_v53 = vpack.c.bf16 %v892_v46, %v891_v45  ;;  %v898_v55 = vmax.f32 %v862_v47, 0.0 }
 0x13e   :  { %v1130_v34 = vpack.c.bf16 %v900_v51, %v899_v48  ;;  %v1105_v56 = vpack.c.bf16 %v890_v52, %v889_v50  ;;  %v1315_v49 = vpop.f32.mrb[36].mxu0 }
 0x13f   :  { %1142 = vst [vmem:[%s1775_s3 + $0x8] sm:$0xff] %v1110_v53   ;;  %v1125_v33 = vpack.c.bf16 %v898_v55, %v897_v31  ;;  %v851_v54 = vadd.f32 %v1315_v49, %v1722_v15  ;;  %v1323_v57 = vpop.f32.mrb[36].mxu1  ;;  %v842_v58 = vpop.f32.mrb[37].mxu0 }
 0x140   :  { %1146 = vst [vmem:[%s1775_s3 + $0x28] sm:$0xff] %v1130_v34   ;;  %1106 = vst [vmem:[%s1775_s3] sm:$0xff] %v1105_v56   ;;  %v883_v36 = vadd.f32 %v1323_v57, %v786_v25  ;;  %v843_v59 = vadd.f32 %v842_v58, %v1716_v63  ;;  %v874_v60 = vpop.f32.mrb[37].mxu1  ;;  %v1316_v61 = vpop.f32.mrb[38].mxu0 }
 0x141   :  { %1145 = vst [vmem:[%s1775_s3 + $0x20] sm:$0xff] %v1125_v33   ;;  %v875_v15 = vadd.f32 %v874_v60, %v778_v6  ;;  %v854_v62 = vadd.f32 %v1316_v61, %v1724_v17  ;;  %v1324_v0 = vpop.f32.mrb[38].mxu1  ;;  %v845_v2 = vpop.f32.mrb[39].mxu0  ;;  %v895_v7 = vmax.f32 %v851_v54, 0.0 }
 0x142   :  { %v886_v3 = vadd.f32 %v1324_v0, %v789_v27  ;;  %v846_v4 = vadd.f32 %v845_v2, %v1718_v1  ;;  %v877_v5 = vpop.f32.mrb[39].mxu1  ;;  %v903_v63 = vmax.f32 %v883_v36, 0.0  ;;  %v893_v11 = vmax.f32 %v843_v59, 0.0 }
 0x143   :  { %v896_v9 = vmax.f32 %v854_v62, 0.0  ;;  %v878_v10 = vadd.f32 %v877_v5, %v1734_v8  ;;  %v901_v14 = vmax.f32 %v875_v15, 0.0 }
 0x144   :  { %v904_v12 = vmax.f32 %v886_v3, 0.0  ;;  %v894_v13 = vmax.f32 %v846_v4, 0.0 }
 0x145   :  { %v1120_v16 = vpack.c.bf16 %v896_v9, %v895_v7  ;;  %v902_v19 = vmax.f32 %v878_v10, 0.0 }
 0x146   :  { %v1140_v6 = vpack.c.bf16 %v904_v12, %v903_v63  ;;  %v1115_v20 = vpack.c.bf16 %v894_v13, %v893_v11 }
 0x147   :  { %1144 = vst [vmem:[%s1775_s3 + $0x18] sm:$0xff] %v1120_v16   ;;  %v1135_v17 = vpack.c.bf16 %v902_v19, %v901_v14 }
 0x148   :  { %1148 = vst [vmem:[%s1775_s3 + $0x38] sm:$0xff] %v1140_v6   ;;  %1143 = vst [vmem:[%s1775_s3 + $0x10] sm:$0xff] %v1115_v20  }
 0x149   :  { %1147 = vst [vmem:[%s1775_s3 + $0x30] sm:$0xff] %v1135_v17  }

// kernel: resnet_feature_extractor.48
= control target key start
LH: loop header
LB: loop body
LE: loop exit
PB: predicated region body
PF: predicated region fallthrough
CT: control target
= control target key end

     0   :  { %s836_s1 = inlined_call_operand.vmem [shape: bf16[256,128], index: 1, kind: input, shape index: {}]   ;;  %s837_s0 = inlined_call_operand.vmem [shape: bf16[128,256], index: 0, kind: input, shape index: {}]   ;;  %s838_s2 = inlined_call_operand.vmem [shape: f32[1,128], index: 2, kind: input, shape index: {}]   ;;  %s839_s3 = inlined_call_operand.vmem [shape: bf16[128,128], index: 3, kind: output, shape index: {}]  }
   0x1   :  { %v635_v0 = vld [vmem:[%s836_s1 + $0x40] sm:$0xff]   ;;  %v637_v2 = vld [vmem:[%s836_s1 + $0x48] sm:$0xff]   ;;  %v639_v4 = vld [vmem:[%s836_s1 + $0x50] sm:$0xff]  }
   0x2   :  { %v636_v1 = vld [vmem:[%s836_s1] sm:$0xff]   ;;  %555 = vmatprep.subr.bf16.mxu0 %v635_v0  ;;  %619 = vmatprep.subr.bf16.mxu1 %v635_v0  ;;  %v638_v3 = vld [vmem:[%s836_s1 + $0x8] sm:$0xff]   ;;  %v640_v5 = vld [vmem:[%s836_s1 + $0x10] sm:$0xff]  }
   0x3   :  { %556 = vmatpush3.bf16.msra.mxu0 %v636_v1  ;;  %627 = vmatpush3.bf16.msra.mxu1 %v636_v1  ;;  %v641_v6 = vld [vmem:[%s836_s1 + $0x58] sm:$0xff]   ;;  %v643_v8 = vld [vmem:[%s836_s1 + $0x60] sm:$0xff]   ;;  %v645_v10 = vld [vmem:[%s836_s1 + $0x68] sm:$0xff]  }
   0x4   :  { %557 = vmatprep.subr.bf16.mxu0 %v637_v2  ;;  %620 = vmatprep.subr.bf16.mxu1 %v637_v2  ;;  %v642_v7 = vld [vmem:[%s836_s1 + $0x18] sm:$0xff]   ;;  %v644_v9 = vld [vmem:[%s836_s1 + $0x20] sm:$0xff]   ;;  %v646_v13 = vld [vmem:[%s836_s1 + $0x28] sm:$0xff]  }
   0x5   :  { %v653_v11 = vld [vmem:[%s837_s0 + $0x4] ss:$8 sps:$4 sm:$0xff]   ;;  %v647_v14 = vld [vmem:[%s836_s1 + $0x70] sm:$0xff]   ;;  %v649_v16 = vld [vmem:[%s836_s1 + $0x78] sm:$0xff]  }
   0x6   :  { %v656_v12 = vld [vmem:[%s837_s0 + $0x44] ss:$8 sps:$4 sm:$0xff]   ;;  %278 = vmatprep.mubr.bf16.mxu0 %v653_v11  ;;  %v648_v15 = vld [vmem:[%s836_s1 + $0x30] sm:$0xff]   ;;  %v650_v17 = vld [vmem:[%s836_s1 + $0x38] sm:$0xff]  }
   0x7   :  { %558 = vmatpush3.bf16.msra.mxu0 %v638_v3  ;;  %628 = vmatpush3.bf16.msra.mxu1 %v638_v3  ;;  %v651_v18 = vld [vmem:[%s837_s0] ss:$8 sps:$4 sm:$0xff]   ;;  %v657_v20 = vld [vmem:[%s837_s0 + $0x14] ss:$8 sps:$4 sm:$0xff]   ;;  %v661_v22 = vld [vmem:[%s837_s0 + $0x10] ss:$8 sps:$4 sm:$0xff]  }
   0x8   :  { %559 = vmatprep.subr.bf16.mxu0 %v639_v4  ;;  %621 = vmatprep.subr.bf16.mxu1 %v639_v4  ;;  %v654_v19 = vld [vmem:[%s837_s0 + $0x40] ss:$8 sps:$4 sm:$0xff]   ;;  %v659_v21 = vld [vmem:[%s837_s0 + $0x54] ss:$8 sps:$4 sm:$0xff]   ;;  %v662_v23 = vld [vmem:[%s837_s0 + $0x50] ss:$8 sps:$4 sm:$0xff]  }
   0x9   :  { %310 = vmatprep.mubr.bf16.mxu1 %v656_v12  ;;  %v663_v24 = vld [vmem:[%s837_s0 + $0x24] ss:$8 sps:$4 sm:$0xff]   ;;  %v667_v26 = vld [vmem:[%s837_s0 + $0x20] ss:$8 sps:$4 sm:$0xff]   ;;  %v669_v28 = vld [vmem:[%s837_s0 + $0x34] ss:$8 sps:$4 sm:$0xff]  }
   0xa   :  { %v665_v25 = vld [vmem:[%s837_s0 + $0x64] ss:$8 sps:$4 sm:$0xff]   ;;  %v668_v27 = vld [vmem:[%s837_s0 + $0x60] ss:$8 sps:$4 sm:$0xff]   ;;  %v671_v29 = vld [vmem:[%s837_s0 + $0x74] ss:$8 sps:$4 sm:$0xff]  }
   0xb   :  { %560 = vmatpush3.bf16.msra.mxu0 %v640_v5  ;;  %629 = vmatpush3.bf16.msra.mxu1 %v640_v5  ;;  %v673_v30 = vld [vmem:[%s837_s0 + $0x30] ss:$8 sps:$4 sm:$0xff]   ;;  %v794_v34 = vld [vmem:[%s838_s2] ss:$0 sm:$0xff] }
   0xc   :  { %561 = vmatprep.subr.bf16.mxu0 %v641_v6  ;;  %622 = vmatprep.subr.bf16.mxu1 %v641_v6  ;;  %v674_v31 = vld [vmem:[%s837_s0 + $0x70] ss:$8 sps:$4 sm:$0xff]  }
   0xf   :  { %562 = vmatpush3.bf16.msra.mxu0 %v642_v7  ;;  %630 = vmatpush3.bf16.msra.mxu1 %v642_v7 }
  0x10   :  { %563 = vmatprep.subr.bf16.mxu0 %v643_v8  ;;  %623 = vmatprep.subr.bf16.mxu1 %v643_v8 }
  0x13   :  { %564 = vmatpush3.bf16.msra.mxu0 %v644_v9  ;;  %631 = vmatpush3.bf16.msra.mxu1 %v644_v9 }
  0x14   :  { %565 = vmatprep.subr.bf16.mxu0 %v645_v10  ;;  %624 = vmatprep.subr.bf16.mxu1 %v645_v10 }
  0x17   :  { %566 = vmatpush3.bf16.msra.mxu0 %v646_v13  ;;  %632 = vmatpush3.bf16.msra.mxu1 %v646_v13 }
  0x18   :  { %567 = vmatprep.subr.bf16.mxu0 %v647_v14  ;;  %625 = vmatprep.subr.bf16.mxu1 %v647_v14 }
  0x1b   :  { %568 = vmatpush3.bf16.msra.mxu0 %v648_v15  ;;  %633 = vmatpush3.bf16.msra.mxu1 %v648_v15 }
  0x1c   :  { %569 = vmatprep.subr.bf16.mxu0 %v649_v16  ;;  %626 = vmatprep.subr.bf16.mxu1 %v649_v16 }
  0x1f   :  { %570 = vmatpush3.bf16.msra.mxu0 %v650_v17  ;;  %634 = vmatpush3.bf16.msra.mxu1 %v650_v17 }
  0x22   :  { %279 = vmatmul.mubr.bf16.vlgmr.msra.gmra.mrb[0].mxu0 %v651_v18  ;;  %311 = vmatmul.mubr.bf16.vlgmr.msra.gmra.mrb[0].mxu1 %v654_v19 }
  0x23   :  { %286 = vmatprep.mubr.bf16.mxu0 %v657_v20  ;;  %318 = vmatprep.mubr.bf16.mxu1 %v659_v21 }
  0x2a   :  { %287 = vmatmul.mubr.bf16.gmra.mrb[4].mxu0 %v661_v22  ;;  %319 = vmatmul.mubr.bf16.gmra.mrb[4].mxu1 %v662_v23 }
  0x2b   :  { %294 = vmatprep.mubr.bf16.mxu0 %v663_v24  ;;  %326 = vmatprep.mubr.bf16.mxu1 %v665_v25 }
  0x32   :  { %295 = vmatmul.mubr.bf16.gmra.mrb[8].mxu0 %v667_v26  ;;  %327 = vmatmul.mubr.bf16.gmra.mrb[8].mxu1 %v668_v27 }
  0x33   :  { %302 = vmatprep.mubr.bf16.mxu0 %v669_v28  ;;  %334 = vmatprep.mubr.bf16.mxu1 %v671_v29 }
  0x3a   :  { %303 = vmatmul.mubr.bf16.gmra.mrb[12].mxu0 %v673_v30  ;;  %335 = vmatmul.mubr.bf16.gmra.mrb[12].mxu1 %v674_v31 }
  0xf5   :  { %v571_v32 = vpop.f32.mrb[0].mxu0  ;;  %v595_v33 = vpop.f32.mrb[0].mxu1 }
  0xf6   :  { %v572_v35 = vpop.f32.mrb[1].mxu0  ;;  %v596_v36 = vpop.f32.mrb[1].mxu1 }
  0xf7   :  { %v573_v37 = vadd.f32 %v572_v35, %v571_v32  ;;  %v597_v38 = vadd.f32 %v596_v36, %v595_v33  ;;  %v574_v39 = vpop.f32.mrb[2].mxu0  ;;  %v598_v40 = vpop.f32.mrb[2].mxu1 }
  0xf8   :  { %v575_v41 = vpop.f32.mrb[3].mxu0  ;;  %v599_v42 = vpop.f32.mrb[3].mxu1 }
  0xf9   :  { %v281_v43 = vadd.f32 %v573_v37, %v794_v34  ;;  %v313_v44 = vadd.f32 %v597_v38, %v794_v34  ;;  %v576_v45 = vadd.f32 %v575_v41, %v574_v39  ;;  %v600_v46 = vadd.f32 %v599_v42, %v598_v40 }
  0xfb   :  { %v284_v47 = vadd.f32 %v576_v45, %v794_v34  ;;  %v316_v48 = vadd.f32 %v600_v46, %v794_v34  ;;  %v343_v49 = vmax.f32 %v281_v43, 0.0  ;;  %v351_v50 = vmax.f32 %v313_v44, 0.0 }
  0xfd   :  { %v344_v51 = vmax.f32 %v284_v47, 0.0  ;;  %v352_v52 = vmax.f32 %v316_v48, 0.0  ;;  %v577_v53 = vpop.f32.mrb[4].mxu0  ;;  %v601_v54 = vpop.f32.mrb[4].mxu1 }
  0xfe   :  { %v578_v55 = vpop.f32.mrb[5].mxu0  ;;  %v602_v56 = vpop.f32.mrb[5].mxu1 }
  0xff   :  { %v511_v57 = vpack.c.bf16 %v344_v51, %v343_v49  ;;  %v531_v58 = vpack.c.bf16 %v352_v52, %v351_v50  ;;  %v579_v59 = vadd.f32 %v578_v55, %v577_v53  ;;  %v603_v60 = vadd.f32 %v602_v56, %v601_v54  ;;  %v580_v61 = vpop.f32.mrb[6].mxu0  ;;  %v604_v62 = vpop.f32.mrb[6].mxu1 }
 0x100   :  { %v581_v63 = vpop.f32.mrb[7].mxu0  ;;  %v605_v0 = vpop.f32.mrb[7].mxu1 }
 0x101   :  { %512 = vst [vmem:[%s839_s3] sm:$0xff] %v511_v57   ;;  %551 = vst [vmem:[%s839_s3 + $0x20] sm:$0xff] %v531_v58   ;;  %v289_v1 = vadd.f32 %v579_v59, %v794_v34  ;;  %v321_v2 = vadd.f32 %v603_v60, %v794_v34  ;;  %v582_v3 = vadd.f32 %v581_v63, %v580_v61 }
 0x102   :  { %v606_v4 = vadd.f32 %v605_v0, %v604_v62 }
 0x103   :  { %v292_v5 = vadd.f32 %v582_v3, %v794_v34  ;;  %v345_v7 = vmax.f32 %v289_v1, 0.0  ;;  %v353_v8 = vmax.f32 %v321_v2, 0.0 }
 0x104   :  { %v324_v6 = vadd.f32 %v606_v4, %v794_v34 }
 0x105   :  { %v346_v9 = vmax.f32 %v292_v5, 0.0  ;;  %v583_v11 = vpop.f32.mrb[8].mxu0  ;;  %v607_v12 = vpop.f32.mrb[8].mxu1 }
 0x106   :  { %v354_v10 = vmax.f32 %v324_v6, 0.0  ;;  %v584_v13 = vpop.f32.mrb[9].mxu0  ;;  %v608_v14 = vpop.f32.mrb[9].mxu1 }
 0x107   :  { %v516_v15 = vpack.c.bf16 %v346_v9, %v345_v7  ;;  %v585_v17 = vadd.f32 %v584_v13, %v583_v11  ;;  %v609_v18 = vadd.f32 %v608_v14, %v607_v12  ;;  %v586_v19 = vpop.f32.mrb[10].mxu0  ;;  %v610_v20 = vpop.f32.mrb[10].mxu1 }
 0x108   :  { %v536_v16 = vpack.c.bf16 %v354_v10, %v353_v8  ;;  %v587_v21 = vpop.f32.mrb[11].mxu0  ;;  %v611_v22 = vpop.f32.mrb[11].mxu1 }
 0x109   :  { %548 = vst [vmem:[%s839_s3 + $0x8] sm:$0xff] %v516_v15   ;;  %v297_v23 = vadd.f32 %v585_v17, %v794_v34  ;;  %v329_v24 = vadd.f32 %v609_v18, %v794_v34  ;;  %v588_v25 = vadd.f32 %v587_v21, %v586_v19  ;;  %v612_v26 = vadd.f32 %v611_v22, %v610_v20 }
 0x10a   :  { %552 = vst [vmem:[%s839_s3 + $0x28] sm:$0xff] %v536_v16  }
 0x10b   :  { %v300_v27 = vadd.f32 %v588_v25, %v794_v34  ;;  %v332_v28 = vadd.f32 %v612_v26, %v794_v34  ;;  %v347_v29 = vmax.f32 %v297_v23, 0.0  ;;  %v355_v30 = vmax.f32 %v329_v24, 0.0 }
 0x10d   :  { %v348_v31 = vmax.f32 %v300_v27, 0.0  ;;  %v356_v32 = vmax.f32 %v332_v28, 0.0  ;;  %v589_v33 = vpop.f32.mrb[12].mxu0  ;;  %v613_v35 = vpop.f32.mrb[12].mxu1 }
 0x10e   :  { %v590_v36 = vpop.f32.mrb[13].mxu0  ;;  %v614_v37 = vpop.f32.mrb[13].mxu1 }
 0x10f   :  { %v521_v38 = vpack.c.bf16 %v348_v31, %v347_v29  ;;  %v541_v39 = vpack.c.bf16 %v356_v32, %v355_v30  ;;  %v591_v40 = vadd.f32 %v590_v36, %v589_v33  ;;  %v615_v41 = vadd.f32 %v614_v37, %v613_v35  ;;  %v592_v42 = vpop.f32.mrb[14].mxu0  ;;  %v616_v43 = vpop.f32.mrb[14].mxu1 }
 0x110   :  { %v593_v44 = vpop.f32.mrb[15].mxu0  ;;  %v617_v45 = vpop.f32.mrb[15].mxu1 }
 0x111   :  { %549 = vst [vmem:[%s839_s3 + $0x10] sm:$0xff] %v521_v38   ;;  %553 = vst [vmem:[%s839_s3 + $0x30] sm:$0xff] %v541_v39   ;;  %v305_v46 = vadd.f32 %v591_v40, %v794_v34  ;;  %v337_v47 = vadd.f32 %v615_v41, %v794_v34  ;;  %v594_v48 = vadd.f32 %v593_v44, %v592_v42 }
 0x112   :  { %v618_v49 = vadd.f32 %v617_v45, %v616_v43 }
 0x113   :  { %v308_v50 = vadd.f32 %v594_v48, %v794_v34  ;;  %v349_v52 = vmax.f32 %v305_v46, 0.0  ;;  %v357_v53 = vmax.f32 %v337_v47, 0.0 }
 0x114   :  { %v340_v51 = vadd.f32 %v618_v49, %v794_v34 }
 0x115   :  { %v350_v54 = vmax.f32 %v308_v50, 0.0 }
 0x116   :  { %v358_v55 = vmax.f32 %v340_v51, 0.0 }
 0x117   :  { %v526_v56 = vpack.c.bf16 %v350_v54, %v349_v52 }
 0x118   :  { %v546_v57 = vpack.c.bf16 %v358_v55, %v357_v53 }
 0x119   :  { %550 = vst [vmem:[%s839_s3 + $0x18] sm:$0xff] %v526_v56  }
 0x11a   :  { %554 = vst [vmem:[%s839_s3 + $0x38] sm:$0xff] %v546_v57  }

// kernel: resnet_feature_extractor.56
= control target key start
LH: loop header
LB: loop body
LE: loop exit
PB: predicated region body
PF: predicated region fallthrough
CT: control target
= control target key end

     0   :  { %s1092_s12 = smov 0   ;;  %s1094_s13 = smov 0   ;;  %s1286_s0 = inlined_call_operand.vmem [shape: bf16[32,256], index: 0, kind: input, shape index: {}]   ;;  %s1287_s1 = inlined_call_operand.vmem [shape: bf16[256,512], index: 1, kind: input, shape index: {}]   ;;  %s1288_s2 = inlined_call_operand.vmem [shape: f32[1,512], index: 2, kind: input, shape index: {}]   ;;  %s1289_s3 = inlined_call_operand.vmem [shape: bf16[32,512], index: 3, kind: output, shape index: {}]  }
   0x1   :  { %s1096_s14 = smov 0   ;;  %s1098_s15 = smov 0  }
   0x2   :  { %s1100_s16 = smov 0  }
   0x3 LB: > { %s22_s17 = sadd.s32 1, %s1066_s15  ;;  %s843_s18 = sadd.s32 4294967295, %s1070_s16   ;;  %s1070_s16 = sphi %s1100_s16, %s13_s16   ;;  %s1066_s15 = sphi %s1098_s15, %s1294_s15   ;;  %s1062_s14 = sphi %s1096_s14, %s1293_s14   ;;  %s1058_s13 = sphi %s1094_s13, %s1292_s13   ;;  %s1054_s12 = sphi %s1092_s12, %s1291_s12  }
   0x4   : > { %p23_p0 = scmp.ge.s32.totalorder %s22_s17, 2  ;;  %p65_p1 = scmp.ne.s32.totalorder %s1058_s13, %s1054_s12 }
   0x5   : > { %p66_p2 = scmp.eq.s32.totalorder %s1070_s16, 0  ;;  %p123_p4 = scmp.eq.s32.totalorder %s843_s18, 1 }
   0x6   : > { %s1296_s17 = smov (%p23_p0, %s22_s17), 0  ;;  %s58_s20 = sadd.s32 1, %s1058_s13 }
   0x7   : > { %p67_p3 = por %p66_p2, %p65_p1  ;;  %s55_s19 = ssub.s32 %s1066_s15, %s1296_s17 }
   0x8   : > { %p56_p5 = scmp.eq.s32.totalorder %s55_s19, 0  ;;  %p1127_p6 = por %p123_p4, %p65_p1 }
   0x9   : > { %p847_p7 = scmp.ge.s32.totalorder %s1070_s16, 2 }
   0xa   : > { %s1132_s22 = scalar_select %p56_p5, %s1058_s13, %s58_s20  }
   0xb   : > { %155 = sbr.rel (%p847_p7) target bundleno = 38 (0x26), region = 20 }
  0x12   : > { %158 = sbr.rel (!%p67_p3) target bundleno = 38 (0x26), region = 24  ;;  %s160_s23 = sand.u32 (%p67_p3), 1, %s1058_s13  }
  0x13   : > { %s900_s24 = sshll.u32 (%p67_p3), %s1066_s15, 3  ;;  %s848_s25 = sshll.u32 (%p67_p3), %s160_s23, 8 }
  0x14   : > { %s1140_s28 = scalar_lea.vmem (%p67_p3), %s1287_s1, %s900_s24  ;;  %s1145_s29 = scalar_lea.vmem (%p67_p3), [#allocation2], %s848_s25 }
  0x15   : > { %v255_v0 = vld [vmem:[%s1140_s28] sm:$0xff] (%p67_p3)  ;;  %v257_v1 = vld [vmem:[%s1140_s28 + $0x10] sm:$0xff] (%p67_p3) }
  0x16   : > { %v259_v2 = vld [vmem:[%s1140_s28 + $0x20] sm:$0xff] (%p67_p3)  ;;  %256 = vst [vmem:[%s1145_s29] sm:$0xff] (%p67_p3), %v255_v0  ;;  %258 = vst [vmem:[%s1145_s29 + $0x8] sm:$0xff] (%p67_p3), %v257_v1  ;;  %v261_v3 = vld [vmem:[%s1140_s28 + $0x30] sm:$0xff] (%p67_p3) }
  0x17   : > { %260 = vst [vmem:[%s1145_s29 + $0x10] sm:$0xff] (%p67_p3), %v259_v2  ;;  %v263_v4 = vld [vmem:[%s1140_s28 + $0x40] sm:$0xff] (%p67_p3)  ;;  %v265_v5 = vld [vmem:[%s1140_s28 + $0x50] sm:$0xff] (%p67_p3)  ;;  %262 = vst [vmem:[%s1145_s29 + $0x18] sm:$0xff] (%p67_p3), %v261_v3 }
  0x18   : > { %264 = vst [vmem:[%s1145_s29 + $0x20] sm:$0xff] (%p67_p3), %v263_v4  ;;  %266 = vst [vmem:[%s1145_s29 + $0x28] sm:$0xff] (%p67_p3), %v265_v5  ;;  %v267_v6 = vld [vmem:[%s1140_s28 + $0x60] sm:$0xff] (%p67_p3)  ;;  %v269_v7 = vld [vmem:[%s1140_s28 + $0x70] sm:$0xff] (%p67_p3) }
  0x19   : > { %v271_v8 = vld [vmem:[%s1140_s28 + $0x80] sm:$0xff]  ;;  %268 = vst [vmem:[%s1145_s29 + $0x30] sm:$0xff] %v267_v6  ;;  %270 = vst [vmem:[%s1145_s29 + $0x38] sm:$0xff] %v269_v7  ;;  %v273_v9 = vld [vmem:[%s1140_s28 + $0x90] sm:$0xff] }
  0x1a   : > { %272 = vst [vmem:[%s1145_s29 + $0x40] sm:$0xff] %v271_v8  ;;  %v275_v10 = vld [vmem:[%s1140_s28 + $0xa0] sm:$0xff]  ;;  %v277_v11 = vld [vmem:[%s1140_s28 + $0xb0] sm:$0xff]  ;;  %274 = vst [vmem:[%s1145_s29 + $0x48] sm:$0xff] %v273_v9 }
  0x1b   : > { %276 = vst [vmem:[%s1145_s29 + $0x50] sm:$0xff] %v275_v10  ;;  %278 = vst [vmem:[%s1145_s29 + $0x58] sm:$0xff] %v277_v11  ;;  %v279_v12 = vld [vmem:[%s1140_s28 + $0xc0] sm:$0xff]  ;;  %v281_v13 = vld [vmem:[%s1140_s28 + $0xd0] sm:$0xff] }
  0x1c   : > { %v283_v14 = vld [vmem:[%s1140_s28 + $0xe0] sm:$0xff]  ;;  %280 = vst [vmem:[%s1145_s29 + $0x60] sm:$0xff] %v279_v12  ;;  %282 = vst [vmem:[%s1145_s29 + $0x68] sm:$0xff] %v281_v13  ;;  %v285_v15 = vld [vmem:[%s1140_s28 + $0xf0] sm:$0xff] }
  0x1d   : > { %284 = vst [vmem:[%s1145_s29 + $0x70] sm:$0xff] %v283_v14  ;;  %v287_v16 = vld [vmem:[%s1140_s28 + $0x100] sm:$0xff]  ;;  %v289_v17 = vld [vmem:[%s1140_s28 + $0x110] sm:$0xff]  ;;  %286 = vst [vmem:[%s1145_s29 + $0x78] sm:$0xff] %v285_v15 }
  0x1e   : > { %288 = vst [vmem:[%s1145_s29 + $0x80] sm:$0xff] %v287_v16  ;;  %290 = vst [vmem:[%s1145_s29 + $0x88] sm:$0xff] %v289_v17  ;;  %v291_v18 = vld [vmem:[%s1140_s28 + $0x120] sm:$0xff]  ;;  %v293_v19 = vld [vmem:[%s1140_s28 + $0x130] sm:$0xff] }
  0x1f   : > { %v295_v20 = vld [vmem:[%s1140_s28 + $0x140] sm:$0xff]  ;;  %292 = vst [vmem:[%s1145_s29 + $0x90] sm:$0xff] %v291_v18  ;;  %294 = vst [vmem:[%s1145_s29 + $0x98] sm:$0xff] %v293_v19  ;;  %v297_v21 = vld [vmem:[%s1140_s28 + $0x150] sm:$0xff] }
  0x20   : > { %296 = vst [vmem:[%s1145_s29 + $0xa0] sm:$0xff] %v295_v20  ;;  %v299_v22 = vld [vmem:[%s1140_s28 + $0x160] sm:$0xff]  ;;  %v301_v23 = vld [vmem:[%s1140_s28 + $0x170] sm:$0xff]  ;;  %298 = vst [vmem:[%s1145_s29 + $0xa8] sm:$0xff] %v297_v21 }
  0x21   : > { %300 = vst [vmem:[%s1145_s29 + $0xb0] sm:$0xff] %v299_v22  ;;  %302 = vst [vmem:[%s1145_s29 + $0xb8] sm:$0xff] %v301_v23  ;;  %v303_v24 = vld [vmem:[%s1140_s28 + $0x180] sm:$0xff]  ;;  %v305_v25 = vld [vmem:[%s1140_s28 + $0x190] sm:$0xff] }
  0x22   : > { %v307_v26 = vld [vmem:[%s1140_s28 + $0x1a0] sm:$0xff]  ;;  %304 = vst [vmem:[%s1145_s29 + $0xc0] sm:$0xff] %v303_v24  ;;  %306 = vst [vmem:[%s1145_s29 + $0xc8] sm:$0xff] %v305_v25  ;;  %v309_v27 = vld [vmem:[%s1140_s28 + $0x1b0] sm:$0xff] }
  0x23   : > { %308 = vst [vmem:[%s1145_s29 + $0xd0] sm:$0xff] %v307_v26  ;;  %v311_v28 = vld [vmem:[%s1140_s28 + $0x1c0] sm:$0xff]  ;;  %v313_v29 = vld [vmem:[%s1140_s28 + $0x1d0] sm:$0xff]  ;;  %310 = vst [vmem:[%s1145_s29 + $0xd8] sm:$0xff] %v309_v27 }
  0x24   : > { %312 = vst [vmem:[%s1145_s29 + $0xe0] sm:$0xff] %v311_v28  ;;  %314 = vst [vmem:[%s1145_s29 + $0xe8] sm:$0xff] %v313_v29  ;;  %v315_v30 = vld [vmem:[%s1140_s28 + $0x1e0] sm:$0xff]  ;;  %v317_v31 = vld [vmem:[%s1140_s28 + $0x1f0] sm:$0xff] }
  0x25   : > { %316 = vst [vmem:[%s1145_s29 + $0xf0] sm:$0xff] %v315_v30  ;;  %318 = vst [vmem:[%s1145_s29 + $0xf8] sm:$0xff] %v317_v31 }
  0x26 PF: > { %p851_p8 = scmp.ge.s32.totalorder %s1070_s16, 1  ;;  %p331_p9 = scmp.lt.s32.totalorder %s1070_s16, 3 }
  0x28   : > { %p332_p10 = pnand %p851_p8, %p331_p9 }
  0x29   : > { %s338_s30 = sand.u32 (!%p332_p10), 1, %s1054_s12   ;;  %v1028_v32 = vld [vmem:[%s1286_s0 + $0x4] ss:$8 sps:$4 sm:$0xff] (!%p332_p10)   ;;  %v1031_v33 = vld [vmem:[%s1286_s0 + $0x14] ss:$8 sps:$4 sm:$0xff] (!%p332_p10)   ;;  %s854_s20 = sshll.u32 (!%p332_p10), %s1062_s14, 1  ;;  %v423_v4 = vlaneseq (!%p332_p10) }
  0x2a   : > { %335 = sbr.rel (%p332_p10) target bundleno = 337 (0x151), region = 66  ;;  %s852_s4 = sshll.u32 (!%p332_p10), %s338_s30, 8  ;;  %645 = vmatprep.mubr.bf16.mxu0 (!%p332_p10), %v1028_v32  ;;  %655 = vmatprep.mubr.bf16.mxu1 (!%p332_p10), %v1031_v33  ;;  %v1026_v2 = vld [vmem:[%s1286_s0] ss:$8 sps:$4 sm:$0xff] (!%p332_p10)   ;;  %v1029_v3 = vld [vmem:[%s1286_s0 + $0x10] ss:$8 sps:$4 sm:$0xff] (!%p332_p10)  }
  0x2b   : > { %s1219_s9 = scalar_lea.vmem (!%p332_p10), [#allocation2], %s852_s4  ;;  %p379_p11 = scmp.lt.s32.totalorder (!%p332_p10), %s854_s20, 3  ;;  %v424_v5 = vshrl.u32 (!%p332_p10), %v423_v4, 7 }
  0x2c   : > { %v978_v34 = vld [vmem:[%s1219_s9 + $0x4] ss:$8 sps:$4 sm:$0xff] (!%p332_p10)   ;;  %v980_v35 = vld [vmem:[%s1219_s9] ss:$8 sps:$4 sm:$0xff] (!%p332_p10)   ;;  %v981_v36 = vld [vmem:[%s1219_s9 + $0x14] ss:$8 sps:$4 sm:$0xff] (!%p332_p10)  }
  0x2d   : > { %613 = vmatprep.subr.bf16.mxu0 (!%p332_p10), %v978_v34  ;;  %906 = vmatprep.subr.bf16.mxu1 (!%p332_p10), %v978_v34  ;;  %v983_v37 = vld [vmem:[%s1219_s9 + $0x10] ss:$8 sps:$4 sm:$0xff] (!%p332_p10)   ;;  %v984_v38 = vld [vmem:[%s1219_s9 + $0x24] ss:$8 sps:$4 sm:$0xff] (!%p332_p10)   ;;  %v986_v39 = vld [vmem:[%s1219_s9 + $0x20] ss:$8 sps:$4 sm:$0xff] (!%p332_p10)  }
  0x2e   : > { %614 = vmatpush1.bf16.msra.mxu0 (!%p332_p10), %v980_v35  ;;  %922 = vmatpush1.bf16.msra.mxu1 (!%p332_p10), %v980_v35  ;;  %v987_v40 = vld [vmem:[%s1219_s9 + $0x34] ss:$8 sps:$4 sm:$0xff] (!%p332_p10)   ;;  %v989_v41 = vld [vmem:[%s1219_s9 + $0x30] ss:$8 sps:$4 sm:$0xff] (!%p332_p10)   ;;  %v990_v42 = vld [vmem:[%s1219_s9 + $0x44] ss:$8 sps:$4 sm:$0xff] (!%p332_p10)  }
  0x2f   : > { %615 = vmatprep.subr.bf16.mxu0 (!%p332_p10), %v981_v36  ;;  %907 = vmatprep.subr.bf16.mxu1 (!%p332_p10), %v981_v36  ;;  %v992_v43 = vld [vmem:[%s1219_s9 + $0x40] ss:$8 sps:$4 sm:$0xff] (!%p332_p10)   ;;  %v993_v44 = vld [vmem:[%s1219_s9 + $0x54] ss:$8 sps:$4 sm:$0xff] (!%p332_p10)   ;;  %v995_v45 = vld [vmem:[%s1219_s9 + $0x50] ss:$8 sps:$4 sm:$0xff] (!%p332_p10)  }
  0x30   : > { %v996_v46 = vld [vmem:[%s1219_s9 + $0x64] ss:$8 sps:$4 sm:$0xff] (!%p332_p10)   ;;  %v998_v47 = vld [vmem:[%s1219_s9 + $0x60] ss:$8 sps:$4 sm:$0xff] (!%p332_p10)   ;;  %v999_v48 = vld [vmem:[%s1219_s9 + $0x74] ss:$8 sps:$4 sm:$0xff] (!%p332_p10)  }
  0x31   : > { %v1001_v49 = vld [vmem:[%s1219_s9 + $0x70] ss:$8 sps:$4 sm:$0xff]   ;;  %v1002_v50 = vld [vmem:[%s1219_s9 + $0x84] ss:$8 sps:$4 sm:$0xff]   ;;  %v1004_v51 = vld [vmem:[%s1219_s9 + $0x80] ss:$8 sps:$4 sm:$0xff]  }
  0x32   : > { %616 = vmatpush1.bf16.msra.mxu0 %v983_v37  ;;  %923 = vmatpush1.bf16.msra.mxu1 %v983_v37  ;;  %v1005_v52 = vld [vmem:[%s1219_s9 + $0x94] ss:$8 sps:$4 sm:$0xff]   ;;  %v1007_v53 = vld [vmem:[%s1219_s9 + $0x90] ss:$8 sps:$4 sm:$0xff]   ;;  %v1008_v54 = vld [vmem:[%s1219_s9 + $0xa4] ss:$8 sps:$4 sm:$0xff]  }
  0x33   : > { %617 = vmatprep.subr.bf16.mxu0 %v984_v38  ;;  %908 = vmatprep.subr.bf16.mxu1 %v984_v38  ;;  %v1010_v55 = vld [vmem:[%s1219_s9 + $0xa0] ss:$8 sps:$4 sm:$0xff]   ;;  %v1011_v56 = vld [vmem:[%s1219_s9 + $0xb4] ss:$8 sps:$4 sm:$0xff]   ;;  %v1013_v57 = vld [vmem:[%s1219_s9 + $0xb0] ss:$8 sps:$4 sm:$0xff]  }
  0x34   : > { %v1014_v58 = vld [vmem:[%s1219_s9 + $0xc4] ss:$8 sps:$4 sm:$0xff]   ;;  %v1016_v59 = vld [vmem:[%s1219_s9 + $0xc0] ss:$8 sps:$4 sm:$0xff]   ;;  %v1017_v60 = vld [vmem:[%s1219_s9 + $0xd4] ss:$8 sps:$4 sm:$0xff]  }
  0x35   : > { %v1019_v61 = vld [vmem:[%s1219_s9 + $0xd0] ss:$8 sps:$4 sm:$0xff]   ;;  %v1020_v62 = vld [vmem:[%s1219_s9 + $0xe4] ss:$8 sps:$4 sm:$0xff]   ;;  %v1022_v63 = vld [vmem:[%s1219_s9 + $0xe0] ss:$8 sps:$4 sm:$0xff]  }
  0x36   : > { %618 = vmatpush1.bf16.msra.mxu0 %v986_v39  ;;  %924 = vmatpush1.bf16.msra.mxu1 %v986_v39  ;;  %v1023_v0 = vld [vmem:[%s1219_s9 + $0xf4] ss:$8 sps:$4 sm:$0xff]   ;;  %v1025_v1 = vld [vmem:[%s1219_s9 + $0xf0] ss:$8 sps:$4 sm:$0xff]   ;;  %s1298_s20 = smov (!%p379_p11, %s854_s20), 3  ;;  %v425_v6 = vsub.s32 0, %v424_v5 }
  0x37   : > { %619 = vmatprep.subr.bf16.mxu0 %v987_v40  ;;  %909 = vmatprep.subr.bf16.mxu1 %v987_v40  ;;  %s381_s25 = scalar_lea.vmem %s1288_s2, %s1298_s20  ;;  %v429_v8 = vsub.s32 1, %v424_v5  ;;  %s853_s26 = sshll.u32 %s338_s30, 5 }
  0x38   : > { %v421_v7 = vld [vmem:[%s381_s25] sm:$0x3]  ;;  %s369_s27 = scalar_lea.vmem [#allocation3], %s853_s26  ;;  %s905_s12 = sshll.u32 (%p1127_p6), %s1062_s14, 3 }
  0x39   : > { %v426_v9 = vrot.slane %v421_v7, %v425_v6  ;;  %v430_v10 = vrot.slane %v421_v7, %v429_v8  ;;  %s706_s30 = scalar_lea.vmem (%p1127_p6), %s1289_s3, %s905_s12 }
  0x3a   : > { %620 = vmatpush1.bf16.msra.mxu0 %v989_v41  ;;  %925 = vmatpush1.bf16.msra.mxu1 %v989_v41 }
  0x3b   : > { %621 = vmatprep.subr.bf16.mxu0 %v990_v42  ;;  %910 = vmatprep.subr.bf16.mxu1 %v990_v42 }
  0x3e   : > { %622 = vmatpush1.bf16.msra.mxu0 %v992_v43  ;;  %926 = vmatpush1.bf16.msra.mxu1 %v992_v43 }
  0x3f   : > { %623 = vmatprep.subr.bf16.mxu0 %v993_v44  ;;  %911 = vmatprep.subr.bf16.mxu1 %v993_v44 }
  0x42   : > { %624 = vmatpush1.bf16.msra.mxu0 %v995_v45  ;;  %927 = vmatpush1.bf16.msra.mxu1 %v995_v45 }
  0x43   : > { %625 = vmatprep.subr.bf16.mxu0 %v996_v46  ;;  %912 = vmatprep.subr.bf16.mxu1 %v996_v46 }
  0x46   : > { %626 = vmatpush1.bf16.msra.mxu0 %v998_v47  ;;  %928 = vmatpush1.bf16.msra.mxu1 %v998_v47 }
  0x47   : > { %627 = vmatprep.subr.bf16.mxu0 %v999_v48  ;;  %913 = vmatprep.subr.bf16.mxu1 %v999_v48 }
  0x4a   : > { %628 = vmatpush1.bf16.msra.mxu0 %v1001_v49  ;;  %929 = vmatpush1.bf16.msra.mxu1 %v1001_v49 }
  0x4b   : > { %629 = vmatprep.subr.bf16.mxu0 %v1002_v50  ;;  %914 = vmatprep.subr.bf16.mxu1 %v1002_v50 }
  0x4e   : > { %630 = vmatpush1.bf16.msra.mxu0 %v1004_v51  ;;  %930 = vmatpush1.bf16.msra.mxu1 %v1004_v51 }
  0x4f   : > { %631 = vmatprep.subr.bf16.mxu0 %v1005_v52  ;;  %915 = vmatprep.subr.bf16.mxu1 %v1005_v52 }
  0x52   : > { %632 = vmatpush1.bf16.msra.mxu0 %v1007_v53  ;;  %931 = vmatpush1.bf16.msra.mxu1 %v1007_v53 }
  0x53   : > { %633 = vmatprep.subr.bf16.mxu0 %v1008_v54  ;;  %916 = vmatprep.subr.bf16.mxu1 %v1008_v54 }
  0x56   : > { %634 = vmatpush1.bf16.msra.mxu0 %v1010_v55  ;;  %932 = vmatpush1.bf16.msra.mxu1 %v1010_v55 }
  0x57   : > { %635 = vmatprep.subr.bf16.mxu0 %v1011_v56  ;;  %917 = vmatprep.subr.bf16.mxu1 %v1011_v56 }
  0x5a   : > { %636 = vmatpush1.bf16.msra.mxu0 %v1013_v57  ;;  %933 = vmatpush1.bf16.msra.mxu1 %v1013_v57 }
  0x5b   : > { %637 = vmatprep.subr.bf16.mxu0 %v1014_v58  ;;  %918 = vmatprep.subr.bf16.mxu1 %v1014_v58 }
  0x5e   : > { %638 = vmatpush1.bf16.msra.mxu0 %v1016_v59  ;;  %934 = vmatpush1.bf16.msra.mxu1 %v1016_v59 }
  0x5f   : > { %639 = vmatprep.subr.bf16.mxu0 %v1017_v60  ;;  %919 = vmatprep.subr.bf16.mxu1 %v1017_v60 }
  0x62   : > { %640 = vmatpush1.bf16.msra.mxu0 %v1019_v61  ;;  %935 = vmatpush1.bf16.msra.mxu1 %v1019_v61 }
  0x63   : > { %641 = vmatprep.subr.bf16.mxu0 %v1020_v62  ;;  %920 = vmatprep.subr.bf16.mxu1 %v1020_v62 }
  0x66   : > { %642 = vmatpush1.bf16.msra.mxu0 %v1022_v63  ;;  %936 = vmatpush1.bf16.msra.mxu1 %v1022_v63 }
  0x67   : > { %643 = vmatprep.subr.bf16.mxu0 %v1023_v0  ;;  %921 = vmatprep.subr.bf16.mxu1 %v1023_v0 }
  0x6a   : > { %644 = vmatpush1.bf16.msra.mxu0 %v1025_v1  ;;  %937 = vmatpush1.bf16.msra.mxu1 %v1025_v1 }
  0x6d   : > { %646 = vmatmul.mubr.bf16.vlgmr.msra.gmra.mrb[0].mxu0 %v1026_v2  ;;  %656 = vmatmul.mubr.bf16.vlgmr.msra.gmra.mrb[0].mxu1 %v1029_v3 }
 0x140   : > { %v647_v11 = vpop.f32.mrb[0].mxu0  ;;  %v657_v12 = vpop.f32.mrb[0].mxu1 }
 0x141   : > { %v648_v13 = vadd.f32 %v647_v11, %v426_v9  ;;  %v658_v14 = vadd.f32 %v657_v12, %v426_v9  ;;  %v649_v15 = vpop.f32.mrb[1].mxu0  ;;  %v659_v16 = vpop.f32.mrb[1].mxu1 }
 0x142   : > { %v650_v17 = vadd.f32 %v649_v15, %v430_v10  ;;  %v660_v18 = vadd.f32 %v659_v16, %v430_v10  ;;  %v651_v19 = vpop.f32.mrb[2].mxu0  ;;  %v661_v20 = vpop.f32.mrb[2].mxu1  ;;  %700 = sbr.rel (!%p1127_p6) target bundleno = 337 (0x151), region = 74 }
 0x143   : > { %v652_v21 = vadd.f32 %v651_v19, %v426_v9  ;;  %v662_v22 = vadd.f32 %v661_v20, %v426_v9  ;;  %v653_v23 = vpop.f32.mrb[3].mxu0  ;;  %v663_v24 = vpop.f32.mrb[3].mxu1 }
 0x144   : > { %v901_v25 = vpack.c.bf16 %v650_v17, %v648_v13  ;;  %v903_v26 = vpack.c.bf16 %v660_v18, %v658_v14  ;;  %v654_v27 = vadd.f32 %v653_v23, %v430_v10  ;;  %v664_v28 = vadd.f32 %v663_v24, %v430_v10 }
 0x146   : > { %690 = vst [vmem:[%s369_s27] sm:$0xff] %v901_v25  ;;  %692 = vst [vmem:[%s369_s27 + $0x10] sm:$0xff] %v903_v26  ;;  %v902_v29 = vpack.c.bf16 %v654_v27, %v652_v21  ;;  %v904_v30 = vpack.c.bf16 %v664_v28, %v662_v22 }
 0x148   : > { %691 = vst [vmem:[%s369_s27 + $0x8] sm:$0xff] %v902_v29  ;;  %693 = vst [vmem:[%s369_s27 + $0x18] sm:$0xff] %v904_v30 }
 0x14d   : > { %v740_v31 = vld [vmem:[%s369_s27] sm:$0xff]  ;;  %v744_v33 = vld [vmem:[%s369_s27 + $0x10] sm:$0xff] }
 0x14e   : > { %741 = vst [vmem:[%s706_s30] sm:$0xff] %v740_v31  ;;  %745 = vst [vmem:[%s706_s30 + $0x20] sm:$0xff] %v744_v33 }
 0x14f   : > { %v742_v32 = vld [vmem:[%s369_s27 + $0x8] sm:$0xff]  ;;  %v746_v34 = vld [vmem:[%s369_s27 + $0x18] sm:$0xff] }
 0x150   : > { %743 = vst [vmem:[%s706_s30 + $0x10] sm:$0xff] %v742_v32  ;;  %747 = vst [vmem:[%s706_s30 + $0x30] sm:$0xff] %v746_v34 }
 0x151 PF: > { %s13_s16 = sadd.s32 1, %s1070_s16   ;;  %s1291_s12 = smov %s1058_s13 }
 0x152   : > { %p10_p12 = scmp.ge.s32.totalorder %s13_s16, 4   ;;  %s1292_s13 = smov %s1132_s22 }
 0x153   : > { %s1293_s14 = smov %s1066_s15  ;;  %s1294_s15 = smov %s1296_s17 }
 0x154   :  { %12 = sbr.rel (!%p10_p12) target bundleno = 3 (0x3), region = 149 }

// kernel: resnet_feature_extractor.55
= control target key start
LH: loop header
LB: loop body
LE: loop exit
PB: predicated region body
PF: predicated region fallthrough
CT: control target
= control target key end

     0   :  { %s1632_s1 = inlined_call_operand.vmem [shape: bf16[1152,128], index: 1, kind: input, shape index: {}]   ;;  %s1633_s0 = inlined_call_operand.vmem [shape: bf16[32,1152], index: 0, kind: input, shape index: {}]   ;;  %s1634_s2 = inlined_call_operand.vmem [shape: f32[1,128], index: 2, kind: input, shape index: {}]   ;;  %s1635_s3 = inlined_call_operand.vmem [shape: bf16[32,128], index: 3, kind: output, shape index: {}]  }
   0x1   :  { %v1235_v0 = vld [vmem:[%s1632_s1 + $0x40] sm:$0xff]   ;;  %v1239_v4 = vld [vmem:[%s1632_s1 + $0x48] sm:$0xff]   ;;  %v1243_v8 = vld [vmem:[%s1632_s1 + $0x50] sm:$0xff]  }
   0x2   :  { %v1236_v1 = vld [vmem:[%s1632_s1] sm:$0xff]   ;;  %1093 = vmatprep.subr.bf16.mxu0 %v1235_v0  ;;  %v1240_v5 = vld [vmem:[%s1632_s1 + $0x8] sm:$0xff]   ;;  %v1244_v9 = vld [vmem:[%s1632_s1 + $0x10] sm:$0xff]  }
   0x3   :  { %v1237_v2 = vld [vmem:[%s1632_s1 + $0xc0] sm:$0xff]   ;;  %1094 = vmatpush3.bf16.msra.mxu0 %v1236_v1  ;;  %v1241_v6 = vld [vmem:[%s1632_s1 + $0xc8] sm:$0xff]   ;;  %v1245_v10 = vld [vmem:[%s1632_s1 + $0xd0] sm:$0xff]  }
   0x4   :  { %v1238_v3 = vld [vmem:[%s1632_s1 + $0x80] sm:$0xff]   ;;  %1121 = vmatprep.subr.bf16.mxu1 %v1237_v2  ;;  %1095 = vmatprep.subr.bf16.mxu0 %v1239_v4  ;;  %v1242_v7 = vld [vmem:[%s1632_s1 + $0x88] sm:$0xff]   ;;  %v1246_v11 = vld [vmem:[%s1632_s1 + $0x90] sm:$0xff]  }
   0x5   :  { %1122 = vmatpush3.bf16.msra.mxu1 %v1238_v3  ;;  %v1247_v12 = vld [vmem:[%s1632_s1 + $0x58] sm:$0xff]   ;;  %v1251_v16 = vld [vmem:[%s1632_s1 + $0x60] sm:$0xff]   ;;  %v1255_v20 = vld [vmem:[%s1632_s1 + $0x68] sm:$0xff]  }
   0x6   :  { %1123 = vmatprep.subr.bf16.mxu1 %v1241_v6  ;;  %v1248_v13 = vld [vmem:[%s1632_s1 + $0x18] sm:$0xff]   ;;  %v1252_v17 = vld [vmem:[%s1632_s1 + $0x20] sm:$0xff]   ;;  %v1256_v21 = vld [vmem:[%s1632_s1 + $0x28] sm:$0xff]  }
   0x7   :  { %1096 = vmatpush3.bf16.msra.mxu0 %v1240_v5  ;;  %v1249_v14 = vld [vmem:[%s1632_s1 + $0xd8] sm:$0xff]   ;;  %v1253_v18 = vld [vmem:[%s1632_s1 + $0xe0] sm:$0xff]   ;;  %v1257_v22 = vld [vmem:[%s1632_s1 + $0xe8] sm:$0xff]  }
   0x8   :  { %1097 = vmatprep.subr.bf16.mxu0 %v1243_v8  ;;  %v1250_v15 = vld [vmem:[%s1632_s1 + $0x98] sm:$0xff]   ;;  %v1254_v19 = vld [vmem:[%s1632_s1 + $0xa0] sm:$0xff]   ;;  %v1258_v23 = vld [vmem:[%s1632_s1 + $0xa8] sm:$0xff]  }
   0x9   :  { %1124 = vmatpush3.bf16.msra.mxu1 %v1242_v7  ;;  %v1259_v24 = vld [vmem:[%s1632_s1 + $0x70] sm:$0xff]   ;;  %v1263_v28 = vld [vmem:[%s1632_s1 + $0x78] sm:$0xff]   ;;  %v1266_v31 = vld [vmem:[%s1633_s0] ss:$36 sps:$4 sm:$0xff]  }
   0xa   :  { %1125 = vmatprep.subr.bf16.mxu1 %v1245_v10  ;;  %v1260_v25 = vld [vmem:[%s1632_s1 + $0x30] sm:$0xff]   ;;  %v1264_v29 = vld [vmem:[%s1632_s1 + $0x38] sm:$0xff]   ;;  %v1268_v32 = vld [vmem:[%s1633_s0 + $0x4] ss:$36 sps:$4 sm:$0xff]  }
   0xb   :  { %1098 = vmatpush3.bf16.msra.mxu0 %v1244_v9  ;;  %v1261_v26 = vld [vmem:[%s1632_s1 + $0xf0] sm:$0xff]   ;;  %v1265_v30 = vld [vmem:[%s1632_s1 + $0xf8] sm:$0xff]   ;;  %742 = vmatprep.mubr.bf16.mxu0 %v1268_v32  ;;  %v1270_v34 = vld [vmem:[%s1632_s1 + $0x140] sm:$0xff]  }
   0xc   :  { %1099 = vmatprep.subr.bf16.mxu0 %v1247_v12  ;;  %v1262_v27 = vld [vmem:[%s1632_s1 + $0xb0] sm:$0xff]   ;;  %v1269_v33 = vld [vmem:[%s1632_s1 + $0xb8] sm:$0xff]   ;;  %v1271_v35 = vld [vmem:[%s1633_s0 + $0x8] ss:$36 sps:$4 sm:$0xff]  }
   0xd   :  { %1126 = vmatpush3.bf16.msra.mxu1 %v1246_v11  ;;  %v1273_v36 = vld [vmem:[%s1633_s0 + $0xc] ss:$36 sps:$4 sm:$0xff]   ;;  %v1274_v37 = vld [vmem:[%s1632_s1 + $0x100] sm:$0xff]   ;;  %v1285_v48 = vld [vmem:[%s1632_s1 + $0x158] sm:$0xff]  }
   0xe   :  { %1127 = vmatprep.subr.bf16.mxu1 %v1249_v14  ;;  %791 = vmatprep.mubr.bf16.mxu1 %v1273_v36  ;;  %v1275_v38 = vld [vmem:[%s1632_s1 + $0x1c0] sm:$0xff]   ;;  %v1277_v40 = vld [vmem:[%s1632_s1 + $0x148] sm:$0xff]   ;;  %v1281_v44 = vld [vmem:[%s1632_s1 + $0x150] sm:$0xff]  }
   0xf   :  { %1100 = vmatpush3.bf16.msra.mxu0 %v1248_v13  ;;  %v1276_v39 = vld [vmem:[%s1632_s1 + $0x180] sm:$0xff]   ;;  %v1278_v41 = vld [vmem:[%s1632_s1 + $0x108] sm:$0xff]   ;;  %v1282_v45 = vld [vmem:[%s1632_s1 + $0x110] sm:$0xff]  }
  0x10   :  { %1101 = vmatprep.subr.bf16.mxu0 %v1251_v16  ;;  %v1279_v42 = vld [vmem:[%s1632_s1 + $0x1c8] sm:$0xff]   ;;  %v1283_v46 = vld [vmem:[%s1632_s1 + $0x1d0] sm:$0xff]   ;;  %v1286_v49 = vld [vmem:[%s1632_s1 + $0x118] sm:$0xff]  }
  0x11   :  { %1128 = vmatpush3.bf16.msra.mxu1 %v1250_v15  ;;  %v1280_v43 = vld [vmem:[%s1632_s1 + $0x188] sm:$0xff]   ;;  %v1284_v47 = vld [vmem:[%s1632_s1 + $0x190] sm:$0xff]   ;;  %v1287_v50 = vld [vmem:[%s1632_s1 + $0x1d8] sm:$0xff]  }
  0x12   :  { %1129 = vmatprep.subr.bf16.mxu1 %v1253_v18  ;;  %v1288_v51 = vld [vmem:[%s1632_s1 + $0x198] sm:$0xff]   ;;  %v1289_v52 = vld [vmem:[%s1632_s1 + $0x160] sm:$0xff]   ;;  %v1293_v56 = vld [vmem:[%s1632_s1 + $0x168] sm:$0xff]  }
  0x13   :  { %1102 = vmatpush3.bf16.msra.mxu0 %v1252_v17  ;;  %v1290_v53 = vld [vmem:[%s1632_s1 + $0x120] sm:$0xff]   ;;  %v1294_v57 = vld [vmem:[%s1633_s0 + $0x4c] ss:$36 sps:$4 sm:$0xff]   ;;  %v1299_v61 = vld [vmem:[%s1633_s0 + $0x54] ss:$36 sps:$4 sm:$0xff]  }
  0x14   :  { %1103 = vmatprep.subr.bf16.mxu0 %v1255_v20  ;;  %v1291_v54 = vld [vmem:[%s1632_s1 + $0x1e0] sm:$0xff]   ;;  %v1296_v58 = vld [vmem:[%s1632_s1 + $0x128] sm:$0xff]   ;;  %v1302_v63 = vld [vmem:[%s1633_s0 + $0x50] ss:$36 sps:$4 sm:$0xff]  }
  0x15   :  { %1130 = vmatpush3.bf16.msra.mxu1 %v1254_v19  ;;  %v1292_v55 = vld [vmem:[%s1632_s1 + $0x1a0] sm:$0xff]   ;;  %v1297_v59 = vld [vmem:[%s1633_s0 + $0x48] ss:$36 sps:$4 sm:$0xff]   ;;  %v1303_v0 = vld [vmem:[%s1632_s1 + $0x170] sm:$0xff]  }
  0x16   :  { %1131 = vmatprep.subr.bf16.mxu1 %v1257_v22  ;;  %v1298_v60 = vld [vmem:[%s1632_s1 + $0x1e8] sm:$0xff]   ;;  %v1304_v1 = vld [vmem:[%s1632_s1 + $0x130] sm:$0xff]   ;;  %v1307_v4 = vld [vmem:[%s1632_s1 + $0x178] sm:$0xff]  }
  0x17   :  { %1104 = vmatpush3.bf16.msra.mxu0 %v1256_v21  ;;  %v1301_v62 = vld [vmem:[%s1632_s1 + $0x1a8] sm:$0xff]   ;;  %v1305_v2 = vld [vmem:[%s1632_s1 + $0x1f0] sm:$0xff]   ;;  %v1308_v5 = vld [vmem:[%s1632_s1 + $0x138] sm:$0xff]  }
  0x18   :  { %1105 = vmatprep.subr.bf16.mxu0 %v1259_v24  ;;  %v1306_v3 = vld [vmem:[%s1632_s1 + $0x1b0] sm:$0xff]   ;;  %v1309_v6 = vld [vmem:[%s1632_s1 + $0x1f8] sm:$0xff]   ;;  %v1314_v10 = vld [vmem:[%s1632_s1 + $0x200] sm:$0xff]  }
  0x19   :  { %1132 = vmatpush3.bf16.msra.mxu1 %v1258_v23  ;;  %v1310_v7 = vld [vmem:[%s1633_s0 + $0x10] ss:$36 sps:$4 sm:$0xff]   ;;  %v1313_v9 = vld [vmem:[%s1632_s1 + $0x1b8] sm:$0xff]   ;;  %v1318_v13 = vld [vmem:[%s1632_s1 + $0x208] sm:$0xff]  }
  0x1a   :  { %1133 = vmatprep.subr.bf16.mxu1 %v1261_v26  ;;  %v1312_v8 = vld [vmem:[%s1633_s0 + $0x14] ss:$36 sps:$4 sm:$0xff]   ;;  %v1317_v12 = vld [vmem:[%s1633_s0 + $0x1c] ss:$36 sps:$4 sm:$0xff]   ;;  %v1323_v17 = vld [vmem:[%s1633_s0 + $0x64] ss:$36 sps:$4 sm:$0xff]  }
  0x1b   :  { %1106 = vmatpush3.bf16.msra.mxu0 %v1260_v25  ;;  %v1315_v11 = vld [vmem:[%s1633_s0 + $0x18] ss:$36 sps:$4 sm:$0xff]   ;;  %v1322_v16 = vld [vmem:[%s1632_s1 + $0x210] sm:$0xff]   ;;  %v1325_v18 = vld [vmem:[%s1633_s0 + $0x60] ss:$36 sps:$4 sm:$0xff]  }
  0x1c   :  { %1107 = vmatprep.subr.bf16.mxu0 %v1263_v28  ;;  %v1319_v14 = vld [vmem:[%s1633_s0 + $0x5c] ss:$36 sps:$4 sm:$0xff]   ;;  %v1328_v22 = vld [vmem:[%s1632_s1 + $0x228] sm:$0xff]   ;;  %v1329_v23 = vld [vmem:[%s1632_s1 + $0x230] sm:$0xff]  }
  0x1d   :  { %1134 = vmatpush3.bf16.msra.mxu1 %v1262_v27  ;;  %v1321_v15 = vld [vmem:[%s1633_s0 + $0x58] ss:$36 sps:$4 sm:$0xff]   ;;  %v1327_v20 = vld [vmem:[%s1632_s1 + $0x220] sm:$0xff]   ;;  %v1332_v25 = vld [vmem:[%s1633_s0 + $0x68] ss:$36 sps:$4 sm:$0xff]  }
  0x1e   :  { %1135 = vmatprep.subr.bf16.mxu1 %v1265_v30  ;;  %v1326_v19 = vld [vmem:[%s1632_s1 + $0x218] sm:$0xff]   ;;  %v1331_v21 = vld [vmem:[%s1633_s0 + $0x20] ss:$36 sps:$4 sm:$0xff]  }
  0x1f   :  { %1108 = vmatpush3.bf16.msra.mxu0 %v1264_v29  ;;  %v1330_v24 = vld [vmem:[%s1632_s1 + $0x238] sm:$0xff]   ;;  %v983_v27 = vld [vmem:[%s1634_s2] ss:$0 sm:$0xff] }
  0x20   :  { %1149 = vmatprep.subr.bf16.mxu0 %v1270_v34 }
  0x21   :  { %1136 = vmatpush3.bf16.msra.mxu1 %v1269_v33 }
  0x22   :  { %743 = vmatmul.mubr.bf16.vlgmr.msra.gmra.mrb[0].mxu0 %v1266_v31  ;;  %1177 = vmatprep.subr.bf16.mxu1 %v1275_v38 }
  0x23   :  { %1150 = vmatpush3.bf16.msra.mxu0 %v1274_v37  ;;  %750 = vmatprep.mubr.bf16.mxu0 %v1294_v57 }
  0x24   :  { %792 = vmatmul.mubr.bf16.vlgmr.msra.gmra.mrb[0].mxu1 %v1271_v35  ;;  %1151 = vmatprep.subr.bf16.mxu0 %v1277_v40 }
  0x25   :  { %1178 = vmatpush3.bf16.msra.mxu1 %v1276_v39  ;;  %799 = vmatprep.mubr.bf16.mxu1 %v1299_v61 }
  0x26   :  { %1179 = vmatprep.subr.bf16.mxu1 %v1279_v42 }
  0x27   :  { %1152 = vmatpush3.bf16.msra.mxu0 %v1278_v41 }
  0x28   :  { %1153 = vmatprep.subr.bf16.mxu0 %v1281_v44 }
  0x29   :  { %1180 = vmatpush3.bf16.msra.mxu1 %v1280_v43 }
  0x2a   :  { %1181 = vmatprep.subr.bf16.mxu1 %v1283_v46  ;;  %751 = vmatmul.mubr.bf16.gmra.mrb[4].mxu0 %v1297_v59 }
  0x2b   :  { %1154 = vmatpush3.bf16.msra.mxu0 %v1282_v45  ;;  %840 = vmatprep.mubr.bf16.mxu0 %v1312_v8 }
  0x2c   :  { %1155 = vmatprep.subr.bf16.mxu0 %v1285_v48  ;;  %800 = vmatmul.mubr.bf16.gmra.mrb[4].mxu1 %v1302_v63 }
  0x2d   :  { %1182 = vmatpush3.bf16.msra.mxu1 %v1284_v47  ;;  %889 = vmatprep.mubr.bf16.mxu1 %v1317_v12 }
  0x2e   :  { %1183 = vmatprep.subr.bf16.mxu1 %v1287_v50 }
  0x2f   :  { %1156 = vmatpush3.bf16.msra.mxu0 %v1286_v49 }
  0x30   :  { %1157 = vmatprep.subr.bf16.mxu0 %v1289_v52 }
  0x31   :  { %1184 = vmatpush3.bf16.msra.mxu1 %v1288_v51 }
  0x32   :  { %1185 = vmatprep.subr.bf16.mxu1 %v1291_v54 }
  0x33   :  { %1158 = vmatpush3.bf16.msra.mxu0 %v1290_v53 }
  0x34   :  { %1159 = vmatprep.subr.bf16.mxu0 %v1293_v56 }
  0x35   :  { %1186 = vmatpush3.bf16.msra.mxu1 %v1292_v55 }
  0x36   :  { %1187 = vmatprep.subr.bf16.mxu1 %v1298_v60 }
  0x37   :  { %1160 = vmatpush3.bf16.msra.mxu0 %v1296_v58 }
  0x38   :  { %1161 = vmatprep.subr.bf16.mxu0 %v1303_v0 }
  0x39   :  { %1188 = vmatpush3.bf16.msra.mxu1 %v1301_v62 }
  0x3a   :  { %1189 = vmatprep.subr.bf16.mxu1 %v1305_v2 }
  0x3b   :  { %1162 = vmatpush3.bf16.msra.mxu0 %v1304_v1 }
  0x3c   :  { %1163 = vmatprep.subr.bf16.mxu0 %v1307_v4 }
  0x3d   :  { %1190 = vmatpush3.bf16.msra.mxu1 %v1306_v3 }
  0x3e   :  { %1191 = vmatprep.subr.bf16.mxu1 %v1309_v6 }
  0x3f   :  { %1164 = vmatpush3.bf16.msra.mxu0 %v1308_v5 }
  0x40   :  { %1215 = vmatprep.subr.bf16.mxu0 %v1314_v10 }
  0x41   :  { %1192 = vmatpush3.bf16.msra.mxu1 %v1313_v9 }
  0x42   :  { %841 = vmatmul.mubr.bf16.vlgmr.msra.gmra.mrb[8].mxu0 %v1310_v7 }
  0x43   :  { %1216 = vmatpush3.bf16.msra.mxu0 %v1314_v10  ;;  %848 = vmatprep.mubr.bf16.mxu0 %v1319_v14 }
  0x44   :  { %890 = vmatmul.mubr.bf16.vlgmr.msra.gmra.mrb[8].mxu1 %v1315_v11  ;;  %1217 = vmatprep.subr.bf16.mxu0 %v1318_v13 }
  0x45   :  { %897 = vmatprep.mubr.bf16.mxu1 %v1323_v17 }
  0x47   :  { %1218 = vmatpush3.bf16.msra.mxu0 %v1318_v13 }
  0x48   :  { %1219 = vmatprep.subr.bf16.mxu0 %v1322_v16 }
  0x4a   :  { %849 = vmatmul.mubr.bf16.gmra.mrb[12].mxu0 %v1321_v15 }
  0x4b   :  { %1220 = vmatpush3.bf16.msra.mxu0 %v1322_v16  ;;  %1231 = vmatprep.mubr.bf16.mxu0 %v1331_v21 }
  0x4c   :  { %898 = vmatmul.mubr.bf16.gmra.mrb[12].mxu1 %v1325_v18  ;;  %1221 = vmatprep.subr.bf16.mxu0 %v1326_v19 }
  0x4f   :  { %1222 = vmatpush3.bf16.msra.mxu0 %v1326_v19 }
  0x50   :  { %1223 = vmatprep.subr.bf16.mxu0 %v1327_v20 }
  0x53   :  { %1224 = vmatpush3.bf16.msra.mxu0 %v1327_v20 }
  0x54   :  { %1225 = vmatprep.subr.bf16.mxu0 %v1328_v22 }
  0x57   :  { %1226 = vmatpush3.bf16.msra.mxu0 %v1328_v22 }
  0x58   :  { %1227 = vmatprep.subr.bf16.mxu0 %v1329_v23 }
  0x5b   :  { %1228 = vmatpush3.bf16.msra.mxu0 %v1329_v23 }
  0x5c   :  { %1229 = vmatprep.subr.bf16.mxu0 %v1330_v24 }
  0x5f   :  { %1230 = vmatpush3.bf16.msra.mxu0 %v1330_v24 }
  0x62   :  { %1232 = vmatmul.mubr.bf16.vlgmr.msra.gmra.mrb[16].mxu0 %v1332_v25 }
  0xf5   :  { %v1109_v26 = vpop.f32.mrb[0].mxu0 }
  0xf6   :  { %v1110_v28 = vpop.f32.mrb[1].mxu0 }
  0xf7   :  { %v1111_v29 = vadd.f32 %v1110_v28, %v1109_v26  ;;  %v1112_v30 = vpop.f32.mrb[2].mxu0  ;;  %v1137_v31 = vpop.f32.mrb[0].mxu1 }
  0xf8   :  { %v1113_v32 = vpop.f32.mrb[3].mxu0  ;;  %v1138_v35 = vpop.f32.mrb[1].mxu1 }
  0xf9   :  { %v745_v33 = vadd.f32 %v1111_v29, %v983_v27  ;;  %v1114_v34 = vadd.f32 %v1113_v32, %v1112_v30  ;;  %v1139_v36 = vadd.f32 %v1138_v35, %v1137_v31  ;;  %v1140_v37 = vpop.f32.mrb[2].mxu1 }
  0xfa   :  { %v1141_v39 = vpop.f32.mrb[3].mxu1 }
  0xfb   :  { %v748_v38 = vadd.f32 %v1114_v34, %v983_v27  ;;  %v794_v40 = vadd.f32 %v1139_v36, %v745_v33  ;;  %v1142_v41 = vadd.f32 %v1141_v39, %v1140_v37 }
  0xfd   :  { %v797_v42 = vadd.f32 %v1142_v41, %v748_v38  ;;  %v1115_v43 = vpop.f32.mrb[4].mxu0 }
  0xfe   :  { %v1116_v44 = vpop.f32.mrb[5].mxu0 }
  0xff   :  { %v1117_v45 = vadd.f32 %v1116_v44, %v1115_v43  ;;  %v1118_v46 = vpop.f32.mrb[6].mxu0  ;;  %v1143_v47 = vpop.f32.mrb[4].mxu1 }
 0x100   :  { %v1119_v48 = vpop.f32.mrb[7].mxu0  ;;  %v1144_v51 = vpop.f32.mrb[5].mxu1 }
 0x101   :  { %v753_v49 = vadd.f32 %v1117_v45, %v983_v27  ;;  %v1120_v50 = vadd.f32 %v1119_v48, %v1118_v46  ;;  %v1145_v52 = vadd.f32 %v1144_v51, %v1143_v47  ;;  %v1146_v53 = vpop.f32.mrb[6].mxu1 }
 0x102   :  { %v1147_v55 = vpop.f32.mrb[7].mxu1 }
 0x103   :  { %v756_v54 = vadd.f32 %v1120_v50, %v983_v27  ;;  %v802_v56 = vadd.f32 %v1145_v52, %v753_v49  ;;  %v1148_v57 = vadd.f32 %v1147_v55, %v1146_v53 }
 0x105   :  { %v805_v58 = vadd.f32 %v1148_v57, %v756_v54 }
 0x115   :  { %v1165_v59 = vpop.f32.mrb[8].mxu0 }
 0x116   :  { %v1166_v60 = vpop.f32.mrb[9].mxu0 }
 0x117   :  { %v1167_v61 = vadd.f32 %v1166_v60, %v1165_v59  ;;  %v1168_v62 = vpop.f32.mrb[10].mxu0  ;;  %v1193_v63 = vpop.f32.mrb[8].mxu1 }
 0x118   :  { %v1169_v0 = vpop.f32.mrb[11].mxu0  ;;  %v1194_v3 = vpop.f32.mrb[9].mxu1 }
 0x119   :  { %v843_v1 = vadd.f32 %v1167_v61, %v794_v40  ;;  %v1170_v2 = vadd.f32 %v1169_v0, %v1168_v62  ;;  %v1195_v4 = vadd.f32 %v1194_v3, %v1193_v63  ;;  %v1196_v5 = vpop.f32.mrb[10].mxu1 }
 0x11a   :  { %v1197_v7 = vpop.f32.mrb[11].mxu1 }
 0x11b   :  { %v846_v6 = vadd.f32 %v1170_v2, %v797_v42  ;;  %v1198_v8 = vadd.f32 %v1197_v7, %v1196_v5  ;;  %v892_v9 = vadd.f32 %v1195_v4, %v843_v1 }
 0x11d   :  { %v1171_v10 = vpop.f32.mrb[12].mxu0  ;;  %v895_v12 = vadd.f32 %v1198_v8, %v846_v6 }
 0x11e   :  { %v1172_v11 = vpop.f32.mrb[13].mxu0 }
 0x11f   :  { %v1173_v13 = vadd.f32 %v1172_v11, %v1171_v10  ;;  %v1174_v14 = vpop.f32.mrb[14].mxu0  ;;  %v1199_v15 = vpop.f32.mrb[12].mxu1 }
 0x120   :  { %v1175_v16 = vpop.f32.mrb[15].mxu0  ;;  %v1200_v19 = vpop.f32.mrb[13].mxu1 }
 0x121   :  { %v851_v17 = vadd.f32 %v1173_v13, %v802_v56  ;;  %v1176_v18 = vadd.f32 %v1175_v16, %v1174_v14  ;;  %v1201_v20 = vadd.f32 %v1200_v19, %v1199_v15  ;;  %v1202_v21 = vpop.f32.mrb[14].mxu1 }
 0x122   :  { %v1203_v23 = vpop.f32.mrb[15].mxu1 }
 0x123   :  { %v854_v22 = vadd.f32 %v1176_v18, %v805_v58  ;;  %v1204_v24 = vadd.f32 %v1203_v23, %v1202_v21  ;;  %v900_v25 = vadd.f32 %v1201_v20, %v851_v17 }
 0x125   :  { %v903_v26 = vadd.f32 %v1204_v24, %v854_v22 }
 0x135   :  { %v1233_v27 = vpop.f32.mrb[16].mxu0 }
 0x136   :  { %v949_v28 = vadd.f32 %v1233_v27, %v900_v25  ;;  %v940_v29 = vpop.f32.mrb[17].mxu0 }
 0x137   :  { %v941_v30 = vadd.f32 %v940_v29, %v892_v9  ;;  %v1234_v31 = vpop.f32.mrb[18].mxu0 }
 0x138   :  { %v952_v32 = vadd.f32 %v1234_v31, %v903_v26  ;;  %v943_v33 = vpop.f32.mrb[19].mxu0  ;;  %v957_v35 = vmax.f32 %v949_v28, 0.0 }
 0x139   :  { %v944_v34 = vadd.f32 %v943_v33, %v895_v12  ;;  %v955_v37 = vmax.f32 %v941_v30, 0.0 }
 0x13a   :  { %v958_v36 = vmax.f32 %v952_v32, 0.0 }
 0x13b   :  { %v956_v38 = vmax.f32 %v944_v34, 0.0 }
 0x13c   :  { %v1090_v39 = vpack.c.bf16 %v958_v36, %v957_v35 }
 0x13d   :  { %v1085_v40 = vpack.c.bf16 %v956_v38, %v955_v37 }
 0x13e   :  { %1092 = vst [vmem:[%s1635_s3 + $0x8] sm:$0xff] %v1090_v39  }
 0x13f   :  { %1086 = vst [vmem:[%s1635_s3] sm:$0xff] %v1085_v40  }

// kernel: resnet_feature_extractor.57
= control target key start
LH: loop header
LB: loop body
LE: loop exit
PB: predicated region body
PF: predicated region fallthrough
CT: control target
= control target key end

     0   :  { %s1022_s15 = smov 0   ;;  %s1024_s16 = smov 0   ;;  %s1161_s0 = inlined_call_operand.vmem [shape: bf16[32,128], index: 0, kind: input, shape index: {}]   ;;  %s1162_s1 = inlined_call_operand.vmem [shape: bf16[128,512], index: 1, kind: input, shape index: {}]   ;;  %s1163_s2 = inlined_call_operand.vmem [shape: f32[1,512], index: 2, kind: input, shape index: {}]   ;;  %s1164_s3 = inlined_call_operand.vmem [shape: bf16[32,512], index: 3, kind: input, shape index: {}]   ;;  %s1165_s4 = inlined_call_operand.vmem [shape: bf16[32,512], index: 4, kind: output, shape index: {}]  }
   0x1   :  { %s1026_s17 = smov 0   ;;  %s1028_s18 = smov 0  }
   0x2   :  { %s1030_s19 = smov 0  }
   0x3 LB: > { %s23_s20 = sadd.s32 1, %s990_s18  ;;  %s823_s21 = sadd.s32 4294967295, %s994_s19   ;;  %s994_s19 = sphi %s1030_s19, %s14_s19   ;;  %s990_s18 = sphi %s1028_s18, %s1171_s18   ;;  %s986_s17 = sphi %s1026_s17, %s1170_s17   ;;  %s982_s16 = sphi %s1024_s16, %s1169_s16   ;;  %s978_s15 = sphi %s1022_s15, %s1168_s15  }
   0x4   : > { %p24_p0 = scmp.ge.s32.totalorder %s23_s20, 2  ;;  %p66_p1 = scmp.ne.s32.totalorder %s982_s16, %s978_s15 }
   0x5   : > { %p67_p2 = scmp.eq.s32.totalorder %s994_s19, 0  ;;  %p152_p4 = scmp.eq.s32.totalorder %s823_s21, 1 }
   0x6   : > { %s1173_s20 = smov (%p24_p0, %s23_s20), 0  ;;  %s59_s24 = sadd.s32 1, %s982_s16 }
   0x7   : > { %p1054_p3 = por %p67_p2, %p66_p1  ;;  %s56_s23 = ssub.s32 %s990_s18, %s1173_s20 }
   0x8   : > { %p57_p5 = scmp.eq.s32.totalorder %s56_s23, 0  ;;  %p1061_p6 = por %p152_p4, %p66_p1 }
   0x9   : > { %p827_p7 = scmp.ge.s32.totalorder %s994_s19, 2 }
   0xa   : > { %s1066_s26 = scalar_select %p57_p5, %s982_s16, %s59_s24  }
   0xb   : > { %183 = sbr.rel (%p827_p7) target bundleno = 37 (0x25), region = 20 }
  0x12   : > { %186 = sbr.rel (!%p1054_p3) target bundleno = 30 (0x1e), region = 24  ;;  %s188_s27 = sand.u32 (%p1054_p3), 1, %s982_s16  }
  0x13   : > { %s866_s28 = sshll.u32 (%p1054_p3), %s990_s18, 3  ;;  %s828_s29 = sshll.u32 (%p1054_p3), %s188_s27, 7 }
  0x14   : > { %s1076_s6 = scalar_lea.vmem (%p1054_p3), %s1162_s1, %s866_s28  ;;  %s190_s7 = scalar_lea.vmem (%p1054_p3), [#allocation2], %s828_s29 }
  0x15   : > { %v251_v0 = vld [vmem:[%s1076_s6] sm:$0xff] (%p1054_p3)  ;;  %v253_v1 = vld [vmem:[%s1076_s6 + $0x10] sm:$0xff] (%p1054_p3) }
  0x16   : > { %v255_v2 = vld [vmem:[%s1076_s6 + $0x20] sm:$0xff] (%p1054_p3)  ;;  %252 = vst [vmem:[%s190_s7] sm:$0xff] (%p1054_p3), %v251_v0  ;;  %254 = vst [vmem:[%s190_s7 + $0x8] sm:$0xff] (%p1054_p3), %v253_v1  ;;  %v257_v3 = vld [vmem:[%s1076_s6 + $0x30] sm:$0xff] (%p1054_p3) }
  0x17   : > { %256 = vst [vmem:[%s190_s7 + $0x10] sm:$0xff] (%p1054_p3), %v255_v2  ;;  %v259_v4 = vld [vmem:[%s1076_s6 + $0x40] sm:$0xff] (%p1054_p3)  ;;  %v261_v5 = vld [vmem:[%s1076_s6 + $0x50] sm:$0xff] (%p1054_p3)  ;;  %258 = vst [vmem:[%s190_s7 + $0x18] sm:$0xff] (%p1054_p3), %v257_v3 }
  0x18   : > { %260 = vst [vmem:[%s190_s7 + $0x20] sm:$0xff] (%p1054_p3), %v259_v4  ;;  %262 = vst [vmem:[%s190_s7 + $0x28] sm:$0xff] (%p1054_p3), %v261_v5  ;;  %v263_v6 = vld [vmem:[%s1076_s6 + $0x60] sm:$0xff] (%p1054_p3)  ;;  %v265_v7 = vld [vmem:[%s1076_s6 + $0x70] sm:$0xff] (%p1054_p3) }
  0x19   : > { %v267_v8 = vld [vmem:[%s1076_s6 + $0x80] sm:$0xff]  ;;  %264 = vst [vmem:[%s190_s7 + $0x30] sm:$0xff] %v263_v6  ;;  %266 = vst [vmem:[%s190_s7 + $0x38] sm:$0xff] %v265_v7  ;;  %v269_v9 = vld [vmem:[%s1076_s6 + $0x90] sm:$0xff] }
  0x1a   : > { %268 = vst [vmem:[%s190_s7 + $0x40] sm:$0xff] %v267_v8  ;;  %v271_v10 = vld [vmem:[%s1076_s6 + $0xa0] sm:$0xff]  ;;  %v273_v11 = vld [vmem:[%s1076_s6 + $0xb0] sm:$0xff]  ;;  %270 = vst [vmem:[%s190_s7 + $0x48] sm:$0xff] %v269_v9 }
  0x1b   : > { %272 = vst [vmem:[%s190_s7 + $0x50] sm:$0xff] %v271_v10  ;;  %274 = vst [vmem:[%s190_s7 + $0x58] sm:$0xff] %v273_v11  ;;  %v275_v12 = vld [vmem:[%s1076_s6 + $0xc0] sm:$0xff]  ;;  %v277_v13 = vld [vmem:[%s1076_s6 + $0xd0] sm:$0xff] }
  0x1c   : > { %v279_v14 = vld [vmem:[%s1076_s6 + $0xe0] sm:$0xff]  ;;  %276 = vst [vmem:[%s190_s7 + $0x60] sm:$0xff] %v275_v12  ;;  %278 = vst [vmem:[%s190_s7 + $0x68] sm:$0xff] %v277_v13  ;;  %v281_v15 = vld [vmem:[%s1076_s6 + $0xf0] sm:$0xff] }
  0x1d   : > { %280 = vst [vmem:[%s190_s7 + $0x70] sm:$0xff] %v279_v14  ;;  %282 = vst [vmem:[%s190_s7 + $0x78] sm:$0xff] %v281_v15 }
  0x1e PF: > { %296 = sbr.rel (!%p1054_p3) target bundleno = 37 (0x25), region = 66  ;;  %s298_s8 = sand.u32 (%p1054_p3), 1, %s982_s16  }
  0x1f   : > { %s867_s9 = sshll.u32 (%p1054_p3), %s990_s18, 3  ;;  %s831_s10 = sshll.u32 (%p1054_p3), %s298_s8, 5 }
  0x20   : > { %s306_s13 = scalar_lea.vmem (%p1054_p3), %s1164_s3, %s867_s9  ;;  %s300_s14 = scalar_lea.vmem (%p1054_p3), [#allocation3], %s831_s10 }
  0x21   : > { %v340_v16 = vld [vmem:[%s306_s13] sm:$0xff] (%p1054_p3)  ;;  %v342_v17 = vld [vmem:[%s306_s13 + $0x10] sm:$0xff] (%p1054_p3) }
  0x22   : > { %v344_v18 = vld [vmem:[%s306_s13 + $0x20] sm:$0xff] (%p1054_p3)  ;;  %341 = vst [vmem:[%s300_s14] sm:$0xff] (%p1054_p3), %v340_v16  ;;  %343 = vst [vmem:[%s300_s14 + $0x8] sm:$0xff] (%p1054_p3), %v342_v17  ;;  %v346_v19 = vld [vmem:[%s306_s13 + $0x30] sm:$0xff] (%p1054_p3) }
  0x23   : > { %345 = vst [vmem:[%s300_s14 + $0x10] sm:$0xff] (%p1054_p3), %v344_v18  ;;  %347 = vst [vmem:[%s300_s14 + $0x18] sm:$0xff] (%p1054_p3), %v346_v19 }
  0x25 PF: > { %p834_p8 = scmp.ge.s32.totalorder %s994_s19, 1  ;;  %p352_p9 = scmp.lt.s32.totalorder %s994_s19, 3 }
  0x27   : > { %p353_p10 = pnand %p834_p8, %p352_p9 }
  0x28   : > { %s359_s21 = sand.u32 (!%p353_p10), 1, %s978_s15   ;;  %v996_v20 = vmov (!%p353_p10), 0   ;;  %v954_v37 = vld [vmem:[%s1161_s0] sm:$0xff] (!%p353_p10)   ;;  %v955_v38 = vld [vmem:[%s1161_s0 + $0x8] sm:$0xff] (!%p353_p10)   ;;  %s838_s30 = sshll.u32 (!%p353_p10), %s986_s17, 1  ;;  %v442_v39 = vlaneseq (!%p353_p10) }
  0x29   : > { %356 = sbr.rel (%p353_p10) target bundleno = 308 (0x134), region = 104  ;;  %s835_s22 = sshll.u32 (!%p353_p10), %s359_s21, 7  ;;  %576 = vmatprep.mubr.bf16.mxu0 (!%p353_p10), %v996_v20  ;;  %586 = vmatprep.mubr.bf16.mxu1 (!%p353_p10), %v996_v20 }
  0x2a   : > { %s1106_s23 = scalar_lea.vmem (!%p353_p10), [#allocation2], %s835_s22  ;;  %p411_p11 = scmp.lt.s32.totalorder (!%p353_p10), %s838_s30, 3  ;;  %v443_v40 = vshrl.u32 (!%p353_p10), %v442_v39, 7 }
  0x2b   : > { %v930_v21 = vld [vmem:[%s1106_s23 + $0x4] ss:$8 sps:$4 sm:$0xff] (!%p353_p10)   ;;  %v932_v22 = vld [vmem:[%s1106_s23] ss:$8 sps:$4 sm:$0xff] (!%p353_p10)   ;;  %v933_v23 = vld [vmem:[%s1106_s23 + $0x14] ss:$8 sps:$4 sm:$0xff] (!%p353_p10)  }
  0x2c   : > { %544 = vmatprep.subr.bf16.mxu0 (!%p353_p10), %v930_v21  ;;  %873 = vmatprep.subr.bf16.mxu1 (!%p353_p10), %v930_v21  ;;  %v935_v24 = vld [vmem:[%s1106_s23 + $0x10] ss:$8 sps:$4 sm:$0xff] (!%p353_p10)   ;;  %v936_v25 = vld [vmem:[%s1106_s23 + $0x24] ss:$8 sps:$4 sm:$0xff] (!%p353_p10)   ;;  %v938_v26 = vld [vmem:[%s1106_s23 + $0x20] ss:$8 sps:$4 sm:$0xff] (!%p353_p10)  }
  0x2d   : > { %545 = vmatpush1.bf16.msra.mxu0 (!%p353_p10), %v932_v22  ;;  %881 = vmatpush1.bf16.msra.mxu1 (!%p353_p10), %v932_v22  ;;  %v939_v27 = vld [vmem:[%s1106_s23 + $0x34] ss:$8 sps:$4 sm:$0xff] (!%p353_p10)   ;;  %v941_v28 = vld [vmem:[%s1106_s23 + $0x30] ss:$8 sps:$4 sm:$0xff] (!%p353_p10)   ;;  %v942_v29 = vld [vmem:[%s1106_s23 + $0x44] ss:$8 sps:$4 sm:$0xff] (!%p353_p10)  }
  0x2e   : > { %546 = vmatprep.subr.bf16.mxu0 (!%p353_p10), %v933_v23  ;;  %874 = vmatprep.subr.bf16.mxu1 (!%p353_p10), %v933_v23  ;;  %v944_v30 = vld [vmem:[%s1106_s23 + $0x40] ss:$8 sps:$4 sm:$0xff] (!%p353_p10)   ;;  %v945_v31 = vld [vmem:[%s1106_s23 + $0x54] ss:$8 sps:$4 sm:$0xff] (!%p353_p10)   ;;  %v947_v32 = vld [vmem:[%s1106_s23 + $0x50] ss:$8 sps:$4 sm:$0xff] (!%p353_p10)  }
  0x2f   : > { %v948_v33 = vld [vmem:[%s1106_s23 + $0x64] ss:$8 sps:$4 sm:$0xff] (!%p353_p10)   ;;  %v950_v34 = vld [vmem:[%s1106_s23 + $0x60] ss:$8 sps:$4 sm:$0xff] (!%p353_p10)   ;;  %v951_v35 = vld [vmem:[%s1106_s23 + $0x74] ss:$8 sps:$4 sm:$0xff] (!%p353_p10)  }
  0x30   : > { %v953_v36 = vld [vmem:[%s1106_s23 + $0x70] ss:$8 sps:$4 sm:$0xff]   ;;  %s1175_s30 = smov (!%p411_p11, %s838_s30), 3  ;;  %s1133_s5 = sshll.u32 %s359_s21, 5  ;;  %v444_v41 = vsub.s32 0, %v443_v40  ;;  %v448_v43 = vsub.s32 1, %v443_v40 }
  0x31   : > { %547 = vmatpush1.bf16.msra.mxu0 %v935_v24  ;;  %882 = vmatpush1.bf16.msra.mxu1 %v935_v24  ;;  %s413_s8 = scalar_lea.vmem %s1163_s2, %s1175_s30  ;;  %s368_s9 = scalar_lea.vmem [#allocation3], %s1133_s5 }
  0x32   : > { %548 = vmatprep.subr.bf16.mxu0 %v936_v25  ;;  %875 = vmatprep.subr.bf16.mxu1 %v936_v25  ;;  %v440_v42 = vld [vmem:[%s413_s8] sm:$0x3]  ;;  %v599_v45 = vld [vmem:[%s368_s9 + $0x10] sm:$0xff]  ;;  %v598_v48 = vld [vmem:[%s368_s9 + $0x8] sm:$0xff]  ;;  %s402_s15 = scalar_lea.vmem [#allocation4], %s1133_s5  ;;  %s872_s10 = sshll.u32 (%p1061_p6), %s986_s17, 3 }
  0x33   : > { %v597_v44 = vld [vmem:[%s368_s9] sm:$0xff]  ;;  %v445_v46 = vrot.slane %v440_v42, %v444_v41  ;;  %v449_v47 = vrot.slane %v440_v42, %v448_v43  ;;  %v600_v49 = vld [vmem:[%s368_s9 + $0x18] sm:$0xff]  ;;  %v605_v51 = vunpack.c.l.bf16 %v599_v45  ;;  %v606_v55 = vunpack.c.h.bf16 %v599_v45  ;;  %s665_s13 = scalar_lea.vmem (%p1061_p6), %s1165_s4, %s872_s10 }
  0x34   : > { %v601_v50 = vunpack.c.l.bf16 %v597_v44  ;;  %v602_v54 = vunpack.c.h.bf16 %v597_v44  ;;  %v603_v60 = vunpack.c.l.bf16 %v598_v48  ;;  %v607_v61 = vunpack.c.l.bf16 %v600_v49 }
  0x35   : > { %549 = vmatpush1.bf16.msra.mxu0 %v938_v26  ;;  %883 = vmatpush1.bf16.msra.mxu1 %v938_v26  ;;  %v604_v2 = vunpack.c.h.bf16 %v598_v48  ;;  %v608_v3 = vunpack.c.h.bf16 %v600_v49 }
  0x36   : > { %550 = vmatprep.subr.bf16.mxu0 %v939_v27  ;;  %876 = vmatprep.subr.bf16.mxu1 %v939_v27 }
  0x39   : > { %551 = vmatpush1.bf16.msra.mxu0 %v941_v28  ;;  %884 = vmatpush1.bf16.msra.mxu1 %v941_v28 }
  0x3a   : > { %552 = vmatprep.subr.bf16.mxu0 %v942_v29  ;;  %877 = vmatprep.subr.bf16.mxu1 %v942_v29 }
  0x3d   : > { %553 = vmatpush1.bf16.msra.mxu0 %v944_v30  ;;  %885 = vmatpush1.bf16.msra.mxu1 %v944_v30 }
  0x3e   : > { %554 = vmatprep.subr.bf16.mxu0 %v945_v31  ;;  %878 = vmatprep.subr.bf16.mxu1 %v945_v31 }
  0x41   : > { %555 = vmatpush1.bf16.msra.mxu0 %v947_v32  ;;  %886 = vmatpush1.bf16.msra.mxu1 %v947_v32 }
  0x42   : > { %556 = vmatprep.subr.bf16.mxu0 %v948_v33  ;;  %879 = vmatprep.subr.bf16.mxu1 %v948_v33 }
  0x45   : > { %557 = vmatpush1.bf16.msra.mxu0 %v950_v34  ;;  %887 = vmatpush1.bf16.msra.mxu1 %v950_v34 }
  0x46   : > { %558 = vmatprep.subr.bf16.mxu0 %v951_v35  ;;  %880 = vmatprep.subr.bf16.mxu1 %v951_v35 }
  0x49   : > { %559 = vmatpush1.bf16.msra.mxu0 %v953_v36  ;;  %888 = vmatpush1.bf16.msra.mxu1 %v953_v36 }
  0x4c   : > { %577 = vmatmul.mubr.bf16.vlgmr.msra.gmra.mrb[0].mxu0 %v954_v37  ;;  %587 = vmatmul.mubr.bf16.vlgmr.msra.gmra.mrb[0].mxu1 %v955_v38 }
 0x11f   : > { %v578_v52 = vpop.f32.mrb[0].mxu0  ;;  %v588_v53 = vpop.f32.mrb[0].mxu1 }
 0x120   : > { %v579_v56 = vadd.f32 %v578_v52, %v445_v46  ;;  %v589_v57 = vadd.f32 %v588_v53, %v445_v46  ;;  %v580_v58 = vpop.f32.mrb[1].mxu0  ;;  %v590_v59 = vpop.f32.mrb[1].mxu1 }
 0x121   : > { %v581_v62 = vadd.f32 %v580_v58, %v449_v47  ;;  %v591_v63 = vadd.f32 %v590_v59, %v449_v47  ;;  %v582_v0 = vpop.f32.mrb[2].mxu0  ;;  %v592_v1 = vpop.f32.mrb[2].mxu1 }
 0x122   : > { %v609_v4 = vadd.f32 %v601_v50, %v579_v56  ;;  %v613_v5 = vadd.f32 %v605_v51, %v589_v57  ;;  %v583_v6 = vadd.f32 %v582_v0, %v445_v46  ;;  %v593_v7 = vadd.f32 %v592_v1, %v445_v46  ;;  %v584_v8 = vpop.f32.mrb[3].mxu0  ;;  %v594_v9 = vpop.f32.mrb[3].mxu1 }
 0x123   : > { %v610_v10 = vadd.f32 %v602_v54, %v581_v62  ;;  %v614_v11 = vadd.f32 %v606_v55, %v591_v63  ;;  %v585_v12 = vadd.f32 %v584_v8, %v449_v47  ;;  %v595_v13 = vadd.f32 %v594_v9, %v449_v47 }
 0x124   : > { %v617_v14 = vmax.f32 %v609_v4, 0.0  ;;  %v621_v15 = vmax.f32 %v613_v5, 0.0  ;;  %v611_v16 = vadd.f32 %v603_v60, %v583_v6  ;;  %v615_v17 = vadd.f32 %v607_v61, %v593_v7 }
 0x125   : > { %v618_v18 = vmax.f32 %v610_v10, 0.0  ;;  %v622_v19 = vmax.f32 %v614_v11, 0.0  ;;  %v612_v20 = vadd.f32 %v604_v2, %v585_v12  ;;  %v616_v21 = vadd.f32 %v608_v3, %v595_v13  ;;  %659 = sbr.rel (!%p1061_p6) target bundleno = 308 (0x134), region = 116 }
 0x126   : > { %v619_v22 = vmax.f32 %v611_v16, 0.0  ;;  %v623_v23 = vmax.f32 %v615_v17, 0.0 }
 0x127   : > { %v868_v24 = vpack.c.bf16 %v618_v18, %v617_v14  ;;  %v870_v25 = vpack.c.bf16 %v622_v19, %v621_v15  ;;  %v620_v26 = vmax.f32 %v612_v20, 0.0  ;;  %v624_v27 = vmax.f32 %v616_v21, 0.0 }
 0x129   : > { %649 = vst [vmem:[%s402_s15] sm:$0xff] %v868_v24  ;;  %651 = vst [vmem:[%s402_s15 + $0x10] sm:$0xff] %v870_v25  ;;  %v869_v28 = vpack.c.bf16 %v620_v26, %v619_v22  ;;  %v871_v29 = vpack.c.bf16 %v624_v27, %v623_v23 }
 0x12b   : > { %650 = vst [vmem:[%s402_s15 + $0x8] sm:$0xff] %v869_v28  ;;  %652 = vst [vmem:[%s402_s15 + $0x18] sm:$0xff] %v871_v29 }
 0x130   : > { %v699_v30 = vld [vmem:[%s402_s15] sm:$0xff]  ;;  %v703_v32 = vld [vmem:[%s402_s15 + $0x10] sm:$0xff] }
 0x131   : > { %700 = vst [vmem:[%s665_s13] sm:$0xff] %v699_v30  ;;  %704 = vst [vmem:[%s665_s13 + $0x20] sm:$0xff] %v703_v32 }
 0x132   : > { %v701_v31 = vld [vmem:[%s402_s15 + $0x8] sm:$0xff]  ;;  %v705_v33 = vld [vmem:[%s402_s15 + $0x18] sm:$0xff] }
 0x133   : > { %702 = vst [vmem:[%s665_s13 + $0x10] sm:$0xff] %v701_v31  ;;  %706 = vst [vmem:[%s665_s13 + $0x30] sm:$0xff] %v705_v33 }
 0x134 PF: > { %s14_s19 = sadd.s32 1, %s994_s19   ;;  %s1168_s15 = smov %s982_s16 }
 0x135   : > { %p11_p12 = scmp.ge.s32.totalorder %s14_s19, 4   ;;  %s1169_s16 = smov %s1066_s26 }
 0x136   : > { %s1170_s17 = smov %s990_s18  ;;  %s1171_s18 = smov %s1173_s20 }
 0x137   :  { %13 = sbr.rel (!%p11_p12) target bundleno = 3 (0x3), region = 199 }

// kernel: resnet_feature_extractor.58
= control target key start
LH: loop header
LB: loop body
LE: loop exit
PB: predicated region body
PF: predicated region fallthrough
CT: control target
= control target key end

     0   :  { %s761_s1 = inlined_call_operand.vmem [shape: bf16[512,128], index: 1, kind: input, shape index: {}]   ;;  %s762_s0 = inlined_call_operand.vmem [shape: bf16[32,512], index: 0, kind: input, shape index: {}]   ;;  %s763_s2 = inlined_call_operand.vmem [shape: f32[1,128], index: 2, kind: input, shape index: {}]   ;;  %s764_s3 = inlined_call_operand.vmem [shape: bf16[32,128], index: 3, kind: output, shape index: {}]  }
   0x1   :  { %v568_v0 = vld [vmem:[%s761_s1 + $0x40] sm:$0xff]   ;;  %v572_v4 = vld [vmem:[%s761_s1 + $0x48] sm:$0xff]   ;;  %v576_v8 = vld [vmem:[%s761_s1 + $0x50] sm:$0xff]  }
   0x2   :  { %v569_v1 = vld [vmem:[%s761_s1 + $0xc0] sm:$0xff]   ;;  %512 = vmatprep.subr.bf16.mxu0 %v568_v0  ;;  %v573_v5 = vld [vmem:[%s761_s1 + $0xc8] sm:$0xff]   ;;  %v577_v9 = vld [vmem:[%s761_s1 + $0xd0] sm:$0xff]  }
   0x3   :  { %v570_v2 = vld [vmem:[%s761_s1] sm:$0xff]   ;;  %540 = vmatprep.subr.bf16.mxu1 %v569_v1  ;;  %v574_v6 = vld [vmem:[%s761_s1 + $0x8] sm:$0xff]   ;;  %v578_v10 = vld [vmem:[%s761_s1 + $0x10] sm:$0xff]  }
   0x4   :  { %v571_v3 = vld [vmem:[%s761_s1 + $0x80] sm:$0xff]   ;;  %513 = vmatpush3.bf16.msra.mxu0 %v570_v2  ;;  %v575_v7 = vld [vmem:[%s761_s1 + $0x88] sm:$0xff]   ;;  %v579_v11 = vld [vmem:[%s761_s1 + $0x90] sm:$0xff]  }
   0x5   :  { %541 = vmatpush3.bf16.msra.mxu1 %v571_v3  ;;  %514 = vmatprep.subr.bf16.mxu0 %v572_v4  ;;  %v580_v12 = vld [vmem:[%s761_s1 + $0x58] sm:$0xff]   ;;  %v584_v16 = vld [vmem:[%s761_s1 + $0x60] sm:$0xff]   ;;  %v588_v20 = vld [vmem:[%s761_s1 + $0x68] sm:$0xff]  }
   0x6   :  { %542 = vmatprep.subr.bf16.mxu1 %v573_v5  ;;  %v581_v13 = vld [vmem:[%s761_s1 + $0xd8] sm:$0xff]   ;;  %v585_v17 = vld [vmem:[%s761_s1 + $0xe0] sm:$0xff]   ;;  %v589_v21 = vld [vmem:[%s761_s1 + $0xe8] sm:$0xff]  }
   0x7   :  { %v582_v14 = vld [vmem:[%s761_s1 + $0x18] sm:$0xff]   ;;  %v586_v18 = vld [vmem:[%s761_s1 + $0x20] sm:$0xff]   ;;  %v590_v22 = vld [vmem:[%s761_s1 + $0x28] sm:$0xff]  }
   0x8   :  { %515 = vmatpush3.bf16.msra.mxu0 %v574_v6  ;;  %v583_v15 = vld [vmem:[%s761_s1 + $0x98] sm:$0xff]   ;;  %v587_v19 = vld [vmem:[%s761_s1 + $0xa0] sm:$0xff]   ;;  %v591_v23 = vld [vmem:[%s761_s1 + $0xa8] sm:$0xff]  }
   0x9   :  { %543 = vmatpush3.bf16.msra.mxu1 %v575_v7  ;;  %516 = vmatprep.subr.bf16.mxu0 %v576_v8  ;;  %v592_v24 = vld [vmem:[%s761_s1 + $0x70] sm:$0xff]   ;;  %v596_v28 = vld [vmem:[%s761_s1 + $0x78] sm:$0xff]   ;;  %v452_v42 = vld [vmem:[%s763_s2] ss:$0 sm:$0xff] }
   0xa   :  { %544 = vmatprep.subr.bf16.mxu1 %v577_v9  ;;  %v593_v25 = vld [vmem:[%s761_s1 + $0xf0] sm:$0xff]   ;;  %v597_v29 = vld [vmem:[%s761_s1 + $0xf8] sm:$0xff]  }
   0xb   :  { %v594_v26 = vld [vmem:[%s761_s1 + $0x30] sm:$0xff]   ;;  %v598_v30 = vld [vmem:[%s761_s1 + $0x38] sm:$0xff]  }
   0xc   :  { %517 = vmatpush3.bf16.msra.mxu0 %v578_v10  ;;  %v595_v27 = vld [vmem:[%s761_s1 + $0xb0] sm:$0xff]   ;;  %v599_v31 = vld [vmem:[%s761_s1 + $0xb8] sm:$0xff]  }
   0xd   :  { %545 = vmatpush3.bf16.msra.mxu1 %v579_v11  ;;  %518 = vmatprep.subr.bf16.mxu0 %v580_v12  ;;  %v600_v32 = vld [vmem:[%s762_s0] ss:$16 sps:$4 sm:$0xff]   ;;  %v602_v33 = vld [vmem:[%s762_s0 + $0x4] ss:$16 sps:$4 sm:$0xff]   ;;  %v603_v34 = vld [vmem:[%s762_s0 + $0x8] ss:$16 sps:$4 sm:$0xff]  }
   0xe   :  { %546 = vmatprep.subr.bf16.mxu1 %v581_v13  ;;  %v605_v35 = vld [vmem:[%s762_s0 + $0xc] ss:$16 sps:$4 sm:$0xff]   ;;  %358 = vmatprep.mubr.bf16.mxu0 %v602_v33  ;;  %v606_v36 = vld [vmem:[%s762_s0 + $0x24] ss:$16 sps:$4 sm:$0xff]   ;;  %v610_v38 = vld [vmem:[%s762_s0 + $0x20] ss:$16 sps:$4 sm:$0xff]  }
   0xf   :  { %407 = vmatprep.mubr.bf16.mxu1 %v605_v35  ;;  %v608_v37 = vld [vmem:[%s762_s0 + $0x2c] ss:$16 sps:$4 sm:$0xff]   ;;  %v611_v39 = vld [vmem:[%s762_s0 + $0x28] ss:$16 sps:$4 sm:$0xff]  }
  0x10   :  { %519 = vmatpush3.bf16.msra.mxu0 %v582_v14 }
  0x11   :  { %547 = vmatpush3.bf16.msra.mxu1 %v583_v15  ;;  %520 = vmatprep.subr.bf16.mxu0 %v584_v16 }
  0x12   :  { %548 = vmatprep.subr.bf16.mxu1 %v585_v17 }
  0x14   :  { %521 = vmatpush3.bf16.msra.mxu0 %v586_v18 }
  0x15   :  { %549 = vmatpush3.bf16.msra.mxu1 %v587_v19  ;;  %522 = vmatprep.subr.bf16.mxu0 %v588_v20 }
  0x16   :  { %550 = vmatprep.subr.bf16.mxu1 %v589_v21 }
  0x18   :  { %523 = vmatpush3.bf16.msra.mxu0 %v590_v22 }
  0x19   :  { %551 = vmatpush3.bf16.msra.mxu1 %v591_v23  ;;  %524 = vmatprep.subr.bf16.mxu0 %v592_v24 }
  0x1a   :  { %552 = vmatprep.subr.bf16.mxu1 %v593_v25 }
  0x1c   :  { %525 = vmatpush3.bf16.msra.mxu0 %v594_v26 }
  0x1d   :  { %553 = vmatpush3.bf16.msra.mxu1 %v595_v27  ;;  %526 = vmatprep.subr.bf16.mxu0 %v596_v28 }
  0x1e   :  { %554 = vmatprep.subr.bf16.mxu1 %v597_v29 }
  0x20   :  { %527 = vmatpush3.bf16.msra.mxu0 %v598_v30 }
  0x21   :  { %555 = vmatpush3.bf16.msra.mxu1 %v599_v31 }
  0x23   :  { %359 = vmatmul.mubr.bf16.vlgmr.msra.gmra.mrb[0].mxu0 %v600_v32 }
  0x24   :  { %408 = vmatmul.mubr.bf16.vlgmr.msra.gmra.mrb[0].mxu1 %v603_v34  ;;  %366 = vmatprep.mubr.bf16.mxu0 %v606_v36 }
  0x25   :  { %415 = vmatprep.mubr.bf16.mxu1 %v608_v37 }
  0x2b   :  { %367 = vmatmul.mubr.bf16.gmra.mrb[4].mxu0 %v610_v38 }
  0x2c   :  { %416 = vmatmul.mubr.bf16.gmra.mrb[4].mxu1 %v611_v39 }
  0xf6   :  { %v528_v40 = vpop.f32.mrb[0].mxu0 }
  0xf7   :  { %v556_v41 = vpop.f32.mrb[0].mxu1  ;;  %v529_v43 = vpop.f32.mrb[1].mxu0 }
  0xf8   :  { %v530_v44 = vadd.f32 %v529_v43, %v528_v40  ;;  %v557_v45 = vpop.f32.mrb[1].mxu1  ;;  %v531_v46 = vpop.f32.mrb[2].mxu0 }
  0xf9   :  { %v558_v47 = vadd.f32 %v557_v45, %v556_v41  ;;  %v559_v48 = vpop.f32.mrb[2].mxu1  ;;  %v532_v49 = vpop.f32.mrb[3].mxu0 }
  0xfa   :  { %v361_v50 = vadd.f32 %v530_v44, %v452_v42  ;;  %v533_v51 = vadd.f32 %v532_v49, %v531_v46  ;;  %v560_v52 = vpop.f32.mrb[3].mxu1 }
  0xfb   :  { %v561_v53 = vadd.f32 %v560_v52, %v559_v48 }
  0xfc   :  { %v410_v54 = vadd.f32 %v558_v47, %v361_v50  ;;  %v364_v55 = vadd.f32 %v533_v51, %v452_v42 }
  0xfe   :  { %v413_v56 = vadd.f32 %v561_v53, %v364_v55  ;;  %v534_v57 = vpop.f32.mrb[4].mxu0  ;;  %v424_v60 = vmax.f32 %v410_v54, 0.0 }
  0xff   :  { %v562_v58 = vpop.f32.mrb[4].mxu1  ;;  %v535_v59 = vpop.f32.mrb[5].mxu0 }
 0x100   :  { %v425_v61 = vmax.f32 %v413_v56, 0.0  ;;  %v536_v62 = vadd.f32 %v535_v59, %v534_v57  ;;  %v563_v63 = vpop.f32.mrb[5].mxu1  ;;  %v537_v0 = vpop.f32.mrb[6].mxu0 }
 0x101   :  { %v564_v1 = vadd.f32 %v563_v63, %v562_v58  ;;  %v565_v2 = vpop.f32.mrb[6].mxu1  ;;  %v538_v3 = vpop.f32.mrb[7].mxu0 }
 0x102   :  { %v504_v4 = vpack.c.bf16 %v425_v61, %v424_v60  ;;  %v369_v5 = vadd.f32 %v536_v62, %v452_v42  ;;  %v539_v6 = vadd.f32 %v538_v3, %v537_v0  ;;  %v566_v7 = vpop.f32.mrb[7].mxu1 }
 0x103   :  { %v567_v8 = vadd.f32 %v566_v7, %v565_v2 }
 0x104   :  { %505 = vst [vmem:[%s764_s3] sm:$0xff] %v504_v4   ;;  %v418_v9 = vadd.f32 %v564_v1, %v369_v5  ;;  %v372_v10 = vadd.f32 %v539_v6, %v452_v42 }
 0x106   :  { %v421_v11 = vadd.f32 %v567_v8, %v372_v10  ;;  %v426_v12 = vmax.f32 %v418_v9, 0.0 }
 0x108   :  { %v427_v13 = vmax.f32 %v421_v11, 0.0 }
 0x10a   :  { %v509_v14 = vpack.c.bf16 %v427_v13, %v426_v12 }
 0x10c   :  { %511 = vst [vmem:[%s764_s3 + $0x8] sm:$0xff] %v509_v14  }

// kernel: resnet_feature_extractor.67
= control target key start
LH: loop header
LB: loop body
LE: loop exit
PB: predicated region body
PF: predicated region fallthrough
CT: control target
= control target key end

     0   :  { %s1374_s12 = smov 0   ;;  %s1376_s13 = smov 0   ;;  %s1645_s0 = inlined_call_operand.vmem [shape: bf16[32,512], index: 0, kind: input, shape index: {}]   ;;  %s1646_s1 = inlined_call_operand.vmem [shape: bf16[512,256], index: 1, kind: input, shape index: {}]   ;;  %s1647_s2 = inlined_call_operand.vmem [shape: f32[1,256], index: 2, kind: input, shape index: {}]   ;;  %s1648_s3 = inlined_call_operand.vmem [shape: bf16[32,256], index: 3, kind: output, shape index: {}]  }
   0x1   :  { %s1378_s14 = smov 0   ;;  %s1380_s15 = smov 0  }
   0x2   :  { %s1382_s16 = smov 0  }
   0x3 LB: > { %s22_s17 = sadd.s32 1, %s1348_s15  ;;  %s1100_s18 = sadd.s32 4294967295, %s1352_s16   ;;  %s1352_s16 = sphi %s1382_s16, %s13_s16   ;;  %s1348_s15 = sphi %s1380_s15, %s1653_s15   ;;  %s1344_s14 = sphi %s1378_s14, %s1652_s14   ;;  %s1340_s13 = sphi %s1376_s13, %s1651_s13   ;;  %s1336_s12 = sphi %s1374_s12, %s1650_s12  }
   0x4   : > { %p23_p0 = scmp.ge.s32.totalorder %s22_s17, 2  ;;  %p65_p1 = scmp.ne.s32.totalorder %s1340_s13, %s1336_s12 }
   0x5   : > { %p66_p2 = scmp.eq.s32.totalorder %s1352_s16, 0  ;;  %p123_p4 = scmp.eq.s32.totalorder %s1100_s18, 1 }
   0x6   : > { %s1655_s17 = smov (%p23_p0, %s22_s17), 0  ;;  %s58_s20 = sadd.s32 1, %s1340_s13 }
   0x7   : > { %p67_p3 = por %p66_p2, %p65_p1  ;;  %s55_s19 = ssub.s32 %s1348_s15, %s1655_s17 }
   0x8   : > { %p56_p5 = scmp.eq.s32.totalorder %s55_s19, 0  ;;  %p1409_p6 = por %p123_p4, %p65_p1 }
   0x9   : > { %p1104_p7 = scmp.ge.s32.totalorder %s1352_s16, 2 }
   0xa   : > { %s1414_s22 = scalar_select %p56_p5, %s1340_s13, %s58_s20  }
   0xb   : > { %155 = sbr.rel (%p1104_p7) target bundleno = 64 (0x40), region = 20 }
  0x12   : > { %158 = sbr.rel (!%p67_p3) target bundleno = 64 (0x40), region = 24  ;;  %s160_s23 = sand.u32 (%p67_p3), 1, %s1340_s13  }
  0x13   : > { %s1106_s24 = sshll.u32 (%p67_p3), %s1348_s15, 2  ;;  %s1105_s25 = sshll.u32 (%p67_p3), %s160_s23, 8 }
  0x14   : > { %s1422_s28 = scalar_lea.vmem (%p67_p3), %s1646_s1, %s1106_s24  ;;  %s1426_s29 = scalar_lea.vmem (%p67_p3), [#allocation2], %s1105_s25 }
  0x15   : > { %v180_v0 = vld [vmem:[%s1422_s28] sm:$0xf] (%p67_p3)  ;;  %v182_v1 = vld [vmem:[%s1422_s28 + $0x8] sm:$0xf] (%p67_p3)  ;;  %v184_v2 = vld [vmem:[%s1422_s28 + $0x10] sm:$0xf] (%p67_p3) }
  0x16   : > { %181 = vst [vmem:[%s1426_s29] sm:$0xf] (%p67_p3), %v180_v0  ;;  %183 = vst [vmem:[%s1426_s29 + $0x4] sm:$0xf] (%p67_p3), %v182_v1  ;;  %v186_v3 = vld [vmem:[%s1422_s28 + $0x18] sm:$0xf] (%p67_p3) }
  0x17   : > { %v188_v4 = vld [vmem:[%s1422_s28 + $0x20] sm:$0xf] (%p67_p3)  ;;  %185 = vst [vmem:[%s1426_s29 + $0x8] sm:$0xf] (%p67_p3), %v184_v2  ;;  %187 = vst [vmem:[%s1426_s29 + $0xc] sm:$0xf] (%p67_p3), %v186_v3 }
  0x18   : > { %189 = vst [vmem:[%s1426_s29 + $0x10] sm:$0xf] (%p67_p3), %v188_v4  ;;  %v190_v5 = vld [vmem:[%s1422_s28 + $0x28] sm:$0xf] (%p67_p3)  ;;  %v192_v6 = vld [vmem:[%s1422_s28 + $0x30] sm:$0xf] (%p67_p3) }
  0x19   : > { %v194_v7 = vld [vmem:[%s1422_s28 + $0x38] sm:$0xf]  ;;  %191 = vst [vmem:[%s1426_s29 + $0x14] sm:$0xf] %v190_v5  ;;  %193 = vst [vmem:[%s1426_s29 + $0x18] sm:$0xf] %v192_v6 }
  0x1a   : > { %195 = vst [vmem:[%s1426_s29 + $0x1c] sm:$0xf] %v194_v7  ;;  %v196_v8 = vld [vmem:[%s1422_s28 + $0x40] sm:$0xf]  ;;  %v198_v9 = vld [vmem:[%s1422_s28 + $0x48] sm:$0xf] }
  0x1b   : > { %v200_v10 = vld [vmem:[%s1422_s28 + $0x50] sm:$0xf]  ;;  %197 = vst [vmem:[%s1426_s29 + $0x20] sm:$0xf] %v196_v8  ;;  %199 = vst [vmem:[%s1426_s29 + $0x24] sm:$0xf] %v198_v9 }
  0x1c   : > { %201 = vst [vmem:[%s1426_s29 + $0x28] sm:$0xf] %v200_v10  ;;  %v202_v11 = vld [vmem:[%s1422_s28 + $0x58] sm:$0xf]  ;;  %v204_v12 = vld [vmem:[%s1422_s28 + $0x60] sm:$0xf] }
  0x1d   : > { %v206_v13 = vld [vmem:[%s1422_s28 + $0x68] sm:$0xf]  ;;  %203 = vst [vmem:[%s1426_s29 + $0x2c] sm:$0xf] %v202_v11  ;;  %205 = vst [vmem:[%s1426_s29 + $0x30] sm:$0xf] %v204_v12 }
  0x1e   : > { %207 = vst [vmem:[%s1426_s29 + $0x34] sm:$0xf] %v206_v13  ;;  %v208_v14 = vld [vmem:[%s1422_s28 + $0x70] sm:$0xf]  ;;  %v210_v15 = vld [vmem:[%s1422_s28 + $0x78] sm:$0xf] }
  0x1f   : > { %v212_v16 = vld [vmem:[%s1422_s28 + $0x80] sm:$0xf]  ;;  %209 = vst [vmem:[%s1426_s29 + $0x38] sm:$0xf] %v208_v14  ;;  %211 = vst [vmem:[%s1426_s29 + $0x3c] sm:$0xf] %v210_v15 }
  0x20   : > { %213 = vst [vmem:[%s1426_s29 + $0x40] sm:$0xf] %v212_v16  ;;  %v214_v17 = vld [vmem:[%s1422_s28 + $0x88] sm:$0xf]  ;;  %v216_v18 = vld [vmem:[%s1422_s28 + $0x90] sm:$0xf] }
  0x21   : > { %v218_v19 = vld [vmem:[%s1422_s28 + $0x98] sm:$0xf]  ;;  %215 = vst [vmem:[%s1426_s29 + $0x44] sm:$0xf] %v214_v17  ;;  %217 = vst [vmem:[%s1426_s29 + $0x48] sm:$0xf] %v216_v18 }
  0x22   : > { %219 = vst [vmem:[%s1426_s29 + $0x4c] sm:$0xf] %v218_v19  ;;  %v220_v20 = vld [vmem:[%s1422_s28 + $0xa0] sm:$0xf]  ;;  %v222_v21 = vld [vmem:[%s1422_s28 + $0xa8] sm:$0xf] }
  0x23   : > { %v224_v22 = vld [vmem:[%s1422_s28 + $0xb0] sm:$0xf]  ;;  %221 = vst [vmem:[%s1426_s29 + $0x50] sm:$0xf] %v220_v20  ;;  %223 = vst [vmem:[%s1426_s29 + $0x54] sm:$0xf] %v222_v21 }
  0x24   : > { %225 = vst [vmem:[%s1426_s29 + $0x58] sm:$0xf] %v224_v22  ;;  %v226_v23 = vld [vmem:[%s1422_s28 + $0xb8] sm:$0xf]  ;;  %v228_v24 = vld [vmem:[%s1422_s28 + $0xc0] sm:$0xf] }
  0x25   : > { %v230_v25 = vld [vmem:[%s1422_s28 + $0xc8] sm:$0xf]  ;;  %227 = vst [vmem:[%s1426_s29 + $0x5c] sm:$0xf] %v226_v23  ;;  %229 = vst [vmem:[%s1426_s29 + $0x60] sm:$0xf] %v228_v24 }
  0x26   : > { %231 = vst [vmem:[%s1426_s29 + $0x64] sm:$0xf] %v230_v25  ;;  %v232_v26 = vld [vmem:[%s1422_s28 + $0xd0] sm:$0xf]  ;;  %v234_v27 = vld [vmem:[%s1422_s28 + $0xd8] sm:$0xf] }
  0x27   : > { %v236_v28 = vld [vmem:[%s1422_s28 + $0xe0] sm:$0xf]  ;;  %233 = vst [vmem:[%s1426_s29 + $0x68] sm:$0xf] %v232_v26  ;;  %235 = vst [vmem:[%s1426_s29 + $0x6c] sm:$0xf] %v234_v27 }
  0x28   : > { %237 = vst [vmem:[%s1426_s29 + $0x70] sm:$0xf] %v236_v28  ;;  %v238_v29 = vld [vmem:[%s1422_s28 + $0xe8] sm:$0xf]  ;;  %v240_v30 = vld [vmem:[%s1422_s28 + $0xf0] sm:$0xf] }
  0x29   : > { %v242_v31 = vld [vmem:[%s1422_s28 + $0xf8] sm:$0xf]  ;;  %239 = vst [vmem:[%s1426_s29 + $0x74] sm:$0xf] %v238_v29  ;;  %241 = vst [vmem:[%s1426_s29 + $0x78] sm:$0xf] %v240_v30 }
  0x2a   : > { %243 = vst [vmem:[%s1426_s29 + $0x7c] sm:$0xf] %v242_v31  ;;  %v244_v32 = vld [vmem:[%s1422_s28 + $0x100] sm:$0xf]  ;;  %v246_v33 = vld [vmem:[%s1422_s28 + $0x108] sm:$0xf] }
  0x2b   : > { %v248_v34 = vld [vmem:[%s1422_s28 + $0x110] sm:$0xf]  ;;  %245 = vst [vmem:[%s1426_s29 + $0x80] sm:$0xf] %v244_v32  ;;  %247 = vst [vmem:[%s1426_s29 + $0x84] sm:$0xf] %v246_v33 }
  0x2c   : > { %249 = vst [vmem:[%s1426_s29 + $0x88] sm:$0xf] %v248_v34  ;;  %v250_v35 = vld [vmem:[%s1422_s28 + $0x118] sm:$0xf]  ;;  %v252_v36 = vld [vmem:[%s1422_s28 + $0x120] sm:$0xf] }
  0x2d   : > { %v254_v37 = vld [vmem:[%s1422_s28 + $0x128] sm:$0xf]  ;;  %251 = vst [vmem:[%s1426_s29 + $0x8c] sm:$0xf] %v250_v35  ;;  %253 = vst [vmem:[%s1426_s29 + $0x90] sm:$0xf] %v252_v36 }
  0x2e   : > { %255 = vst [vmem:[%s1426_s29 + $0x94] sm:$0xf] %v254_v37  ;;  %v256_v38 = vld [vmem:[%s1422_s28 + $0x130] sm:$0xf]  ;;  %v258_v39 = vld [vmem:[%s1422_s28 + $0x138] sm:$0xf] }
  0x2f   : > { %v260_v40 = vld [vmem:[%s1422_s28 + $0x140] sm:$0xf]  ;;  %257 = vst [vmem:[%s1426_s29 + $0x98] sm:$0xf] %v256_v38  ;;  %259 = vst [vmem:[%s1426_s29 + $0x9c] sm:$0xf] %v258_v39 }
  0x30   : > { %261 = vst [vmem:[%s1426_s29 + $0xa0] sm:$0xf] %v260_v40  ;;  %v262_v41 = vld [vmem:[%s1422_s28 + $0x148] sm:$0xf]  ;;  %v264_v42 = vld [vmem:[%s1422_s28 + $0x150] sm:$0xf] }
  0x31   : > { %v266_v43 = vld [vmem:[%s1422_s28 + $0x158] sm:$0xf]  ;;  %263 = vst [vmem:[%s1426_s29 + $0xa4] sm:$0xf] %v262_v41  ;;  %265 = vst [vmem:[%s1426_s29 + $0xa8] sm:$0xf] %v264_v42 }
  0x32   : > { %267 = vst [vmem:[%s1426_s29 + $0xac] sm:$0xf] %v266_v43  ;;  %v268_v44 = vld [vmem:[%s1422_s28 + $0x160] sm:$0xf]  ;;  %v270_v45 = vld [vmem:[%s1422_s28 + $0x168] sm:$0xf] }
  0x33   : > { %v272_v46 = vld [vmem:[%s1422_s28 + $0x170] sm:$0xf]  ;;  %269 = vst [vmem:[%s1426_s29 + $0xb0] sm:$0xf] %v268_v44  ;;  %271 = vst [vmem:[%s1426_s29 + $0xb4] sm:$0xf] %v270_v45 }
  0x34   : > { %273 = vst [vmem:[%s1426_s29 + $0xb8] sm:$0xf] %v272_v46  ;;  %v274_v47 = vld [vmem:[%s1422_s28 + $0x178] sm:$0xf]  ;;  %v276_v48 = vld [vmem:[%s1422_s28 + $0x180] sm:$0xf] }
  0x35   : > { %v278_v49 = vld [vmem:[%s1422_s28 + $0x188] sm:$0xf]  ;;  %275 = vst [vmem:[%s1426_s29 + $0xbc] sm:$0xf] %v274_v47  ;;  %277 = vst [vmem:[%s1426_s29 + $0xc0] sm:$0xf] %v276_v48 }
  0x36   : > { %279 = vst [vmem:[%s1426_s29 + $0xc4] sm:$0xf] %v278_v49  ;;  %v280_v50 = vld [vmem:[%s1422_s28 + $0x190] sm:$0xf]  ;;  %v282_v51 = vld [vmem:[%s1422_s28 + $0x198] sm:$0xf] }
  0x37   : > { %v284_v52 = vld [vmem:[%s1422_s28 + $0x1a0] sm:$0xf]  ;;  %281 = vst [vmem:[%s1426_s29 + $0xc8] sm:$0xf] %v280_v50  ;;  %283 = vst [vmem:[%s1426_s29 + $0xcc] sm:$0xf] %v282_v51 }
  0x38   : > { %285 = vst [vmem:[%s1426_s29 + $0xd0] sm:$0xf] %v284_v52  ;;  %v286_v53 = vld [vmem:[%s1422_s28 + $0x1a8] sm:$0xf]  ;;  %v288_v54 = vld [vmem:[%s1422_s28 + $0x1b0] sm:$0xf] }
  0x39   : > { %v290_v55 = vld [vmem:[%s1422_s28 + $0x1b8] sm:$0xf]  ;;  %287 = vst [vmem:[%s1426_s29 + $0xd4] sm:$0xf] %v286_v53  ;;  %289 = vst [vmem:[%s1426_s29 + $0xd8] sm:$0xf] %v288_v54 }
  0x3a   : > { %291 = vst [vmem:[%s1426_s29 + $0xdc] sm:$0xf] %v290_v55  ;;  %v292_v56 = vld [vmem:[%s1422_s28 + $0x1c0] sm:$0xf]  ;;  %v294_v57 = vld [vmem:[%s1422_s28 + $0x1c8] sm:$0xf] }
  0x3b   : > { %v296_v58 = vld [vmem:[%s1422_s28 + $0x1d0] sm:$0xf]  ;;  %293 = vst [vmem:[%s1426_s29 + $0xe0] sm:$0xf] %v292_v56  ;;  %295 = vst [vmem:[%s1426_s29 + $0xe4] sm:$0xf] %v294_v57 }
  0x3c   : > { %297 = vst [vmem:[%s1426_s29 + $0xe8] sm:$0xf] %v296_v58  ;;  %v298_v59 = vld [vmem:[%s1422_s28 + $0x1d8] sm:$0xf]  ;;  %v300_v60 = vld [vmem:[%s1422_s28 + $0x1e0] sm:$0xf] }
  0x3d   : > { %v302_v61 = vld [vmem:[%s1422_s28 + $0x1e8] sm:$0xf]  ;;  %299 = vst [vmem:[%s1426_s29 + $0xec] sm:$0xf] %v298_v59  ;;  %301 = vst [vmem:[%s1426_s29 + $0xf0] sm:$0xf] %v300_v60 }
  0x3e   : > { %303 = vst [vmem:[%s1426_s29 + $0xf4] sm:$0xf] %v302_v61  ;;  %v304_v62 = vld [vmem:[%s1422_s28 + $0x1f0] sm:$0xf]  ;;  %v306_v63 = vld [vmem:[%s1422_s28 + $0x1f8] sm:$0xf] }
  0x3f   : > { %305 = vst [vmem:[%s1426_s29 + $0xf8] sm:$0xf] %v304_v62  ;;  %307 = vst [vmem:[%s1426_s29 + $0xfc] sm:$0xf] %v306_v63 }
  0x40 PF: > { %p1107_p8 = scmp.ge.s32.totalorder %s1352_s16, 1  ;;  %p463_p9 = scmp.lt.s32.totalorder %s1352_s16, 3 }
  0x42   : > { %p464_p10 = pnand %p1107_p8, %p463_p9 }
  0x43   : > { %s470_s30 = sand.u32 (!%p464_p10), 1, %s1336_s12   ;;  %v1304_v0 = vld [vmem:[%s1645_s0 + $0x4] ss:$16 sps:$4 sm:$0xff] (!%p464_p10)   ;;  %v1307_v1 = vld [vmem:[%s1645_s0 + $0xc] ss:$16 sps:$4 sm:$0xff] (!%p464_p10)   ;;  %p508_p11 = scmp.lt.s32.totalorder (!%p464_p10), %s1344_s14, 1 }
  0x44   : > { %467 = sbr.rel (%p464_p10) target bundleno = 346 (0x15a), region = 69  ;;  %s1108_s4 = sshll.u32 (!%p464_p10), %s470_s30, 8  ;;  %856 = vmatprep.mubr.bf16.mxu0 (!%p464_p10), %v1304_v0  ;;  %905 = vmatprep.mubr.bf16.mxu1 (!%p464_p10), %v1307_v1  ;;  %v1302_v32 = vld [vmem:[%s1645_s0] ss:$16 sps:$4 sm:$0xff] (!%p464_p10)   ;;  %v1305_v34 = vld [vmem:[%s1645_s0 + $0x8] ss:$16 sps:$4 sm:$0xff] (!%p464_p10)  }
  0x45   : > { %s1565_s9 = scalar_lea.vmem (!%p464_p10), [#allocation2], %s1108_s4  ;;  %v1308_v36 = vld [vmem:[%s1645_s0 + $0x24] ss:$16 sps:$4 sm:$0xff] (!%p464_p10)   ;;  %v1310_v37 = vld [vmem:[%s1645_s0 + $0x2c] ss:$16 sps:$4 sm:$0xff] (!%p464_p10)   ;;  %s1109_s8 = sshll.u32 (!%p464_p10), %s470_s30, 4 }
  0x46   : > { %v1270_v2 = vld [vmem:[%s1565_s9 + $0x40] sm:$0xff] (!%p464_p10)   ;;  %v1274_v6 = vld [vmem:[%s1565_s9 + $0x48] sm:$0xff] (!%p464_p10)   ;;  %v1278_v10 = vld [vmem:[%s1565_s9 + $0x50] sm:$0xff] (!%p464_p10)  }
  0x47   : > { %v1271_v3 = vld [vmem:[%s1565_s9 + $0xc0] sm:$0xff] (!%p464_p10)   ;;  %1174 = vmatprep.subr.bf16.mxu0 (!%p464_p10), %v1270_v2  ;;  %v1275_v7 = vld [vmem:[%s1565_s9 + $0xc8] sm:$0xff] (!%p464_p10)   ;;  %v1279_v11 = vld [vmem:[%s1565_s9 + $0xd0] sm:$0xff] (!%p464_p10)  }
  0x48   : > { %v1272_v4 = vld [vmem:[%s1565_s9] sm:$0xff] (!%p464_p10)   ;;  %1202 = vmatprep.subr.bf16.mxu1 (!%p464_p10), %v1271_v3  ;;  %v1276_v8 = vld [vmem:[%s1565_s9 + $0x8] sm:$0xff] (!%p464_p10)   ;;  %v1280_v12 = vld [vmem:[%s1565_s9 + $0x10] sm:$0xff] (!%p464_p10)  }
  0x49   : > { %v1273_v5 = vld [vmem:[%s1565_s9 + $0x80] sm:$0xff] (!%p464_p10)   ;;  %1175 = vmatpush3.bf16.msra.mxu0 (!%p464_p10), %v1272_v4  ;;  %v1277_v9 = vld [vmem:[%s1565_s9 + $0x88] sm:$0xff] (!%p464_p10)   ;;  %v1281_v13 = vld [vmem:[%s1565_s9 + $0x90] sm:$0xff] (!%p464_p10)  }
  0x4a   : > { %1203 = vmatpush3.bf16.msra.mxu1 (!%p464_p10), %v1273_v5  ;;  %1176 = vmatprep.subr.bf16.mxu0 (!%p464_p10), %v1274_v6  ;;  %v1282_v14 = vld [vmem:[%s1565_s9 + $0x58] sm:$0xff] (!%p464_p10)   ;;  %v1286_v18 = vld [vmem:[%s1565_s9 + $0x60] sm:$0xff] (!%p464_p10)   ;;  %v1290_v22 = vld [vmem:[%s1565_s9 + $0x68] sm:$0xff] (!%p464_p10)  }
  0x4b   : > { %1204 = vmatprep.subr.bf16.mxu1 %v1275_v7  ;;  %v1283_v15 = vld [vmem:[%s1565_s9 + $0xd8] sm:$0xff]   ;;  %v1287_v19 = vld [vmem:[%s1565_s9 + $0xe0] sm:$0xff]   ;;  %v1291_v23 = vld [vmem:[%s1565_s9 + $0xe8] sm:$0xff]   ;;  %s509_s4 = scalar_select %p508_p11, %s1344_s14, 1 }
  0x4c   : > { %v1284_v16 = vld [vmem:[%s1565_s9 + $0x18] sm:$0xff]   ;;  %v1288_v20 = vld [vmem:[%s1565_s9 + $0x20] sm:$0xff]   ;;  %v1292_v24 = vld [vmem:[%s1565_s9 + $0x28] sm:$0xff]   ;;  %s1156_s12 = sshll.u32 (%p1409_p6), %s1344_s14, 2 }
  0x4d   : > { %1177 = vmatpush3.bf16.msra.mxu0 %v1276_v8  ;;  %v1285_v17 = vld [vmem:[%s1565_s9 + $0x98] sm:$0xff]   ;;  %v1289_v21 = vld [vmem:[%s1565_s9 + $0xa0] sm:$0xff]   ;;  %v1293_v25 = vld [vmem:[%s1565_s9 + $0xa8] sm:$0xff]   ;;  %s510_s7 = scalar_lea.vmem %s1647_s2, %s509_s4  ;;  %s957_s11 = scalar_lea.vmem (%p1409_p6), %s1648_s3, %s1156_s12 }
  0x4e   : > { %1205 = vmatpush3.bf16.msra.mxu1 %v1277_v9  ;;  %1178 = vmatprep.subr.bf16.mxu0 %v1278_v10  ;;  %v1294_v26 = vld [vmem:[%s1565_s9 + $0x70] sm:$0xff]   ;;  %v1298_v30 = vld [vmem:[%s1565_s9 + $0x78] sm:$0xff]   ;;  %v1110_v42 = vld [vmem:[%s510_s7] ss:$0 sm:$0xff] }
  0x4f   : > { %1206 = vmatprep.subr.bf16.mxu1 %v1279_v11  ;;  %v1295_v27 = vld [vmem:[%s1565_s9 + $0xf0] sm:$0xff]   ;;  %v1299_v31 = vld [vmem:[%s1565_s9 + $0xf8] sm:$0xff]  }
  0x50   : > { %v1296_v28 = vld [vmem:[%s1565_s9 + $0x30] sm:$0xff]   ;;  %v1300_v33 = vld [vmem:[%s1565_s9 + $0x38] sm:$0xff]  }
  0x51   : > { %1179 = vmatpush3.bf16.msra.mxu0 %v1280_v12  ;;  %v1297_v29 = vld [vmem:[%s1565_s9 + $0xb0] sm:$0xff]   ;;  %v1301_v35 = vld [vmem:[%s1565_s9 + $0xb8] sm:$0xff]   ;;  %s500_s9 = scalar_lea.vmem [#allocation3], %s1109_s8 }
  0x52   : > { %1207 = vmatpush3.bf16.msra.mxu1 %v1281_v13  ;;  %1180 = vmatprep.subr.bf16.mxu0 %v1282_v14  ;;  %v1312_v38 = vld [vmem:[%s1645_s0 + $0x20] ss:$16 sps:$4 sm:$0xff]   ;;  %v1313_v39 = vld [vmem:[%s1645_s0 + $0x28] ss:$16 sps:$4 sm:$0xff]  }
  0x53   : > { %1208 = vmatprep.subr.bf16.mxu1 %v1283_v15 }
  0x55   : > { %1181 = vmatpush3.bf16.msra.mxu0 %v1284_v16 }
  0x56   : > { %1209 = vmatpush3.bf16.msra.mxu1 %v1285_v17  ;;  %1182 = vmatprep.subr.bf16.mxu0 %v1286_v18 }
  0x57   : > { %1210 = vmatprep.subr.bf16.mxu1 %v1287_v19 }
  0x59   : > { %1183 = vmatpush3.bf16.msra.mxu0 %v1288_v20 }
  0x5a   : > { %1211 = vmatpush3.bf16.msra.mxu1 %v1289_v21  ;;  %1184 = vmatprep.subr.bf16.mxu0 %v1290_v22 }
  0x5b   : > { %1212 = vmatprep.subr.bf16.mxu1 %v1291_v23 }
  0x5d   : > { %1185 = vmatpush3.bf16.msra.mxu0 %v1292_v24 }
  0x5e   : > { %1213 = vmatpush3.bf16.msra.mxu1 %v1293_v25  ;;  %1186 = vmatprep.subr.bf16.mxu0 %v1294_v26 }
  0x5f   : > { %1214 = vmatprep.subr.bf16.mxu1 %v1295_v27 }
  0x61   : > { %1187 = vmatpush3.bf16.msra.mxu0 %v1296_v28 }
  0x62   : > { %1215 = vmatpush3.bf16.msra.mxu1 %v1297_v29  ;;  %1188 = vmatprep.subr.bf16.mxu0 %v1298_v30 }
  0x63   : > { %1216 = vmatprep.subr.bf16.mxu1 %v1299_v31 }
  0x65   : > { %1189 = vmatpush3.bf16.msra.mxu0 %v1300_v33 }
  0x66   : > { %1217 = vmatpush3.bf16.msra.mxu1 %v1301_v35 }
  0x68   : > { %857 = vmatmul.mubr.bf16.vlgmr.msra.gmra.mrb[0].mxu0 %v1302_v32 }
  0x69   : > { %906 = vmatmul.mubr.bf16.vlgmr.msra.gmra.mrb[0].mxu1 %v1305_v34  ;;  %864 = vmatprep.mubr.bf16.mxu0 %v1308_v36 }
  0x6a   : > { %913 = vmatprep.mubr.bf16.mxu1 %v1310_v37 }
  0x70   : > { %865 = vmatmul.mubr.bf16.gmra.mrb[4].mxu0 %v1312_v38 }
  0x71   : > { %914 = vmatmul.mubr.bf16.gmra.mrb[4].mxu1 %v1313_v39 }
 0x13b   : > { %v1190_v40 = vpop.f32.mrb[0].mxu0 }
 0x13c   : > { %v1218_v41 = vpop.f32.mrb[0].mxu1  ;;  %v1191_v43 = vpop.f32.mrb[1].mxu0 }
 0x13d   : > { %v1192_v44 = vadd.f32 %v1191_v43, %v1190_v40  ;;  %v1219_v45 = vpop.f32.mrb[1].mxu1  ;;  %v1193_v46 = vpop.f32.mrb[2].mxu0 }
 0x13e   : > { %v1220_v47 = vadd.f32 %v1219_v45, %v1218_v41  ;;  %v1221_v48 = vpop.f32.mrb[2].mxu1  ;;  %v1194_v49 = vpop.f32.mrb[3].mxu0 }
 0x13f   : > { %v859_v50 = vadd.f32 %v1192_v44, %v1110_v42  ;;  %v1195_v51 = vadd.f32 %v1194_v49, %v1193_v46  ;;  %v1222_v52 = vpop.f32.mrb[3].mxu1 }
 0x140   : > { %v1223_v53 = vadd.f32 %v1222_v52, %v1221_v48 }
 0x141   : > { %v908_v54 = vadd.f32 %v1220_v47, %v859_v50  ;;  %v862_v55 = vadd.f32 %v1195_v51, %v1110_v42 }
 0x143   : > { %v911_v56 = vadd.f32 %v1223_v53, %v862_v55  ;;  %v1196_v57 = vpop.f32.mrb[4].mxu0  ;;  %v922_v60 = vmax.f32 %v908_v54, 0.0 }
 0x144   : > { %v1224_v58 = vpop.f32.mrb[4].mxu1  ;;  %v1197_v59 = vpop.f32.mrb[5].mxu0 }
 0x145   : > { %v923_v61 = vmax.f32 %v911_v56, 0.0  ;;  %v1198_v62 = vadd.f32 %v1197_v59, %v1196_v57  ;;  %v1225_v63 = vpop.f32.mrb[5].mxu1  ;;  %v1199_v0 = vpop.f32.mrb[6].mxu0 }
 0x146   : > { %v1226_v1 = vadd.f32 %v1225_v63, %v1224_v58  ;;  %v1227_v2 = vpop.f32.mrb[6].mxu1  ;;  %v1200_v3 = vpop.f32.mrb[7].mxu0 }
 0x147   : > { %v1166_v4 = vpack.c.bf16 %v923_v61, %v922_v60  ;;  %v867_v5 = vadd.f32 %v1198_v62, %v1110_v42  ;;  %v1201_v6 = vadd.f32 %v1200_v3, %v1199_v0  ;;  %v1228_v7 = vpop.f32.mrb[7].mxu1 }
 0x148   : > { %v1229_v8 = vadd.f32 %v1228_v7, %v1227_v2 }
 0x149   : > { %1167 = vst [vmem:[%s500_s9] sm:$0xff] %v1166_v4   ;;  %v916_v9 = vadd.f32 %v1226_v1, %v867_v5  ;;  %v870_v10 = vadd.f32 %v1201_v6, %v1110_v42 }
 0x14b   : > { %v919_v11 = vadd.f32 %v1229_v8, %v870_v10  ;;  %v924_v12 = vmax.f32 %v916_v9, 0.0  ;;  %952 = sbr.rel (!%p1409_p6) target bundleno = 346 (0x15a), region = 77 }
 0x14d   : > { %v925_v13 = vmax.f32 %v919_v11, 0.0 }
 0x14f   : > { %v1171_v14 = vpack.c.bf16 %v925_v13, %v924_v12 }
 0x150   : > { %v973_v15 = vld [vmem:[%s500_s9] sm:$0xf] (%p1409_p6)  ;;  %v975_v16 = vld [vmem:[%s500_s9 + $0x4] sm:$0xf] (%p1409_p6) }
 0x151   : > { %1173 = vst [vmem:[%s500_s9 + $0x8] sm:$0xff] %v1171_v14   ;;  %974 = vst [vmem:[%s957_s11] sm:$0xf] (%p1409_p6), %v973_v15 }
 0x152   : > { %976 = vst [vmem:[%s957_s11 + $0x8] sm:$0xf] %v975_v16 }
 0x158   : > { %v977_v17 = vld [vmem:[%s500_s9 + $0x8] sm:$0xf]  ;;  %v979_v18 = vld [vmem:[%s500_s9 + $0xc] sm:$0xf] }
 0x159   : > { %978 = vst [vmem:[%s957_s11 + $0x10] sm:$0xf] %v977_v17  ;;  %980 = vst [vmem:[%s957_s11 + $0x18] sm:$0xf] %v979_v18 }
 0x15a PF: > { %s13_s16 = sadd.s32 1, %s1352_s16   ;;  %s1650_s12 = smov %s1340_s13 }
 0x15b   : > { %p10_p12 = scmp.ge.s32.totalorder %s13_s16, 4   ;;  %s1651_s13 = smov %s1414_s22 }
 0x15c   : > { %s1652_s14 = smov %s1348_s15  ;;  %s1653_s15 = smov %s1655_s17 }
 0x15d   :  { %12 = sbr.rel (!%p10_p12) target bundleno = 3 (0x3), region = 155 }

// kernel: resnet_feature_extractor.69
= control target key start
LH: loop header
LB: loop body
LE: loop exit
PB: predicated region body
PF: predicated region fallthrough
CT: control target
= control target key end

     0   :  { %s1475_s12 = smov 0   ;;  %s1477_s13 = smov 0   ;;  %s1765_s0 = inlined_call_operand.vmem [shape: bf16[16,512], index: 0, kind: input, shape index: {}]   ;;  %s1766_s1 = inlined_call_operand.vmem [shape: bf16[512,1024], index: 1, kind: input, shape index: {}]   ;;  %s1767_s2 = inlined_call_operand.vmem [shape: f32[1,1024], index: 2, kind: input, shape index: {}]   ;;  %s1768_s3 = inlined_call_operand.vmem [shape: bf16[16,1024], index: 3, kind: output, shape index: {}]  }
   0x1   :  { %s1479_s14 = smov 0   ;;  %s1481_s15 = smov 0  }
   0x2   :  { %s1483_s16 = smov 0  }
   0x3 LB: > { %s22_s17 = sadd.s32 1, %s1449_s15  ;;  %s1174_s18 = sadd.s32 4294967295, %s1453_s16   ;;  %s1453_s16 = sphi %s1483_s16, %s13_s16   ;;  %s1449_s15 = sphi %s1481_s15, %s1773_s15   ;;  %s1445_s14 = sphi %s1479_s14, %s1772_s14   ;;  %s1441_s13 = sphi %s1477_s13, %s1771_s13   ;;  %s1437_s12 = sphi %s1475_s12, %s1770_s12  }
   0x4   : > { %p23_p0 = scmp.ge.s32.totalorder %s22_s17, 4  ;;  %p65_p1 = scmp.ne.s32.totalorder %s1441_s13, %s1437_s12 }
   0x5   : > { %p66_p2 = scmp.eq.s32.totalorder %s1453_s16, 0  ;;  %p123_p4 = scmp.eq.s32.totalorder %s1174_s18, 3 }
   0x6   : > { %s1775_s17 = smov (%p23_p0, %s22_s17), 0  ;;  %s58_s20 = sadd.s32 1, %s1441_s13 }
   0x7   : > { %p67_p3 = por %p66_p2, %p65_p1  ;;  %s55_s19 = ssub.s32 %s1449_s15, %s1775_s17 }
   0x8   : > { %p56_p5 = scmp.eq.s32.totalorder %s55_s19, 0  ;;  %p1510_p6 = por %p123_p4, %p65_p1 }
   0x9   : > { %p1178_p7 = scmp.ge.s32.totalorder %s1453_s16, 4 }
   0xa   : > { %s1515_s22 = scalar_select %p56_p5, %s1441_s13, %s58_s20  }
   0xb   : > { %155 = sbr.rel (%p1178_p7) target bundleno = 86 (0x56), region = 20 }
  0x12   : > { %158 = sbr.rel (!%p67_p3) target bundleno = 86 (0x56), region = 24  ;;  %s160_s23 = sand.u32 (%p67_p3), 1, %s1441_s13  }
  0x13   : > { %s1261_s24 = sshll.u32 (%p67_p3), %s1449_s15, 3  ;;  %s1179_s25 = sshll.u32 (%p67_p3), %s160_s23, 9 }
  0x14   : > { %s1523_s28 = scalar_lea.vmem (%p67_p3), %s1766_s1, %s1261_s24  ;;  %s1528_s29 = scalar_lea.vmem (%p67_p3), [#allocation2], %s1179_s25 }
  0x15   : > { %v319_v0 = vld [vmem:[%s1523_s28] sm:$0xff] (%p67_p3) }
  0x16   : > { %v321_v1 = vld [vmem:[%s1523_s28 + $0x20] sm:$0xff] (%p67_p3)  ;;  %320 = vst [vmem:[%s1528_s29] sm:$0xff] (%p67_p3), %v319_v0 }
  0x17   : > { %v323_v2 = vld [vmem:[%s1523_s28 + $0x40] sm:$0xff] (%p67_p3)  ;;  %322 = vst [vmem:[%s1528_s29 + $0x8] sm:$0xff] (%p67_p3), %v321_v1 }
  0x18   : > { %324 = vst [vmem:[%s1528_s29 + $0x10] sm:$0xff] (%p67_p3), %v323_v2  ;;  %v325_v3 = vld [vmem:[%s1523_s28 + $0x60] sm:$0xff] (%p67_p3) }
  0x19   : > { %v327_v4 = vld [vmem:[%s1523_s28 + $0x80] sm:$0xff]  ;;  %326 = vst [vmem:[%s1528_s29 + $0x18] sm:$0xff] %v325_v3 }
  0x1a   : > { %v329_v5 = vld [vmem:[%s1523_s28 + $0xa0] sm:$0xff]  ;;  %328 = vst [vmem:[%s1528_s29 + $0x20] sm:$0xff] %v327_v4 }
  0x1b   : > { %330 = vst [vmem:[%s1528_s29 + $0x28] sm:$0xff] %v329_v5  ;;  %v331_v6 = vld [vmem:[%s1523_s28 + $0xc0] sm:$0xff] }
  0x1c   : > { %v333_v7 = vld [vmem:[%s1523_s28 + $0xe0] sm:$0xff]  ;;  %332 = vst [vmem:[%s1528_s29 + $0x30] sm:$0xff] %v331_v6 }
  0x1d   : > { %v335_v8 = vld [vmem:[%s1523_s28 + $0x100] sm:$0xff]  ;;  %334 = vst [vmem:[%s1528_s29 + $0x38] sm:$0xff] %v333_v7 }
  0x1e   : > { %336 = vst [vmem:[%s1528_s29 + $0x40] sm:$0xff] %v335_v8  ;;  %v337_v9 = vld [vmem:[%s1523_s28 + $0x120] sm:$0xff] }
  0x1f   : > { %v339_v10 = vld [vmem:[%s1523_s28 + $0x140] sm:$0xff]  ;;  %338 = vst [vmem:[%s1528_s29 + $0x48] sm:$0xff] %v337_v9 }
  0x20   : > { %v341_v11 = vld [vmem:[%s1523_s28 + $0x160] sm:$0xff]  ;;  %340 = vst [vmem:[%s1528_s29 + $0x50] sm:$0xff] %v339_v10 }
  0x21   : > { %342 = vst [vmem:[%s1528_s29 + $0x58] sm:$0xff] %v341_v11  ;;  %v343_v12 = vld [vmem:[%s1523_s28 + $0x180] sm:$0xff] }
  0x22   : > { %v345_v13 = vld [vmem:[%s1523_s28 + $0x1a0] sm:$0xff]  ;;  %344 = vst [vmem:[%s1528_s29 + $0x60] sm:$0xff] %v343_v12 }
  0x23   : > { %v347_v14 = vld [vmem:[%s1523_s28 + $0x1c0] sm:$0xff]  ;;  %346 = vst [vmem:[%s1528_s29 + $0x68] sm:$0xff] %v345_v13 }
  0x24   : > { %348 = vst [vmem:[%s1528_s29 + $0x70] sm:$0xff] %v347_v14  ;;  %v349_v15 = vld [vmem:[%s1523_s28 + $0x1e0] sm:$0xff] }
  0x25   : > { %v351_v16 = vld [vmem:[%s1523_s28 + $0x200] sm:$0xff]  ;;  %350 = vst [vmem:[%s1528_s29 + $0x78] sm:$0xff] %v349_v15 }
  0x26   : > { %v353_v17 = vld [vmem:[%s1523_s28 + $0x220] sm:$0xff]  ;;  %352 = vst [vmem:[%s1528_s29 + $0x80] sm:$0xff] %v351_v16 }
  0x27   : > { %354 = vst [vmem:[%s1528_s29 + $0x88] sm:$0xff] %v353_v17  ;;  %v355_v18 = vld [vmem:[%s1523_s28 + $0x240] sm:$0xff] }
  0x28   : > { %v357_v19 = vld [vmem:[%s1523_s28 + $0x260] sm:$0xff]  ;;  %356 = vst [vmem:[%s1528_s29 + $0x90] sm:$0xff] %v355_v18 }
  0x29   : > { %v359_v20 = vld [vmem:[%s1523_s28 + $0x280] sm:$0xff]  ;;  %358 = vst [vmem:[%s1528_s29 + $0x98] sm:$0xff] %v357_v19 }
  0x2a   : > { %360 = vst [vmem:[%s1528_s29 + $0xa0] sm:$0xff] %v359_v20  ;;  %v361_v21 = vld [vmem:[%s1523_s28 + $0x2a0] sm:$0xff] }
  0x2b   : > { %v363_v22 = vld [vmem:[%s1523_s28 + $0x2c0] sm:$0xff]  ;;  %362 = vst [vmem:[%s1528_s29 + $0xa8] sm:$0xff] %v361_v21 }
  0x2c   : > { %v365_v23 = vld [vmem:[%s1523_s28 + $0x2e0] sm:$0xff]  ;;  %364 = vst [vmem:[%s1528_s29 + $0xb0] sm:$0xff] %v363_v22 }
  0x2d   : > { %366 = vst [vmem:[%s1528_s29 + $0xb8] sm:$0xff] %v365_v23  ;;  %v367_v24 = vld [vmem:[%s1523_s28 + $0x300] sm:$0xff] }
  0x2e   : > { %v369_v25 = vld [vmem:[%s1523_s28 + $0x320] sm:$0xff]  ;;  %368 = vst [vmem:[%s1528_s29 + $0xc0] sm:$0xff] %v367_v24 }
  0x2f   : > { %v371_v26 = vld [vmem:[%s1523_s28 + $0x340] sm:$0xff]  ;;  %370 = vst [vmem:[%s1528_s29 + $0xc8] sm:$0xff] %v369_v25 }
  0x30   : > { %372 = vst [vmem:[%s1528_s29 + $0xd0] sm:$0xff] %v371_v26  ;;  %v373_v27 = vld [vmem:[%s1523_s28 + $0x360] sm:$0xff] }
  0x31   : > { %v375_v28 = vld [vmem:[%s1523_s28 + $0x380] sm:$0xff]  ;;  %374 = vst [vmem:[%s1528_s29 + $0xd8] sm:$0xff] %v373_v27 }
  0x32   : > { %v377_v29 = vld [vmem:[%s1523_s28 + $0x3a0] sm:$0xff]  ;;  %376 = vst [vmem:[%s1528_s29 + $0xe0] sm:$0xff] %v375_v28 }
  0x33   : > { %378 = vst [vmem:[%s1528_s29 + $0xe8] sm:$0xff] %v377_v29  ;;  %v379_v30 = vld [vmem:[%s1523_s28 + $0x3c0] sm:$0xff] }
  0x34   : > { %v381_v31 = vld [vmem:[%s1523_s28 + $0x3e0] sm:$0xff]  ;;  %380 = vst [vmem:[%s1528_s29 + $0xf0] sm:$0xff] %v379_v30 }
  0x35   : > { %v383_v32 = vld [vmem:[%s1523_s28 + $0x400] sm:$0xff]  ;;  %382 = vst [vmem:[%s1528_s29 + $0xf8] sm:$0xff] %v381_v31 }
  0x36   : > { %384 = vst [vmem:[%s1528_s29 + $0x100] sm:$0xff] %v383_v32  ;;  %v385_v33 = vld [vmem:[%s1523_s28 + $0x420] sm:$0xff] }
  0x37   : > { %v387_v34 = vld [vmem:[%s1523_s28 + $0x440] sm:$0xff]  ;;  %386 = vst [vmem:[%s1528_s29 + $0x108] sm:$0xff] %v385_v33 }
  0x38   : > { %v389_v35 = vld [vmem:[%s1523_s28 + $0x460] sm:$0xff]  ;;  %388 = vst [vmem:[%s1528_s29 + $0x110] sm:$0xff] %v387_v34 }
  0x39   : > { %390 = vst [vmem:[%s1528_s29 + $0x118] sm:$0xff] %v389_v35  ;;  %v391_v36 = vld [vmem:[%s1523_s28 + $0x480] sm:$0xff] }
  0x3a   : > { %v393_v37 = vld [vmem:[%s1523_s28 + $0x4a0] sm:$0xff]  ;;  %392 = vst [vmem:[%s1528_s29 + $0x120] sm:$0xff] %v391_v36 }
  0x3b   : > { %v395_v38 = vld [vmem:[%s1523_s28 + $0x4c0] sm:$0xff]  ;;  %394 = vst [vmem:[%s1528_s29 + $0x128] sm:$0xff] %v393_v37 }
  0x3c   : > { %396 = vst [vmem:[%s1528_s29 + $0x130] sm:$0xff] %v395_v38  ;;  %v397_v39 = vld [vmem:[%s1523_s28 + $0x4e0] sm:$0xff] }
  0x3d   : > { %v399_v40 = vld [vmem:[%s1523_s28 + $0x500] sm:$0xff]  ;;  %398 = vst [vmem:[%s1528_s29 + $0x138] sm:$0xff] %v397_v39 }
  0x3e   : > { %v401_v41 = vld [vmem:[%s1523_s28 + $0x520] sm:$0xff]  ;;  %400 = vst [vmem:[%s1528_s29 + $0x140] sm:$0xff] %v399_v40 }
  0x3f   : > { %402 = vst [vmem:[%s1528_s29 + $0x148] sm:$0xff] %v401_v41  ;;  %v403_v42 = vld [vmem:[%s1523_s28 + $0x540] sm:$0xff] }
  0x40   : > { %v405_v43 = vld [vmem:[%s1523_s28 + $0x560] sm:$0xff]  ;;  %404 = vst [vmem:[%s1528_s29 + $0x150] sm:$0xff] %v403_v42 }
  0x41   : > { %v407_v44 = vld [vmem:[%s1523_s28 + $0x580] sm:$0xff]  ;;  %406 = vst [vmem:[%s1528_s29 + $0x158] sm:$0xff] %v405_v43 }
  0x42   : > { %408 = vst [vmem:[%s1528_s29 + $0x160] sm:$0xff] %v407_v44  ;;  %v409_v45 = vld [vmem:[%s1523_s28 + $0x5a0] sm:$0xff] }
  0x43   : > { %v411_v46 = vld [vmem:[%s1523_s28 + $0x5c0] sm:$0xff]  ;;  %410 = vst [vmem:[%s1528_s29 + $0x168] sm:$0xff] %v409_v45 }
  0x44   : > { %v413_v47 = vld [vmem:[%s1523_s28 + $0x5e0] sm:$0xff]  ;;  %412 = vst [vmem:[%s1528_s29 + $0x170] sm:$0xff] %v411_v46 }
  0x45   : > { %414 = vst [vmem:[%s1528_s29 + $0x178] sm:$0xff] %v413_v47  ;;  %v415_v48 = vld [vmem:[%s1523_s28 + $0x600] sm:$0xff] }
  0x46   : > { %v417_v49 = vld [vmem:[%s1523_s28 + $0x620] sm:$0xff]  ;;  %416 = vst [vmem:[%s1528_s29 + $0x180] sm:$0xff] %v415_v48 }
  0x47   : > { %v419_v50 = vld [vmem:[%s1523_s28 + $0x640] sm:$0xff]  ;;  %418 = vst [vmem:[%s1528_s29 + $0x188] sm:$0xff] %v417_v49 }
  0x48   : > { %420 = vst [vmem:[%s1528_s29 + $0x190] sm:$0xff] %v419_v50  ;;  %v421_v51 = vld [vmem:[%s1523_s28 + $0x660] sm:$0xff] }
  0x49   : > { %v423_v52 = vld [vmem:[%s1523_s28 + $0x680] sm:$0xff]  ;;  %422 = vst [vmem:[%s1528_s29 + $0x198] sm:$0xff] %v421_v51 }
  0x4a   : > { %v425_v53 = vld [vmem:[%s1523_s28 + $0x6a0] sm:$0xff]  ;;  %424 = vst [vmem:[%s1528_s29 + $0x1a0] sm:$0xff] %v423_v52 }
  0x4b   : > { %426 = vst [vmem:[%s1528_s29 + $0x1a8] sm:$0xff] %v425_v53  ;;  %v427_v54 = vld [vmem:[%s1523_s28 + $0x6c0] sm:$0xff] }
  0x4c   : > { %v429_v55 = vld [vmem:[%s1523_s28 + $0x6e0] sm:$0xff]  ;;  %428 = vst [vmem:[%s1528_s29 + $0x1b0] sm:$0xff] %v427_v54 }
  0x4d   : > { %v431_v56 = vld [vmem:[%s1523_s28 + $0x700] sm:$0xff]  ;;  %430 = vst [vmem:[%s1528_s29 + $0x1b8] sm:$0xff] %v429_v55 }
  0x4e   : > { %432 = vst [vmem:[%s1528_s29 + $0x1c0] sm:$0xff] %v431_v56  ;;  %v433_v57 = vld [vmem:[%s1523_s28 + $0x720] sm:$0xff] }
  0x4f   : > { %v435_v58 = vld [vmem:[%s1523_s28 + $0x740] sm:$0xff]  ;;  %434 = vst [vmem:[%s1528_s29 + $0x1c8] sm:$0xff] %v433_v57 }
  0x50   : > { %v437_v59 = vld [vmem:[%s1523_s28 + $0x760] sm:$0xff]  ;;  %436 = vst [vmem:[%s1528_s29 + $0x1d0] sm:$0xff] %v435_v58 }
  0x51   : > { %438 = vst [vmem:[%s1528_s29 + $0x1d8] sm:$0xff] %v437_v59  ;;  %v439_v60 = vld [vmem:[%s1523_s28 + $0x780] sm:$0xff] }
  0x52   : > { %v441_v61 = vld [vmem:[%s1523_s28 + $0x7a0] sm:$0xff]  ;;  %440 = vst [vmem:[%s1528_s29 + $0x1e0] sm:$0xff] %v439_v60 }
  0x53   : > { %v443_v62 = vld [vmem:[%s1523_s28 + $0x7c0] sm:$0xff]  ;;  %442 = vst [vmem:[%s1528_s29 + $0x1e8] sm:$0xff] %v441_v61 }
  0x54   : > { %444 = vst [vmem:[%s1528_s29 + $0x1f0] sm:$0xff] %v443_v62  ;;  %v445_v63 = vld [vmem:[%s1523_s28 + $0x7e0] sm:$0xff] }
  0x55   : > { %446 = vst [vmem:[%s1528_s29 + $0x1f8] sm:$0xff] %v445_v63 }
  0x56 PF: > { %p1182_p8 = scmp.ge.s32.totalorder %s1453_s16, 1  ;;  %p459_p9 = scmp.lt.s32.totalorder %s1453_s16, 5 }
  0x58   : > { %p460_p10 = pnand %p1182_p8, %p459_p9 }
  0x59   : > { %s466_s30 = sand.u32 (!%p460_p10), 1, %s1437_s12   ;;  %v1411_v0 = vld [vmem:[%s1765_s0 + $0x4] ss:$16 sps:$4 sm:$0xff] (!%p460_p10)   ;;  %v1414_v1 = vld [vmem:[%s1765_s0 + $0xc] ss:$16 sps:$4 sm:$0xff] (!%p460_p10)   ;;  %s1185_s20 = sshll.u32 (!%p460_p10), %s1445_s14, 1 }
  0x5a   : > { %463 = sbr.rel (%p460_p10) target bundleno = 387 (0x183), region = 66  ;;  %s1183_s4 = sshll.u32 (!%p460_p10), %s466_s30, 9  ;;  %965 = vmatprep.mubr.bf16.mxu1 (!%p460_p10), %v1411_v0  ;;  %1008 = vmatprep.mubr.bf16.mxu0 (!%p460_p10), %v1414_v1 }
  0x5b   : > { %s1666_s9 = scalar_lea.vmem (!%p460_p10), [#allocation2], %s1183_s4  ;;  %p507_p11 = scmp.lt.s32.totalorder (!%p460_p10), %s1185_s20, 7 }
  0x5c   : > { %v1313_v2 = vld [vmem:[%s1666_s9 + $0x4] ss:$8 sps:$4 sm:$0xff] (!%p460_p10)   ;;  %v1317_v4 = vld [vmem:[%s1666_s9] ss:$8 sps:$4 sm:$0xff] (!%p460_p10)   ;;  %v1319_v6 = vld [vmem:[%s1666_s9 + $0x14] ss:$8 sps:$4 sm:$0xff] (!%p460_p10)  }
  0x5d   : > { %v1315_v3 = vld [vmem:[%s1666_s9 + $0x104] ss:$8 sps:$4 sm:$0xff] (!%p460_p10)   ;;  %933 = vmatprep.subr.bf16.mxu1 (!%p460_p10), %v1313_v2  ;;  %v1318_v5 = vld [vmem:[%s1666_s9 + $0x100] ss:$8 sps:$4 sm:$0xff] (!%p460_p10)   ;;  %v1321_v7 = vld [vmem:[%s1666_s9 + $0x114] ss:$8 sps:$4 sm:$0xff] (!%p460_p10)  }
  0x5e   : > { %976 = vmatprep.subr.bf16.mxu0 (!%p460_p10), %v1315_v3  ;;  %934 = vmatpush1.bf16.msra.mxu1 (!%p460_p10), %v1317_v4  ;;  %v1323_v8 = vld [vmem:[%s1666_s9 + $0x10] ss:$8 sps:$4 sm:$0xff] (!%p460_p10)   ;;  %v1325_v10 = vld [vmem:[%s1666_s9 + $0x24] ss:$8 sps:$4 sm:$0xff] (!%p460_p10)   ;;  %v1329_v12 = vld [vmem:[%s1666_s9 + $0x20] ss:$8 sps:$4 sm:$0xff] (!%p460_p10)   ;;  %v583_v4 = vlaneseq (!%p460_p10) }
  0x5f   : > { %977 = vmatpush1.bf16.msra.mxu0 (!%p460_p10), %v1318_v5  ;;  %935 = vmatprep.subr.bf16.mxu1 (!%p460_p10), %v1319_v6  ;;  %v1324_v9 = vld [vmem:[%s1666_s9 + $0x110] ss:$8 sps:$4 sm:$0xff] (!%p460_p10)   ;;  %v1327_v11 = vld [vmem:[%s1666_s9 + $0x124] ss:$8 sps:$4 sm:$0xff] (!%p460_p10)   ;;  %v1330_v13 = vld [vmem:[%s1666_s9 + $0x120] ss:$8 sps:$4 sm:$0xff] (!%p460_p10)  }
  0x60   : > { %978 = vmatprep.subr.bf16.mxu0 (!%p460_p10), %v1321_v7  ;;  %v1331_v14 = vld [vmem:[%s1666_s9 + $0x34] ss:$8 sps:$4 sm:$0xff] (!%p460_p10)   ;;  %v1335_v16 = vld [vmem:[%s1666_s9 + $0x30] ss:$8 sps:$4 sm:$0xff] (!%p460_p10)   ;;  %v1337_v18 = vld [vmem:[%s1666_s9 + $0x44] ss:$8 sps:$4 sm:$0xff] (!%p460_p10)  }
  0x61   : > { %v1333_v15 = vld [vmem:[%s1666_s9 + $0x134] ss:$8 sps:$4 sm:$0xff]   ;;  %v1336_v17 = vld [vmem:[%s1666_s9 + $0x130] ss:$8 sps:$4 sm:$0xff]   ;;  %v1339_v19 = vld [vmem:[%s1666_s9 + $0x144] ss:$8 sps:$4 sm:$0xff]  }
  0x62   : > { %936 = vmatpush1.bf16.msra.mxu1 %v1323_v8  ;;  %v1341_v20 = vld [vmem:[%s1666_s9 + $0x40] ss:$8 sps:$4 sm:$0xff]   ;;  %v1343_v22 = vld [vmem:[%s1666_s9 + $0x54] ss:$8 sps:$4 sm:$0xff]   ;;  %v1347_v24 = vld [vmem:[%s1666_s9 + $0x50] ss:$8 sps:$4 sm:$0xff]  }
  0x63   : > { %979 = vmatpush1.bf16.msra.mxu0 %v1324_v9  ;;  %937 = vmatprep.subr.bf16.mxu1 %v1325_v10  ;;  %v1342_v21 = vld [vmem:[%s1666_s9 + $0x140] ss:$8 sps:$4 sm:$0xff]   ;;  %v1345_v23 = vld [vmem:[%s1666_s9 + $0x154] ss:$8 sps:$4 sm:$0xff]   ;;  %v1348_v25 = vld [vmem:[%s1666_s9 + $0x150] ss:$8 sps:$4 sm:$0xff]  }
  0x64   : > { %980 = vmatprep.subr.bf16.mxu0 %v1327_v11  ;;  %v1349_v26 = vld [vmem:[%s1666_s9 + $0x64] ss:$8 sps:$4 sm:$0xff]   ;;  %v1353_v28 = vld [vmem:[%s1666_s9 + $0x60] ss:$8 sps:$4 sm:$0xff]   ;;  %v1355_v30 = vld [vmem:[%s1666_s9 + $0x74] ss:$8 sps:$4 sm:$0xff]  }
  0x65   : > { %v1351_v27 = vld [vmem:[%s1666_s9 + $0x164] ss:$8 sps:$4 sm:$0xff]   ;;  %v1354_v29 = vld [vmem:[%s1666_s9 + $0x160] ss:$8 sps:$4 sm:$0xff]   ;;  %v1357_v31 = vld [vmem:[%s1666_s9 + $0x174] ss:$8 sps:$4 sm:$0xff]  }
  0x66   : > { %938 = vmatpush1.bf16.msra.mxu1 %v1329_v12  ;;  %v1359_v32 = vld [vmem:[%s1666_s9 + $0x70] ss:$8 sps:$4 sm:$0xff]   ;;  %v1361_v34 = vld [vmem:[%s1666_s9 + $0x84] ss:$8 sps:$4 sm:$0xff]   ;;  %v1365_v36 = vld [vmem:[%s1666_s9 + $0x80] ss:$8 sps:$4 sm:$0xff]  }
  0x67   : > { %981 = vmatpush1.bf16.msra.mxu0 %v1330_v13  ;;  %939 = vmatprep.subr.bf16.mxu1 %v1331_v14  ;;  %v1360_v33 = vld [vmem:[%s1666_s9 + $0x170] ss:$8 sps:$4 sm:$0xff]   ;;  %v1363_v35 = vld [vmem:[%s1666_s9 + $0x184] ss:$8 sps:$4 sm:$0xff]   ;;  %v1366_v37 = vld [vmem:[%s1666_s9 + $0x180] ss:$8 sps:$4 sm:$0xff]  }
  0x68   : > { %982 = vmatprep.subr.bf16.mxu0 %v1333_v15  ;;  %v1367_v38 = vld [vmem:[%s1666_s9 + $0x94] ss:$8 sps:$4 sm:$0xff]   ;;  %v1371_v40 = vld [vmem:[%s1666_s9 + $0x90] ss:$8 sps:$4 sm:$0xff]   ;;  %v1373_v42 = vld [vmem:[%s1666_s9 + $0xa4] ss:$8 sps:$4 sm:$0xff]  }
  0x69   : > { %v1369_v39 = vld [vmem:[%s1666_s9 + $0x194] ss:$8 sps:$4 sm:$0xff]   ;;  %v1372_v41 = vld [vmem:[%s1666_s9 + $0x190] ss:$8 sps:$4 sm:$0xff]   ;;  %v1375_v43 = vld [vmem:[%s1666_s9 + $0x1a4] ss:$8 sps:$4 sm:$0xff]  }
  0x6a   : > { %940 = vmatpush1.bf16.msra.mxu1 %v1335_v16  ;;  %v1377_v44 = vld [vmem:[%s1666_s9 + $0xa0] ss:$8 sps:$4 sm:$0xff]   ;;  %v1379_v46 = vld [vmem:[%s1666_s9 + $0xb4] ss:$8 sps:$4 sm:$0xff]   ;;  %v1383_v48 = vld [vmem:[%s1666_s9 + $0xb0] ss:$8 sps:$4 sm:$0xff]  }
  0x6b   : > { %983 = vmatpush1.bf16.msra.mxu0 %v1336_v17  ;;  %941 = vmatprep.subr.bf16.mxu1 %v1337_v18  ;;  %v1378_v45 = vld [vmem:[%s1666_s9 + $0x1a0] ss:$8 sps:$4 sm:$0xff]   ;;  %v1381_v47 = vld [vmem:[%s1666_s9 + $0x1b4] ss:$8 sps:$4 sm:$0xff]   ;;  %v1384_v49 = vld [vmem:[%s1666_s9 + $0x1b0] ss:$8 sps:$4 sm:$0xff]  }
  0x6c   : > { %984 = vmatprep.subr.bf16.mxu0 %v1339_v19  ;;  %v1385_v50 = vld [vmem:[%s1666_s9 + $0xc4] ss:$8 sps:$4 sm:$0xff]   ;;  %v1389_v52 = vld [vmem:[%s1666_s9 + $0xc0] ss:$8 sps:$4 sm:$0xff]   ;;  %v1391_v54 = vld [vmem:[%s1666_s9 + $0xd4] ss:$8 sps:$4 sm:$0xff]  }
  0x6d   : > { %v1387_v51 = vld [vmem:[%s1666_s9 + $0x1c4] ss:$8 sps:$4 sm:$0xff]   ;;  %v1390_v53 = vld [vmem:[%s1666_s9 + $0x1c0] ss:$8 sps:$4 sm:$0xff]   ;;  %v1393_v55 = vld [vmem:[%s1666_s9 + $0x1d4] ss:$8 sps:$4 sm:$0xff]  }
  0x6e   : > { %942 = vmatpush1.bf16.msra.mxu1 %v1341_v20  ;;  %v1395_v56 = vld [vmem:[%s1666_s9 + $0xd0] ss:$8 sps:$4 sm:$0xff]   ;;  %v1397_v58 = vld [vmem:[%s1666_s9 + $0xe4] ss:$8 sps:$4 sm:$0xff]   ;;  %v1401_v60 = vld [vmem:[%s1666_s9 + $0xe0] ss:$8 sps:$4 sm:$0xff]  }
  0x6f   : > { %985 = vmatpush1.bf16.msra.mxu0 %v1342_v21  ;;  %943 = vmatprep.subr.bf16.mxu1 %v1343_v22  ;;  %v1396_v57 = vld [vmem:[%s1666_s9 + $0x1d0] ss:$8 sps:$4 sm:$0xff]   ;;  %v1399_v59 = vld [vmem:[%s1666_s9 + $0x1e4] ss:$8 sps:$4 sm:$0xff]   ;;  %v1402_v61 = vld [vmem:[%s1666_s9 + $0x1e0] ss:$8 sps:$4 sm:$0xff]  }
  0x70   : > { %986 = vmatprep.subr.bf16.mxu0 %v1345_v23  ;;  %v1403_v62 = vld [vmem:[%s1666_s9 + $0xf4] ss:$8 sps:$4 sm:$0xff]   ;;  %v1407_v0 = vld [vmem:[%s1666_s9 + $0xf0] ss:$8 sps:$4 sm:$0xff]   ;;  %s1777_s20 = smov (!%p507_p11, %s1185_s20), 7  ;;  %v584_v5 = vshrl.u32 %v583_v4, 7 }
  0x71   : > { %v1405_v63 = vld [vmem:[%s1666_s9 + $0x1f4] ss:$8 sps:$4 sm:$0xff]   ;;  %v1408_v1 = vld [vmem:[%s1666_s9 + $0x1f0] ss:$8 sps:$4 sm:$0xff]   ;;  %s509_s25 = scalar_lea.vmem %s1767_s2, %s1777_s20  ;;  %s1184_s26 = sshll.u32 %s466_s30, 4 }
  0x72   : > { %944 = vmatpush1.bf16.msra.mxu1 %v1347_v24  ;;  %v1409_v2 = vld [vmem:[%s1765_s0] ss:$16 sps:$4 sm:$0xff]   ;;  %v1412_v3 = vld [vmem:[%s1765_s0 + $0x8] ss:$16 sps:$4 sm:$0xff]   ;;  %v585_v6 = vsub.s32 0, %v584_v5  ;;  %v589_v8 = vsub.s32 1, %v584_v5 }
  0x73   : > { %987 = vmatpush1.bf16.msra.mxu0 %v1348_v25  ;;  %945 = vmatprep.subr.bf16.mxu1 %v1349_v26  ;;  %v581_v7 = vld [vmem:[%s509_s25] sm:$0x3]  ;;  %s497_s27 = scalar_lea.vmem [#allocation3], %s1184_s26  ;;  %s1264_s12 = sshll.u32 (%p1510_p6), %s1445_s14, 3 }
  0x74   : > { %988 = vmatprep.subr.bf16.mxu0 %v1351_v27  ;;  %v586_v9 = vrot.slane %v581_v7, %v585_v6  ;;  %v590_v10 = vrot.slane %v581_v7, %v589_v8  ;;  %s1045_s30 = scalar_lea.vmem (%p1510_p6), %s1768_s3, %s1264_s12 }
  0x76   : > { %946 = vmatpush1.bf16.msra.mxu1 %v1353_v28 }
  0x77   : > { %989 = vmatpush1.bf16.msra.mxu0 %v1354_v29  ;;  %947 = vmatprep.subr.bf16.mxu1 %v1355_v30 }
  0x78   : > { %990 = vmatprep.subr.bf16.mxu0 %v1357_v31 }
  0x7a   : > { %948 = vmatpush1.bf16.msra.mxu1 %v1359_v32 }
  0x7b   : > { %991 = vmatpush1.bf16.msra.mxu0 %v1360_v33  ;;  %949 = vmatprep.subr.bf16.mxu1 %v1361_v34 }
  0x7c   : > { %992 = vmatprep.subr.bf16.mxu0 %v1363_v35 }
  0x7e   : > { %950 = vmatpush1.bf16.msra.mxu1 %v1365_v36 }
  0x7f   : > { %993 = vmatpush1.bf16.msra.mxu0 %v1366_v37  ;;  %951 = vmatprep.subr.bf16.mxu1 %v1367_v38 }
  0x80   : > { %994 = vmatprep.subr.bf16.mxu0 %v1369_v39 }
  0x82   : > { %952 = vmatpush1.bf16.msra.mxu1 %v1371_v40 }
  0x83   : > { %995 = vmatpush1.bf16.msra.mxu0 %v1372_v41  ;;  %953 = vmatprep.subr.bf16.mxu1 %v1373_v42 }
  0x84   : > { %996 = vmatprep.subr.bf16.mxu0 %v1375_v43 }
  0x86   : > { %954 = vmatpush1.bf16.msra.mxu1 %v1377_v44 }
  0x87   : > { %997 = vmatpush1.bf16.msra.mxu0 %v1378_v45  ;;  %955 = vmatprep.subr.bf16.mxu1 %v1379_v46 }
  0x88   : > { %998 = vmatprep.subr.bf16.mxu0 %v1381_v47 }
  0x8a   : > { %956 = vmatpush1.bf16.msra.mxu1 %v1383_v48 }
  0x8b   : > { %999 = vmatpush1.bf16.msra.mxu0 %v1384_v49  ;;  %957 = vmatprep.subr.bf16.mxu1 %v1385_v50 }
  0x8c   : > { %1000 = vmatprep.subr.bf16.mxu0 %v1387_v51 }
  0x8e   : > { %958 = vmatpush1.bf16.msra.mxu1 %v1389_v52 }
  0x8f   : > { %1001 = vmatpush1.bf16.msra.mxu0 %v1390_v53  ;;  %959 = vmatprep.subr.bf16.mxu1 %v1391_v54 }
  0x90   : > { %1002 = vmatprep.subr.bf16.mxu0 %v1393_v55 }
  0x92   : > { %960 = vmatpush1.bf16.msra.mxu1 %v1395_v56 }
  0x93   : > { %1003 = vmatpush1.bf16.msra.mxu0 %v1396_v57  ;;  %961 = vmatprep.subr.bf16.mxu1 %v1397_v58 }
  0x94   : > { %1004 = vmatprep.subr.bf16.mxu0 %v1399_v59 }
  0x96   : > { %962 = vmatpush1.bf16.msra.mxu1 %v1401_v60 }
  0x97   : > { %1005 = vmatpush1.bf16.msra.mxu0 %v1402_v61  ;;  %963 = vmatprep.subr.bf16.mxu1 %v1403_v62 }
  0x98   : > { %1006 = vmatprep.subr.bf16.mxu0 %v1405_v63 }
  0x9a   : > { %964 = vmatpush1.bf16.msra.mxu1 %v1407_v0 }
  0x9b   : > { %1007 = vmatpush1.bf16.msra.mxu0 %v1408_v1 }
  0x9d   : > { %966 = vmatmul.mubr.bf16.vlgmr.msra.gmra.mrb[0].mxu1 %v1409_v2 }
  0x9e   : > { %1009 = vmatmul.mubr.bf16.vlgmr.msra.gmra.mrb[0].mxu0 %v1412_v3 }
 0x170   : > { %v967_v11 = vpop.f32.mrb[0].mxu1 }
 0x171   : > { %v1010_v12 = vpop.f32.mrb[0].mxu0  ;;  %v968_v13 = vadd.f32 %v967_v11, %v586_v9  ;;  %v969_v14 = vpop.f32.mrb[1].mxu1 }
 0x172   : > { %v1012_v15 = vpop.f32.mrb[1].mxu0  ;;  %v970_v16 = vadd.f32 %v969_v14, %v590_v10  ;;  %v971_v17 = vpop.f32.mrb[2].mxu1 }
 0x173   : > { %v1014_v18 = vpop.f32.mrb[2].mxu0  ;;  %v1011_v19 = vadd.f32 %v1010_v12, %v968_v13  ;;  %v972_v20 = vadd.f32 %v971_v17, %v586_v9  ;;  %v973_v21 = vpop.f32.mrb[3].mxu1 }
 0x174   : > { %v1016_v22 = vpop.f32.mrb[3].mxu0  ;;  %v1013_v23 = vadd.f32 %v1012_v15, %v970_v16  ;;  %v974_v24 = vadd.f32 %v973_v21, %v590_v10  ;;  %1039 = sbr.rel (!%p1510_p6) target bundleno = 387 (0x183), region = 74 }
 0x175   : > { %v1015_v25 = vadd.f32 %v1014_v18, %v972_v20 }
 0x176   : > { %v1262_v26 = vpack.c.bf16 %v1013_v23, %v1011_v19  ;;  %v1017_v27 = vadd.f32 %v1016_v22, %v974_v24 }
 0x178   : > { %1031 = vst [vmem:[%s497_s27] sm:$0xff] %v1262_v26  ;;  %v1263_v28 = vpack.c.bf16 %v1017_v27, %v1015_v25 }
 0x17a   : > { %1032 = vst [vmem:[%s497_s27 + $0x8] sm:$0xff] %v1263_v28 }
 0x17f   : > { %v1075_v29 = vld [vmem:[%s497_s27] sm:$0xff] }
 0x180   : > { %1076 = vst [vmem:[%s1045_s30] sm:$0xff] %v1075_v29 }
 0x181   : > { %v1077_v30 = vld [vmem:[%s497_s27 + $0x8] sm:$0xff] }
 0x182   : > { %1078 = vst [vmem:[%s1045_s30 + $0x20] sm:$0xff] %v1077_v30 }
 0x183 PF: > { %s13_s16 = sadd.s32 1, %s1453_s16   ;;  %s1770_s12 = smov %s1441_s13 }
 0x184   : > { %p10_p12 = scmp.ge.s32.totalorder %s13_s16, 6   ;;  %s1771_s13 = smov %s1515_s22 }
 0x185   : > { %s1772_s14 = smov %s1449_s15  ;;  %s1773_s15 = smov %s1775_s17 }
 0x186   :  { %12 = sbr.rel (!%p10_p12) target bundleno = 3 (0x3), region = 149 }

// kernel: resnet_feature_extractor.68
= control target key start
LH: loop header
LB: loop body
LE: loop exit
PB: predicated region body
PF: predicated region fallthrough
CT: control target
= control target key end

     0   :  { %s3858_s12 = smov 0   ;;  %s3860_s13 = smov 0   ;;  %s4719_s0 = inlined_call_operand.vmem [shape: bf16[16,2304], index: 0, kind: input, shape index: {}]   ;;  %s4720_s1 = inlined_call_operand.vmem [shape: bf16[2304,256], index: 1, kind: input, shape index: {}]   ;;  %s4721_s2 = inlined_call_operand.vmem [shape: f32[1,256], index: 2, kind: input, shape index: {}]   ;;  %s4722_s3 = inlined_call_operand.vmem [shape: bf16[16,256], index: 3, kind: output, shape index: {}]  }
   0x1   :  { %s3862_s14 = smov 0   ;;  %s3864_s15 = smov 0  }
   0x2   :  { %s3866_s16 = smov 0  }
   0x3 LB: > { %s22_s17 = sadd.s32 1, %s3832_s15  ;;  %s3203_s18 = sadd.s32 4294967295, %s3836_s16   ;;  %s3836_s16 = sphi %s3866_s16, %s13_s16   ;;  %s3832_s15 = sphi %s3864_s15, %s4727_s15   ;;  %s3828_s14 = sphi %s3862_s14, %s4726_s14   ;;  %s3824_s13 = sphi %s3860_s13, %s4725_s13   ;;  %s3820_s12 = sphi %s3858_s12, %s4724_s12  }
   0x4   : > { %p23_p0 = scmp.ge.s32.totalorder %s22_s17, 2  ;;  %p65_p1 = scmp.ne.s32.totalorder %s3824_s13, %s3820_s12 }
   0x5   : > { %p66_p2 = scmp.eq.s32.totalorder %s3836_s16, 0  ;;  %p123_p4 = scmp.eq.s32.totalorder %s3203_s18, 1 }
   0x6   : > { %s4729_s17 = smov (%p23_p0, %s22_s17), 0  ;;  %s58_s20 = sadd.s32 1, %s3824_s13 }
   0x7   : > { %p67_p3 = por %p66_p2, %p65_p1  ;;  %s55_s19 = ssub.s32 %s3832_s15, %s4729_s17 }
   0x8   : > { %p56_p5 = scmp.eq.s32.totalorder %s55_s19, 0  ;;  %p3893_p6 = por %p123_p4, %p65_p1 }
   0x9   : > { %p3207_p7 = scmp.ge.s32.totalorder %s3836_s16, 2 }
   0xa   : > { %s3898_s22 = scalar_select %p56_p5, %s3824_s13, %s58_s20  }
   0xb   : > { %155 = sbr.rel (%p3207_p7) target bundleno = 214 (0xd6), region = 20 }
  0x12   : > { %158 = sbr.rel (!%p67_p3) target bundleno = 214 (0xd6), region = 24  ;;  %s160_s23 = sand.u32 (%p67_p3), 1, %s3824_s13  }
  0x13   : > { %s3208_s24 = sshll.u32 (%p67_p3), %s3832_s15, 2  ;;  %s3585_s25 = smul.u32 (%p67_p3), 1152, %s160_s23 }
  0x14   : > { %s3906_s28 = scalar_lea.vmem (%p67_p3), %s4720_s1, %s3208_s24 }
  0x15   : > { %v180_v0 = vld [vmem:[%s3906_s28] sm:$0xf] (%p67_p3)  ;;  %v182_v1 = vld [vmem:[%s3906_s28 + $0x8] sm:$0xf] (%p67_p3)  ;;  %v184_v2 = vld [vmem:[%s3906_s28 + $0x10] sm:$0xf] (%p67_p3) }
  0x16   : > { %v186_v3 = vld [vmem:[%s3906_s28 + $0x18] sm:$0xf] (%p67_p3)  ;;  %v188_v4 = vld [vmem:[%s3906_s28 + $0x20] sm:$0xf] (%p67_p3)  ;;  %s3913_s29 = scalar_lea.vmem (%p67_p3), [#allocation2], %s3585_s25 }
  0x17   : > { %181 = vst [vmem:[%s3913_s29] sm:$0xf] (%p67_p3), %v180_v0  ;;  %183 = vst [vmem:[%s3913_s29 + $0x4] sm:$0xf] (%p67_p3), %v182_v1  ;;  %v190_v5 = vld [vmem:[%s3906_s28 + $0x28] sm:$0xf] (%p67_p3) }
  0x18   : > { %185 = vst [vmem:[%s3913_s29 + $0x8] sm:$0xf] (%p67_p3), %v184_v2  ;;  %187 = vst [vmem:[%s3913_s29 + $0xc] sm:$0xf] (%p67_p3), %v186_v3  ;;  %v192_v6 = vld [vmem:[%s3906_s28 + $0x30] sm:$0xf] (%p67_p3) }
  0x19   : > { %189 = vst [vmem:[%s3913_s29 + $0x10] sm:$0xf] %v188_v4  ;;  %v194_v7 = vld [vmem:[%s3906_s28 + $0x38] sm:$0xf]  ;;  %191 = vst [vmem:[%s3913_s29 + $0x14] sm:$0xf] %v190_v5 }
  0x1a   : > { %193 = vst [vmem:[%s3913_s29 + $0x18] sm:$0xf] %v192_v6  ;;  %195 = vst [vmem:[%s3913_s29 + $0x1c] sm:$0xf] %v194_v7  ;;  %v196_v8 = vld [vmem:[%s3906_s28 + $0x40] sm:$0xf] }
  0x1b   : > { %v198_v9 = vld [vmem:[%s3906_s28 + $0x48] sm:$0xf]  ;;  %v200_v10 = vld [vmem:[%s3906_s28 + $0x50] sm:$0xf]  ;;  %197 = vst [vmem:[%s3913_s29 + $0x20] sm:$0xf] %v196_v8 }
  0x1c   : > { %199 = vst [vmem:[%s3913_s29 + $0x24] sm:$0xf] %v198_v9  ;;  %201 = vst [vmem:[%s3913_s29 + $0x28] sm:$0xf] %v200_v10  ;;  %v202_v11 = vld [vmem:[%s3906_s28 + $0x58] sm:$0xf] }
  0x1d   : > { %v204_v12 = vld [vmem:[%s3906_s28 + $0x60] sm:$0xf]  ;;  %v206_v13 = vld [vmem:[%s3906_s28 + $0x68] sm:$0xf]  ;;  %203 = vst [vmem:[%s3913_s29 + $0x2c] sm:$0xf] %v202_v11 }
  0x1e   : > { %205 = vst [vmem:[%s3913_s29 + $0x30] sm:$0xf] %v204_v12  ;;  %207 = vst [vmem:[%s3913_s29 + $0x34] sm:$0xf] %v206_v13  ;;  %v208_v14 = vld [vmem:[%s3906_s28 + $0x70] sm:$0xf] }
  0x1f   : > { %v210_v15 = vld [vmem:[%s3906_s28 + $0x78] sm:$0xf]  ;;  %v212_v16 = vld [vmem:[%s3906_s28 + $0x80] sm:$0xf]  ;;  %209 = vst [vmem:[%s3913_s29 + $0x38] sm:$0xf] %v208_v14 }
  0x20   : > { %211 = vst [vmem:[%s3913_s29 + $0x3c] sm:$0xf] %v210_v15  ;;  %213 = vst [vmem:[%s3913_s29 + $0x40] sm:$0xf] %v212_v16  ;;  %v214_v17 = vld [vmem:[%s3906_s28 + $0x88] sm:$0xf] }
  0x21   : > { %v216_v18 = vld [vmem:[%s3906_s28 + $0x90] sm:$0xf]  ;;  %v218_v19 = vld [vmem:[%s3906_s28 + $0x98] sm:$0xf]  ;;  %215 = vst [vmem:[%s3913_s29 + $0x44] sm:$0xf] %v214_v17 }
  0x22   : > { %217 = vst [vmem:[%s3913_s29 + $0x48] sm:$0xf] %v216_v18  ;;  %219 = vst [vmem:[%s3913_s29 + $0x4c] sm:$0xf] %v218_v19  ;;  %v220_v20 = vld [vmem:[%s3906_s28 + $0xa0] sm:$0xf] }
  0x23   : > { %v222_v21 = vld [vmem:[%s3906_s28 + $0xa8] sm:$0xf]  ;;  %v224_v22 = vld [vmem:[%s3906_s28 + $0xb0] sm:$0xf]  ;;  %221 = vst [vmem:[%s3913_s29 + $0x50] sm:$0xf] %v220_v20 }
  0x24   : > { %223 = vst [vmem:[%s3913_s29 + $0x54] sm:$0xf] %v222_v21  ;;  %225 = vst [vmem:[%s3913_s29 + $0x58] sm:$0xf] %v224_v22  ;;  %v226_v23 = vld [vmem:[%s3906_s28 + $0xb8] sm:$0xf] }
  0x25   : > { %v228_v24 = vld [vmem:[%s3906_s28 + $0xc0] sm:$0xf]  ;;  %v230_v25 = vld [vmem:[%s3906_s28 + $0xc8] sm:$0xf]  ;;  %227 = vst [vmem:[%s3913_s29 + $0x5c] sm:$0xf] %v226_v23 }
  0x26   : > { %229 = vst [vmem:[%s3913_s29 + $0x60] sm:$0xf] %v228_v24  ;;  %231 = vst [vmem:[%s3913_s29 + $0x64] sm:$0xf] %v230_v25  ;;  %v232_v26 = vld [vmem:[%s3906_s28 + $0xd0] sm:$0xf] }
  0x27   : > { %v234_v27 = vld [vmem:[%s3906_s28 + $0xd8] sm:$0xf]  ;;  %v236_v28 = vld [vmem:[%s3906_s28 + $0xe0] sm:$0xf]  ;;  %233 = vst [vmem:[%s3913_s29 + $0x68] sm:$0xf] %v232_v26 }
  0x28   : > { %235 = vst [vmem:[%s3913_s29 + $0x6c] sm:$0xf] %v234_v27  ;;  %237 = vst [vmem:[%s3913_s29 + $0x70] sm:$0xf] %v236_v28  ;;  %v238_v29 = vld [vmem:[%s3906_s28 + $0xe8] sm:$0xf] }
  0x29   : > { %v240_v30 = vld [vmem:[%s3906_s28 + $0xf0] sm:$0xf]  ;;  %v242_v31 = vld [vmem:[%s3906_s28 + $0xf8] sm:$0xf]  ;;  %239 = vst [vmem:[%s3913_s29 + $0x74] sm:$0xf] %v238_v29 }
  0x2a   : > { %241 = vst [vmem:[%s3913_s29 + $0x78] sm:$0xf] %v240_v30  ;;  %243 = vst [vmem:[%s3913_s29 + $0x7c] sm:$0xf] %v242_v31  ;;  %v244_v32 = vld [vmem:[%s3906_s28 + $0x100] sm:$0xf] }
  0x2b   : > { %v246_v33 = vld [vmem:[%s3906_s28 + $0x108] sm:$0xf]  ;;  %v248_v34 = vld [vmem:[%s3906_s28 + $0x110] sm:$0xf]  ;;  %245 = vst [vmem:[%s3913_s29 + $0x80] sm:$0xf] %v244_v32 }
  0x2c   : > { %247 = vst [vmem:[%s3913_s29 + $0x84] sm:$0xf] %v246_v33  ;;  %249 = vst [vmem:[%s3913_s29 + $0x88] sm:$0xf] %v248_v34  ;;  %v250_v35 = vld [vmem:[%s3906_s28 + $0x118] sm:$0xf] }
  0x2d   : > { %v252_v36 = vld [vmem:[%s3906_s28 + $0x120] sm:$0xf]  ;;  %v254_v37 = vld [vmem:[%s3906_s28 + $0x128] sm:$0xf]  ;;  %251 = vst [vmem:[%s3913_s29 + $0x8c] sm:$0xf] %v250_v35 }
  0x2e   : > { %253 = vst [vmem:[%s3913_s29 + $0x90] sm:$0xf] %v252_v36  ;;  %255 = vst [vmem:[%s3913_s29 + $0x94] sm:$0xf] %v254_v37  ;;  %v256_v38 = vld [vmem:[%s3906_s28 + $0x130] sm:$0xf] }
  0x2f   : > { %v258_v39 = vld [vmem:[%s3906_s28 + $0x138] sm:$0xf]  ;;  %v260_v40 = vld [vmem:[%s3906_s28 + $0x140] sm:$0xf]  ;;  %257 = vst [vmem:[%s3913_s29 + $0x98] sm:$0xf] %v256_v38 }
  0x30   : > { %259 = vst [vmem:[%s3913_s29 + $0x9c] sm:$0xf] %v258_v39  ;;  %261 = vst [vmem:[%s3913_s29 + $0xa0] sm:$0xf] %v260_v40  ;;  %v262_v41 = vld [vmem:[%s3906_s28 + $0x148] sm:$0xf] }
  0x31   : > { %v264_v42 = vld [vmem:[%s3906_s28 + $0x150] sm:$0xf]  ;;  %v266_v43 = vld [vmem:[%s3906_s28 + $0x158] sm:$0xf]  ;;  %263 = vst [vmem:[%s3913_s29 + $0xa4] sm:$0xf] %v262_v41 }
  0x32   : > { %265 = vst [vmem:[%s3913_s29 + $0xa8] sm:$0xf] %v264_v42  ;;  %267 = vst [vmem:[%s3913_s29 + $0xac] sm:$0xf] %v266_v43  ;;  %v268_v44 = vld [vmem:[%s3906_s28 + $0x160] sm:$0xf] }
  0x33   : > { %v270_v45 = vld [vmem:[%s3906_s28 + $0x168] sm:$0xf]  ;;  %v272_v46 = vld [vmem:[%s3906_s28 + $0x170] sm:$0xf]  ;;  %269 = vst [vmem:[%s3913_s29 + $0xb0] sm:$0xf] %v268_v44 }
  0x34   : > { %271 = vst [vmem:[%s3913_s29 + $0xb4] sm:$0xf] %v270_v45  ;;  %273 = vst [vmem:[%s3913_s29 + $0xb8] sm:$0xf] %v272_v46  ;;  %v274_v47 = vld [vmem:[%s3906_s28 + $0x178] sm:$0xf] }
  0x35   : > { %v276_v48 = vld [vmem:[%s3906_s28 + $0x180] sm:$0xf]  ;;  %v278_v49 = vld [vmem:[%s3906_s28 + $0x188] sm:$0xf]  ;;  %275 = vst [vmem:[%s3913_s29 + $0xbc] sm:$0xf] %v274_v47 }
  0x36   : > { %277 = vst [vmem:[%s3913_s29 + $0xc0] sm:$0xf] %v276_v48  ;;  %279 = vst [vmem:[%s3913_s29 + $0xc4] sm:$0xf] %v278_v49  ;;  %v280_v50 = vld [vmem:[%s3906_s28 + $0x190] sm:$0xf] }
  0x37   : > { %v282_v51 = vld [vmem:[%s3906_s28 + $0x198] sm:$0xf]  ;;  %v284_v52 = vld [vmem:[%s3906_s28 + $0x1a0] sm:$0xf]  ;;  %281 = vst [vmem:[%s3913_s29 + $0xc8] sm:$0xf] %v280_v50 }
  0x38   : > { %283 = vst [vmem:[%s3913_s29 + $0xcc] sm:$0xf] %v282_v51  ;;  %285 = vst [vmem:[%s3913_s29 + $0xd0] sm:$0xf] %v284_v52  ;;  %v286_v53 = vld [vmem:[%s3906_s28 + $0x1a8] sm:$0xf] }
  0x39   : > { %v288_v54 = vld [vmem:[%s3906_s28 + $0x1b0] sm:$0xf]  ;;  %v290_v55 = vld [vmem:[%s3906_s28 + $0x1b8] sm:$0xf]  ;;  %287 = vst [vmem:[%s3913_s29 + $0xd4] sm:$0xf] %v286_v53 }
  0x3a   : > { %289 = vst [vmem:[%s3913_s29 + $0xd8] sm:$0xf] %v288_v54  ;;  %291 = vst [vmem:[%s3913_s29 + $0xdc] sm:$0xf] %v290_v55  ;;  %v292_v56 = vld [vmem:[%s3906_s28 + $0x1c0] sm:$0xf] }
  0x3b   : > { %v294_v57 = vld [vmem:[%s3906_s28 + $0x1c8] sm:$0xf]  ;;  %v296_v58 = vld [vmem:[%s3906_s28 + $0x1d0] sm:$0xf]  ;;  %293 = vst [vmem:[%s3913_s29 + $0xe0] sm:$0xf] %v292_v56 }
  0x3c   : > { %295 = vst [vmem:[%s3913_s29 + $0xe4] sm:$0xf] %v294_v57  ;;  %297 = vst [vmem:[%s3913_s29 + $0xe8] sm:$0xf] %v296_v58  ;;  %v298_v59 = vld [vmem:[%s3906_s28 + $0x1d8] sm:$0xf] }
  0x3d   : > { %v300_v60 = vld [vmem:[%s3906_s28 + $0x1e0] sm:$0xf]  ;;  %v302_v61 = vld [vmem:[%s3906_s28 + $0x1e8] sm:$0xf]  ;;  %299 = vst [vmem:[%s3913_s29 + $0xec] sm:$0xf] %v298_v59 }
  0x3e   : > { %301 = vst [vmem:[%s3913_s29 + $0xf0] sm:$0xf] %v300_v60  ;;  %303 = vst [vmem:[%s3913_s29 + $0xf4] sm:$0xf] %v302_v61  ;;  %v304_v62 = vld [vmem:[%s3906_s28 + $0x1f0] sm:$0xf] }
  0x3f   : > { %v306_v63 = vld [vmem:[%s3906_s28 + $0x1f8] sm:$0xf]  ;;  %v308_v0 = vld [vmem:[%s3906_s28 + $0x200] sm:$0xf]  ;;  %305 = vst [vmem:[%s3913_s29 + $0xf8] sm:$0xf] %v304_v62 }
  0x40   : > { %307 = vst [vmem:[%s3913_s29 + $0xfc] sm:$0xf] %v306_v63  ;;  %309 = vst [vmem:[%s3913_s29 + $0x100] sm:$0xf] %v308_v0  ;;  %v310_v1 = vld [vmem:[%s3906_s28 + $0x208] sm:$0xf] }
  0x41   : > { %v312_v2 = vld [vmem:[%s3906_s28 + $0x210] sm:$0xf]  ;;  %v314_v3 = vld [vmem:[%s3906_s28 + $0x218] sm:$0xf]  ;;  %311 = vst [vmem:[%s3913_s29 + $0x104] sm:$0xf] %v310_v1 }
  0x42   : > { %313 = vst [vmem:[%s3913_s29 + $0x108] sm:$0xf] %v312_v2  ;;  %315 = vst [vmem:[%s3913_s29 + $0x10c] sm:$0xf] %v314_v3  ;;  %v316_v4 = vld [vmem:[%s3906_s28 + $0x220] sm:$0xf] }
  0x43   : > { %v318_v5 = vld [vmem:[%s3906_s28 + $0x228] sm:$0xf]  ;;  %v320_v6 = vld [vmem:[%s3906_s28 + $0x230] sm:$0xf]  ;;  %317 = vst [vmem:[%s3913_s29 + $0x110] sm:$0xf] %v316_v4 }
  0x44   : > { %319 = vst [vmem:[%s3913_s29 + $0x114] sm:$0xf] %v318_v5  ;;  %321 = vst [vmem:[%s3913_s29 + $0x118] sm:$0xf] %v320_v6  ;;  %v322_v7 = vld [vmem:[%s3906_s28 + $0x238] sm:$0xf] }
  0x45   : > { %v324_v8 = vld [vmem:[%s3906_s28 + $0x240] sm:$0xf]  ;;  %v326_v9 = vld [vmem:[%s3906_s28 + $0x248] sm:$0xf]  ;;  %323 = vst [vmem:[%s3913_s29 + $0x11c] sm:$0xf] %v322_v7 }
  0x46   : > { %325 = vst [vmem:[%s3913_s29 + $0x120] sm:$0xf] %v324_v8  ;;  %327 = vst [vmem:[%s3913_s29 + $0x124] sm:$0xf] %v326_v9  ;;  %v328_v10 = vld [vmem:[%s3906_s28 + $0x250] sm:$0xf] }
  0x47   : > { %v330_v11 = vld [vmem:[%s3906_s28 + $0x258] sm:$0xf]  ;;  %v332_v12 = vld [vmem:[%s3906_s28 + $0x260] sm:$0xf]  ;;  %329 = vst [vmem:[%s3913_s29 + $0x128] sm:$0xf] %v328_v10 }
  0x48   : > { %331 = vst [vmem:[%s3913_s29 + $0x12c] sm:$0xf] %v330_v11  ;;  %333 = vst [vmem:[%s3913_s29 + $0x130] sm:$0xf] %v332_v12  ;;  %v334_v13 = vld [vmem:[%s3906_s28 + $0x268] sm:$0xf] }
  0x49   : > { %v336_v14 = vld [vmem:[%s3906_s28 + $0x270] sm:$0xf]  ;;  %v338_v15 = vld [vmem:[%s3906_s28 + $0x278] sm:$0xf]  ;;  %335 = vst [vmem:[%s3913_s29 + $0x134] sm:$0xf] %v334_v13 }
  0x4a   : > { %337 = vst [vmem:[%s3913_s29 + $0x138] sm:$0xf] %v336_v14  ;;  %339 = vst [vmem:[%s3913_s29 + $0x13c] sm:$0xf] %v338_v15  ;;  %v340_v16 = vld [vmem:[%s3906_s28 + $0x280] sm:$0xf] }
  0x4b   : > { %v342_v17 = vld [vmem:[%s3906_s28 + $0x288] sm:$0xf]  ;;  %v344_v18 = vld [vmem:[%s3906_s28 + $0x290] sm:$0xf]  ;;  %341 = vst [vmem:[%s3913_s29 + $0x140] sm:$0xf] %v340_v16 }
  0x4c   : > { %343 = vst [vmem:[%s3913_s29 + $0x144] sm:$0xf] %v342_v17  ;;  %345 = vst [vmem:[%s3913_s29 + $0x148] sm:$0xf] %v344_v18  ;;  %v346_v19 = vld [vmem:[%s3906_s28 + $0x298] sm:$0xf] }
  0x4d   : > { %v348_v20 = vld [vmem:[%s3906_s28 + $0x2a0] sm:$0xf]  ;;  %v350_v21 = vld [vmem:[%s3906_s28 + $0x2a8] sm:$0xf]  ;;  %347 = vst [vmem:[%s3913_s29 + $0x14c] sm:$0xf] %v346_v19 }
  0x4e   : > { %349 = vst [vmem:[%s3913_s29 + $0x150] sm:$0xf] %v348_v20  ;;  %351 = vst [vmem:[%s3913_s29 + $0x154] sm:$0xf] %v350_v21  ;;  %v352_v22 = vld [vmem:[%s3906_s28 + $0x2b0] sm:$0xf] }
  0x4f   : > { %v354_v23 = vld [vmem:[%s3906_s28 + $0x2b8] sm:$0xf]  ;;  %v356_v24 = vld [vmem:[%s3906_s28 + $0x2c0] sm:$0xf]  ;;  %353 = vst [vmem:[%s3913_s29 + $0x158] sm:$0xf] %v352_v22 }
  0x50   : > { %355 = vst [vmem:[%s3913_s29 + $0x15c] sm:$0xf] %v354_v23  ;;  %357 = vst [vmem:[%s3913_s29 + $0x160] sm:$0xf] %v356_v24  ;;  %v358_v25 = vld [vmem:[%s3906_s28 + $0x2c8] sm:$0xf] }
  0x51   : > { %v360_v26 = vld [vmem:[%s3906_s28 + $0x2d0] sm:$0xf]  ;;  %v362_v27 = vld [vmem:[%s3906_s28 + $0x2d8] sm:$0xf]  ;;  %359 = vst [vmem:[%s3913_s29 + $0x164] sm:$0xf] %v358_v25 }
  0x52   : > { %361 = vst [vmem:[%s3913_s29 + $0x168] sm:$0xf] %v360_v26  ;;  %363 = vst [vmem:[%s3913_s29 + $0x16c] sm:$0xf] %v362_v27  ;;  %v364_v28 = vld [vmem:[%s3906_s28 + $0x2e0] sm:$0xf] }
  0x53   : > { %v366_v29 = vld [vmem:[%s3906_s28 + $0x2e8] sm:$0xf]  ;;  %v368_v30 = vld [vmem:[%s3906_s28 + $0x2f0] sm:$0xf]  ;;  %365 = vst [vmem:[%s3913_s29 + $0x170] sm:$0xf] %v364_v28 }
  0x54   : > { %367 = vst [vmem:[%s3913_s29 + $0x174] sm:$0xf] %v366_v29  ;;  %369 = vst [vmem:[%s3913_s29 + $0x178] sm:$0xf] %v368_v30  ;;  %v370_v31 = vld [vmem:[%s3906_s28 + $0x2f8] sm:$0xf] }
  0x55   : > { %v372_v32 = vld [vmem:[%s3906_s28 + $0x300] sm:$0xf]  ;;  %v374_v33 = vld [vmem:[%s3906_s28 + $0x308] sm:$0xf]  ;;  %371 = vst [vmem:[%s3913_s29 + $0x17c] sm:$0xf] %v370_v31 }
  0x56   : > { %373 = vst [vmem:[%s3913_s29 + $0x180] sm:$0xf] %v372_v32  ;;  %375 = vst [vmem:[%s3913_s29 + $0x184] sm:$0xf] %v374_v33  ;;  %v376_v34 = vld [vmem:[%s3906_s28 + $0x310] sm:$0xf] }
  0x57   : > { %v378_v35 = vld [vmem:[%s3906_s28 + $0x318] sm:$0xf]  ;;  %v380_v36 = vld [vmem:[%s3906_s28 + $0x320] sm:$0xf]  ;;  %377 = vst [vmem:[%s3913_s29 + $0x188] sm:$0xf] %v376_v34 }
  0x58   : > { %379 = vst [vmem:[%s3913_s29 + $0x18c] sm:$0xf] %v378_v35  ;;  %381 = vst [vmem:[%s3913_s29 + $0x190] sm:$0xf] %v380_v36  ;;  %v382_v37 = vld [vmem:[%s3906_s28 + $0x328] sm:$0xf] }
  0x59   : > { %v384_v38 = vld [vmem:[%s3906_s28 + $0x330] sm:$0xf]  ;;  %v386_v39 = vld [vmem:[%s3906_s28 + $0x338] sm:$0xf]  ;;  %383 = vst [vmem:[%s3913_s29 + $0x194] sm:$0xf] %v382_v37 }
  0x5a   : > { %385 = vst [vmem:[%s3913_s29 + $0x198] sm:$0xf] %v384_v38  ;;  %387 = vst [vmem:[%s3913_s29 + $0x19c] sm:$0xf] %v386_v39  ;;  %v388_v40 = vld [vmem:[%s3906_s28 + $0x340] sm:$0xf] }
  0x5b   : > { %v390_v41 = vld [vmem:[%s3906_s28 + $0x348] sm:$0xf]  ;;  %v392_v42 = vld [vmem:[%s3906_s28 + $0x350] sm:$0xf]  ;;  %389 = vst [vmem:[%s3913_s29 + $0x1a0] sm:$0xf] %v388_v40 }
  0x5c   : > { %391 = vst [vmem:[%s3913_s29 + $0x1a4] sm:$0xf] %v390_v41  ;;  %393 = vst [vmem:[%s3913_s29 + $0x1a8] sm:$0xf] %v392_v42  ;;  %v394_v43 = vld [vmem:[%s3906_s28 + $0x358] sm:$0xf] }
  0x5d   : > { %v396_v44 = vld [vmem:[%s3906_s28 + $0x360] sm:$0xf]  ;;  %v398_v45 = vld [vmem:[%s3906_s28 + $0x368] sm:$0xf]  ;;  %395 = vst [vmem:[%s3913_s29 + $0x1ac] sm:$0xf] %v394_v43 }
  0x5e   : > { %397 = vst [vmem:[%s3913_s29 + $0x1b0] sm:$0xf] %v396_v44  ;;  %399 = vst [vmem:[%s3913_s29 + $0x1b4] sm:$0xf] %v398_v45  ;;  %v400_v46 = vld [vmem:[%s3906_s28 + $0x370] sm:$0xf] }
  0x5f   : > { %v402_v47 = vld [vmem:[%s3906_s28 + $0x378] sm:$0xf]  ;;  %v404_v48 = vld [vmem:[%s3906_s28 + $0x380] sm:$0xf]  ;;  %401 = vst [vmem:[%s3913_s29 + $0x1b8] sm:$0xf] %v400_v46 }
  0x60   : > { %403 = vst [vmem:[%s3913_s29 + $0x1bc] sm:$0xf] %v402_v47  ;;  %405 = vst [vmem:[%s3913_s29 + $0x1c0] sm:$0xf] %v404_v48  ;;  %v406_v49 = vld [vmem:[%s3906_s28 + $0x388] sm:$0xf] }
  0x61   : > { %v408_v50 = vld [vmem:[%s3906_s28 + $0x390] sm:$0xf]  ;;  %v410_v51 = vld [vmem:[%s3906_s28 + $0x398] sm:$0xf]  ;;  %407 = vst [vmem:[%s3913_s29 + $0x1c4] sm:$0xf] %v406_v49 }
  0x62   : > { %409 = vst [vmem:[%s3913_s29 + $0x1c8] sm:$0xf] %v408_v50  ;;  %411 = vst [vmem:[%s3913_s29 + $0x1cc] sm:$0xf] %v410_v51  ;;  %v412_v52 = vld [vmem:[%s3906_s28 + $0x3a0] sm:$0xf] }
  0x63   : > { %v414_v53 = vld [vmem:[%s3906_s28 + $0x3a8] sm:$0xf]  ;;  %v416_v54 = vld [vmem:[%s3906_s28 + $0x3b0] sm:$0xf]  ;;  %413 = vst [vmem:[%s3913_s29 + $0x1d0] sm:$0xf] %v412_v52 }
  0x64   : > { %415 = vst [vmem:[%s3913_s29 + $0x1d4] sm:$0xf] %v414_v53  ;;  %417 = vst [vmem:[%s3913_s29 + $0x1d8] sm:$0xf] %v416_v54  ;;  %v418_v55 = vld [vmem:[%s3906_s28 + $0x3b8] sm:$0xf] }
  0x65   : > { %v420_v56 = vld [vmem:[%s3906_s28 + $0x3c0] sm:$0xf]  ;;  %v422_v57 = vld [vmem:[%s3906_s28 + $0x3c8] sm:$0xf]  ;;  %419 = vst [vmem:[%s3913_s29 + $0x1dc] sm:$0xf] %v418_v55 }
  0x66   : > { %421 = vst [vmem:[%s3913_s29 + $0x1e0] sm:$0xf] %v420_v56  ;;  %423 = vst [vmem:[%s3913_s29 + $0x1e4] sm:$0xf] %v422_v57  ;;  %v424_v58 = vld [vmem:[%s3906_s28 + $0x3d0] sm:$0xf] }
  0x67   : > { %v426_v59 = vld [vmem:[%s3906_s28 + $0x3d8] sm:$0xf]  ;;  %v428_v60 = vld [vmem:[%s3906_s28 + $0x3e0] sm:$0xf]  ;;  %425 = vst [vmem:[%s3913_s29 + $0x1e8] sm:$0xf] %v424_v58 }
  0x68   : > { %427 = vst [vmem:[%s3913_s29 + $0x1ec] sm:$0xf] %v426_v59  ;;  %429 = vst [vmem:[%s3913_s29 + $0x1f0] sm:$0xf] %v428_v60  ;;  %v430_v61 = vld [vmem:[%s3906_s28 + $0x3e8] sm:$0xf] }
  0x69   : > { %v432_v62 = vld [vmem:[%s3906_s28 + $0x3f0] sm:$0xf]  ;;  %v434_v63 = vld [vmem:[%s3906_s28 + $0x3f8] sm:$0xf]  ;;  %431 = vst [vmem:[%s3913_s29 + $0x1f4] sm:$0xf] %v430_v61 }
  0x6a   : > { %433 = vst [vmem:[%s3913_s29 + $0x1f8] sm:$0xf] %v432_v62  ;;  %435 = vst [vmem:[%s3913_s29 + $0x1fc] sm:$0xf] %v434_v63  ;;  %v436_v0 = vld [vmem:[%s3906_s28 + $0x400] sm:$0xf] }
  0x6b   : > { %v438_v1 = vld [vmem:[%s3906_s28 + $0x408] sm:$0xf]  ;;  %v440_v2 = vld [vmem:[%s3906_s28 + $0x410] sm:$0xf]  ;;  %437 = vst [vmem:[%s3913_s29 + $0x200] sm:$0xf] %v436_v0 }
  0x6c   : > { %439 = vst [vmem:[%s3913_s29 + $0x204] sm:$0xf] %v438_v1  ;;  %441 = vst [vmem:[%s3913_s29 + $0x208] sm:$0xf] %v440_v2  ;;  %v442_v3 = vld [vmem:[%s3906_s28 + $0x418] sm:$0xf] }
  0x6d   : > { %v444_v4 = vld [vmem:[%s3906_s28 + $0x420] sm:$0xf]  ;;  %v446_v5 = vld [vmem:[%s3906_s28 + $0x428] sm:$0xf]  ;;  %443 = vst [vmem:[%s3913_s29 + $0x20c] sm:$0xf] %v442_v3 }
  0x6e   : > { %445 = vst [vmem:[%s3913_s29 + $0x210] sm:$0xf] %v444_v4  ;;  %447 = vst [vmem:[%s3913_s29 + $0x214] sm:$0xf] %v446_v5  ;;  %v448_v6 = vld [vmem:[%s3906_s28 + $0x430] sm:$0xf] }
  0x6f   : > { %v450_v7 = vld [vmem:[%s3906_s28 + $0x438] sm:$0xf]  ;;  %v452_v8 = vld [vmem:[%s3906_s28 + $0x440] sm:$0xf]  ;;  %449 = vst [vmem:[%s3913_s29 + $0x218] sm:$0xf] %v448_v6 }
  0x70   : > { %451 = vst [vmem:[%s3913_s29 + $0x21c] sm:$0xf] %v450_v7  ;;  %453 = vst [vmem:[%s3913_s29 + $0x220] sm:$0xf] %v452_v8  ;;  %v454_v9 = vld [vmem:[%s3906_s28 + $0x448] sm:$0xf] }
  0x71   : > { %v456_v10 = vld [vmem:[%s3906_s28 + $0x450] sm:$0xf]  ;;  %v458_v11 = vld [vmem:[%s3906_s28 + $0x458] sm:$0xf]  ;;  %455 = vst [vmem:[%s3913_s29 + $0x224] sm:$0xf] %v454_v9 }
  0x72   : > { %457 = vst [vmem:[%s3913_s29 + $0x228] sm:$0xf] %v456_v10  ;;  %459 = vst [vmem:[%s3913_s29 + $0x22c] sm:$0xf] %v458_v11  ;;  %v460_v12 = vld [vmem:[%s3906_s28 + $0x460] sm:$0xf] }
  0x73   : > { %v462_v13 = vld [vmem:[%s3906_s28 + $0x468] sm:$0xf]  ;;  %v464_v14 = vld [vmem:[%s3906_s28 + $0x470] sm:$0xf]  ;;  %461 = vst [vmem:[%s3913_s29 + $0x230] sm:$0xf] %v460_v12 }
  0x74   : > { %463 = vst [vmem:[%s3913_s29 + $0x234] sm:$0xf] %v462_v13  ;;  %465 = vst [vmem:[%s3913_s29 + $0x238] sm:$0xf] %v464_v14  ;;  %v466_v15 = vld [vmem:[%s3906_s28 + $0x478] sm:$0xf] }
  0x75   : > { %v468_v16 = vld [vmem:[%s3906_s28 + $0x480] sm:$0xf]  ;;  %v470_v17 = vld [vmem:[%s3906_s28 + $0x488] sm:$0xf]  ;;  %467 = vst [vmem:[%s3913_s29 + $0x23c] sm:$0xf] %v466_v15 }
  0x76   : > { %469 = vst [vmem:[%s3913_s29 + $0x240] sm:$0xf] %v468_v16  ;;  %471 = vst [vmem:[%s3913_s29 + $0x244] sm:$0xf] %v470_v17  ;;  %v472_v18 = vld [vmem:[%s3906_s28 + $0x490] sm:$0xf] }
  0x77   : > { %v474_v19 = vld [vmem:[%s3906_s28 + $0x498] sm:$0xf]  ;;  %v476_v20 = vld [vmem:[%s3906_s28 + $0x4a0] sm:$0xf]  ;;  %473 = vst [vmem:[%s3913_s29 + $0x248] sm:$0xf] %v472_v18 }
  0x78   : > { %475 = vst [vmem:[%s3913_s29 + $0x24c] sm:$0xf] %v474_v19  ;;  %477 = vst [vmem:[%s3913_s29 + $0x250] sm:$0xf] %v476_v20  ;;  %v478_v21 = vld [vmem:[%s3906_s28 + $0x4a8] sm:$0xf] }
  0x79   : > { %v480_v22 = vld [vmem:[%s3906_s28 + $0x4b0] sm:$0xf]  ;;  %v482_v23 = vld [vmem:[%s3906_s28 + $0x4b8] sm:$0xf]  ;;  %479 = vst [vmem:[%s3913_s29 + $0x254] sm:$0xf] %v478_v21 }
  0x7a   : > { %481 = vst [vmem:[%s3913_s29 + $0x258] sm:$0xf] %v480_v22  ;;  %483 = vst [vmem:[%s3913_s29 + $0x25c] sm:$0xf] %v482_v23  ;;  %v484_v24 = vld [vmem:[%s3906_s28 + $0x4c0] sm:$0xf] }
  0x7b   : > { %v486_v25 = vld [vmem:[%s3906_s28 + $0x4c8] sm:$0xf]  ;;  %v488_v26 = vld [vmem:[%s3906_s28 + $0x4d0] sm:$0xf]  ;;  %485 = vst [vmem:[%s3913_s29 + $0x260] sm:$0xf] %v484_v24 }
  0x7c   : > { %487 = vst [vmem:[%s3913_s29 + $0x264] sm:$0xf] %v486_v25  ;;  %489 = vst [vmem:[%s3913_s29 + $0x268] sm:$0xf] %v488_v26  ;;  %v490_v27 = vld [vmem:[%s3906_s28 + $0x4d8] sm:$0xf] }
  0x7d   : > { %v492_v28 = vld [vmem:[%s3906_s28 + $0x4e0] sm:$0xf]  ;;  %v494_v29 = vld [vmem:[%s3906_s28 + $0x4e8] sm:$0xf]  ;;  %491 = vst [vmem:[%s3913_s29 + $0x26c] sm:$0xf] %v490_v27 }
  0x7e   : > { %493 = vst [vmem:[%s3913_s29 + $0x270] sm:$0xf] %v492_v28  ;;  %495 = vst [vmem:[%s3913_s29 + $0x274] sm:$0xf] %v494_v29  ;;  %v496_v30 = vld [vmem:[%s3906_s28 + $0x4f0] sm:$0xf] }
  0x7f   : > { %v498_v31 = vld [vmem:[%s3906_s28 + $0x4f8] sm:$0xf]  ;;  %v500_v32 = vld [vmem:[%s3906_s28 + $0x500] sm:$0xf]  ;;  %497 = vst [vmem:[%s3913_s29 + $0x278] sm:$0xf] %v496_v30 }
  0x80   : > { %499 = vst [vmem:[%s3913_s29 + $0x27c] sm:$0xf] %v498_v31  ;;  %501 = vst [vmem:[%s3913_s29 + $0x280] sm:$0xf] %v500_v32  ;;  %v502_v33 = vld [vmem:[%s3906_s28 + $0x508] sm:$0xf] }
  0x81   : > { %v504_v34 = vld [vmem:[%s3906_s28 + $0x510] sm:$0xf]  ;;  %v506_v35 = vld [vmem:[%s3906_s28 + $0x518] sm:$0xf]  ;;  %503 = vst [vmem:[%s3913_s29 + $0x284] sm:$0xf] %v502_v33 }
  0x82   : > { %505 = vst [vmem:[%s3913_s29 + $0x288] sm:$0xf] %v504_v34  ;;  %507 = vst [vmem:[%s3913_s29 + $0x28c] sm:$0xf] %v506_v35  ;;  %v508_v36 = vld [vmem:[%s3906_s28 + $0x520] sm:$0xf] }
  0x83   : > { %v510_v37 = vld [vmem:[%s3906_s28 + $0x528] sm:$0xf]  ;;  %v512_v38 = vld [vmem:[%s3906_s28 + $0x530] sm:$0xf]  ;;  %509 = vst [vmem:[%s3913_s29 + $0x290] sm:$0xf] %v508_v36 }
  0x84   : > { %511 = vst [vmem:[%s3913_s29 + $0x294] sm:$0xf] %v510_v37  ;;  %513 = vst [vmem:[%s3913_s29 + $0x298] sm:$0xf] %v512_v38  ;;  %v514_v39 = vld [vmem:[%s3906_s28 + $0x538] sm:$0xf] }
  0x85   : > { %v516_v40 = vld [vmem:[%s3906_s28 + $0x540] sm:$0xf]  ;;  %v518_v41 = vld [vmem:[%s3906_s28 + $0x548] sm:$0xf]  ;;  %515 = vst [vmem:[%s3913_s29 + $0x29c] sm:$0xf] %v514_v39 }
  0x86   : > { %517 = vst [vmem:[%s3913_s29 + $0x2a0] sm:$0xf] %v516_v40  ;;  %519 = vst [vmem:[%s3913_s29 + $0x2a4] sm:$0xf] %v518_v41  ;;  %v520_v42 = vld [vmem:[%s3906_s28 + $0x550] sm:$0xf] }
  0x87   : > { %v522_v43 = vld [vmem:[%s3906_s28 + $0x558] sm:$0xf]  ;;  %v524_v44 = vld [vmem:[%s3906_s28 + $0x560] sm:$0xf]  ;;  %521 = vst [vmem:[%s3913_s29 + $0x2a8] sm:$0xf] %v520_v42 }
  0x88   : > { %523 = vst [vmem:[%s3913_s29 + $0x2ac] sm:$0xf] %v522_v43  ;;  %525 = vst [vmem:[%s3913_s29 + $0x2b0] sm:$0xf] %v524_v44  ;;  %v526_v45 = vld [vmem:[%s3906_s28 + $0x568] sm:$0xf] }
  0x89   : > { %v528_v46 = vld [vmem:[%s3906_s28 + $0x570] sm:$0xf]  ;;  %v530_v47 = vld [vmem:[%s3906_s28 + $0x578] sm:$0xf]  ;;  %527 = vst [vmem:[%s3913_s29 + $0x2b4] sm:$0xf] %v526_v45 }
  0x8a   : > { %529 = vst [vmem:[%s3913_s29 + $0x2b8] sm:$0xf] %v528_v46  ;;  %531 = vst [vmem:[%s3913_s29 + $0x2bc] sm:$0xf] %v530_v47  ;;  %v532_v48 = vld [vmem:[%s3906_s28 + $0x580] sm:$0xf] }
  0x8b   : > { %v534_v49 = vld [vmem:[%s3906_s28 + $0x588] sm:$0xf]  ;;  %v536_v50 = vld [vmem:[%s3906_s28 + $0x590] sm:$0xf]  ;;  %533 = vst [vmem:[%s3913_s29 + $0x2c0] sm:$0xf] %v532_v48 }
  0x8c   : > { %535 = vst [vmem:[%s3913_s29 + $0x2c4] sm:$0xf] %v534_v49  ;;  %537 = vst [vmem:[%s3913_s29 + $0x2c8] sm:$0xf] %v536_v50  ;;  %v538_v51 = vld [vmem:[%s3906_s28 + $0x598] sm:$0xf] }
  0x8d   : > { %v540_v52 = vld [vmem:[%s3906_s28 + $0x5a0] sm:$0xf]  ;;  %v542_v53 = vld [vmem:[%s3906_s28 + $0x5a8] sm:$0xf]  ;;  %539 = vst [vmem:[%s3913_s29 + $0x2cc] sm:$0xf] %v538_v51 }
  0x8e   : > { %541 = vst [vmem:[%s3913_s29 + $0x2d0] sm:$0xf] %v540_v52  ;;  %543 = vst [vmem:[%s3913_s29 + $0x2d4] sm:$0xf] %v542_v53  ;;  %v544_v54 = vld [vmem:[%s3906_s28 + $0x5b0] sm:$0xf] }
  0x8f   : > { %v546_v55 = vld [vmem:[%s3906_s28 + $0x5b8] sm:$0xf]  ;;  %v548_v56 = vld [vmem:[%s3906_s28 + $0x5c0] sm:$0xf]  ;;  %545 = vst [vmem:[%s3913_s29 + $0x2d8] sm:$0xf] %v544_v54 }
  0x90   : > { %547 = vst [vmem:[%s3913_s29 + $0x2dc] sm:$0xf] %v546_v55  ;;  %549 = vst [vmem:[%s3913_s29 + $0x2e0] sm:$0xf] %v548_v56  ;;  %v550_v57 = vld [vmem:[%s3906_s28 + $0x5c8] sm:$0xf] }
  0x91   : > { %v552_v58 = vld [vmem:[%s3906_s28 + $0x5d0] sm:$0xf]  ;;  %v554_v59 = vld [vmem:[%s3906_s28 + $0x5d8] sm:$0xf]  ;;  %551 = vst [vmem:[%s3913_s29 + $0x2e4] sm:$0xf] %v550_v57 }
  0x92   : > { %553 = vst [vmem:[%s3913_s29 + $0x2e8] sm:$0xf] %v552_v58  ;;  %555 = vst [vmem:[%s3913_s29 + $0x2ec] sm:$0xf] %v554_v59  ;;  %v556_v60 = vld [vmem:[%s3906_s28 + $0x5e0] sm:$0xf] }
  0x93   : > { %v558_v61 = vld [vmem:[%s3906_s28 + $0x5e8] sm:$0xf]  ;;  %v560_v62 = vld [vmem:[%s3906_s28 + $0x5f0] sm:$0xf]  ;;  %557 = vst [vmem:[%s3913_s29 + $0x2f0] sm:$0xf] %v556_v60 }
  0x94   : > { %559 = vst [vmem:[%s3913_s29 + $0x2f4] sm:$0xf] %v558_v61  ;;  %561 = vst [vmem:[%s3913_s29 + $0x2f8] sm:$0xf] %v560_v62  ;;  %v562_v63 = vld [vmem:[%s3906_s28 + $0x5f8] sm:$0xf] }
  0x95   : > { %v564_v0 = vld [vmem:[%s3906_s28 + $0x600] sm:$0xf]  ;;  %v566_v1 = vld [vmem:[%s3906_s28 + $0x608] sm:$0xf]  ;;  %563 = vst [vmem:[%s3913_s29 + $0x2fc] sm:$0xf] %v562_v63 }
  0x96   : > { %565 = vst [vmem:[%s3913_s29 + $0x300] sm:$0xf] %v564_v0  ;;  %567 = vst [vmem:[%s3913_s29 + $0x304] sm:$0xf] %v566_v1  ;;  %v568_v2 = vld [vmem:[%s3906_s28 + $0x610] sm:$0xf] }
  0x97   : > { %v570_v3 = vld [vmem:[%s3906_s28 + $0x618] sm:$0xf]  ;;  %v572_v4 = vld [vmem:[%s3906_s28 + $0x620] sm:$0xf]  ;;  %569 = vst [vmem:[%s3913_s29 + $0x308] sm:$0xf] %v568_v2 }
  0x98   : > { %571 = vst [vmem:[%s3913_s29 + $0x30c] sm:$0xf] %v570_v3  ;;  %573 = vst [vmem:[%s3913_s29 + $0x310] sm:$0xf] %v572_v4  ;;  %v574_v5 = vld [vmem:[%s3906_s28 + $0x628] sm:$0xf] }
  0x99   : > { %v576_v6 = vld [vmem:[%s3906_s28 + $0x630] sm:$0xf]  ;;  %v578_v7 = vld [vmem:[%s3906_s28 + $0x638] sm:$0xf]  ;;  %575 = vst [vmem:[%s3913_s29 + $0x314] sm:$0xf] %v574_v5 }
  0x9a   : > { %577 = vst [vmem:[%s3913_s29 + $0x318] sm:$0xf] %v576_v6  ;;  %579 = vst [vmem:[%s3913_s29 + $0x31c] sm:$0xf] %v578_v7  ;;  %v580_v8 = vld [vmem:[%s3906_s28 + $0x640] sm:$0xf] }
  0x9b   : > { %v582_v9 = vld [vmem:[%s3906_s28 + $0x648] sm:$0xf]  ;;  %v584_v10 = vld [vmem:[%s3906_s28 + $0x650] sm:$0xf]  ;;  %581 = vst [vmem:[%s3913_s29 + $0x320] sm:$0xf] %v580_v8 }
  0x9c   : > { %583 = vst [vmem:[%s3913_s29 + $0x324] sm:$0xf] %v582_v9  ;;  %585 = vst [vmem:[%s3913_s29 + $0x328] sm:$0xf] %v584_v10  ;;  %v586_v11 = vld [vmem:[%s3906_s28 + $0x658] sm:$0xf] }
  0x9d   : > { %v588_v12 = vld [vmem:[%s3906_s28 + $0x660] sm:$0xf]  ;;  %v590_v13 = vld [vmem:[%s3906_s28 + $0x668] sm:$0xf]  ;;  %587 = vst [vmem:[%s3913_s29 + $0x32c] sm:$0xf] %v586_v11 }
  0x9e   : > { %589 = vst [vmem:[%s3913_s29 + $0x330] sm:$0xf] %v588_v12  ;;  %591 = vst [vmem:[%s3913_s29 + $0x334] sm:$0xf] %v590_v13  ;;  %v592_v14 = vld [vmem:[%s3906_s28 + $0x670] sm:$0xf] }
  0x9f   : > { %v594_v15 = vld [vmem:[%s3906_s28 + $0x678] sm:$0xf]  ;;  %v596_v16 = vld [vmem:[%s3906_s28 + $0x680] sm:$0xf]  ;;  %593 = vst [vmem:[%s3913_s29 + $0x338] sm:$0xf] %v592_v14 }
  0xa0   : > { %595 = vst [vmem:[%s3913_s29 + $0x33c] sm:$0xf] %v594_v15  ;;  %597 = vst [vmem:[%s3913_s29 + $0x340] sm:$0xf] %v596_v16  ;;  %v598_v17 = vld [vmem:[%s3906_s28 + $0x688] sm:$0xf] }
  0xa1   : > { %v600_v18 = vld [vmem:[%s3906_s28 + $0x690] sm:$0xf]  ;;  %v602_v19 = vld [vmem:[%s3906_s28 + $0x698] sm:$0xf]  ;;  %599 = vst [vmem:[%s3913_s29 + $0x344] sm:$0xf] %v598_v17 }
  0xa2   : > { %601 = vst [vmem:[%s3913_s29 + $0x348] sm:$0xf] %v600_v18  ;;  %603 = vst [vmem:[%s3913_s29 + $0x34c] sm:$0xf] %v602_v19  ;;  %v604_v20 = vld [vmem:[%s3906_s28 + $0x6a0] sm:$0xf] }
  0xa3   : > { %v606_v21 = vld [vmem:[%s3906_s28 + $0x6a8] sm:$0xf]  ;;  %v608_v22 = vld [vmem:[%s3906_s28 + $0x6b0] sm:$0xf]  ;;  %605 = vst [vmem:[%s3913_s29 + $0x350] sm:$0xf] %v604_v20 }
  0xa4   : > { %607 = vst [vmem:[%s3913_s29 + $0x354] sm:$0xf] %v606_v21  ;;  %609 = vst [vmem:[%s3913_s29 + $0x358] sm:$0xf] %v608_v22  ;;  %v610_v23 = vld [vmem:[%s3906_s28 + $0x6b8] sm:$0xf] }
  0xa5   : > { %v612_v24 = vld [vmem:[%s3906_s28 + $0x6c0] sm:$0xf]  ;;  %v614_v25 = vld [vmem:[%s3906_s28 + $0x6c8] sm:$0xf]  ;;  %611 = vst [vmem:[%s3913_s29 + $0x35c] sm:$0xf] %v610_v23 }
  0xa6   : > { %613 = vst [vmem:[%s3913_s29 + $0x360] sm:$0xf] %v612_v24  ;;  %615 = vst [vmem:[%s3913_s29 + $0x364] sm:$0xf] %v614_v25  ;;  %v616_v26 = vld [vmem:[%s3906_s28 + $0x6d0] sm:$0xf] }
  0xa7   : > { %v618_v27 = vld [vmem:[%s3906_s28 + $0x6d8] sm:$0xf]  ;;  %v620_v28 = vld [vmem:[%s3906_s28 + $0x6e0] sm:$0xf]  ;;  %617 = vst [vmem:[%s3913_s29 + $0x368] sm:$0xf] %v616_v26 }
  0xa8   : > { %619 = vst [vmem:[%s3913_s29 + $0x36c] sm:$0xf] %v618_v27  ;;  %621 = vst [vmem:[%s3913_s29 + $0x370] sm:$0xf] %v620_v28  ;;  %v622_v29 = vld [vmem:[%s3906_s28 + $0x6e8] sm:$0xf] }
  0xa9   : > { %v624_v30 = vld [vmem:[%s3906_s28 + $0x6f0] sm:$0xf]  ;;  %v626_v31 = vld [vmem:[%s3906_s28 + $0x6f8] sm:$0xf]  ;;  %623 = vst [vmem:[%s3913_s29 + $0x374] sm:$0xf] %v622_v29 }
  0xaa   : > { %625 = vst [vmem:[%s3913_s29 + $0x378] sm:$0xf] %v624_v30  ;;  %627 = vst [vmem:[%s3913_s29 + $0x37c] sm:$0xf] %v626_v31  ;;  %v628_v32 = vld [vmem:[%s3906_s28 + $0x700] sm:$0xf] }
  0xab   : > { %v630_v33 = vld [vmem:[%s3906_s28 + $0x708] sm:$0xf]  ;;  %v632_v34 = vld [vmem:[%s3906_s28 + $0x710] sm:$0xf]  ;;  %629 = vst [vmem:[%s3913_s29 + $0x380] sm:$0xf] %v628_v32 }
  0xac   : > { %631 = vst [vmem:[%s3913_s29 + $0x384] sm:$0xf] %v630_v33  ;;  %633 = vst [vmem:[%s3913_s29 + $0x388] sm:$0xf] %v632_v34  ;;  %v634_v35 = vld [vmem:[%s3906_s28 + $0x718] sm:$0xf] }
  0xad   : > { %v636_v36 = vld [vmem:[%s3906_s28 + $0x720] sm:$0xf]  ;;  %v638_v37 = vld [vmem:[%s3906_s28 + $0x728] sm:$0xf]  ;;  %635 = vst [vmem:[%s3913_s29 + $0x38c] sm:$0xf] %v634_v35 }
  0xae   : > { %637 = vst [vmem:[%s3913_s29 + $0x390] sm:$0xf] %v636_v36  ;;  %639 = vst [vmem:[%s3913_s29 + $0x394] sm:$0xf] %v638_v37  ;;  %v640_v38 = vld [vmem:[%s3906_s28 + $0x730] sm:$0xf] }
  0xaf   : > { %v642_v39 = vld [vmem:[%s3906_s28 + $0x738] sm:$0xf]  ;;  %v644_v40 = vld [vmem:[%s3906_s28 + $0x740] sm:$0xf]  ;;  %641 = vst [vmem:[%s3913_s29 + $0x398] sm:$0xf] %v640_v38 }
  0xb0   : > { %643 = vst [vmem:[%s3913_s29 + $0x39c] sm:$0xf] %v642_v39  ;;  %645 = vst [vmem:[%s3913_s29 + $0x3a0] sm:$0xf] %v644_v40  ;;  %v646_v41 = vld [vmem:[%s3906_s28 + $0x748] sm:$0xf] }
  0xb1   : > { %v648_v42 = vld [vmem:[%s3906_s28 + $0x750] sm:$0xf]  ;;  %v650_v43 = vld [vmem:[%s3906_s28 + $0x758] sm:$0xf]  ;;  %647 = vst [vmem:[%s3913_s29 + $0x3a4] sm:$0xf] %v646_v41 }
  0xb2   : > { %649 = vst [vmem:[%s3913_s29 + $0x3a8] sm:$0xf] %v648_v42  ;;  %651 = vst [vmem:[%s3913_s29 + $0x3ac] sm:$0xf] %v650_v43  ;;  %v652_v44 = vld [vmem:[%s3906_s28 + $0x760] sm:$0xf] }
  0xb3   : > { %v654_v45 = vld [vmem:[%s3906_s28 + $0x768] sm:$0xf]  ;;  %v656_v46 = vld [vmem:[%s3906_s28 + $0x770] sm:$0xf]  ;;  %653 = vst [vmem:[%s3913_s29 + $0x3b0] sm:$0xf] %v652_v44 }
  0xb4   : > { %655 = vst [vmem:[%s3913_s29 + $0x3b4] sm:$0xf] %v654_v45  ;;  %657 = vst [vmem:[%s3913_s29 + $0x3b8] sm:$0xf] %v656_v46  ;;  %v658_v47 = vld [vmem:[%s3906_s28 + $0x778] sm:$0xf] }
  0xb5   : > { %v660_v48 = vld [vmem:[%s3906_s28 + $0x780] sm:$0xf]  ;;  %v662_v49 = vld [vmem:[%s3906_s28 + $0x788] sm:$0xf]  ;;  %659 = vst [vmem:[%s3913_s29 + $0x3bc] sm:$0xf] %v658_v47 }
  0xb6   : > { %661 = vst [vmem:[%s3913_s29 + $0x3c0] sm:$0xf] %v660_v48  ;;  %663 = vst [vmem:[%s3913_s29 + $0x3c4] sm:$0xf] %v662_v49  ;;  %v664_v50 = vld [vmem:[%s3906_s28 + $0x790] sm:$0xf] }
  0xb7   : > { %v666_v51 = vld [vmem:[%s3906_s28 + $0x798] sm:$0xf]  ;;  %v668_v52 = vld [vmem:[%s3906_s28 + $0x7a0] sm:$0xf]  ;;  %665 = vst [vmem:[%s3913_s29 + $0x3c8] sm:$0xf] %v664_v50 }
  0xb8   : > { %667 = vst [vmem:[%s3913_s29 + $0x3cc] sm:$0xf] %v666_v51  ;;  %669 = vst [vmem:[%s3913_s29 + $0x3d0] sm:$0xf] %v668_v52  ;;  %v670_v53 = vld [vmem:[%s3906_s28 + $0x7a8] sm:$0xf] }
  0xb9   : > { %v672_v54 = vld [vmem:[%s3906_s28 + $0x7b0] sm:$0xf]  ;;  %v674_v55 = vld [vmem:[%s3906_s28 + $0x7b8] sm:$0xf]  ;;  %671 = vst [vmem:[%s3913_s29 + $0x3d4] sm:$0xf] %v670_v53 }
  0xba   : > { %673 = vst [vmem:[%s3913_s29 + $0x3d8] sm:$0xf] %v672_v54  ;;  %675 = vst [vmem:[%s3913_s29 + $0x3dc] sm:$0xf] %v674_v55  ;;  %v676_v56 = vld [vmem:[%s3906_s28 + $0x7c0] sm:$0xf] }
  0xbb   : > { %v678_v57 = vld [vmem:[%s3906_s28 + $0x7c8] sm:$0xf]  ;;  %v680_v58 = vld [vmem:[%s3906_s28 + $0x7d0] sm:$0xf]  ;;  %677 = vst [vmem:[%s3913_s29 + $0x3e0] sm:$0xf] %v676_v56 }
  0xbc   : > { %679 = vst [vmem:[%s3913_s29 + $0x3e4] sm:$0xf] %v678_v57  ;;  %681 = vst [vmem:[%s3913_s29 + $0x3e8] sm:$0xf] %v680_v58  ;;  %v682_v59 = vld [vmem:[%s3906_s28 + $0x7d8] sm:$0xf] }
  0xbd   : > { %v684_v60 = vld [vmem:[%s3906_s28 + $0x7e0] sm:$0xf]  ;;  %v686_v61 = vld [vmem:[%s3906_s28 + $0x7e8] sm:$0xf]  ;;  %683 = vst [vmem:[%s3913_s29 + $0x3ec] sm:$0xf] %v682_v59 }
  0xbe   : > { %685 = vst [vmem:[%s3913_s29 + $0x3f0] sm:$0xf] %v684_v60  ;;  %687 = vst [vmem:[%s3913_s29 + $0x3f4] sm:$0xf] %v686_v61  ;;  %v688_v62 = vld [vmem:[%s3906_s28 + $0x7f0] sm:$0xf] }
  0xbf   : > { %v690_v63 = vld [vmem:[%s3906_s28 + $0x7f8] sm:$0xf]  ;;  %v692_v0 = vld [vmem:[%s3906_s28 + $0x800] sm:$0xf]  ;;  %689 = vst [vmem:[%s3913_s29 + $0x3f8] sm:$0xf] %v688_v62 }
  0xc0   : > { %691 = vst [vmem:[%s3913_s29 + $0x3fc] sm:$0xf] %v690_v63  ;;  %693 = vst [vmem:[%s3913_s29 + $0x400] sm:$0xf] %v692_v0  ;;  %v694_v1 = vld [vmem:[%s3906_s28 + $0x808] sm:$0xf] }
  0xc1   : > { %v696_v2 = vld [vmem:[%s3906_s28 + $0x810] sm:$0xf]  ;;  %v698_v3 = vld [vmem:[%s3906_s28 + $0x818] sm:$0xf]  ;;  %695 = vst [vmem:[%s3913_s29 + $0x404] sm:$0xf] %v694_v1 }
  0xc2   : > { %697 = vst [vmem:[%s3913_s29 + $0x408] sm:$0xf] %v696_v2  ;;  %699 = vst [vmem:[%s3913_s29 + $0x40c] sm:$0xf] %v698_v3  ;;  %v700_v4 = vld [vmem:[%s3906_s28 + $0x820] sm:$0xf] }
  0xc3   : > { %v702_v5 = vld [vmem:[%s3906_s28 + $0x828] sm:$0xf]  ;;  %v704_v6 = vld [vmem:[%s3906_s28 + $0x830] sm:$0xf]  ;;  %701 = vst [vmem:[%s3913_s29 + $0x410] sm:$0xf] %v700_v4 }
  0xc4   : > { %703 = vst [vmem:[%s3913_s29 + $0x414] sm:$0xf] %v702_v5  ;;  %705 = vst [vmem:[%s3913_s29 + $0x418] sm:$0xf] %v704_v6  ;;  %v706_v7 = vld [vmem:[%s3906_s28 + $0x838] sm:$0xf] }
  0xc5   : > { %v708_v8 = vld [vmem:[%s3906_s28 + $0x840] sm:$0xf]  ;;  %v710_v9 = vld [vmem:[%s3906_s28 + $0x848] sm:$0xf]  ;;  %707 = vst [vmem:[%s3913_s29 + $0x41c] sm:$0xf] %v706_v7 }
  0xc6   : > { %709 = vst [vmem:[%s3913_s29 + $0x420] sm:$0xf] %v708_v8  ;;  %711 = vst [vmem:[%s3913_s29 + $0x424] sm:$0xf] %v710_v9  ;;  %v712_v10 = vld [vmem:[%s3906_s28 + $0x850] sm:$0xf] }
  0xc7   : > { %v714_v11 = vld [vmem:[%s3906_s28 + $0x858] sm:$0xf]  ;;  %v716_v12 = vld [vmem:[%s3906_s28 + $0x860] sm:$0xf]  ;;  %713 = vst [vmem:[%s3913_s29 + $0x428] sm:$0xf] %v712_v10 }
  0xc8   : > { %715 = vst [vmem:[%s3913_s29 + $0x42c] sm:$0xf] %v714_v11  ;;  %717 = vst [vmem:[%s3913_s29 + $0x430] sm:$0xf] %v716_v12  ;;  %v718_v13 = vld [vmem:[%s3906_s28 + $0x868] sm:$0xf] }
  0xc9   : > { %v720_v14 = vld [vmem:[%s3906_s28 + $0x870] sm:$0xf]  ;;  %v722_v15 = vld [vmem:[%s3906_s28 + $0x878] sm:$0xf]  ;;  %719 = vst [vmem:[%s3913_s29 + $0x434] sm:$0xf] %v718_v13 }
  0xca   : > { %721 = vst [vmem:[%s3913_s29 + $0x438] sm:$0xf] %v720_v14  ;;  %723 = vst [vmem:[%s3913_s29 + $0x43c] sm:$0xf] %v722_v15  ;;  %v724_v16 = vld [vmem:[%s3906_s28 + $0x880] sm:$0xf] }
  0xcb   : > { %v726_v17 = vld [vmem:[%s3906_s28 + $0x888] sm:$0xf]  ;;  %v728_v18 = vld [vmem:[%s3906_s28 + $0x890] sm:$0xf]  ;;  %725 = vst [vmem:[%s3913_s29 + $0x440] sm:$0xf] %v724_v16 }
  0xcc   : > { %727 = vst [vmem:[%s3913_s29 + $0x444] sm:$0xf] %v726_v17  ;;  %729 = vst [vmem:[%s3913_s29 + $0x448] sm:$0xf] %v728_v18  ;;  %v730_v19 = vld [vmem:[%s3906_s28 + $0x898] sm:$0xf] }
  0xcd   : > { %v732_v20 = vld [vmem:[%s3906_s28 + $0x8a0] sm:$0xf]  ;;  %v734_v21 = vld [vmem:[%s3906_s28 + $0x8a8] sm:$0xf]  ;;  %731 = vst [vmem:[%s3913_s29 + $0x44c] sm:$0xf] %v730_v19 }
  0xce   : > { %733 = vst [vmem:[%s3913_s29 + $0x450] sm:$0xf] %v732_v20  ;;  %735 = vst [vmem:[%s3913_s29 + $0x454] sm:$0xf] %v734_v21  ;;  %v736_v22 = vld [vmem:[%s3906_s28 + $0x8b0] sm:$0xf] }
  0xcf   : > { %v738_v23 = vld [vmem:[%s3906_s28 + $0x8b8] sm:$0xf]  ;;  %v740_v24 = vld [vmem:[%s3906_s28 + $0x8c0] sm:$0xf]  ;;  %737 = vst [vmem:[%s3913_s29 + $0x458] sm:$0xf] %v736_v22 }
  0xd0   : > { %739 = vst [vmem:[%s3913_s29 + $0x45c] sm:$0xf] %v738_v23  ;;  %741 = vst [vmem:[%s3913_s29 + $0x460] sm:$0xf] %v740_v24  ;;  %v742_v25 = vld [vmem:[%s3906_s28 + $0x8c8] sm:$0xf] }
  0xd1   : > { %v744_v26 = vld [vmem:[%s3906_s28 + $0x8d0] sm:$0xf]  ;;  %v746_v27 = vld [vmem:[%s3906_s28 + $0x8d8] sm:$0xf]  ;;  %743 = vst [vmem:[%s3913_s29 + $0x464] sm:$0xf] %v742_v25 }
  0xd2   : > { %745 = vst [vmem:[%s3913_s29 + $0x468] sm:$0xf] %v744_v26  ;;  %747 = vst [vmem:[%s3913_s29 + $0x46c] sm:$0xf] %v746_v27  ;;  %v748_v28 = vld [vmem:[%s3906_s28 + $0x8e0] sm:$0xf] }
  0xd3   : > { %v750_v29 = vld [vmem:[%s3906_s28 + $0x8e8] sm:$0xf]  ;;  %v752_v30 = vld [vmem:[%s3906_s28 + $0x8f0] sm:$0xf]  ;;  %749 = vst [vmem:[%s3913_s29 + $0x470] sm:$0xf] %v748_v28 }
  0xd4   : > { %751 = vst [vmem:[%s3913_s29 + $0x474] sm:$0xf] %v750_v29  ;;  %753 = vst [vmem:[%s3913_s29 + $0x478] sm:$0xf] %v752_v30  ;;  %v754_v31 = vld [vmem:[%s3906_s28 + $0x8f8] sm:$0xf] }
  0xd5   : > { %755 = vst [vmem:[%s3913_s29 + $0x47c] sm:$0xf] %v754_v31 }
  0xd6 PF: > { %p3209_p8 = scmp.ge.s32.totalorder %s3836_s16, 1  ;;  %p1359_p9 = scmp.lt.s32.totalorder %s3836_s16, 3 }
  0xd8   : > { %p1360_p10 = pnand %p3209_p8, %p1359_p9 }
  0xd9   : > { %s1366_s30 = sand.u32 (!%p1360_p10), 1, %s3820_s12   ;;  %v3660_v32 = vld [vmem:[%s4719_s0 + $0x4] ss:$72 sps:$4 sm:$0xff] (!%p1360_p10)   ;;  %v3658_v63 = vld [vmem:[%s4719_s0] ss:$72 sps:$4 sm:$0xff] (!%p1360_p10)   ;;  %p1404_p11 = scmp.lt.s32.totalorder (!%p1360_p10), %s3828_s14, 1 }
  0xda   : > { %1363 = sbr.rel (%p1360_p10) target bundleno = 615 (0x267), region = 69  ;;  %v3665_v33 = vld [vmem:[%s4719_s0 + $0xc] ss:$72 sps:$4 sm:$0xff] (!%p1360_p10)   ;;  %2708 = vmatprep.mubr.bf16.mxu0 (!%p1360_p10), %v3660_v32  ;;  %v3663_v3 = vld [vmem:[%s4719_s0 + $0x8] ss:$72 sps:$4 sm:$0xff] (!%p1360_p10)  }
  0xdb   : > { %s3586_s4 = smul.u32 (!%p1360_p10), 1152, %s1366_s30  ;;  %2749 = vmatprep.mubr.bf16.mxu1 (!%p1360_p10), %v3665_v33  ;;  %v3698_v1 = vld [vmem:[%s4719_s0 + $0x14] ss:$72 sps:$4 sm:$0xff] (!%p1360_p10)  }
  0xdd   : > { %s4497_s9 = scalar_lea.vmem (!%p1360_p10), [#allocation2], %s3586_s4 }
  0xde   : > { %v3627_v34 = vld [vmem:[%s4497_s9 + $0x40] sm:$0xff] (!%p1360_p10)   ;;  %v3631_v38 = vld [vmem:[%s4497_s9 + $0x48] sm:$0xff] (!%p1360_p10)   ;;  %v3635_v42 = vld [vmem:[%s4497_s9 + $0x50] sm:$0xff] (!%p1360_p10)  }
  0xdf   : > { %v3628_v35 = vld [vmem:[%s4497_s9] sm:$0xff] (!%p1360_p10)   ;;  %3387 = vmatprep.subr.bf16.mxu0 (!%p1360_p10), %v3627_v34  ;;  %v3632_v39 = vld [vmem:[%s4497_s9 + $0x8] sm:$0xff] (!%p1360_p10)   ;;  %v3636_v43 = vld [vmem:[%s4497_s9 + $0x10] sm:$0xff] (!%p1360_p10)  }
  0xe0   : > { %v3629_v36 = vld [vmem:[%s4497_s9 + $0xc0] sm:$0xff] (!%p1360_p10)   ;;  %3388 = vmatpush3.bf16.msra.mxu0 (!%p1360_p10), %v3628_v35  ;;  %v3633_v40 = vld [vmem:[%s4497_s9 + $0xc8] sm:$0xff] (!%p1360_p10)   ;;  %v3637_v44 = vld [vmem:[%s4497_s9 + $0xd0] sm:$0xff] (!%p1360_p10)  }
  0xe1   : > { %v3630_v37 = vld [vmem:[%s4497_s9 + $0x80] sm:$0xff]   ;;  %3409 = vmatprep.subr.bf16.mxu1 %v3629_v36  ;;  %3389 = vmatprep.subr.bf16.mxu0 %v3631_v38  ;;  %v3634_v41 = vld [vmem:[%s4497_s9 + $0x88] sm:$0xff]   ;;  %v3638_v45 = vld [vmem:[%s4497_s9 + $0x90] sm:$0xff]   ;;  %s1405_s7 = scalar_select %p1404_p11, %s3828_s14, 1 }
  0xe2   : > { %3410 = vmatpush3.bf16.msra.mxu1 %v3630_v37  ;;  %v3639_v46 = vld [vmem:[%s4497_s9 + $0x58] sm:$0xff]   ;;  %v3643_v50 = vld [vmem:[%s4497_s9 + $0x60] sm:$0xff]   ;;  %v3647_v54 = vld [vmem:[%s4497_s9 + $0x68] sm:$0xff]   ;;  %s3377_s19 = sshll.u32 (%p3893_p6), %s3828_s14, 2 }
  0xe3   : > { %3411 = vmatprep.subr.bf16.mxu1 %v3633_v40  ;;  %v3640_v47 = vld [vmem:[%s4497_s9 + $0x18] sm:$0xff]   ;;  %v3644_v51 = vld [vmem:[%s4497_s9 + $0x20] sm:$0xff]   ;;  %v3648_v55 = vld [vmem:[%s4497_s9 + $0x28] sm:$0xff]   ;;  %s1406_s11 = scalar_lea.vmem %s4721_s2, %s1405_s7  ;;  %s3068_s24 = scalar_lea.vmem (%p3893_p6), %s4722_s3, %s3377_s19 }
  0xe4   : > { %3390 = vmatpush3.bf16.msra.mxu0 %v3632_v39  ;;  %v3641_v48 = vld [vmem:[%s4497_s9 + $0xd8] sm:$0xff]   ;;  %v3645_v52 = vld [vmem:[%s4497_s9 + $0xe0] sm:$0xff]   ;;  %v3649_v56 = vld [vmem:[%s4497_s9 + $0xe8] sm:$0xff]  }
  0xe5   : > { %3391 = vmatprep.subr.bf16.mxu0 %v3635_v42  ;;  %v3642_v49 = vld [vmem:[%s4497_s9 + $0x98] sm:$0xff]   ;;  %v3646_v53 = vld [vmem:[%s4497_s9 + $0xa0] sm:$0xff]   ;;  %v3650_v57 = vld [vmem:[%s4497_s9 + $0xa8] sm:$0xff]  }
  0xe6   : > { %3412 = vmatpush3.bf16.msra.mxu1 %v3634_v41  ;;  %v3651_v58 = vld [vmem:[%s4497_s9 + $0x70] sm:$0xff]   ;;  %v3655_v62 = vld [vmem:[%s4497_s9 + $0x78] sm:$0xff]   ;;  %v3662_v5 = vld [vmem:[%s4497_s9 + $0x140] sm:$0xff]  }
  0xe7   : > { %3413 = vmatprep.subr.bf16.mxu1 %v3637_v44  ;;  %v3652_v59 = vld [vmem:[%s4497_s9 + $0x30] sm:$0xff]   ;;  %v3656_v0 = vld [vmem:[%s4497_s9 + $0x38] sm:$0xff]   ;;  %v3666_v6 = vld [vmem:[%s4497_s9 + $0x100] sm:$0xff]  }
  0xe8   : > { %3392 = vmatpush3.bf16.msra.mxu0 %v3636_v43  ;;  %v3653_v60 = vld [vmem:[%s4497_s9 + $0xf0] sm:$0xff]   ;;  %v3657_v2 = vld [vmem:[%s4497_s9 + $0xf8] sm:$0xff]   ;;  %v3667_v7 = vld [vmem:[%s4497_s9 + $0x1c0] sm:$0xff]  }
  0xe9   : > { %3393 = vmatprep.subr.bf16.mxu0 %v3639_v46  ;;  %v3654_v61 = vld [vmem:[%s4497_s9 + $0xb0] sm:$0xff]   ;;  %v3661_v4 = vld [vmem:[%s4497_s9 + $0xb8] sm:$0xff]   ;;  %v3668_v8 = vld [vmem:[%s4497_s9 + $0x180] sm:$0xff]  }
  0xea   : > { %3414 = vmatpush3.bf16.msra.mxu1 %v3638_v45  ;;  %v3669_v9 = vld [vmem:[%s4497_s9 + $0x148] sm:$0xff]   ;;  %v3673_v13 = vld [vmem:[%s4497_s9 + $0x150] sm:$0xff]   ;;  %v3677_v17 = vld [vmem:[%s4497_s9 + $0x158] sm:$0xff]  }
  0xeb   : > { %3415 = vmatprep.subr.bf16.mxu1 %v3641_v48  ;;  %v3670_v10 = vld [vmem:[%s4497_s9 + $0x108] sm:$0xff]   ;;  %v3674_v14 = vld [vmem:[%s4497_s9 + $0x110] sm:$0xff]   ;;  %v3678_v18 = vld [vmem:[%s4497_s9 + $0x118] sm:$0xff]  }
  0xec   : > { %3394 = vmatpush3.bf16.msra.mxu0 %v3640_v47  ;;  %v3671_v11 = vld [vmem:[%s4497_s9 + $0x1c8] sm:$0xff]   ;;  %v3675_v15 = vld [vmem:[%s4497_s9 + $0x1d0] sm:$0xff]   ;;  %v3679_v19 = vld [vmem:[%s4497_s9 + $0x1d8] sm:$0xff]  }
  0xed   : > { %3395 = vmatprep.subr.bf16.mxu0 %v3643_v50  ;;  %v3672_v12 = vld [vmem:[%s4497_s9 + $0x188] sm:$0xff]   ;;  %v3676_v16 = vld [vmem:[%s4497_s9 + $0x190] sm:$0xff]   ;;  %v3680_v20 = vld [vmem:[%s4497_s9 + $0x198] sm:$0xff]  }
  0xee   : > { %3416 = vmatpush3.bf16.msra.mxu1 %v3642_v49  ;;  %v3681_v21 = vld [vmem:[%s4497_s9 + $0x160] sm:$0xff]   ;;  %v3685_v25 = vld [vmem:[%s4497_s9 + $0x168] sm:$0xff]   ;;  %v3689_v29 = vld [vmem:[%s4497_s9 + $0x170] sm:$0xff]  }
  0xef   : > { %3417 = vmatprep.subr.bf16.mxu1 %v3645_v52  ;;  %v3682_v22 = vld [vmem:[%s4497_s9 + $0x120] sm:$0xff]   ;;  %v3686_v26 = vld [vmem:[%s4497_s9 + $0x128] sm:$0xff]   ;;  %v3690_v30 = vld [vmem:[%s4497_s9 + $0x130] sm:$0xff]  }
  0xf0   : > { %3396 = vmatpush3.bf16.msra.mxu0 %v3644_v51  ;;  %v3683_v23 = vld [vmem:[%s4497_s9 + $0x1e0] sm:$0xff]   ;;  %v3687_v27 = vld [vmem:[%s4497_s9 + $0x1e8] sm:$0xff]   ;;  %v3691_v31 = vld [vmem:[%s4497_s9 + $0x1f0] sm:$0xff]  }
  0xf1   : > { %3397 = vmatprep.subr.bf16.mxu0 %v3647_v54  ;;  %v3684_v24 = vld [vmem:[%s4497_s9 + $0x1a0] sm:$0xff]   ;;  %v3688_v28 = vld [vmem:[%s4497_s9 + $0x1a8] sm:$0xff]   ;;  %v3692_v32 = vld [vmem:[%s4497_s9 + $0x1b0] sm:$0xff]  }
  0xf2   : > { %3418 = vmatpush3.bf16.msra.mxu1 %v3646_v53  ;;  %v3693_v33 = vld [vmem:[%s4497_s9 + $0x178] sm:$0xff]   ;;  %v3700_v38 = vld [vmem:[%s4497_s9 + $0x240] sm:$0xff]   ;;  %v3707_v44 = vld [vmem:[%s4497_s9 + $0x248] sm:$0xff]  }
  0xf3   : > { %3419 = vmatprep.subr.bf16.mxu1 %v3649_v56  ;;  %v3696_v34 = vld [vmem:[%s4719_s0 + $0x10] ss:$72 sps:$4 sm:$0xff]   ;;  %v3703_v40 = vld [vmem:[%s4719_s0 + $0x1c] ss:$72 sps:$4 sm:$0xff]   ;;  %v3708_v45 = vld [vmem:[%s4497_s9 + $0x208] sm:$0xff]  }
  0xf4   : > { %3398 = vmatpush3.bf16.msra.mxu0 %v3648_v55  ;;  %v3694_v35 = vld [vmem:[%s4497_s9 + $0x138] sm:$0xff]   ;;  %v3704_v41 = vld [vmem:[%s4497_s9 + $0x200] sm:$0xff]   ;;  %v3709_v46 = vld [vmem:[%s4497_s9 + $0x2c8] sm:$0xff]  }
  0xf5   : > { %3399 = vmatprep.subr.bf16.mxu0 %v3651_v58  ;;  %v3695_v36 = vld [vmem:[%s4497_s9 + $0x1f8] sm:$0xff]   ;;  %v3705_v42 = vld [vmem:[%s4497_s9 + $0x2c0] sm:$0xff]   ;;  %v3710_v47 = vld [vmem:[%s4497_s9 + $0x288] sm:$0xff]  }
  0xf6   : > { %3420 = vmatpush3.bf16.msra.mxu1 %v3650_v57  ;;  %v3699_v37 = vld [vmem:[%s4497_s9 + $0x1b8] sm:$0xff]   ;;  %v3706_v43 = vld [vmem:[%s4497_s9 + $0x280] sm:$0xff]   ;;  %v3711_v48 = vld [vmem:[%s4497_s9 + $0x250] sm:$0xff]  }
  0xf7   : > { %3421 = vmatprep.subr.bf16.mxu1 %v3653_v60  ;;  %v3701_v39 = vld [vmem:[%s4719_s0 + $0x18] ss:$72 sps:$4 sm:$0xff]   ;;  %v3712_v49 = vld [vmem:[%s4497_s9 + $0x210] sm:$0xff]   ;;  %v3723_v60 = vld [vmem:[%s4497_s9 + $0x268] sm:$0xff]  }
  0xf8   : > { %3400 = vmatpush3.bf16.msra.mxu0 %v3652_v59  ;;  %v3713_v50 = vld [vmem:[%s4497_s9 + $0x2d0] sm:$0xff]   ;;  %v3715_v52 = vld [vmem:[%s4497_s9 + $0x258] sm:$0xff]   ;;  %v3719_v56 = vld [vmem:[%s4497_s9 + $0x260] sm:$0xff]  }
  0xf9   : > { %3401 = vmatprep.subr.bf16.mxu0 %v3655_v62  ;;  %v3714_v51 = vld [vmem:[%s4497_s9 + $0x290] sm:$0xff]   ;;  %v3716_v53 = vld [vmem:[%s4497_s9 + $0x218] sm:$0xff]   ;;  %v3720_v57 = vld [vmem:[%s4497_s9 + $0x220] sm:$0xff]  }
  0xfa   : > { %3422 = vmatpush3.bf16.msra.mxu1 %v3654_v61  ;;  %v3717_v54 = vld [vmem:[%s4497_s9 + $0x2d8] sm:$0xff]   ;;  %v3721_v58 = vld [vmem:[%s4497_s9 + $0x2e0] sm:$0xff]   ;;  %v3724_v61 = vld [vmem:[%s4497_s9 + $0x228] sm:$0xff]  }
  0xfb   : > { %3423 = vmatprep.subr.bf16.mxu1 %v3657_v2  ;;  %v3718_v55 = vld [vmem:[%s4497_s9 + $0x298] sm:$0xff]   ;;  %v3722_v59 = vld [vmem:[%s4497_s9 + $0x2a0] sm:$0xff]   ;;  %v3725_v62 = vld [vmem:[%s4497_s9 + $0x2e8] sm:$0xff]  }
  0xfc   : > { %3402 = vmatpush3.bf16.msra.mxu0 %v3656_v0  ;;  %v3727_v0 = vld [vmem:[%s4497_s9 + $0x270] sm:$0xff]  }
  0xfd   : > { %3431 = vmatprep.subr.bf16.mxu0 %v3662_v5  ;;  %v3729_v2 = vld [vmem:[%s4497_s9 + $0x2f0] sm:$0xff]   ;;  %v3732_v5 = vld [vmem:[%s4497_s9 + $0x238] sm:$0xff]  }
  0xfe   : > { %3424 = vmatpush3.bf16.msra.mxu1 %v3661_v4  ;;  %v3731_v4 = vld [vmem:[%s4497_s9 + $0x278] sm:$0xff]  }
  0xff   : > { %2709 = vmatmul.mubr.bf16.vlgmr.msra.gmra.mrb[0].mxu0 %v3658_v63  ;;  %3453 = vmatprep.subr.bf16.mxu1 %v3667_v7  ;;  %v3726_v63 = vld [vmem:[%s4497_s9 + $0x2a8] sm:$0xff]  }
 0x100   : > { %3432 = vmatpush3.bf16.msra.mxu0 %v3666_v6  ;;  %2790 = vmatprep.mubr.bf16.mxu0 %v3698_v1  ;;  %v3728_v1 = vld [vmem:[%s4497_s9 + $0x230] sm:$0xff]   ;;  %v3733_v6 = vld [vmem:[%s4497_s9 + $0x2f8] sm:$0xff]   ;;  %v3734_v7 = vld [vmem:[%s4719_s0 + $0x20] ss:$72 sps:$4 sm:$0xff]  }
 0x101   : > { %2750 = vmatmul.mubr.bf16.vlgmr.msra.gmra.mrb[0].mxu1 %v3663_v3  ;;  %3433 = vmatprep.subr.bf16.mxu0 %v3669_v9  ;;  %v3730_v3 = vld [vmem:[%s4497_s9 + $0x2b0] sm:$0xff]   ;;  %v3737_v9 = vld [vmem:[%s4497_s9 + $0x2b8] sm:$0xff]  }
 0x102   : > { %3454 = vmatpush3.bf16.msra.mxu1 %v3668_v8  ;;  %2831 = vmatprep.mubr.bf16.mxu1 %v3703_v40  ;;  %v3736_v8 = vld [vmem:[%s4719_s0 + $0x24] ss:$72 sps:$4 sm:$0xff]   ;;  %v3769_v40 = vld [vmem:[%s4497_s9 + $0x378] sm:$0xff]  }
 0x103   : > { %3455 = vmatprep.subr.bf16.mxu1 %v3671_v11  ;;  %v3739_v11 = vld [vmem:[%s4719_s0 + $0x28] ss:$72 sps:$4 sm:$0xff]  }
 0x104   : > { %3434 = vmatpush3.bf16.msra.mxu0 %v3670_v10  ;;  %v3738_v10 = vld [vmem:[%s4497_s9 + $0x340] sm:$0xff]  }
 0x105   : > { %3435 = vmatprep.subr.bf16.mxu0 %v3673_v13  ;;  %v3742_v13 = vld [vmem:[%s4497_s9 + $0x300] sm:$0xff]  }
 0x106   : > { %3456 = vmatpush3.bf16.msra.mxu1 %v3672_v12  ;;  %v3741_v12 = vld [vmem:[%s4719_s0 + $0x2c] ss:$72 sps:$4 sm:$0xff]  }
 0x107   : > { %3457 = vmatprep.subr.bf16.mxu1 %v3675_v15  ;;  %v3744_v15 = vld [vmem:[%s4497_s9 + $0x380] sm:$0xff]  }
 0x108   : > { %3436 = vmatpush3.bf16.msra.mxu0 %v3674_v14  ;;  %v3743_v14 = vld [vmem:[%s4497_s9 + $0x3c0] sm:$0xff]  }
 0x109   : > { %3437 = vmatprep.subr.bf16.mxu0 %v3677_v17  ;;  %v3746_v17 = vld [vmem:[%s4497_s9 + $0x308] sm:$0xff]  }
 0x10a   : > { %3458 = vmatpush3.bf16.msra.mxu1 %v3676_v16  ;;  %v3745_v16 = vld [vmem:[%s4497_s9 + $0x348] sm:$0xff]  }
 0x10b   : > { %3459 = vmatprep.subr.bf16.mxu1 %v3679_v19  ;;  %v3748_v19 = vld [vmem:[%s4497_s9 + $0x388] sm:$0xff]  }
 0x10c   : > { %3438 = vmatpush3.bf16.msra.mxu0 %v3678_v18  ;;  %v3747_v18 = vld [vmem:[%s4497_s9 + $0x3c8] sm:$0xff]  }
 0x10d   : > { %3439 = vmatprep.subr.bf16.mxu0 %v3681_v21  ;;  %v3750_v21 = vld [vmem:[%s4497_s9 + $0x310] sm:$0xff]  }
 0x10e   : > { %3460 = vmatpush3.bf16.msra.mxu1 %v3680_v20  ;;  %v3749_v20 = vld [vmem:[%s4497_s9 + $0x350] sm:$0xff]  }
 0x10f   : > { %3461 = vmatprep.subr.bf16.mxu1 %v3683_v23  ;;  %v3752_v23 = vld [vmem:[%s4497_s9 + $0x390] sm:$0xff]  }
 0x110   : > { %3440 = vmatpush3.bf16.msra.mxu0 %v3682_v22  ;;  %v3751_v22 = vld [vmem:[%s4497_s9 + $0x3d0] sm:$0xff]  }
 0x111   : > { %3441 = vmatprep.subr.bf16.mxu0 %v3685_v25  ;;  %v3754_v25 = vld [vmem:[%s4497_s9 + $0x318] sm:$0xff]  }
 0x112   : > { %3462 = vmatpush3.bf16.msra.mxu1 %v3684_v24  ;;  %v3753_v24 = vld [vmem:[%s4497_s9 + $0x358] sm:$0xff]  }
 0x113   : > { %3463 = vmatprep.subr.bf16.mxu1 %v3687_v27  ;;  %v3756_v27 = vld [vmem:[%s4497_s9 + $0x398] sm:$0xff]  }
 0x114   : > { %3442 = vmatpush3.bf16.msra.mxu0 %v3686_v26  ;;  %v3755_v26 = vld [vmem:[%s4497_s9 + $0x3d8] sm:$0xff]  }
 0x115   : > { %3443 = vmatprep.subr.bf16.mxu0 %v3689_v29  ;;  %v3758_v29 = vld [vmem:[%s4497_s9 + $0x320] sm:$0xff]  }
 0x116   : > { %3464 = vmatpush3.bf16.msra.mxu1 %v3688_v28  ;;  %v3757_v28 = vld [vmem:[%s4497_s9 + $0x360] sm:$0xff]  }
 0x117   : > { %3465 = vmatprep.subr.bf16.mxu1 %v3691_v31  ;;  %v3760_v31 = vld [vmem:[%s4497_s9 + $0x3a0] sm:$0xff]  }
 0x118   : > { %3444 = vmatpush3.bf16.msra.mxu0 %v3690_v30  ;;  %v3759_v30 = vld [vmem:[%s4497_s9 + $0x3e0] sm:$0xff]  }
 0x119   : > { %3445 = vmatprep.subr.bf16.mxu0 %v3693_v33  ;;  %v3762_v33 = vld [vmem:[%s4497_s9 + $0x328] sm:$0xff]  }
 0x11a   : > { %3466 = vmatpush3.bf16.msra.mxu1 %v3692_v32  ;;  %v3761_v32 = vld [vmem:[%s4497_s9 + $0x368] sm:$0xff]  }
 0x11b   : > { %3467 = vmatprep.subr.bf16.mxu1 %v3695_v36  ;;  %v3765_v36 = vld [vmem:[%s4497_s9 + $0x370] sm:$0xff]  }
 0x11c   : > { %3446 = vmatpush3.bf16.msra.mxu0 %v3694_v35  ;;  %v3764_v35 = vld [vmem:[%s4497_s9 + $0x3a8] sm:$0xff]  }
 0x11d   : > { %3475 = vmatprep.subr.bf16.mxu0 %v3700_v38  ;;  %v3767_v38 = vld [vmem:[%s4497_s9 + $0x3f0] sm:$0xff]  }
 0x11e   : > { %3468 = vmatpush3.bf16.msra.mxu1 %v3699_v37  ;;  %v3766_v37 = vld [vmem:[%s4497_s9 + $0x330] sm:$0xff]  }
 0x11f   : > { %2791 = vmatmul.mubr.bf16.vlgmr.msra.gmra.mrb[4].mxu0 %v3696_v34  ;;  %3497 = vmatprep.subr.bf16.mxu1 %v3705_v42  ;;  %v3763_v34 = vld [vmem:[%s4497_s9 + $0x3e8] sm:$0xff]   ;;  %v3771_v42 = vld [vmem:[%s4497_s9 + $0x3f8] sm:$0xff]  }
 0x120   : > { %3476 = vmatpush3.bf16.msra.mxu0 %v3704_v41  ;;  %2872 = vmatprep.mubr.bf16.mxu0 %v3736_v8  ;;  %v3770_v41 = vld [vmem:[%s4497_s9 + $0x338] sm:$0xff]  }
 0x121   : > { %2832 = vmatmul.mubr.bf16.vlgmr.msra.gmra.mrb[4].mxu1 %v3701_v39  ;;  %3477 = vmatprep.subr.bf16.mxu0 %v3707_v44  ;;  %v3768_v39 = vld [vmem:[%s4497_s9 + $0x3b0] sm:$0xff]  }
 0x122   : > { %3498 = vmatpush3.bf16.msra.mxu1 %v3706_v43  ;;  %2913 = vmatprep.mubr.bf16.mxu1 %v3741_v12  ;;  %v3772_v43 = vld [vmem:[%s4719_s0 + $0x30] ss:$72 sps:$4 sm:$0xff]   ;;  %v3774_v44 = vld [vmem:[%s4719_s0 + $0x34] ss:$72 sps:$4 sm:$0xff]  }
 0x123   : > { %3499 = vmatprep.subr.bf16.mxu1 %v3709_v46  ;;  %v3776_v46 = vld [vmem:[%s4497_s9 + $0x440] sm:$0xff]  }
 0x124   : > { %3478 = vmatpush3.bf16.msra.mxu0 %v3708_v45  ;;  %v3775_v45 = vld [vmem:[%s4497_s9 + $0x3b8] sm:$0xff]  }
 0x125   : > { %3479 = vmatprep.subr.bf16.mxu0 %v3711_v48  ;;  %v3779_v48 = vld [vmem:[%s4719_s0 + $0x3c] ss:$72 sps:$4 sm:$0xff]  }
 0x126   : > { %3500 = vmatpush3.bf16.msra.mxu1 %v3710_v47  ;;  %v3777_v47 = vld [vmem:[%s4719_s0 + $0x38] ss:$72 sps:$4 sm:$0xff]  }
 0x127   : > { %3501 = vmatprep.subr.bf16.mxu1 %v3713_v50  ;;  %v3781_v50 = vld [vmem:[%s4497_s9 + $0x448] sm:$0xff]  }
 0x128   : > { %3480 = vmatpush3.bf16.msra.mxu0 %v3712_v49  ;;  %v3780_v49 = vld [vmem:[%s4497_s9 + $0x400] sm:$0xff]  }
 0x129   : > { %3481 = vmatprep.subr.bf16.mxu0 %v3715_v52  ;;  %v3783_v52 = vld [vmem:[%s4497_s9 + $0x450] sm:$0xff]  }
 0x12a   : > { %3502 = vmatpush3.bf16.msra.mxu1 %v3714_v51  ;;  %v3782_v51 = vld [vmem:[%s4497_s9 + $0x408] sm:$0xff]  }
 0x12b   : > { %3503 = vmatprep.subr.bf16.mxu1 %v3717_v54  ;;  %v3785_v54 = vld [vmem:[%s4497_s9 + $0x458] sm:$0xff]  }
 0x12c   : > { %3482 = vmatpush3.bf16.msra.mxu0 %v3716_v53  ;;  %v3784_v53 = vld [vmem:[%s4497_s9 + $0x410] sm:$0xff]  }
 0x12d   : > { %3483 = vmatprep.subr.bf16.mxu0 %v3719_v56  ;;  %v3787_v56 = vld [vmem:[%s4497_s9 + $0x460] sm:$0xff]  }
 0x12e   : > { %3504 = vmatpush3.bf16.msra.mxu1 %v3718_v55  ;;  %v3786_v55 = vld [vmem:[%s4497_s9 + $0x418] sm:$0xff]  }
 0x12f   : > { %3505 = vmatprep.subr.bf16.mxu1 %v3721_v58  ;;  %v3789_v58 = vld [vmem:[%s4497_s9 + $0x468] sm:$0xff]  }
 0x130   : > { %3484 = vmatpush3.bf16.msra.mxu0 %v3720_v57  ;;  %v3788_v57 = vld [vmem:[%s4497_s9 + $0x420] sm:$0xff]  }
 0x131   : > { %3485 = vmatprep.subr.bf16.mxu0 %v3723_v60  ;;  %v3790_v60 = vld [vmem:[%s4497_s9 + $0x428] sm:$0xff]  }
 0x132   : > { %3506 = vmatpush3.bf16.msra.mxu1 %v3722_v59  ;;  %v3797_v59 = vld [vmem:[%s4719_s0 + $0x44] ss:$72 sps:$4 sm:$0xff]  }
 0x133   : > { %3507 = vmatprep.subr.bf16.mxu1 %v3725_v62  ;;  %v3792_v62 = vld [vmem:[%s4497_s9 + $0x430] sm:$0xff]  }
 0x134   : > { %3486 = vmatpush3.bf16.msra.mxu0 %v3724_v61  ;;  %v3791_v61 = vld [vmem:[%s4497_s9 + $0x470] sm:$0xff]  }
 0x135   : > { %3487 = vmatprep.subr.bf16.mxu0 %v3727_v0  ;;  %v3794_v0 = vld [vmem:[%s4497_s9 + $0x438] sm:$0xff]  }
 0x136   : > { %3508 = vmatpush3.bf16.msra.mxu1 %v3726_v63  ;;  %v3793_v63 = vld [vmem:[%s4497_s9 + $0x478] sm:$0xff]   ;;  %s3210_s9 = sshll.u32 %s1366_s30, 3 }
 0x137   : > { %3509 = vmatprep.subr.bf16.mxu1 %v3729_v2  ;;  %s1396_s18 = scalar_lea.vmem [#allocation3], %s3210_s9 }
 0x138   : > { %3488 = vmatpush3.bf16.msra.mxu0 %v3728_v1  ;;  %v3795_v1 = vld [vmem:[%s4719_s0 + $0x40] ss:$72 sps:$4 sm:$0xff]  }
 0x139   : > { %3489 = vmatprep.subr.bf16.mxu0 %v3731_v4 }
 0x13a   : > { %3510 = vmatpush3.bf16.msra.mxu1 %v3730_v3  ;;  %v3211_v3 = vld [vmem:[%s1406_s11] ss:$0 sm:$0xff] }
 0x13b   : > { %3511 = vmatprep.subr.bf16.mxu1 %v3733_v6 }
 0x13c   : > { %3490 = vmatpush3.bf16.msra.mxu0 %v3732_v5 }
 0x13d   : > { %3519 = vmatprep.subr.bf16.mxu0 %v3738_v10 }
 0x13e   : > { %3512 = vmatpush3.bf16.msra.mxu1 %v3737_v9 }
 0x13f   : > { %2873 = vmatmul.mubr.bf16.vlgmr.msra.gmra.mrb[8].mxu0 %v3734_v7  ;;  %3541 = vmatprep.subr.bf16.mxu1 %v3743_v14 }
 0x140   : > { %3520 = vmatpush3.bf16.msra.mxu0 %v3742_v13  ;;  %2954 = vmatprep.mubr.bf16.mxu0 %v3774_v44 }
 0x141   : > { %2914 = vmatmul.mubr.bf16.vlgmr.msra.gmra.mrb[8].mxu1 %v3739_v11  ;;  %3521 = vmatprep.subr.bf16.mxu0 %v3745_v16 }
 0x142   : > { %3542 = vmatpush3.bf16.msra.mxu1 %v3744_v15  ;;  %2995 = vmatprep.mubr.bf16.mxu1 %v3779_v48 }
 0x143   : > { %3543 = vmatprep.subr.bf16.mxu1 %v3747_v18 }
 0x144   : > { %3522 = vmatpush3.bf16.msra.mxu0 %v3746_v17 }
 0x145   : > { %3523 = vmatprep.subr.bf16.mxu0 %v3749_v20 }
 0x146   : > { %3544 = vmatpush3.bf16.msra.mxu1 %v3748_v19 }
 0x147   : > { %3545 = vmatprep.subr.bf16.mxu1 %v3751_v22 }
 0x148   : > { %3524 = vmatpush3.bf16.msra.mxu0 %v3750_v21 }
 0x149   : > { %3525 = vmatprep.subr.bf16.mxu0 %v3753_v24 }
 0x14a   : > { %3546 = vmatpush3.bf16.msra.mxu1 %v3752_v23 }
 0x14b   : > { %3547 = vmatprep.subr.bf16.mxu1 %v3755_v26 }
 0x14c   : > { %3526 = vmatpush3.bf16.msra.mxu0 %v3754_v25 }
 0x14d   : > { %3527 = vmatprep.subr.bf16.mxu0 %v3757_v28 }
 0x14e   : > { %3548 = vmatpush3.bf16.msra.mxu1 %v3756_v27 }
 0x14f   : > { %3549 = vmatprep.subr.bf16.mxu1 %v3759_v30 }
 0x150   : > { %3528 = vmatpush3.bf16.msra.mxu0 %v3758_v29 }
 0x151   : > { %3529 = vmatprep.subr.bf16.mxu0 %v3761_v32 }
 0x152   : > { %3550 = vmatpush3.bf16.msra.mxu1 %v3760_v31 }
 0x153   : > { %3551 = vmatprep.subr.bf16.mxu1 %v3763_v34 }
 0x154   : > { %3530 = vmatpush3.bf16.msra.mxu0 %v3762_v33 }
 0x155   : > { %3531 = vmatprep.subr.bf16.mxu0 %v3765_v36 }
 0x156   : > { %3552 = vmatpush3.bf16.msra.mxu1 %v3764_v35 }
 0x157   : > { %3553 = vmatprep.subr.bf16.mxu1 %v3767_v38 }
 0x158   : > { %3532 = vmatpush3.bf16.msra.mxu0 %v3766_v37 }
 0x159   : > { %3533 = vmatprep.subr.bf16.mxu0 %v3769_v40 }
 0x15a   : > { %3554 = vmatpush3.bf16.msra.mxu1 %v3768_v39 }
 0x15b   : > { %3555 = vmatprep.subr.bf16.mxu1 %v3771_v42 }
 0x15c   : > { %3534 = vmatpush3.bf16.msra.mxu0 %v3770_v41 }
 0x15d   : > { %3563 = vmatprep.subr.bf16.mxu0 %v3776_v46 }
 0x15e   : > { %3556 = vmatpush3.bf16.msra.mxu1 %v3775_v45 }
 0x15f   : > { %2955 = vmatmul.mubr.bf16.vlgmr.msra.gmra.mrb[12].mxu0 %v3772_v43 }
 0x160   : > { %3564 = vmatpush3.bf16.msra.mxu0 %v3780_v49  ;;  %3036 = vmatprep.mubr.bf16.mxu0 %v3797_v59 }
 0x161   : > { %2996 = vmatmul.mubr.bf16.vlgmr.msra.gmra.mrb[12].mxu1 %v3777_v47  ;;  %3565 = vmatprep.subr.bf16.mxu0 %v3781_v50 }
 0x164   : > { %3566 = vmatpush3.bf16.msra.mxu0 %v3782_v51 }
 0x165   : > { %3567 = vmatprep.subr.bf16.mxu0 %v3783_v52 }
 0x168   : > { %3568 = vmatpush3.bf16.msra.mxu0 %v3784_v53 }
 0x169   : > { %3569 = vmatprep.subr.bf16.mxu0 %v3785_v54 }
 0x16c   : > { %3570 = vmatpush3.bf16.msra.mxu0 %v3786_v55 }
 0x16d   : > { %3571 = vmatprep.subr.bf16.mxu0 %v3787_v56 }
 0x170   : > { %3572 = vmatpush3.bf16.msra.mxu0 %v3788_v57 }
 0x171   : > { %3573 = vmatprep.subr.bf16.mxu0 %v3789_v58 }
 0x174   : > { %3574 = vmatpush3.bf16.msra.mxu0 %v3790_v60 }
 0x175   : > { %3575 = vmatprep.subr.bf16.mxu0 %v3791_v61 }
 0x178   : > { %3576 = vmatpush3.bf16.msra.mxu0 %v3792_v62 }
 0x179   : > { %3577 = vmatprep.subr.bf16.mxu0 %v3793_v63 }
 0x17c   : > { %3578 = vmatpush3.bf16.msra.mxu0 %v3794_v0 }
 0x17f   : > { %3037 = vmatmul.mubr.bf16.vlgmr.msra.gmra.mrb[16].mxu0 %v3795_v1 }
 0x1d2   : > { %v3403_v2 = vpop.f32.mrb[0].mxu0 }
 0x1d3   : > { %v3404_v4 = vpop.f32.mrb[1].mxu0 }
 0x1d4   : > { %v3405_v5 = vadd.f32 %v3404_v4, %v3403_v2  ;;  %v3406_v6 = vpop.f32.mrb[2].mxu0  ;;  %v3425_v7 = vpop.f32.mrb[0].mxu1 }
 0x1d5   : > { %v3407_v8 = vpop.f32.mrb[3].mxu0  ;;  %v3426_v9 = vpop.f32.mrb[1].mxu1 }
 0x1d6   : > { %v2711_v10 = vadd.f32 %v3405_v5, %v3211_v3  ;;  %v3408_v11 = vadd.f32 %v3407_v8, %v3406_v6  ;;  %v3427_v12 = vadd.f32 %v3426_v9, %v3425_v7  ;;  %v3428_v13 = vpop.f32.mrb[2].mxu1 }
 0x1d7   : > { %v3429_v14 = vpop.f32.mrb[3].mxu1 }
 0x1d8   : > { %v2714_v15 = vadd.f32 %v3408_v11, %v3211_v3  ;;  %v2752_v16 = vadd.f32 %v3427_v12, %v2711_v10  ;;  %v3430_v17 = vadd.f32 %v3429_v14, %v3428_v13 }
 0x1da   : > { %v2755_v18 = vadd.f32 %v3430_v17, %v2714_v15 }
 0x1f2   : > { %v3447_v19 = vpop.f32.mrb[4].mxu0 }
 0x1f3   : > { %v3448_v20 = vpop.f32.mrb[5].mxu0 }
 0x1f4   : > { %v3449_v21 = vadd.f32 %v3448_v20, %v3447_v19  ;;  %v3450_v22 = vpop.f32.mrb[6].mxu0  ;;  %v3469_v23 = vpop.f32.mrb[4].mxu1 }
 0x1f5   : > { %v3451_v24 = vpop.f32.mrb[7].mxu0  ;;  %v3470_v27 = vpop.f32.mrb[5].mxu1 }
 0x1f6   : > { %v2793_v25 = vadd.f32 %v3449_v21, %v2752_v16  ;;  %v3452_v26 = vadd.f32 %v3451_v24, %v3450_v22  ;;  %v3471_v28 = vadd.f32 %v3470_v27, %v3469_v23  ;;  %v3472_v29 = vpop.f32.mrb[6].mxu1 }
 0x1f7   : > { %v3473_v31 = vpop.f32.mrb[7].mxu1 }
 0x1f8   : > { %v2796_v30 = vadd.f32 %v3452_v26, %v2755_v18  ;;  %v2834_v32 = vadd.f32 %v3471_v28, %v2793_v25  ;;  %v3474_v33 = vadd.f32 %v3473_v31, %v3472_v29 }
 0x1fa   : > { %v2837_v34 = vadd.f32 %v3474_v33, %v2796_v30 }
 0x212   : > { %v3491_v35 = vpop.f32.mrb[8].mxu0 }
 0x213   : > { %v3492_v36 = vpop.f32.mrb[9].mxu0 }
 0x214   : > { %v3493_v37 = vadd.f32 %v3492_v36, %v3491_v35  ;;  %v3494_v38 = vpop.f32.mrb[10].mxu0  ;;  %v3513_v39 = vpop.f32.mrb[8].mxu1 }
 0x215   : > { %v3495_v40 = vpop.f32.mrb[11].mxu0  ;;  %v3514_v43 = vpop.f32.mrb[9].mxu1 }
 0x216   : > { %v2875_v41 = vadd.f32 %v3493_v37, %v2834_v32  ;;  %v3496_v42 = vadd.f32 %v3495_v40, %v3494_v38  ;;  %v3515_v44 = vadd.f32 %v3514_v43, %v3513_v39  ;;  %v3516_v45 = vpop.f32.mrb[10].mxu1 }
 0x217   : > { %v3517_v47 = vpop.f32.mrb[11].mxu1 }
 0x218   : > { %v2878_v46 = vadd.f32 %v3496_v42, %v2837_v34  ;;  %v2916_v48 = vadd.f32 %v3515_v44, %v2875_v41  ;;  %v3518_v49 = vadd.f32 %v3517_v47, %v3516_v45 }
 0x21a   : > { %v2919_v50 = vadd.f32 %v3518_v49, %v2878_v46 }
 0x232   : > { %v3535_v51 = vpop.f32.mrb[12].mxu0 }
 0x233   : > { %v3536_v52 = vpop.f32.mrb[13].mxu0 }
 0x234   : > { %v3537_v53 = vadd.f32 %v3536_v52, %v3535_v51  ;;  %v3538_v54 = vpop.f32.mrb[14].mxu0  ;;  %v3557_v55 = vpop.f32.mrb[12].mxu1 }
 0x235   : > { %v3539_v56 = vpop.f32.mrb[15].mxu0  ;;  %v3558_v59 = vpop.f32.mrb[13].mxu1 }
 0x236   : > { %v2957_v57 = vadd.f32 %v3537_v53, %v2916_v48  ;;  %v3540_v58 = vadd.f32 %v3539_v56, %v3538_v54  ;;  %v3559_v60 = vadd.f32 %v3558_v59, %v3557_v55  ;;  %v3560_v61 = vpop.f32.mrb[14].mxu1 }
 0x237   : > { %v3561_v63 = vpop.f32.mrb[15].mxu1 }
 0x238   : > { %v2960_v62 = vadd.f32 %v3540_v58, %v2919_v50  ;;  %v2998_v0 = vadd.f32 %v3559_v60, %v2957_v57  ;;  %v3562_v1 = vadd.f32 %v3561_v63, %v3560_v61 }
 0x23a   : > { %v3001_v2 = vadd.f32 %v3562_v1, %v2960_v62 }
 0x252   : > { %v3579_v3 = vpop.f32.mrb[16].mxu0 }
 0x253   : > { %v3580_v4 = vpop.f32.mrb[17].mxu0 }
 0x254   : > { %v3581_v5 = vadd.f32 %v3580_v4, %v3579_v3  ;;  %v3582_v6 = vpop.f32.mrb[18].mxu0 }
 0x255   : > { %v3583_v7 = vpop.f32.mrb[19].mxu0 }
 0x256   : > { %v3039_v8 = vadd.f32 %v3581_v5, %v2998_v0  ;;  %v3584_v9 = vadd.f32 %v3583_v7, %v3582_v6 }
 0x258   : > { %v3042_v10 = vadd.f32 %v3584_v9, %v3001_v2  ;;  %v3045_v11 = vmax.f32 %v3039_v8, 0.0  ;;  %3063 = sbr.rel (!%p3893_p6) target bundleno = 615 (0x267), region = 77 }
 0x25a   : > { %v3046_v12 = vmax.f32 %v3042_v10, 0.0 }
 0x25c   : > { %v3385_v13 = vpack.c.bf16 %v3046_v12, %v3045_v11 }
 0x25e   : > { %3386 = vst [vmem:[%s1396_s18] sm:$0xff] %v3385_v13  }
 0x265   : > { %v3084_v14 = vld [vmem:[%s1396_s18] sm:$0xf]  ;;  %v3086_v15 = vld [vmem:[%s1396_s18 + $0x4] sm:$0xf] }
 0x266   : > { %3085 = vst [vmem:[%s3068_s24] sm:$0xf] %v3084_v14  ;;  %3087 = vst [vmem:[%s3068_s24 + $0x8] sm:$0xf] %v3086_v15 }
 0x267 PF: > { %s13_s16 = sadd.s32 1, %s3836_s16   ;;  %s4724_s12 = smov %s3824_s13 }
 0x268   : > { %p10_p12 = scmp.ge.s32.totalorder %s13_s16, 4   ;;  %s4725_s13 = smov %s3898_s22 }
 0x269   : > { %s4726_s14 = smov %s3832_s15  ;;  %s4727_s15 = smov %s4729_s17 }
 0x26a   :  { %12 = sbr.rel (!%p10_p12) target bundleno = 3 (0x3), region = 155 }

// kernel: resnet_feature_extractor.70
= control target key start
LH: loop header
LB: loop body
LE: loop exit
PB: predicated region body
PF: predicated region fallthrough
CT: control target
= control target key end

     0   :  { %s1145_s15 = smov 0   ;;  %s1147_s16 = smov 0   ;;  %s1350_s0 = inlined_call_operand.vmem [shape: bf16[16,256], index: 0, kind: input, shape index: {}]   ;;  %s1351_s1 = inlined_call_operand.vmem [shape: bf16[256,1024], index: 1, kind: input, shape index: {}]   ;;  %s1352_s2 = inlined_call_operand.vmem [shape: f32[1,1024], index: 2, kind: input, shape index: {}]   ;;  %s1353_s3 = inlined_call_operand.vmem [shape: bf16[16,1024], index: 3, kind: input, shape index: {}]   ;;  %s1354_s4 = inlined_call_operand.vmem [shape: bf16[16,1024], index: 4, kind: output, shape index: {}]  }
   0x1   :  { %s1149_s17 = smov 0   ;;  %s1151_s18 = smov 0  }
   0x2   :  { %s1153_s19 = smov 0  }
   0x3 LB: > { %s23_s20 = sadd.s32 1, %s1114_s18  ;;  %s927_s21 = sadd.s32 4294967295, %s1118_s19   ;;  %s1118_s19 = sphi %s1153_s19, %s14_s19   ;;  %s1114_s18 = sphi %s1151_s18, %s1360_s18   ;;  %s1110_s17 = sphi %s1149_s17, %s1359_s17   ;;  %s1106_s16 = sphi %s1147_s16, %s1358_s16   ;;  %s1102_s15 = sphi %s1145_s15, %s1357_s15  }
   0x4   : > { %p24_p0 = scmp.ge.s32.totalorder %s23_s20, 4  ;;  %p66_p1 = scmp.ne.s32.totalorder %s1106_s16, %s1102_s15 }
   0x5   : > { %p67_p2 = scmp.eq.s32.totalorder %s1118_s19, 0  ;;  %p152_p4 = scmp.eq.s32.totalorder %s927_s21, 3 }
   0x6   : > { %s1362_s20 = smov (%p24_p0, %s23_s20), 0  ;;  %s59_s24 = sadd.s32 1, %s1106_s16 }
   0x7   : > { %p1177_p3 = por %p67_p2, %p66_p1  ;;  %s56_s23 = ssub.s32 %s1114_s18, %s1362_s20 }
   0x8   : > { %p57_p5 = scmp.eq.s32.totalorder %s56_s23, 0  ;;  %p1184_p6 = por %p152_p4, %p66_p1 }
   0x9   : > { %p931_p7 = scmp.ge.s32.totalorder %s1118_s19, 4 }
   0xa   : > { %s1189_s26 = scalar_select %p57_p5, %s1106_s16, %s59_s24  }
   0xb   : > { %184 = sbr.rel (%p931_p7) target bundleno = 61 (0x3d), region = 20 }
  0x12   : > { %187 = sbr.rel (!%p1177_p3) target bundleno = 54 (0x36), region = 24  ;;  %s189_s27 = sand.u32 (%p1177_p3), 1, %s1106_s16  }
  0x13   : > { %s984_s28 = sshll.u32 (%p1177_p3), %s1114_s18, 3  ;;  %s932_s29 = sshll.u32 (%p1177_p3), %s189_s27, 8 }
  0x14   : > { %s1199_s6 = scalar_lea.vmem (%p1177_p3), %s1351_s1, %s984_s28  ;;  %s1204_s7 = scalar_lea.vmem (%p1177_p3), [#allocation2], %s932_s29 }
  0x15   : > { %v284_v0 = vld [vmem:[%s1199_s6] sm:$0xff] (%p1177_p3) }
  0x16   : > { %v286_v1 = vld [vmem:[%s1199_s6 + $0x20] sm:$0xff] (%p1177_p3)  ;;  %285 = vst [vmem:[%s1204_s7] sm:$0xff] (%p1177_p3), %v284_v0 }
  0x17   : > { %v288_v2 = vld [vmem:[%s1199_s6 + $0x40] sm:$0xff] (%p1177_p3)  ;;  %287 = vst [vmem:[%s1204_s7 + $0x8] sm:$0xff] (%p1177_p3), %v286_v1 }
  0x18   : > { %289 = vst [vmem:[%s1204_s7 + $0x10] sm:$0xff] (%p1177_p3), %v288_v2  ;;  %v290_v3 = vld [vmem:[%s1199_s6 + $0x60] sm:$0xff] (%p1177_p3) }
  0x19   : > { %v292_v4 = vld [vmem:[%s1199_s6 + $0x80] sm:$0xff]  ;;  %291 = vst [vmem:[%s1204_s7 + $0x18] sm:$0xff] %v290_v3 }
  0x1a   : > { %v294_v5 = vld [vmem:[%s1199_s6 + $0xa0] sm:$0xff]  ;;  %293 = vst [vmem:[%s1204_s7 + $0x20] sm:$0xff] %v292_v4 }
  0x1b   : > { %295 = vst [vmem:[%s1204_s7 + $0x28] sm:$0xff] %v294_v5  ;;  %v296_v6 = vld [vmem:[%s1199_s6 + $0xc0] sm:$0xff] }
  0x1c   : > { %v298_v7 = vld [vmem:[%s1199_s6 + $0xe0] sm:$0xff]  ;;  %297 = vst [vmem:[%s1204_s7 + $0x30] sm:$0xff] %v296_v6 }
  0x1d   : > { %v300_v8 = vld [vmem:[%s1199_s6 + $0x100] sm:$0xff]  ;;  %299 = vst [vmem:[%s1204_s7 + $0x38] sm:$0xff] %v298_v7 }
  0x1e   : > { %301 = vst [vmem:[%s1204_s7 + $0x40] sm:$0xff] %v300_v8  ;;  %v302_v9 = vld [vmem:[%s1199_s6 + $0x120] sm:$0xff] }
  0x1f   : > { %v304_v10 = vld [vmem:[%s1199_s6 + $0x140] sm:$0xff]  ;;  %303 = vst [vmem:[%s1204_s7 + $0x48] sm:$0xff] %v302_v9 }
  0x20   : > { %v306_v11 = vld [vmem:[%s1199_s6 + $0x160] sm:$0xff]  ;;  %305 = vst [vmem:[%s1204_s7 + $0x50] sm:$0xff] %v304_v10 }
  0x21   : > { %307 = vst [vmem:[%s1204_s7 + $0x58] sm:$0xff] %v306_v11  ;;  %v308_v12 = vld [vmem:[%s1199_s6 + $0x180] sm:$0xff] }
  0x22   : > { %v310_v13 = vld [vmem:[%s1199_s6 + $0x1a0] sm:$0xff]  ;;  %309 = vst [vmem:[%s1204_s7 + $0x60] sm:$0xff] %v308_v12 }
  0x23   : > { %v312_v14 = vld [vmem:[%s1199_s6 + $0x1c0] sm:$0xff]  ;;  %311 = vst [vmem:[%s1204_s7 + $0x68] sm:$0xff] %v310_v13 }
  0x24   : > { %313 = vst [vmem:[%s1204_s7 + $0x70] sm:$0xff] %v312_v14  ;;  %v314_v15 = vld [vmem:[%s1199_s6 + $0x1e0] sm:$0xff] }
  0x25   : > { %v316_v16 = vld [vmem:[%s1199_s6 + $0x200] sm:$0xff]  ;;  %315 = vst [vmem:[%s1204_s7 + $0x78] sm:$0xff] %v314_v15 }
  0x26   : > { %v318_v17 = vld [vmem:[%s1199_s6 + $0x220] sm:$0xff]  ;;  %317 = vst [vmem:[%s1204_s7 + $0x80] sm:$0xff] %v316_v16 }
  0x27   : > { %319 = vst [vmem:[%s1204_s7 + $0x88] sm:$0xff] %v318_v17  ;;  %v320_v18 = vld [vmem:[%s1199_s6 + $0x240] sm:$0xff] }
  0x28   : > { %v322_v19 = vld [vmem:[%s1199_s6 + $0x260] sm:$0xff]  ;;  %321 = vst [vmem:[%s1204_s7 + $0x90] sm:$0xff] %v320_v18 }
  0x29   : > { %v324_v20 = vld [vmem:[%s1199_s6 + $0x280] sm:$0xff]  ;;  %323 = vst [vmem:[%s1204_s7 + $0x98] sm:$0xff] %v322_v19 }
  0x2a   : > { %325 = vst [vmem:[%s1204_s7 + $0xa0] sm:$0xff] %v324_v20  ;;  %v326_v21 = vld [vmem:[%s1199_s6 + $0x2a0] sm:$0xff] }
  0x2b   : > { %v328_v22 = vld [vmem:[%s1199_s6 + $0x2c0] sm:$0xff]  ;;  %327 = vst [vmem:[%s1204_s7 + $0xa8] sm:$0xff] %v326_v21 }
  0x2c   : > { %v330_v23 = vld [vmem:[%s1199_s6 + $0x2e0] sm:$0xff]  ;;  %329 = vst [vmem:[%s1204_s7 + $0xb0] sm:$0xff] %v328_v22 }
  0x2d   : > { %331 = vst [vmem:[%s1204_s7 + $0xb8] sm:$0xff] %v330_v23  ;;  %v332_v24 = vld [vmem:[%s1199_s6 + $0x300] sm:$0xff] }
  0x2e   : > { %v334_v25 = vld [vmem:[%s1199_s6 + $0x320] sm:$0xff]  ;;  %333 = vst [vmem:[%s1204_s7 + $0xc0] sm:$0xff] %v332_v24 }
  0x2f   : > { %v336_v26 = vld [vmem:[%s1199_s6 + $0x340] sm:$0xff]  ;;  %335 = vst [vmem:[%s1204_s7 + $0xc8] sm:$0xff] %v334_v25 }
  0x30   : > { %337 = vst [vmem:[%s1204_s7 + $0xd0] sm:$0xff] %v336_v26  ;;  %v338_v27 = vld [vmem:[%s1199_s6 + $0x360] sm:$0xff] }
  0x31   : > { %v340_v28 = vld [vmem:[%s1199_s6 + $0x380] sm:$0xff]  ;;  %339 = vst [vmem:[%s1204_s7 + $0xd8] sm:$0xff] %v338_v27 }
  0x32   : > { %v342_v29 = vld [vmem:[%s1199_s6 + $0x3a0] sm:$0xff]  ;;  %341 = vst [vmem:[%s1204_s7 + $0xe0] sm:$0xff] %v340_v28 }
  0x33   : > { %343 = vst [vmem:[%s1204_s7 + $0xe8] sm:$0xff] %v342_v29  ;;  %v344_v30 = vld [vmem:[%s1199_s6 + $0x3c0] sm:$0xff] }
  0x34   : > { %v346_v31 = vld [vmem:[%s1199_s6 + $0x3e0] sm:$0xff]  ;;  %345 = vst [vmem:[%s1204_s7 + $0xf0] sm:$0xff] %v344_v30 }
  0x35   : > { %347 = vst [vmem:[%s1204_s7 + $0xf8] sm:$0xff] %v346_v31 }
  0x36 PF: > { %361 = sbr.rel (!%p1177_p3) target bundleno = 61 (0x3d), region = 66  ;;  %s363_s8 = sand.u32 (%p1177_p3), 1, %s1106_s16  }
  0x37   : > { %s985_s9 = sshll.u32 (%p1177_p3), %s1114_s18, 3  ;;  %s935_s10 = sshll.u32 (%p1177_p3), %s363_s8, 4 }
  0x38   : > { %s371_s13 = scalar_lea.vmem (%p1177_p3), %s1353_s3, %s985_s9  ;;  %s365_s14 = scalar_lea.vmem (%p1177_p3), [#allocation3], %s935_s10 }
  0x39   : > { %v401_v32 = vld [vmem:[%s371_s13] sm:$0xff] (%p1177_p3) }
  0x3a   : > { %v403_v33 = vld [vmem:[%s371_s13 + $0x20] sm:$0xff] (%p1177_p3)  ;;  %402 = vst [vmem:[%s365_s14] sm:$0xff] (%p1177_p3), %v401_v32 }
  0x3b   : > { %404 = vst [vmem:[%s365_s14 + $0x8] sm:$0xff] (%p1177_p3), %v403_v33 }
  0x3d PF: > { %p938_p8 = scmp.ge.s32.totalorder %s1118_s19, 1  ;;  %p409_p9 = scmp.lt.s32.totalorder %s1118_s19, 5 }
  0x3f   : > { %p410_p10 = pnand %p938_p8, %p409_p9 }
  0x40   : > { %s416_s21 = sand.u32 (!%p410_p10), 1, %s1102_s15   ;;  %v1079_v34 = vld [vmem:[%s1350_s0 + $0x4] ss:$8 sps:$4 sm:$0xff] (!%p410_p10)   ;;  %v1077_v3 = vld [vmem:[%s1350_s0] ss:$8 sps:$4 sm:$0xff] (!%p410_p10)   ;;  %s942_s30 = sshll.u32 (!%p410_p10), %s1110_s17, 1  ;;  %v514_v4 = vlaneseq (!%p410_p10) }
  0x41   : > { %413 = sbr.rel (%p410_p10) target bundleno = 364 (0x16c), region = 104  ;;  %s939_s22 = sshll.u32 (!%p410_p10), %s416_s21, 8  ;;  %726 = vmatprep.mubr.bf16.mxu0 (!%p410_p10), %v1079_v34 }
  0x42   : > { %s1282_s27 = scalar_lea.vmem (!%p410_p10), [#allocation2], %s939_s22  ;;  %p470_p11 = scmp.lt.s32.totalorder (!%p410_p10), %s942_s30, 7  ;;  %v515_v5 = vshrl.u32 (!%p410_p10), %v514_v4, 7 }
  0x43   : > { %v1029_v35 = vld [vmem:[%s1282_s27 + $0x4] ss:$8 sps:$4 sm:$0xff] (!%p410_p10)   ;;  %v1031_v36 = vld [vmem:[%s1282_s27] ss:$8 sps:$4 sm:$0xff] (!%p410_p10)   ;;  %v1032_v37 = vld [vmem:[%s1282_s27 + $0x14] ss:$8 sps:$4 sm:$0xff] (!%p410_p10)  }
  0x44   : > { %694 = vmatprep.subr.bf16.mxu0 (!%p410_p10), %v1029_v35  ;;  %v1034_v38 = vld [vmem:[%s1282_s27 + $0x10] ss:$8 sps:$4 sm:$0xff] (!%p410_p10)   ;;  %v1035_v39 = vld [vmem:[%s1282_s27 + $0x24] ss:$8 sps:$4 sm:$0xff] (!%p410_p10)   ;;  %v1037_v40 = vld [vmem:[%s1282_s27 + $0x20] ss:$8 sps:$4 sm:$0xff] (!%p410_p10)  }
  0x45   : > { %695 = vmatpush1.bf16.msra.mxu0 (!%p410_p10), %v1031_v36  ;;  %v1038_v41 = vld [vmem:[%s1282_s27 + $0x34] ss:$8 sps:$4 sm:$0xff] (!%p410_p10)   ;;  %v1040_v42 = vld [vmem:[%s1282_s27 + $0x30] ss:$8 sps:$4 sm:$0xff] (!%p410_p10)   ;;  %v1041_v43 = vld [vmem:[%s1282_s27 + $0x44] ss:$8 sps:$4 sm:$0xff] (!%p410_p10)  }
  0x46   : > { %696 = vmatprep.subr.bf16.mxu0 (!%p410_p10), %v1032_v37  ;;  %v1043_v44 = vld [vmem:[%s1282_s27 + $0x40] ss:$8 sps:$4 sm:$0xff] (!%p410_p10)   ;;  %v1044_v45 = vld [vmem:[%s1282_s27 + $0x54] ss:$8 sps:$4 sm:$0xff] (!%p410_p10)   ;;  %v1046_v46 = vld [vmem:[%s1282_s27 + $0x50] ss:$8 sps:$4 sm:$0xff] (!%p410_p10)  }
  0x47   : > { %v1047_v47 = vld [vmem:[%s1282_s27 + $0x64] ss:$8 sps:$4 sm:$0xff] (!%p410_p10)   ;;  %v1049_v48 = vld [vmem:[%s1282_s27 + $0x60] ss:$8 sps:$4 sm:$0xff] (!%p410_p10)   ;;  %v1050_v49 = vld [vmem:[%s1282_s27 + $0x74] ss:$8 sps:$4 sm:$0xff] (!%p410_p10)  }
  0x48   : > { %v1052_v50 = vld [vmem:[%s1282_s27 + $0x70] ss:$8 sps:$4 sm:$0xff]   ;;  %v1053_v51 = vld [vmem:[%s1282_s27 + $0x84] ss:$8 sps:$4 sm:$0xff]   ;;  %v1055_v52 = vld [vmem:[%s1282_s27 + $0x80] ss:$8 sps:$4 sm:$0xff]  }
  0x49   : > { %697 = vmatpush1.bf16.msra.mxu0 %v1034_v38  ;;  %v1056_v53 = vld [vmem:[%s1282_s27 + $0x94] ss:$8 sps:$4 sm:$0xff]   ;;  %v1058_v54 = vld [vmem:[%s1282_s27 + $0x90] ss:$8 sps:$4 sm:$0xff]   ;;  %v1059_v55 = vld [vmem:[%s1282_s27 + $0xa4] ss:$8 sps:$4 sm:$0xff]  }
  0x4a   : > { %698 = vmatprep.subr.bf16.mxu0 %v1035_v39  ;;  %v1061_v56 = vld [vmem:[%s1282_s27 + $0xa0] ss:$8 sps:$4 sm:$0xff]   ;;  %v1062_v57 = vld [vmem:[%s1282_s27 + $0xb4] ss:$8 sps:$4 sm:$0xff]   ;;  %v1064_v58 = vld [vmem:[%s1282_s27 + $0xb0] ss:$8 sps:$4 sm:$0xff]  }
  0x4b   : > { %v1065_v59 = vld [vmem:[%s1282_s27 + $0xc4] ss:$8 sps:$4 sm:$0xff]   ;;  %v1067_v60 = vld [vmem:[%s1282_s27 + $0xc0] ss:$8 sps:$4 sm:$0xff]   ;;  %v1068_v61 = vld [vmem:[%s1282_s27 + $0xd4] ss:$8 sps:$4 sm:$0xff]  }
  0x4c   : > { %v1070_v62 = vld [vmem:[%s1282_s27 + $0xd0] ss:$8 sps:$4 sm:$0xff]   ;;  %v1071_v63 = vld [vmem:[%s1282_s27 + $0xe4] ss:$8 sps:$4 sm:$0xff]   ;;  %v1073_v0 = vld [vmem:[%s1282_s27 + $0xe0] ss:$8 sps:$4 sm:$0xff]  }
  0x4d   : > { %699 = vmatpush1.bf16.msra.mxu0 %v1037_v40  ;;  %v1074_v1 = vld [vmem:[%s1282_s27 + $0xf4] ss:$8 sps:$4 sm:$0xff]   ;;  %v1076_v2 = vld [vmem:[%s1282_s27 + $0xf0] ss:$8 sps:$4 sm:$0xff]   ;;  %s1364_s30 = smov (!%p470_p11, %s942_s30), 7  ;;  %s1322_s5 = sshll.u32 %s416_s21, 4 }
  0x4e   : > { %700 = vmatprep.subr.bf16.mxu0 %v1038_v41  ;;  %s472_s8 = scalar_lea.vmem %s1352_s2, %s1364_s30  ;;  %v516_v6 = vsub.s32 0, %v515_v5  ;;  %v520_v8 = vsub.s32 1, %v515_v5  ;;  %s425_s9 = scalar_lea.vmem [#allocation3], %s1322_s5 }
  0x4f   : > { %v512_v7 = vld [vmem:[%s472_s8] sm:$0x3]  ;;  %v738_v12 = vld [vmem:[%s425_s9 + $0x8] sm:$0xff]  ;;  %s460_s15 = scalar_lea.vmem [#allocation4], %s1322_s5  ;;  %s988_s10 = sshll.u32 (%p1184_p6), %s1110_s17, 3 }
  0x50   : > { %v737_v9 = vld [vmem:[%s425_s9] sm:$0xff]  ;;  %v517_v10 = vrot.slane %v512_v7, %v516_v6  ;;  %v521_v11 = vrot.slane %v512_v7, %v520_v8  ;;  %v741_v18 = vunpack.c.l.bf16 %v738_v12  ;;  %v742_v21 = vunpack.c.h.bf16 %v738_v12  ;;  %s777_s13 = scalar_lea.vmem (%p1184_p6), %s1354_s4, %s988_s10 }
  0x51   : > { %701 = vmatpush1.bf16.msra.mxu0 %v1040_v42  ;;  %v739_v13 = vunpack.c.l.bf16 %v737_v9  ;;  %v740_v15 = vunpack.c.h.bf16 %v737_v9 }
  0x52   : > { %702 = vmatprep.subr.bf16.mxu0 %v1041_v43 }
  0x55   : > { %703 = vmatpush1.bf16.msra.mxu0 %v1043_v44 }
  0x56   : > { %704 = vmatprep.subr.bf16.mxu0 %v1044_v45 }
  0x59   : > { %705 = vmatpush1.bf16.msra.mxu0 %v1046_v46 }
  0x5a   : > { %706 = vmatprep.subr.bf16.mxu0 %v1047_v47 }
  0x5d   : > { %707 = vmatpush1.bf16.msra.mxu0 %v1049_v48 }
  0x5e   : > { %708 = vmatprep.subr.bf16.mxu0 %v1050_v49 }
  0x61   : > { %709 = vmatpush1.bf16.msra.mxu0 %v1052_v50 }
  0x62   : > { %710 = vmatprep.subr.bf16.mxu0 %v1053_v51 }
  0x65   : > { %711 = vmatpush1.bf16.msra.mxu0 %v1055_v52 }
  0x66   : > { %712 = vmatprep.subr.bf16.mxu0 %v1056_v53 }
  0x69   : > { %713 = vmatpush1.bf16.msra.mxu0 %v1058_v54 }
  0x6a   : > { %714 = vmatprep.subr.bf16.mxu0 %v1059_v55 }
  0x6d   : > { %715 = vmatpush1.bf16.msra.mxu0 %v1061_v56 }
  0x6e   : > { %716 = vmatprep.subr.bf16.mxu0 %v1062_v57 }
  0x71   : > { %717 = vmatpush1.bf16.msra.mxu0 %v1064_v58 }
  0x72   : > { %718 = vmatprep.subr.bf16.mxu0 %v1065_v59 }
  0x75   : > { %719 = vmatpush1.bf16.msra.mxu0 %v1067_v60 }
  0x76   : > { %720 = vmatprep.subr.bf16.mxu0 %v1068_v61 }
  0x79   : > { %721 = vmatpush1.bf16.msra.mxu0 %v1070_v62 }
  0x7a   : > { %722 = vmatprep.subr.bf16.mxu0 %v1071_v63 }
  0x7d   : > { %723 = vmatpush1.bf16.msra.mxu0 %v1073_v0 }
  0x7e   : > { %724 = vmatprep.subr.bf16.mxu0 %v1074_v1 }
  0x81   : > { %725 = vmatpush1.bf16.msra.mxu0 %v1076_v2 }
  0x84   : > { %727 = vmatmul.mubr.bf16.vlgmr.msra.gmra.mrb[0].mxu0 %v1077_v3 }
 0x157   : > { %v728_v14 = vpop.f32.mrb[0].mxu0 }
 0x158   : > { %v729_v16 = vadd.f32 %v728_v14, %v517_v10  ;;  %v730_v17 = vpop.f32.mrb[1].mxu0 }
 0x159   : > { %v731_v19 = vadd.f32 %v730_v17, %v521_v11  ;;  %v732_v20 = vpop.f32.mrb[2].mxu0 }
 0x15a   : > { %v743_v22 = vadd.f32 %v739_v13, %v729_v16  ;;  %v733_v23 = vadd.f32 %v732_v20, %v517_v10  ;;  %v734_v24 = vpop.f32.mrb[3].mxu0 }
 0x15b   : > { %v744_v25 = vadd.f32 %v740_v15, %v731_v19  ;;  %v735_v26 = vadd.f32 %v734_v24, %v521_v11 }
 0x15c   : > { %v747_v27 = vmax.f32 %v743_v22, 0.0  ;;  %v745_v28 = vadd.f32 %v741_v18, %v733_v23 }
 0x15d   : > { %v748_v29 = vmax.f32 %v744_v25, 0.0  ;;  %v746_v30 = vadd.f32 %v742_v21, %v735_v26  ;;  %771 = sbr.rel (!%p1184_p6) target bundleno = 364 (0x16c), region = 116 }
 0x15e   : > { %v749_v31 = vmax.f32 %v745_v28, 0.0 }
 0x15f   : > { %v986_v32 = vpack.c.bf16 %v748_v29, %v747_v27  ;;  %v750_v33 = vmax.f32 %v746_v30, 0.0 }
 0x161   : > { %763 = vst [vmem:[%s460_s15] sm:$0xff] %v986_v32  ;;  %v987_v34 = vpack.c.bf16 %v750_v33, %v749_v31 }
 0x163   : > { %764 = vst [vmem:[%s460_s15 + $0x8] sm:$0xff] %v987_v34 }
 0x168   : > { %v807_v35 = vld [vmem:[%s460_s15] sm:$0xff] }
 0x169   : > { %808 = vst [vmem:[%s777_s13] sm:$0xff] %v807_v35 }
 0x16a   : > { %v809_v36 = vld [vmem:[%s460_s15 + $0x8] sm:$0xff] }
 0x16b   : > { %810 = vst [vmem:[%s777_s13 + $0x20] sm:$0xff] %v809_v36 }
 0x16c PF: > { %s14_s19 = sadd.s32 1, %s1118_s19   ;;  %s1357_s15 = smov %s1106_s16 }
 0x16d   : > { %p11_p12 = scmp.ge.s32.totalorder %s14_s19, 6   ;;  %s1358_s16 = smov %s1189_s26 }
 0x16e   : > { %s1359_s17 = smov %s1114_s18  ;;  %s1360_s18 = smov %s1362_s20 }
 0x16f   :  { %13 = sbr.rel (!%p11_p12) target bundleno = 3 (0x3), region = 199 }

// kernel: resnet_feature_extractor.71
= control target key start
LH: loop header
LB: loop body
LE: loop exit
PB: predicated region body
PF: predicated region fallthrough
CT: control target
= control target key end

     0   :  { %s2006_s12 = smov 0   ;;  %s2008_s13 = smov 0   ;;  %s2469_s0 = inlined_call_operand.vmem [shape: bf16[16,1024], index: 0, kind: input, shape index: {}]   ;;  %s2470_s1 = inlined_call_operand.vmem [shape: bf16[1024,256], index: 1, kind: input, shape index: {}]   ;;  %s2471_s2 = inlined_call_operand.vmem [shape: f32[1,256], index: 2, kind: input, shape index: {}]   ;;  %s2472_s3 = inlined_call_operand.vmem [shape: bf16[16,256], index: 3, kind: output, shape index: {}]  }
   0x1   :  { %s2010_s14 = smov 0   ;;  %s2012_s15 = smov 0  }
   0x2   :  { %s2014_s16 = smov 0  }
   0x3 LB: > { %s22_s17 = sadd.s32 1, %s1980_s15  ;;  %s1658_s18 = sadd.s32 4294967295, %s1984_s16   ;;  %s1984_s16 = sphi %s2014_s16, %s13_s16   ;;  %s1980_s15 = sphi %s2012_s15, %s2477_s15   ;;  %s1976_s14 = sphi %s2010_s14, %s2476_s14   ;;  %s1972_s13 = sphi %s2008_s13, %s2475_s13   ;;  %s1968_s12 = sphi %s2006_s12, %s2474_s12  }
   0x4   : > { %p23_p0 = scmp.ge.s32.totalorder %s22_s17, 2  ;;  %p65_p1 = scmp.ne.s32.totalorder %s1972_s13, %s1968_s12 }
   0x5   : > { %p66_p2 = scmp.eq.s32.totalorder %s1984_s16, 0  ;;  %p123_p4 = scmp.eq.s32.totalorder %s1658_s18, 1 }
   0x6   : > { %s2479_s17 = smov (%p23_p0, %s22_s17), 0  ;;  %s58_s20 = sadd.s32 1, %s1972_s13 }
   0x7   : > { %p67_p3 = por %p66_p2, %p65_p1  ;;  %s55_s19 = ssub.s32 %s1980_s15, %s2479_s17 }
   0x8   : > { %p56_p5 = scmp.eq.s32.totalorder %s55_s19, 0  ;;  %p2041_p6 = por %p123_p4, %p65_p1 }
   0x9   : > { %p1662_p7 = scmp.ge.s32.totalorder %s1984_s16, 2 }
   0xa   : > { %s2046_s22 = scalar_select %p56_p5, %s1972_s13, %s58_s20  }
   0xb   : > { %155 = sbr.rel (%p1662_p7) target bundleno = 107 (0x6b), region = 20 }
  0x12   : > { %158 = sbr.rel (!%p67_p3) target bundleno = 107 (0x6b), region = 24  ;;  %s160_s23 = sand.u32 (%p67_p3), 1, %s1972_s13  }
  0x13   : > { %s1664_s24 = sshll.u32 (%p67_p3), %s1980_s15, 2  ;;  %s1663_s25 = sshll.u32 (%p67_p3), %s160_s23, 9 }
  0x14   : > { %s2054_s28 = scalar_lea.vmem (%p67_p3), %s2470_s1, %s1664_s24  ;;  %s2058_s29 = scalar_lea.vmem (%p67_p3), [#allocation2], %s1663_s25 }
  0x15   : > { %v180_v0 = vld [vmem:[%s2054_s28] sm:$0xf] (%p67_p3)  ;;  %v182_v1 = vld [vmem:[%s2054_s28 + $0x8] sm:$0xf] (%p67_p3)  ;;  %v184_v2 = vld [vmem:[%s2054_s28 + $0x10] sm:$0xf] (%p67_p3) }
  0x16   : > { %181 = vst [vmem:[%s2058_s29] sm:$0xf] (%p67_p3), %v180_v0  ;;  %183 = vst [vmem:[%s2058_s29 + $0x4] sm:$0xf] (%p67_p3), %v182_v1  ;;  %v186_v3 = vld [vmem:[%s2054_s28 + $0x18] sm:$0xf] (%p67_p3) }
  0x17   : > { %v188_v4 = vld [vmem:[%s2054_s28 + $0x20] sm:$0xf] (%p67_p3)  ;;  %185 = vst [vmem:[%s2058_s29 + $0x8] sm:$0xf] (%p67_p3), %v184_v2  ;;  %187 = vst [vmem:[%s2058_s29 + $0xc] sm:$0xf] (%p67_p3), %v186_v3 }
  0x18   : > { %189 = vst [vmem:[%s2058_s29 + $0x10] sm:$0xf] (%p67_p3), %v188_v4  ;;  %v190_v5 = vld [vmem:[%s2054_s28 + $0x28] sm:$0xf] (%p67_p3)  ;;  %v192_v6 = vld [vmem:[%s2054_s28 + $0x30] sm:$0xf] (%p67_p3) }
  0x19   : > { %v194_v7 = vld [vmem:[%s2054_s28 + $0x38] sm:$0xf]  ;;  %191 = vst [vmem:[%s2058_s29 + $0x14] sm:$0xf] %v190_v5  ;;  %193 = vst [vmem:[%s2058_s29 + $0x18] sm:$0xf] %v192_v6 }
  0x1a   : > { %195 = vst [vmem:[%s2058_s29 + $0x1c] sm:$0xf] %v194_v7  ;;  %v196_v8 = vld [vmem:[%s2054_s28 + $0x40] sm:$0xf]  ;;  %v198_v9 = vld [vmem:[%s2054_s28 + $0x48] sm:$0xf] }
  0x1b   : > { %v200_v10 = vld [vmem:[%s2054_s28 + $0x50] sm:$0xf]  ;;  %197 = vst [vmem:[%s2058_s29 + $0x20] sm:$0xf] %v196_v8  ;;  %199 = vst [vmem:[%s2058_s29 + $0x24] sm:$0xf] %v198_v9 }
  0x1c   : > { %201 = vst [vmem:[%s2058_s29 + $0x28] sm:$0xf] %v200_v10  ;;  %v202_v11 = vld [vmem:[%s2054_s28 + $0x58] sm:$0xf]  ;;  %v204_v12 = vld [vmem:[%s2054_s28 + $0x60] sm:$0xf] }
  0x1d   : > { %v206_v13 = vld [vmem:[%s2054_s28 + $0x68] sm:$0xf]  ;;  %203 = vst [vmem:[%s2058_s29 + $0x2c] sm:$0xf] %v202_v11  ;;  %205 = vst [vmem:[%s2058_s29 + $0x30] sm:$0xf] %v204_v12 }
  0x1e   : > { %207 = vst [vmem:[%s2058_s29 + $0x34] sm:$0xf] %v206_v13  ;;  %v208_v14 = vld [vmem:[%s2054_s28 + $0x70] sm:$0xf]  ;;  %v210_v15 = vld [vmem:[%s2054_s28 + $0x78] sm:$0xf] }
  0x1f   : > { %v212_v16 = vld [vmem:[%s2054_s28 + $0x80] sm:$0xf]  ;;  %209 = vst [vmem:[%s2058_s29 + $0x38] sm:$0xf] %v208_v14  ;;  %211 = vst [vmem:[%s2058_s29 + $0x3c] sm:$0xf] %v210_v15 }
  0x20   : > { %213 = vst [vmem:[%s2058_s29 + $0x40] sm:$0xf] %v212_v16  ;;  %v214_v17 = vld [vmem:[%s2054_s28 + $0x88] sm:$0xf]  ;;  %v216_v18 = vld [vmem:[%s2054_s28 + $0x90] sm:$0xf] }
  0x21   : > { %v218_v19 = vld [vmem:[%s2054_s28 + $0x98] sm:$0xf]  ;;  %215 = vst [vmem:[%s2058_s29 + $0x44] sm:$0xf] %v214_v17  ;;  %217 = vst [vmem:[%s2058_s29 + $0x48] sm:$0xf] %v216_v18 }
  0x22   : > { %219 = vst [vmem:[%s2058_s29 + $0x4c] sm:$0xf] %v218_v19  ;;  %v220_v20 = vld [vmem:[%s2054_s28 + $0xa0] sm:$0xf]  ;;  %v222_v21 = vld [vmem:[%s2054_s28 + $0xa8] sm:$0xf] }
  0x23   : > { %v224_v22 = vld [vmem:[%s2054_s28 + $0xb0] sm:$0xf]  ;;  %221 = vst [vmem:[%s2058_s29 + $0x50] sm:$0xf] %v220_v20  ;;  %223 = vst [vmem:[%s2058_s29 + $0x54] sm:$0xf] %v222_v21 }
  0x24   : > { %225 = vst [vmem:[%s2058_s29 + $0x58] sm:$0xf] %v224_v22  ;;  %v226_v23 = vld [vmem:[%s2054_s28 + $0xb8] sm:$0xf]  ;;  %v228_v24 = vld [vmem:[%s2054_s28 + $0xc0] sm:$0xf] }
  0x25   : > { %v230_v25 = vld [vmem:[%s2054_s28 + $0xc8] sm:$0xf]  ;;  %227 = vst [vmem:[%s2058_s29 + $0x5c] sm:$0xf] %v226_v23  ;;  %229 = vst [vmem:[%s2058_s29 + $0x60] sm:$0xf] %v228_v24 }
  0x26   : > { %231 = vst [vmem:[%s2058_s29 + $0x64] sm:$0xf] %v230_v25  ;;  %v232_v26 = vld [vmem:[%s2054_s28 + $0xd0] sm:$0xf]  ;;  %v234_v27 = vld [vmem:[%s2054_s28 + $0xd8] sm:$0xf] }
  0x27   : > { %v236_v28 = vld [vmem:[%s2054_s28 + $0xe0] sm:$0xf]  ;;  %233 = vst [vmem:[%s2058_s29 + $0x68] sm:$0xf] %v232_v26  ;;  %235 = vst [vmem:[%s2058_s29 + $0x6c] sm:$0xf] %v234_v27 }
  0x28   : > { %237 = vst [vmem:[%s2058_s29 + $0x70] sm:$0xf] %v236_v28  ;;  %v238_v29 = vld [vmem:[%s2054_s28 + $0xe8] sm:$0xf]  ;;  %v240_v30 = vld [vmem:[%s2054_s28 + $0xf0] sm:$0xf] }
  0x29   : > { %v242_v31 = vld [vmem:[%s2054_s28 + $0xf8] sm:$0xf]  ;;  %239 = vst [vmem:[%s2058_s29 + $0x74] sm:$0xf] %v238_v29  ;;  %241 = vst [vmem:[%s2058_s29 + $0x78] sm:$0xf] %v240_v30 }
  0x2a   : > { %243 = vst [vmem:[%s2058_s29 + $0x7c] sm:$0xf] %v242_v31  ;;  %v244_v32 = vld [vmem:[%s2054_s28 + $0x100] sm:$0xf]  ;;  %v246_v33 = vld [vmem:[%s2054_s28 + $0x108] sm:$0xf] }
  0x2b   : > { %v248_v34 = vld [vmem:[%s2054_s28 + $0x110] sm:$0xf]  ;;  %245 = vst [vmem:[%s2058_s29 + $0x80] sm:$0xf] %v244_v32  ;;  %247 = vst [vmem:[%s2058_s29 + $0x84] sm:$0xf] %v246_v33 }
  0x2c   : > { %249 = vst [vmem:[%s2058_s29 + $0x88] sm:$0xf] %v248_v34  ;;  %v250_v35 = vld [vmem:[%s2054_s28 + $0x118] sm:$0xf]  ;;  %v252_v36 = vld [vmem:[%s2054_s28 + $0x120] sm:$0xf] }
  0x2d   : > { %v254_v37 = vld [vmem:[%s2054_s28 + $0x128] sm:$0xf]  ;;  %251 = vst [vmem:[%s2058_s29 + $0x8c] sm:$0xf] %v250_v35  ;;  %253 = vst [vmem:[%s2058_s29 + $0x90] sm:$0xf] %v252_v36 }
  0x2e   : > { %255 = vst [vmem:[%s2058_s29 + $0x94] sm:$0xf] %v254_v37  ;;  %v256_v38 = vld [vmem:[%s2054_s28 + $0x130] sm:$0xf]  ;;  %v258_v39 = vld [vmem:[%s2054_s28 + $0x138] sm:$0xf] }
  0x2f   : > { %v260_v40 = vld [vmem:[%s2054_s28 + $0x140] sm:$0xf]  ;;  %257 = vst [vmem:[%s2058_s29 + $0x98] sm:$0xf] %v256_v38  ;;  %259 = vst [vmem:[%s2058_s29 + $0x9c] sm:$0xf] %v258_v39 }
  0x30   : > { %261 = vst [vmem:[%s2058_s29 + $0xa0] sm:$0xf] %v260_v40  ;;  %v262_v41 = vld [vmem:[%s2054_s28 + $0x148] sm:$0xf]  ;;  %v264_v42 = vld [vmem:[%s2054_s28 + $0x150] sm:$0xf] }
  0x31   : > { %v266_v43 = vld [vmem:[%s2054_s28 + $0x158] sm:$0xf]  ;;  %263 = vst [vmem:[%s2058_s29 + $0xa4] sm:$0xf] %v262_v41  ;;  %265 = vst [vmem:[%s2058_s29 + $0xa8] sm:$0xf] %v264_v42 }
  0x32   : > { %267 = vst [vmem:[%s2058_s29 + $0xac] sm:$0xf] %v266_v43  ;;  %v268_v44 = vld [vmem:[%s2054_s28 + $0x160] sm:$0xf]  ;;  %v270_v45 = vld [vmem:[%s2054_s28 + $0x168] sm:$0xf] }
  0x33   : > { %v272_v46 = vld [vmem:[%s2054_s28 + $0x170] sm:$0xf]  ;;  %269 = vst [vmem:[%s2058_s29 + $0xb0] sm:$0xf] %v268_v44  ;;  %271 = vst [vmem:[%s2058_s29 + $0xb4] sm:$0xf] %v270_v45 }
  0x34   : > { %273 = vst [vmem:[%s2058_s29 + $0xb8] sm:$0xf] %v272_v46  ;;  %v274_v47 = vld [vmem:[%s2054_s28 + $0x178] sm:$0xf]  ;;  %v276_v48 = vld [vmem:[%s2054_s28 + $0x180] sm:$0xf] }
  0x35   : > { %v278_v49 = vld [vmem:[%s2054_s28 + $0x188] sm:$0xf]  ;;  %275 = vst [vmem:[%s2058_s29 + $0xbc] sm:$0xf] %v274_v47  ;;  %277 = vst [vmem:[%s2058_s29 + $0xc0] sm:$0xf] %v276_v48 }
  0x36   : > { %279 = vst [vmem:[%s2058_s29 + $0xc4] sm:$0xf] %v278_v49  ;;  %v280_v50 = vld [vmem:[%s2054_s28 + $0x190] sm:$0xf]  ;;  %v282_v51 = vld [vmem:[%s2054_s28 + $0x198] sm:$0xf] }
  0x37   : > { %v284_v52 = vld [vmem:[%s2054_s28 + $0x1a0] sm:$0xf]  ;;  %281 = vst [vmem:[%s2058_s29 + $0xc8] sm:$0xf] %v280_v50  ;;  %283 = vst [vmem:[%s2058_s29 + $0xcc] sm:$0xf] %v282_v51 }
  0x38   : > { %285 = vst [vmem:[%s2058_s29 + $0xd0] sm:$0xf] %v284_v52  ;;  %v286_v53 = vld [vmem:[%s2054_s28 + $0x1a8] sm:$0xf]  ;;  %v288_v54 = vld [vmem:[%s2054_s28 + $0x1b0] sm:$0xf] }
  0x39   : > { %v290_v55 = vld [vmem:[%s2054_s28 + $0x1b8] sm:$0xf]  ;;  %287 = vst [vmem:[%s2058_s29 + $0xd4] sm:$0xf] %v286_v53  ;;  %289 = vst [vmem:[%s2058_s29 + $0xd8] sm:$0xf] %v288_v54 }
  0x3a   : > { %291 = vst [vmem:[%s2058_s29 + $0xdc] sm:$0xf] %v290_v55  ;;  %v292_v56 = vld [vmem:[%s2054_s28 + $0x1c0] sm:$0xf]  ;;  %v294_v57 = vld [vmem:[%s2054_s28 + $0x1c8] sm:$0xf] }
  0x3b   : > { %v296_v58 = vld [vmem:[%s2054_s28 + $0x1d0] sm:$0xf]  ;;  %293 = vst [vmem:[%s2058_s29 + $0xe0] sm:$0xf] %v292_v56  ;;  %295 = vst [vmem:[%s2058_s29 + $0xe4] sm:$0xf] %v294_v57 }
  0x3c   : > { %297 = vst [vmem:[%s2058_s29 + $0xe8] sm:$0xf] %v296_v58  ;;  %v298_v59 = vld [vmem:[%s2054_s28 + $0x1d8] sm:$0xf]  ;;  %v300_v60 = vld [vmem:[%s2054_s28 + $0x1e0] sm:$0xf] }
  0x3d   : > { %v302_v61 = vld [vmem:[%s2054_s28 + $0x1e8] sm:$0xf]  ;;  %299 = vst [vmem:[%s2058_s29 + $0xec] sm:$0xf] %v298_v59  ;;  %301 = vst [vmem:[%s2058_s29 + $0xf0] sm:$0xf] %v300_v60 }
  0x3e   : > { %303 = vst [vmem:[%s2058_s29 + $0xf4] sm:$0xf] %v302_v61  ;;  %v304_v62 = vld [vmem:[%s2054_s28 + $0x1f0] sm:$0xf]  ;;  %v306_v63 = vld [vmem:[%s2054_s28 + $0x1f8] sm:$0xf] }
  0x3f   : > { %v308_v0 = vld [vmem:[%s2054_s28 + $0x200] sm:$0xf]  ;;  %305 = vst [vmem:[%s2058_s29 + $0xf8] sm:$0xf] %v304_v62  ;;  %307 = vst [vmem:[%s2058_s29 + $0xfc] sm:$0xf] %v306_v63 }
  0x40   : > { %309 = vst [vmem:[%s2058_s29 + $0x100] sm:$0xf] %v308_v0  ;;  %v310_v1 = vld [vmem:[%s2054_s28 + $0x208] sm:$0xf]  ;;  %v312_v2 = vld [vmem:[%s2054_s28 + $0x210] sm:$0xf] }
  0x41   : > { %v314_v3 = vld [vmem:[%s2054_s28 + $0x218] sm:$0xf]  ;;  %311 = vst [vmem:[%s2058_s29 + $0x104] sm:$0xf] %v310_v1  ;;  %313 = vst [vmem:[%s2058_s29 + $0x108] sm:$0xf] %v312_v2 }
  0x42   : > { %315 = vst [vmem:[%s2058_s29 + $0x10c] sm:$0xf] %v314_v3  ;;  %v316_v4 = vld [vmem:[%s2054_s28 + $0x220] sm:$0xf]  ;;  %v318_v5 = vld [vmem:[%s2054_s28 + $0x228] sm:$0xf] }
  0x43   : > { %v320_v6 = vld [vmem:[%s2054_s28 + $0x230] sm:$0xf]  ;;  %317 = vst [vmem:[%s2058_s29 + $0x110] sm:$0xf] %v316_v4  ;;  %319 = vst [vmem:[%s2058_s29 + $0x114] sm:$0xf] %v318_v5 }
  0x44   : > { %321 = vst [vmem:[%s2058_s29 + $0x118] sm:$0xf] %v320_v6  ;;  %v322_v7 = vld [vmem:[%s2054_s28 + $0x238] sm:$0xf]  ;;  %v324_v8 = vld [vmem:[%s2054_s28 + $0x240] sm:$0xf] }
  0x45   : > { %v326_v9 = vld [vmem:[%s2054_s28 + $0x248] sm:$0xf]  ;;  %323 = vst [vmem:[%s2058_s29 + $0x11c] sm:$0xf] %v322_v7  ;;  %325 = vst [vmem:[%s2058_s29 + $0x120] sm:$0xf] %v324_v8 }
  0x46   : > { %327 = vst [vmem:[%s2058_s29 + $0x124] sm:$0xf] %v326_v9  ;;  %v328_v10 = vld [vmem:[%s2054_s28 + $0x250] sm:$0xf]  ;;  %v330_v11 = vld [vmem:[%s2054_s28 + $0x258] sm:$0xf] }
  0x47   : > { %v332_v12 = vld [vmem:[%s2054_s28 + $0x260] sm:$0xf]  ;;  %329 = vst [vmem:[%s2058_s29 + $0x128] sm:$0xf] %v328_v10  ;;  %331 = vst [vmem:[%s2058_s29 + $0x12c] sm:$0xf] %v330_v11 }
  0x48   : > { %333 = vst [vmem:[%s2058_s29 + $0x130] sm:$0xf] %v332_v12  ;;  %v334_v13 = vld [vmem:[%s2054_s28 + $0x268] sm:$0xf]  ;;  %v336_v14 = vld [vmem:[%s2054_s28 + $0x270] sm:$0xf] }
  0x49   : > { %v338_v15 = vld [vmem:[%s2054_s28 + $0x278] sm:$0xf]  ;;  %335 = vst [vmem:[%s2058_s29 + $0x134] sm:$0xf] %v334_v13  ;;  %337 = vst [vmem:[%s2058_s29 + $0x138] sm:$0xf] %v336_v14 }
  0x4a   : > { %339 = vst [vmem:[%s2058_s29 + $0x13c] sm:$0xf] %v338_v15  ;;  %v340_v16 = vld [vmem:[%s2054_s28 + $0x280] sm:$0xf]  ;;  %v342_v17 = vld [vmem:[%s2054_s28 + $0x288] sm:$0xf] }
  0x4b   : > { %v344_v18 = vld [vmem:[%s2054_s28 + $0x290] sm:$0xf]  ;;  %341 = vst [vmem:[%s2058_s29 + $0x140] sm:$0xf] %v340_v16  ;;  %343 = vst [vmem:[%s2058_s29 + $0x144] sm:$0xf] %v342_v17 }
  0x4c   : > { %345 = vst [vmem:[%s2058_s29 + $0x148] sm:$0xf] %v344_v18  ;;  %v346_v19 = vld [vmem:[%s2054_s28 + $0x298] sm:$0xf]  ;;  %v348_v20 = vld [vmem:[%s2054_s28 + $0x2a0] sm:$0xf] }
  0x4d   : > { %v350_v21 = vld [vmem:[%s2054_s28 + $0x2a8] sm:$0xf]  ;;  %347 = vst [vmem:[%s2058_s29 + $0x14c] sm:$0xf] %v346_v19  ;;  %349 = vst [vmem:[%s2058_s29 + $0x150] sm:$0xf] %v348_v20 }
  0x4e   : > { %351 = vst [vmem:[%s2058_s29 + $0x154] sm:$0xf] %v350_v21  ;;  %v352_v22 = vld [vmem:[%s2054_s28 + $0x2b0] sm:$0xf]  ;;  %v354_v23 = vld [vmem:[%s2054_s28 + $0x2b8] sm:$0xf] }
  0x4f   : > { %v356_v24 = vld [vmem:[%s2054_s28 + $0x2c0] sm:$0xf]  ;;  %353 = vst [vmem:[%s2058_s29 + $0x158] sm:$0xf] %v352_v22  ;;  %355 = vst [vmem:[%s2058_s29 + $0x15c] sm:$0xf] %v354_v23 }
  0x50   : > { %357 = vst [vmem:[%s2058_s29 + $0x160] sm:$0xf] %v356_v24  ;;  %v358_v25 = vld [vmem:[%s2054_s28 + $0x2c8] sm:$0xf]  ;;  %v360_v26 = vld [vmem:[%s2054_s28 + $0x2d0] sm:$0xf] }
  0x51   : > { %v362_v27 = vld [vmem:[%s2054_s28 + $0x2d8] sm:$0xf]  ;;  %359 = vst [vmem:[%s2058_s29 + $0x164] sm:$0xf] %v358_v25  ;;  %361 = vst [vmem:[%s2058_s29 + $0x168] sm:$0xf] %v360_v26 }
  0x52   : > { %363 = vst [vmem:[%s2058_s29 + $0x16c] sm:$0xf] %v362_v27  ;;  %v364_v28 = vld [vmem:[%s2054_s28 + $0x2e0] sm:$0xf]  ;;  %v366_v29 = vld [vmem:[%s2054_s28 + $0x2e8] sm:$0xf] }
  0x53   : > { %v368_v30 = vld [vmem:[%s2054_s28 + $0x2f0] sm:$0xf]  ;;  %365 = vst [vmem:[%s2058_s29 + $0x170] sm:$0xf] %v364_v28  ;;  %367 = vst [vmem:[%s2058_s29 + $0x174] sm:$0xf] %v366_v29 }
  0x54   : > { %369 = vst [vmem:[%s2058_s29 + $0x178] sm:$0xf] %v368_v30  ;;  %v370_v31 = vld [vmem:[%s2054_s28 + $0x2f8] sm:$0xf]  ;;  %v372_v32 = vld [vmem:[%s2054_s28 + $0x300] sm:$0xf] }
  0x55   : > { %v374_v33 = vld [vmem:[%s2054_s28 + $0x308] sm:$0xf]  ;;  %371 = vst [vmem:[%s2058_s29 + $0x17c] sm:$0xf] %v370_v31  ;;  %373 = vst [vmem:[%s2058_s29 + $0x180] sm:$0xf] %v372_v32 }
  0x56   : > { %375 = vst [vmem:[%s2058_s29 + $0x184] sm:$0xf] %v374_v33  ;;  %v376_v34 = vld [vmem:[%s2054_s28 + $0x310] sm:$0xf]  ;;  %v378_v35 = vld [vmem:[%s2054_s28 + $0x318] sm:$0xf] }
  0x57   : > { %v380_v36 = vld [vmem:[%s2054_s28 + $0x320] sm:$0xf]  ;;  %377 = vst [vmem:[%s2058_s29 + $0x188] sm:$0xf] %v376_v34  ;;  %379 = vst [vmem:[%s2058_s29 + $0x18c] sm:$0xf] %v378_v35 }
  0x58   : > { %381 = vst [vmem:[%s2058_s29 + $0x190] sm:$0xf] %v380_v36  ;;  %v382_v37 = vld [vmem:[%s2054_s28 + $0x328] sm:$0xf]  ;;  %v384_v38 = vld [vmem:[%s2054_s28 + $0x330] sm:$0xf] }
  0x59   : > { %v386_v39 = vld [vmem:[%s2054_s28 + $0x338] sm:$0xf]  ;;  %383 = vst [vmem:[%s2058_s29 + $0x194] sm:$0xf] %v382_v37  ;;  %385 = vst [vmem:[%s2058_s29 + $0x198] sm:$0xf] %v384_v38 }
  0x5a   : > { %387 = vst [vmem:[%s2058_s29 + $0x19c] sm:$0xf] %v386_v39  ;;  %v388_v40 = vld [vmem:[%s2054_s28 + $0x340] sm:$0xf]  ;;  %v390_v41 = vld [vmem:[%s2054_s28 + $0x348] sm:$0xf] }
  0x5b   : > { %v392_v42 = vld [vmem:[%s2054_s28 + $0x350] sm:$0xf]  ;;  %389 = vst [vmem:[%s2058_s29 + $0x1a0] sm:$0xf] %v388_v40  ;;  %391 = vst [vmem:[%s2058_s29 + $0x1a4] sm:$0xf] %v390_v41 }
  0x5c   : > { %393 = vst [vmem:[%s2058_s29 + $0x1a8] sm:$0xf] %v392_v42  ;;  %v394_v43 = vld [vmem:[%s2054_s28 + $0x358] sm:$0xf]  ;;  %v396_v44 = vld [vmem:[%s2054_s28 + $0x360] sm:$0xf] }
  0x5d   : > { %v398_v45 = vld [vmem:[%s2054_s28 + $0x368] sm:$0xf]  ;;  %395 = vst [vmem:[%s2058_s29 + $0x1ac] sm:$0xf] %v394_v43  ;;  %397 = vst [vmem:[%s2058_s29 + $0x1b0] sm:$0xf] %v396_v44 }
  0x5e   : > { %399 = vst [vmem:[%s2058_s29 + $0x1b4] sm:$0xf] %v398_v45  ;;  %v400_v46 = vld [vmem:[%s2054_s28 + $0x370] sm:$0xf]  ;;  %v402_v47 = vld [vmem:[%s2054_s28 + $0x378] sm:$0xf] }
  0x5f   : > { %v404_v48 = vld [vmem:[%s2054_s28 + $0x380] sm:$0xf]  ;;  %401 = vst [vmem:[%s2058_s29 + $0x1b8] sm:$0xf] %v400_v46  ;;  %403 = vst [vmem:[%s2058_s29 + $0x1bc] sm:$0xf] %v402_v47 }
  0x60   : > { %405 = vst [vmem:[%s2058_s29 + $0x1c0] sm:$0xf] %v404_v48  ;;  %v406_v49 = vld [vmem:[%s2054_s28 + $0x388] sm:$0xf]  ;;  %v408_v50 = vld [vmem:[%s2054_s28 + $0x390] sm:$0xf] }
  0x61   : > { %v410_v51 = vld [vmem:[%s2054_s28 + $0x398] sm:$0xf]  ;;  %407 = vst [vmem:[%s2058_s29 + $0x1c4] sm:$0xf] %v406_v49  ;;  %409 = vst [vmem:[%s2058_s29 + $0x1c8] sm:$0xf] %v408_v50 }
  0x62   : > { %411 = vst [vmem:[%s2058_s29 + $0x1cc] sm:$0xf] %v410_v51  ;;  %v412_v52 = vld [vmem:[%s2054_s28 + $0x3a0] sm:$0xf]  ;;  %v414_v53 = vld [vmem:[%s2054_s28 + $0x3a8] sm:$0xf] }
  0x63   : > { %v416_v54 = vld [vmem:[%s2054_s28 + $0x3b0] sm:$0xf]  ;;  %413 = vst [vmem:[%s2058_s29 + $0x1d0] sm:$0xf] %v412_v52  ;;  %415 = vst [vmem:[%s2058_s29 + $0x1d4] sm:$0xf] %v414_v53 }
  0x64   : > { %417 = vst [vmem:[%s2058_s29 + $0x1d8] sm:$0xf] %v416_v54  ;;  %v418_v55 = vld [vmem:[%s2054_s28 + $0x3b8] sm:$0xf]  ;;  %v420_v56 = vld [vmem:[%s2054_s28 + $0x3c0] sm:$0xf] }
  0x65   : > { %v422_v57 = vld [vmem:[%s2054_s28 + $0x3c8] sm:$0xf]  ;;  %419 = vst [vmem:[%s2058_s29 + $0x1dc] sm:$0xf] %v418_v55  ;;  %421 = vst [vmem:[%s2058_s29 + $0x1e0] sm:$0xf] %v420_v56 }
  0x66   : > { %423 = vst [vmem:[%s2058_s29 + $0x1e4] sm:$0xf] %v422_v57  ;;  %v424_v58 = vld [vmem:[%s2054_s28 + $0x3d0] sm:$0xf]  ;;  %v426_v59 = vld [vmem:[%s2054_s28 + $0x3d8] sm:$0xf] }
  0x67   : > { %v428_v60 = vld [vmem:[%s2054_s28 + $0x3e0] sm:$0xf]  ;;  %425 = vst [vmem:[%s2058_s29 + $0x1e8] sm:$0xf] %v424_v58  ;;  %427 = vst [vmem:[%s2058_s29 + $0x1ec] sm:$0xf] %v426_v59 }
  0x68   : > { %429 = vst [vmem:[%s2058_s29 + $0x1f0] sm:$0xf] %v428_v60  ;;  %v430_v61 = vld [vmem:[%s2054_s28 + $0x3e8] sm:$0xf]  ;;  %v432_v62 = vld [vmem:[%s2054_s28 + $0x3f0] sm:$0xf] }
  0x69   : > { %v434_v63 = vld [vmem:[%s2054_s28 + $0x3f8] sm:$0xf]  ;;  %431 = vst [vmem:[%s2058_s29 + $0x1f4] sm:$0xf] %v430_v61  ;;  %433 = vst [vmem:[%s2058_s29 + $0x1f8] sm:$0xf] %v432_v62 }
  0x6a   : > { %435 = vst [vmem:[%s2058_s29 + $0x1fc] sm:$0xf] %v434_v63 }
  0x6b PF: > { %p1665_p8 = scmp.ge.s32.totalorder %s1984_s16, 1  ;;  %p719_p9 = scmp.lt.s32.totalorder %s1984_s16, 3 }
  0x6d   : > { %p720_p10 = pnand %p1665_p8, %p719_p9 }
  0x6e   : > { %s726_s30 = sand.u32 (!%p720_p10), 1, %s1968_s12   ;;  %v2320_v0 = vld [vmem:[%s2469_s0] sm:$0xff] (!%p720_p10)  ;;  %v2330_v2 = vld [vmem:[%s2469_s0 + $0x8] sm:$0xff] (!%p720_p10)  ;;  %v2377_v35 = vld [vmem:[%s2469_s0 + $0x10] sm:$0xff] (!%p720_p10)  ;;  %p764_p11 = scmp.lt.s32.totalorder (!%p720_p10), %s1976_s14, 1 }
  0x6f   : > { %723 = sbr.rel (%p720_p10) target bundleno = 413 (0x19d), region = 69  ;;  %v2325_v1 = vld [vmem:[%s2469_s0 + $0x20] sm:$0xff] (!%p720_p10)  ;;  %s1666_s10 = sshll.u32 (!%p720_p10), %s726_s30, 9  ;;  %v2339_v4 = vld [vmem:[%s2469_s0 + $0x28] sm:$0xff] (!%p720_p10)  ;;  %v2382_v36 = vld [vmem:[%s2469_s0 + $0x30] sm:$0xff] (!%p720_p10) }
  0x70   : > { %v1670_v3 = vcombine.high (!%p720_p10), %v2320_v0, %v2325_v1  ;;  %v1672_v5 = vcombine.high (!%p720_p10), %v2330_v2, %v2339_v4  ;;  %s2343_s19 = scalar_lea.vmem (!%p720_p10), [#allocation2], %s1666_s10  ;;  %v2388_v38 = vld [vmem:[%s2469_s0 + $0x18] sm:$0xff] (!%p720_p10)  ;;  %v1669_v42 = vcombine.low (!%p720_p10), %v2320_v0, %v2325_v1  ;;  %v1671_v43 = vcombine.low (!%p720_p10), %v2330_v2, %v2339_v4  ;;  %s1667_s8 = sshll.u32 (!%p720_p10), %s726_s30, 3 }
  0x71   : > { %v1882_v6 = vld [vmem:[%s2343_s19 + $0x40] sm:$0xff] (!%p720_p10)   ;;  %v1886_v10 = vld [vmem:[%s2343_s19 + $0x48] sm:$0xff] (!%p720_p10)   ;;  %v1890_v14 = vld [vmem:[%s2343_s19 + $0x50] sm:$0xff] (!%p720_p10)   ;;  %v1674_v46 = vcombine.high (!%p720_p10), %v2377_v35, %v2382_v36  ;;  %s756_s9 = scalar_lea.vmem (!%p720_p10), [#allocation3], %s1667_s8 }
  0x72   : > { %1368 = vmatprep.mubr.bf16.mxu0 (!%p720_p10), %v1670_v3  ;;  %v1883_v7 = vld [vmem:[%s2343_s19 + $0xc0] sm:$0xff] (!%p720_p10)   ;;  %1409 = vmatprep.mubr.bf16.mxu1 (!%p720_p10), %v1672_v5  ;;  %v1887_v11 = vld [vmem:[%s2343_s19 + $0xc8] sm:$0xff] (!%p720_p10)   ;;  %v1891_v15 = vld [vmem:[%s2343_s19 + $0xd0] sm:$0xff] (!%p720_p10)  }
  0x73   : > { %1754 = vmatprep.subr.bf16.mxu0 (!%p720_p10), %v1882_v6  ;;  %v1884_v8 = vld [vmem:[%s2343_s19] sm:$0xff] (!%p720_p10)   ;;  %1776 = vmatprep.subr.bf16.mxu1 (!%p720_p10), %v1883_v7  ;;  %v1888_v12 = vld [vmem:[%s2343_s19 + $0x8] sm:$0xff] (!%p720_p10)   ;;  %v1892_v16 = vld [vmem:[%s2343_s19 + $0x10] sm:$0xff] (!%p720_p10)  }
  0x74   : > { %v1885_v9 = vld [vmem:[%s2343_s19 + $0x80] sm:$0xff] (!%p720_p10)   ;;  %1755 = vmatpush3.bf16.msra.mxu0 (!%p720_p10), %v1884_v8  ;;  %v1889_v13 = vld [vmem:[%s2343_s19 + $0x88] sm:$0xff] (!%p720_p10)   ;;  %v1893_v17 = vld [vmem:[%s2343_s19 + $0x90] sm:$0xff] (!%p720_p10)  }
  0x75   : > { %1777 = vmatpush3.bf16.msra.mxu1 (!%p720_p10), %v1885_v9  ;;  %1756 = vmatprep.subr.bf16.mxu0 (!%p720_p10), %v1886_v10  ;;  %v1894_v18 = vld [vmem:[%s2343_s19 + $0x58] sm:$0xff] (!%p720_p10)   ;;  %v1898_v22 = vld [vmem:[%s2343_s19 + $0x60] sm:$0xff] (!%p720_p10)   ;;  %v1902_v26 = vld [vmem:[%s2343_s19 + $0x68] sm:$0xff] (!%p720_p10)  }
  0x76   : > { %1778 = vmatprep.subr.bf16.mxu1 %v1887_v11  ;;  %v1895_v19 = vld [vmem:[%s2343_s19 + $0xd8] sm:$0xff]   ;;  %v1899_v23 = vld [vmem:[%s2343_s19 + $0xe0] sm:$0xff]   ;;  %v1903_v27 = vld [vmem:[%s2343_s19 + $0xe8] sm:$0xff]   ;;  %s765_s4 = scalar_select %p764_p11, %s1976_s14, 1 }
  0x77   : > { %v1896_v20 = vld [vmem:[%s2343_s19 + $0x18] sm:$0xff]   ;;  %v1900_v24 = vld [vmem:[%s2343_s19 + $0x20] sm:$0xff]   ;;  %v1904_v28 = vld [vmem:[%s2343_s19 + $0x28] sm:$0xff]   ;;  %s1744_s10 = sshll.u32 (%p2041_p6), %s1976_s14, 2 }
  0x78   : > { %1757 = vmatpush3.bf16.msra.mxu0 %v1888_v12  ;;  %v1897_v21 = vld [vmem:[%s2343_s19 + $0x98] sm:$0xff]   ;;  %v1901_v25 = vld [vmem:[%s2343_s19 + $0xa0] sm:$0xff]   ;;  %v1905_v29 = vld [vmem:[%s2343_s19 + $0xa8] sm:$0xff]   ;;  %s766_s7 = scalar_lea.vmem %s2471_s2, %s765_s4 }
  0x79   : > { %1779 = vmatpush3.bf16.msra.mxu1 %v1889_v13  ;;  %1758 = vmatprep.subr.bf16.mxu0 %v1890_v14  ;;  %v1906_v30 = vld [vmem:[%s2343_s19 + $0x70] sm:$0xff]   ;;  %v1910_v34 = vld [vmem:[%s2343_s19 + $0x78] sm:$0xff]   ;;  %v1914_v44 = vld [vmem:[%s2343_s19 + $0x140] sm:$0xff]   ;;  %v1673_v14 = vcombine.low %v2377_v35, %v2382_v36 }
  0x7a   : > { %1780 = vmatprep.subr.bf16.mxu1 %v1891_v15  ;;  %v1907_v31 = vld [vmem:[%s2343_s19 + $0xf0] sm:$0xff]   ;;  %v1911_v37 = vld [vmem:[%s2343_s19 + $0xf8] sm:$0xff]   ;;  %v1915_v45 = vld [vmem:[%s2343_s19 + $0x1c0] sm:$0xff]  }
  0x7b   : > { %v1908_v32 = vld [vmem:[%s2343_s19 + $0x30] sm:$0xff]   ;;  %v2393_v39 = vld [vmem:[%s2469_s0 + $0x38] sm:$0xff]  ;;  %v1916_v47 = vld [vmem:[%s2343_s19 + $0x100] sm:$0xff]  }
  0x7c   : > { %1759 = vmatpush3.bf16.msra.mxu0 %v1892_v16  ;;  %v1909_v33 = vld [vmem:[%s2343_s19 + $0xb0] sm:$0xff]   ;;  %v1912_v40 = vld [vmem:[%s2343_s19 + $0x38] sm:$0xff]   ;;  %v1676_v48 = vcombine.high %v2388_v38, %v2393_v39  ;;  %v1917_v49 = vld [vmem:[%s2343_s19 + $0x180] sm:$0xff]   ;;  %v1675_v15 = vcombine.low %v2388_v38, %v2393_v39 }
  0x7d   : > { %1781 = vmatpush3.bf16.msra.mxu1 %v1893_v17  ;;  %1760 = vmatprep.subr.bf16.mxu0 %v1894_v18  ;;  %v1913_v41 = vld [vmem:[%s2343_s19 + $0xb8] sm:$0xff]   ;;  %v1918_v50 = vld [vmem:[%s2343_s19 + $0x148] sm:$0xff]   ;;  %v1922_v54 = vld [vmem:[%s2343_s19 + $0x150] sm:$0xff]  }
  0x7e   : > { %1782 = vmatprep.subr.bf16.mxu1 %v1895_v19  ;;  %v1919_v51 = vld [vmem:[%s2343_s19 + $0x1c8] sm:$0xff]   ;;  %v1923_v55 = vld [vmem:[%s2343_s19 + $0x1d0] sm:$0xff]   ;;  %v1926_v58 = vld [vmem:[%s2343_s19 + $0x158] sm:$0xff]  }
  0x7f   : > { %v1920_v52 = vld [vmem:[%s2343_s19 + $0x108] sm:$0xff]   ;;  %v1924_v56 = vld [vmem:[%s2343_s19 + $0x110] sm:$0xff]   ;;  %v1927_v59 = vld [vmem:[%s2343_s19 + $0x1d8] sm:$0xff]  }
  0x80   : > { %1761 = vmatpush3.bf16.msra.mxu0 %v1896_v20  ;;  %v1921_v53 = vld [vmem:[%s2343_s19 + $0x188] sm:$0xff]   ;;  %v1925_v57 = vld [vmem:[%s2343_s19 + $0x190] sm:$0xff]   ;;  %v1928_v60 = vld [vmem:[%s2343_s19 + $0x118] sm:$0xff]  }
  0x81   : > { %1783 = vmatpush3.bf16.msra.mxu1 %v1897_v21  ;;  %1762 = vmatprep.subr.bf16.mxu0 %v1898_v22  ;;  %v1929_v61 = vld [vmem:[%s2343_s19 + $0x198] sm:$0xff]   ;;  %v1930_v62 = vld [vmem:[%s2343_s19 + $0x160] sm:$0xff]   ;;  %v1934_v2 = vld [vmem:[%s2343_s19 + $0x168] sm:$0xff]  }
  0x82   : > { %1784 = vmatprep.subr.bf16.mxu1 %v1899_v23  ;;  %v1931_v63 = vld [vmem:[%s2343_s19 + $0x1e0] sm:$0xff]   ;;  %v1935_v3 = vld [vmem:[%s2343_s19 + $0x1e8] sm:$0xff]   ;;  %v1938_v6 = vld [vmem:[%s2343_s19 + $0x170] sm:$0xff]  }
  0x83   : > { %v1932_v0 = vld [vmem:[%s2343_s19 + $0x120] sm:$0xff]   ;;  %v1936_v4 = vld [vmem:[%s2343_s19 + $0x128] sm:$0xff]   ;;  %v1939_v7 = vld [vmem:[%s2343_s19 + $0x1f0] sm:$0xff]  }
  0x84   : > { %1763 = vmatpush3.bf16.msra.mxu0 %v1900_v24  ;;  %v1933_v1 = vld [vmem:[%s2343_s19 + $0x1a0] sm:$0xff]   ;;  %v1937_v5 = vld [vmem:[%s2343_s19 + $0x1a8] sm:$0xff]   ;;  %v1940_v8 = vld [vmem:[%s2343_s19 + $0x130] sm:$0xff]  }
  0x85   : > { %1785 = vmatpush3.bf16.msra.mxu1 %v1901_v25  ;;  %1764 = vmatprep.subr.bf16.mxu0 %v1902_v26  ;;  %v1941_v9 = vld [vmem:[%s2343_s19 + $0x1b0] sm:$0xff]   ;;  %v1942_v10 = vld [vmem:[%s2343_s19 + $0x178] sm:$0xff]   ;;  %v1668_v18 = vld [vmem:[%s766_s7] ss:$0 sm:$0xff] }
  0x86   : > { %1786 = vmatprep.subr.bf16.mxu1 %v1903_v27  ;;  %v1943_v11 = vld [vmem:[%s2343_s19 + $0x1f8] sm:$0xff]  }
  0x87   : > { %v1944_v12 = vld [vmem:[%s2343_s19 + $0x138] sm:$0xff]  }
  0x88   : > { %1765 = vmatpush3.bf16.msra.mxu0 %v1904_v28  ;;  %v1945_v13 = vld [vmem:[%s2343_s19 + $0x1b8] sm:$0xff]   ;;  %s1523_s19 = scalar_lea.vmem (%p2041_p6), %s2472_s3, %s1744_s10 }
  0x89   : > { %1787 = vmatpush3.bf16.msra.mxu1 %v1905_v29  ;;  %1766 = vmatprep.subr.bf16.mxu0 %v1906_v30 }
  0x8a   : > { %1788 = vmatprep.subr.bf16.mxu1 %v1907_v31 }
  0x8c   : > { %1767 = vmatpush3.bf16.msra.mxu0 %v1908_v32 }
  0x8d   : > { %1789 = vmatpush3.bf16.msra.mxu1 %v1909_v33  ;;  %1768 = vmatprep.subr.bf16.mxu0 %v1910_v34 }
  0x8e   : > { %1790 = vmatprep.subr.bf16.mxu1 %v1911_v37 }
  0x90   : > { %1769 = vmatpush3.bf16.msra.mxu0 %v1912_v40 }
  0x91   : > { %1791 = vmatpush3.bf16.msra.mxu1 %v1913_v41  ;;  %1798 = vmatprep.subr.bf16.mxu0 %v1914_v44 }
  0x92   : > { %1820 = vmatprep.subr.bf16.mxu1 %v1915_v45 }
  0x93   : > { %1369 = vmatmul.mubr.bf16.vlgmr.msra.gmra.mrb[0].mxu0 %v1669_v42 }
  0x94   : > { %1410 = vmatmul.mubr.bf16.vlgmr.msra.gmra.mrb[0].mxu1 %v1671_v43  ;;  %1799 = vmatpush3.bf16.msra.mxu0 %v1916_v47 }
  0x95   : > { %1821 = vmatpush3.bf16.msra.mxu1 %v1917_v49  ;;  %1450 = vmatprep.mubr.bf16.mxu0 %v1674_v46 }
  0x96   : > { %1800 = vmatprep.subr.bf16.mxu0 %v1918_v50  ;;  %1491 = vmatprep.mubr.bf16.mxu1 %v1676_v48 }
  0x97   : > { %1822 = vmatprep.subr.bf16.mxu1 %v1919_v51 }
  0x98   : > { %1801 = vmatpush3.bf16.msra.mxu0 %v1920_v52 }
  0x99   : > { %1823 = vmatpush3.bf16.msra.mxu1 %v1921_v53  ;;  %1802 = vmatprep.subr.bf16.mxu0 %v1922_v54 }
  0x9a   : > { %1824 = vmatprep.subr.bf16.mxu1 %v1923_v55 }
  0x9c   : > { %1803 = vmatpush3.bf16.msra.mxu0 %v1924_v56 }
  0x9d   : > { %1825 = vmatpush3.bf16.msra.mxu1 %v1925_v57  ;;  %1804 = vmatprep.subr.bf16.mxu0 %v1926_v58 }
  0x9e   : > { %1826 = vmatprep.subr.bf16.mxu1 %v1927_v59 }
  0xa0   : > { %1805 = vmatpush3.bf16.msra.mxu0 %v1928_v60 }
  0xa1   : > { %1827 = vmatpush3.bf16.msra.mxu1 %v1929_v61  ;;  %1806 = vmatprep.subr.bf16.mxu0 %v1930_v62 }
  0xa2   : > { %1828 = vmatprep.subr.bf16.mxu1 %v1931_v63 }
  0xa4   : > { %1807 = vmatpush3.bf16.msra.mxu0 %v1932_v0 }
  0xa5   : > { %1829 = vmatpush3.bf16.msra.mxu1 %v1933_v1  ;;  %1808 = vmatprep.subr.bf16.mxu0 %v1934_v2 }
  0xa6   : > { %1830 = vmatprep.subr.bf16.mxu1 %v1935_v3 }
  0xa8   : > { %1809 = vmatpush3.bf16.msra.mxu0 %v1936_v4 }
  0xa9   : > { %1831 = vmatpush3.bf16.msra.mxu1 %v1937_v5  ;;  %1810 = vmatprep.subr.bf16.mxu0 %v1938_v6 }
  0xaa   : > { %1832 = vmatprep.subr.bf16.mxu1 %v1939_v7 }
  0xac   : > { %1811 = vmatpush3.bf16.msra.mxu0 %v1940_v8 }
  0xad   : > { %1833 = vmatpush3.bf16.msra.mxu1 %v1941_v9  ;;  %1812 = vmatprep.subr.bf16.mxu0 %v1942_v10 }
  0xae   : > { %1834 = vmatprep.subr.bf16.mxu1 %v1943_v11 }
  0xb0   : > { %1813 = vmatpush3.bf16.msra.mxu0 %v1944_v12 }
  0xb1   : > { %1835 = vmatpush3.bf16.msra.mxu1 %v1945_v13 }
  0xb3   : > { %1451 = vmatmul.mubr.bf16.vlgmr.msra.gmra.mrb[4].mxu0 %v1673_v14 }
  0xb4   : > { %1492 = vmatmul.mubr.bf16.vlgmr.msra.gmra.mrb[4].mxu1 %v1675_v15 }
 0x166   : > { %v1770_v16 = vpop.f32.mrb[0].mxu0 }
 0x167   : > { %v1792_v17 = vpop.f32.mrb[0].mxu1  ;;  %v1771_v19 = vpop.f32.mrb[1].mxu0 }
 0x168   : > { %v1772_v20 = vadd.f32 %v1771_v19, %v1770_v16  ;;  %v1793_v21 = vpop.f32.mrb[1].mxu1  ;;  %v1773_v22 = vpop.f32.mrb[2].mxu0 }
 0x169   : > { %v1794_v23 = vadd.f32 %v1793_v21, %v1792_v17  ;;  %v1795_v24 = vpop.f32.mrb[2].mxu1  ;;  %v1774_v25 = vpop.f32.mrb[3].mxu0 }
 0x16a   : > { %v1371_v26 = vadd.f32 %v1772_v20, %v1668_v18  ;;  %v1775_v27 = vadd.f32 %v1774_v25, %v1773_v22  ;;  %v1796_v28 = vpop.f32.mrb[3].mxu1 }
 0x16b   : > { %v1797_v29 = vadd.f32 %v1796_v28, %v1795_v24 }
 0x16c   : > { %v1412_v30 = vadd.f32 %v1794_v23, %v1371_v26  ;;  %v1374_v31 = vadd.f32 %v1775_v27, %v1668_v18 }
 0x16e   : > { %v1415_v32 = vadd.f32 %v1797_v29, %v1374_v31 }
 0x186   : > { %v1814_v33 = vpop.f32.mrb[4].mxu0 }
 0x187   : > { %v1836_v34 = vpop.f32.mrb[4].mxu1  ;;  %v1815_v35 = vpop.f32.mrb[5].mxu0 }
 0x188   : > { %v1816_v36 = vadd.f32 %v1815_v35, %v1814_v33  ;;  %v1837_v37 = vpop.f32.mrb[5].mxu1  ;;  %v1817_v38 = vpop.f32.mrb[6].mxu0 }
 0x189   : > { %v1838_v39 = vadd.f32 %v1837_v37, %v1836_v34  ;;  %v1839_v40 = vpop.f32.mrb[6].mxu1  ;;  %v1818_v41 = vpop.f32.mrb[7].mxu0 }
 0x18a   : > { %v1453_v42 = vadd.f32 %v1816_v36, %v1412_v30  ;;  %v1819_v43 = vadd.f32 %v1818_v41, %v1817_v38  ;;  %v1840_v44 = vpop.f32.mrb[7].mxu1 }
 0x18b   : > { %v1841_v45 = vadd.f32 %v1840_v44, %v1839_v40 }
 0x18c   : > { %v1494_v46 = vadd.f32 %v1838_v39, %v1453_v42  ;;  %v1456_v47 = vadd.f32 %v1819_v43, %v1415_v32 }
 0x18e   : > { %v1497_v48 = vadd.f32 %v1841_v45, %v1456_v47  ;;  %v1500_v49 = vmax.f32 %v1494_v46, 0.0  ;;  %1518 = sbr.rel (!%p2041_p6) target bundleno = 413 (0x19d), region = 77 }
 0x190   : > { %v1501_v50 = vmax.f32 %v1497_v48, 0.0 }
 0x192   : > { %v1752_v51 = vpack.c.bf16 %v1501_v50, %v1500_v49 }
 0x194   : > { %1753 = vst [vmem:[%s756_s9] sm:$0xff] %v1752_v51  }
 0x19b   : > { %v1539_v52 = vld [vmem:[%s756_s9] sm:$0xf]  ;;  %v1541_v53 = vld [vmem:[%s756_s9 + $0x4] sm:$0xf] }
 0x19c   : > { %1540 = vst [vmem:[%s1523_s19] sm:$0xf] %v1539_v52  ;;  %1542 = vst [vmem:[%s1523_s19 + $0x8] sm:$0xf] %v1541_v53 }
 0x19d PF: > { %s13_s16 = sadd.s32 1, %s1984_s16   ;;  %s2474_s12 = smov %s1972_s13 }
 0x19e   : > { %p10_p12 = scmp.ge.s32.totalorder %s13_s16, 4   ;;  %s2475_s13 = smov %s2046_s22 }
 0x19f   : > { %s2476_s14 = smov %s1980_s15  ;;  %s2477_s15 = smov %s2479_s17 }
 0x1a0   :  { %12 = sbr.rel (!%p10_p12) target bundleno = 3 (0x3), region = 155 }

</bundles_post_ra>
